<compile_context>
chip_gen: v5e
topology: v5e:2x2
jax: 0.10.0
libtpu: 0.0.40
codegen_flags: <defaults>
</compile_context>

<pallas_src>
import jax
import jax.numpy as jnp
from jax.experimental import pallas as pl
from jax.experimental.pallas import tpu as pltpu

HIDDEN = 256
INPUT = 2048
VMEM_LIMIT = 48 * 1024 * 1024          # <= 64 MiB (v7x per-TC VMEM)


# --------------------------------------------------------------------------
# Pallas kernels
# --------------------------------------------------------------------------
def input_proj_kernel(x_ref, w_ref, b_ref, out_ref):
    """(T*B, D) @ (D, 4H) + fused bias for one direction (grid = direction)."""
    out_ref[0] = (
        jnp.dot(x_ref[...], w_ref[0], preferred_element_type=jnp.float32)
        + b_ref[0]
    ).astype(out_ref.dtype)


def bilstm_step_kernel(xproj_ref, whh_ref, out_ref, h_sc, c_sc):
    """One timestep of one direction; grid = (direction, time)."""
    d = pl.program_id(0)
    t = pl.program_id(1)
    H = whh_ref.shape[1]

    @pl.when(t == 0)
    def _():
        h_sc[d] = jnp.zeros((h_sc.shape[1], h_sc.shape[2]), h_sc.dtype)
        c_sc[d] = jnp.zeros((c_sc.shape[1], c_sc.shape[2]), c_sc.dtype)

    h_prev = h_sc[d]                                   # (B, H) f32
    c_prev = c_sc[d]
    # Pre-projected input (bias already folded in) + recurrent bf16 MXU matmul.
    gates = xproj_ref[0, 0] + jnp.dot(
        h_prev.astype(jnp.bfloat16), whh_ref[0],
        preferred_element_type=jnp.float32)            # (B, 4H), order i|f|g|o
    i = jax.nn.sigmoid(gates[:, 0 * H:1 * H])
    f = jax.nn.sigmoid(gates[:, 1 * H:2 * H])
    g = jnp.tanh(gates[:, 2 * H:3 * H])
    o = jax.nn.sigmoid(gates[:, 3 * H:4 * H])
    c_new = f * c_prev + i * g
    h_new = o * jnp.tanh(c_new)
    c_sc[d] = c_new
    h_sc[d] = h_new
    out_ref[0] = h_new.astype(out_ref.dtype)


# --------------------------------------------------------------------------
# pallas_call wrappers
# --------------------------------------------------------------------------
def input_projection(x_tbd, wih, bias):
    """x:(T,B,Din) f32, wih:(2,Din,4H) bf16, bias:(2,1,4H) f32 -> (2,T,B,4H) f32."""
    T, B, Din = x_tbd.shape
    G = wih.shape[-1]                                  # 4H
    M = T * B
    x2d = x_tbd.reshape(M, Din).astype(jnp.bfloat16)
    cost = pl.CostEstimate(
        flops=int(2 * 2 * M * Din * G),
        transcendentals=0,
        bytes_accessed=int(wih.size * 2 + 2 * x2d.size * 2
                           + 2 * M * G * 4 + bias.size * 4),
    )
    out = pl.pallas_call(
        input_proj_kernel,
        out_shape=jax.ShapeDtypeStruct((2, M, G), jnp.float32),
        grid=(2,),
        in_specs=[
            pl.BlockSpec((M, Din), lambda d: (0, 0)),        # x stays resident
            pl.BlockSpec((1, Din, G), lambda d: (d, 0, 0)),  # per-direction W_ih
            pl.BlockSpec((1, 1, G), lambda d: (d, 0, 0)),    # fused bias
        ],
        out_specs=pl.BlockSpec((1, M, G), lambda d: (d, 0, 0)),
        compiler_params=pltpu.CompilerParams(
            dimension_semantics=("parallel",),
            vmem_limit_bytes=VMEM_LIMIT,
        ),
        cost_estimate=cost,
    )(x2d, wih, bias)
    return out.reshape(2, T, B, G)


def bilstm_layer(xproj, whh):
    """xproj:(2,T,B,4H) f32, whh:(2,H,4H) bf16 -> (T,B,2H) f32."""
    _, T, B, G = xproj.shape
    H = whh.shape[1]

    def xp_idx(d, t):
        # forward (d=0): time block t ; backward (d=1): time block T-1-t
        return (d, t + d * (T - 1 - 2 * t), 0, 0)

    def out_idx(d, t):
        # same time reversal; last-axis half selected by direction
        return (t + d * (T - 1 - 2 * t), 0, d)

    cost = pl.CostEstimate(
        flops=int(2 * T * (2 * B * H * G) + 2 * T * 12 * B * H),
        transcendentals=int(2 * T * 5 * B * H),
        bytes_accessed=int(whh.size * 2 + xproj.size * 4 + T * B * 2 * H * 4),
    )
    return pl.pallas_call(
        bilstm_step_kernel,
        out_shape=jax.ShapeDtypeStruct((T, B, 2 * H), jnp.float32),
        grid=(2, T),
        in_specs=[
            pl.BlockSpec((1, 1, B, G), xp_idx),
            pl.BlockSpec((1, H, G), lambda d, t: (d, 0, 0)),
        ],
        out_specs=pl.BlockSpec((1, B, H), out_idx),
        scratch_shapes=[
            pltpu.VMEM((2, B, H), jnp.float32),    # h, per direction
            pltpu.VMEM((2, B, H), jnp.float32),    # c, per direction
        ],
        compiler_params=pltpu.CompilerParams(
            dimension_semantics=("parallel", "arbitrary"),
            vmem_limit_bytes=VMEM_LIMIT,
        ),
        cost_estimate=cost,
    )(xproj, whh)


def deepfake_detector_forward(x_btd, params):
    """x_btd: (B, T, 2048) float32, batch-first like the PyTorch module."""
    x = jnp.transpose(x_btd, (1, 0, 2)).astype(jnp.float32)     # (T, B, D)
    layer_in = x
    for layer in range(2):
        p = params[f"layer{layer}"]
        xproj = input_projection(layer_in, p["wih"], p["bias"])  # (2,T,B,4H)
        layer_in = bilstm_layer(xproj, p["whh"])                 # (T,B,2H)
    last = layer_in[-1]                                          # lstm_out[:, -1, :]
    # MLP head in plain XLA (per perf review: (B,1) output, launch overhead
    # exceeds compute). Dropout(0.3) is eval-mode identity.
    h = jnp.maximum(last @ params["w1"] + params["b1"], 0.0)
    return jax.nn.sigmoid(h @ params["w2"] + params["b2"])


# --------------------------------------------------------------------------
# Deterministic parameter init (PyTorch-style uniform(-1/sqrt(fan), 1/sqrt(fan)))
# --------------------------------------------------------------------------
def init_params(key):
    params = {}
    keys = iter(jax.random.split(key, 24))

    def uni(shape, k):
        return jax.random.uniform(next(keys), shape, jnp.float32, -k, k)

    H = HIDDEN
    k_lstm = 1.0 / (H ** 0.5)
    for layer in range(2):
        D = INPUT if layer == 0 else 2 * H
        wih, whh, bias = [], [], []
        for _ in range(2):                         # fwd, bwd
            w_ih = uni((4 * H, D), k_lstm)         # PyTorch weight_ih_l{L}
            w_hh = uni((4 * H, H), k_lstm)         # PyTorch weight_hh_l{L}
            b_ih = uni((4 * H,), k_lstm)
            b_hh = uni((4 * H,), k_lstm)
            wih.append(w_ih.T)                     # (D, 4H)
            whh.append(w_hh.T)                     # (H, 4H)
            bias.append((b_ih + b_hh).reshape(1, 4 * H))
        params[f"layer{layer}"] = {
            "wih": jnp.stack(wih).astype(jnp.bfloat16),   # (2, D, 4H)
            "whh": jnp.stack(whh).astype(jnp.bfloat16),   # (2, H, 4H)
            "bias": jnp.stack(bias),                      # (2, 1, 4H) f32
        }

    k1 = 1.0 / (512 ** 0.5)
    params["w1"] = uni((128, 512), k1).T           # fc1: Linear(512, 128)
    params["b1"] = uni((128,), k1)
    k2 = 1.0 / (128 ** 0.5)
    params["w2"] = uni((1, 128), k2).T             # fc2: Linear(128, 1)
    params["b2"] = uni((1,), k2)
    return params


# --------------------------------------------------------------------------
# Pure-JAX reference with matching bf16 matmul semantics (kernel sanity check)
# --------------------------------------------------------------------------
def _forward_ref(x_btd, params):
    x = jnp.transpose(x_btd, (1, 0, 2))
    T, B, _ = x.shape
    layer_in = x
    for layer in range(2):
        p = params[f"layer{layer}"]
        Din = layer_in.shape[-1]
        x2d = layer_in.reshape(T * B, Din).astype(jnp.bfloat16)
        H = p["whh"].shape[1]
        outs = []
        for d in range(2):
            proj = (jnp.dot(x2d, p["wih"][d], preferred_element_type=jnp.float32)
                    + p["bias"][d]).reshape(T, B, 4 * H)
            whh_d = p["whh"][d]

            def step(carry, g_in, whh_d=whh_d, H=H):
                h, c = carry
                g = g_in + jnp.dot(h.astype(jnp.bfloat16), whh_d,
                                   preferred_element_type=jnp.float32)
                i = jax.nn.sigmoid(g[:, :H])
                f = jax.nn.sigmoid(g[:, H:2 * H])
                gg = jnp.tanh(g[:, 2 * H:3 * H])
                o = jax.nn.sigmoid(g[:, 3 * H:])
                c = f * c + i * gg
                h = o * jnp.tanh(c)
                return (h, c), h

            xs = proj[::-1] if d == 1 else proj
            init = (jnp.zeros((B, H), jnp.float32), jnp.zeros((B, H), jnp.float32))
            _, hs = jax.lax.scan(step, init, xs)
            outs.append(hs[::-1] if d == 1 else hs)
        layer_in = jnp.concatenate(outs, axis=-1)
    last = layer_in[-1]
    h = jnp.maximum(last @ params["w1"] + params["b1"], 0.0)
    return jax.nn.sigmoid(h @ params["w2"] + params["b2"])


# --------------------------------------------------------------------------
if __name__ == "__main__":
    key = jax.random.PRNGKey(0)
    k_param, k_x = jax.random.split(key)

    B, T = 2, 8                               # small batch / sequence
    params = init_params(k_param)
    x = jax.random.normal(k_x, (B, T, INPUT), jnp.float32)

    fwd = jax.jit(deepfake_detector_forward)
    out = jax.block_until_ready(fwd(x, params))

    ref = _forward_ref(x, params)
    assert out.shape == (B, 1)
    assert bool(jnp.all(jnp.isfinite(out)))
    assert bool(jnp.allclose(out, ref, atol=2e-2, rtol=2e-2))

    print("KERNEL_OK")
</pallas_src>

<mosaic_0001>
module attributes {stable_mosaic.version = 11 : i64} {
  func.func @input_proj_kernel(%arg0: i32, %arg1: memref<16x2048xbf16, #tpu.memory_space<vmem>>, %arg2: memref<1x2048x1024xbf16, #tpu.memory_space<vmem>>, %arg3: memref<1x1x1024xf32, #tpu.memory_space<vmem>>, %arg4: memref<1x16x1024xf32, #tpu.memory_space<vmem>>) attributes {dimension_semantics = [#tpu.dimension_semantics<parallel>], iteration_bounds = array<i64: 2>, scalar_prefetch = 0 : i64, scratch_operands = 0 : i64, tpu.core_type = #tpu.core_type<tc>, window_params = [{pipeline_mode = #tpu.pipeline_mode<synchronous>, transform_indices = @transform_0, window_bounds = array<i64: 16, 2048>}, {transform_indices = @transform_1, window_bounds = array<i64: 1, 2048, 1024>}, {transform_indices = @transform_2, window_bounds = array<i64: 1, 1, 1024>}, {transform_indices = @transform_3, window_bounds = array<i64: 1, 16, 1024>}]} {
    %c0 = arith.constant 0 : index
    %c0_0 = arith.constant 0 : index
    %0 = vector.load %arg1[%c0, %c0_0] : memref<16x2048xbf16, #tpu.memory_space<vmem>>, vector<16x2048xbf16>
    %c0_1 = arith.constant 0 : index
    %c0_2 = arith.constant 0 : index
    %c0_3 = arith.constant 0 : index
    %1 = vector.load %arg2[%c0_1, %c0_2, %c0_3] : memref<1x2048x1024xbf16, #tpu.memory_space<vmem>>, vector<1x2048x1024xbf16>
    %2 = vector.shape_cast %1 : vector<1x2048x1024xbf16> to vector<2048x1024xbf16>
    %cst = arith.constant dense<0.000000e+00> : vector<16x1024xf32>
    %3 = tpu.matmul %0, %2, %cst {dimension_numbers = #tpu.dot_dimension_numbers<[1], [0], [0], [1], [0, 0, 1, 1], [], []>} : vector<16x2048xbf16>, vector<2048x1024xbf16>, vector<16x1024xf32> -> vector<16x1024xf32>
    %c0_4 = arith.constant 0 : index
    %c0_5 = arith.constant 0 : index
    %c0_6 = arith.constant 0 : index
    %4 = vector.load %arg3[%c0_4, %c0_5, %c0_6] : memref<1x1x1024xf32, #tpu.memory_space<vmem>>, vector<1x1x1024xf32>
    %5 = vector.shape_cast %4 : vector<1x1x1024xf32> to vector<1x1024xf32>
    %6 = vector.broadcast %5 : vector<1x1024xf32> to vector<16x1024xf32>
    %7 = arith.addf %3, %6 : vector<16x1024xf32>
    %c0_7 = arith.constant 0 : index
    %c0_8 = arith.constant 0 : index
    %c0_9 = arith.constant 0 : index
    %8 = vector.load %arg4[%c0_7, %c0_8, %c0_9] : memref<1x16x1024xf32, #tpu.memory_space<vmem>>, vector<1x16x1024xf32>
    %9 = vector.shape_cast %8 : vector<1x16x1024xf32> to vector<16x1024xf32>
    %10 = vector.shape_cast %7 : vector<16x1024xf32> to vector<1x16x1024xf32>
    tpu.vector_store %arg4[%c0_7, %c0_8, %c0_9], %10 {strides = array<i32>} : memref<1x16x1024xf32, #tpu.memory_space<vmem>>, vector<1x16x1024xf32>,
    return
  }
  func.func @transform_0(%arg0: i32) -> (i32, i32) {
    %c0_i32 = arith.constant 0 : i32
    %c0_i32_0 = arith.constant 0 : i32
    %c0_i32_1 = arith.constant 0 : i32
    return %c0_i32, %c0_i32_0 : i32, i32
  }
  func.func @transform_1(%arg0: i32) -> (i32, i32, i32) {
    %c0_i32 = arith.constant 0 : i32
    %c0_i32_0 = arith.constant 0 : i32
    %c0_i32_1 = arith.constant 0 : i32
    return %arg0, %c0_i32, %c0_i32_0 : i32, i32, i32
  }
  func.func @transform_2(%arg0: i32) -> (i32, i32, i32) {
    %c0_i32 = arith.constant 0 : i32
    %c0_i32_0 = arith.constant 0 : i32
    %c0_i32_1 = arith.constant 0 : i32
    return %arg0, %c0_i32, %c0_i32_0 : i32, i32, i32
  }
  func.func @transform_3(%arg0: i32) -> (i32, i32, i32) {
    %c0_i32 = arith.constant 0 : i32
    %c0_i32_0 = arith.constant 0 : i32
    %c0_i32_1 = arith.constant 0 : i32
    return %arg0, %c0_i32, %c0_i32_0 : i32, i32, i32
  }
}

module attributes {stable_mosaic.version = 11 : i64} {
  func.func @bilstm_step_kernel(%arg0: i32, %arg1: i32, %arg2: memref<1x1x2x1024xf32, #tpu.memory_space<vmem>>, %arg3: memref<1x256x1024xbf16, #tpu.memory_space<vmem>>, %arg4: memref<1x2x256xf32, #tpu.memory_space<vmem>>, %arg5: memref<2x2x256xf32, #tpu.memory_space<vmem>>, %arg6: memref<2x2x256xf32, #tpu.memory_space<vmem>>) attributes {dimension_semantics = [#tpu.dimension_semantics<parallel>, #tpu.dimension_semantics<arbitrary>], iteration_bounds = array<i64: 2, 8>, scalar_prefetch = 0 : i64, scratch_operands = 2 : i64, tpu.core_type = #tpu.core_type<tc>, window_params = [{transform_indices = @transform_0, window_bounds = array<i64: 1, 1, 2, 1024>}, {transform_indices = @transform_1, window_bounds = array<i64: 1, 256, 1024>}, {transform_indices = @transform_2, window_bounds = array<i64: 1, 2, 256>}]} {
    %c0_i32 = arith.constant 0 : i32
    %0 = arith.cmpi eq, %arg1, %c0_i32 : i32
    %1 = arith.extui %0 : i1 to i32
    %c0_i32_0 = arith.constant 0 : i32
    %2 = arith.cmpi ne, %1, %c0_i32_0 : i32
    scf.if %2 {
      %cst_21 = arith.constant 0.000000e+00 : f32
      %52 = vector.broadcast %cst_21 : f32 to vector<2x256xf32>
      %53 = arith.index_cast %arg0 : i32 to index
      %c0_22 = arith.constant 0 : index
      %c0_23 = arith.constant 0 : index
      %54 = vector.load %arg5[%53, %c0_22, %c0_23] : memref<2x2x256xf32, #tpu.memory_space<vmem>>, vector<1x2x256xf32>
      %55 = vector.shape_cast %54 : vector<1x2x256xf32> to vector<2x256xf32>
      %56 = vector.shape_cast %52 : vector<2x256xf32> to vector<1x2x256xf32>
      tpu.vector_store %arg5[%53, %c0_22, %c0_23], %56 {strides = array<i32>} : memref<2x2x256xf32, #tpu.memory_space<vmem>>, vector<1x2x256xf32>,
      %cst_24 = arith.constant 0.000000e+00 : f32
      %57 = vector.broadcast %cst_24 : f32 to vector<2x256xf32>
      %58 = arith.index_cast %arg0 : i32 to index
      %c0_25 = arith.constant 0 : index
      %c0_26 = arith.constant 0 : index
      %59 = vector.load %arg6[%58, %c0_25, %c0_26] : memref<2x2x256xf32, #tpu.memory_space<vmem>>, vector<1x2x256xf32>
      %60 = vector.shape_cast %59 : vector<1x2x256xf32> to vector<2x256xf32>
      %61 = vector.shape_cast %57 : vector<2x256xf32> to vector<1x2x256xf32>
      tpu.vector_store %arg6[%58, %c0_25, %c0_26], %61 {strides = array<i32>} : memref<2x2x256xf32, #tpu.memory_space<vmem>>, vector<1x2x256xf32>,
    } else {
    }
    %3 = arith.index_cast %arg0 : i32 to index
    %c0 = arith.constant 0 : index
    %c0_1 = arith.constant 0 : index
    %4 = vector.load %arg5[%3, %c0, %c0_1] : memref<2x2x256xf32, #tpu.memory_space<vmem>>, vector<1x2x256xf32>
    %5 = vector.shape_cast %4 : vector<1x2x256xf32> to vector<2x256xf32>
    %6 = arith.index_cast %arg0 : i32 to index
    %c0_2 = arith.constant 0 : index
    %c0_3 = arith.constant 0 : index
    %7 = vector.load %arg6[%6, %c0_2, %c0_3] : memref<2x2x256xf32, #tpu.memory_space<vmem>>, vector<1x2x256xf32>
    %8 = vector.shape_cast %7 : vector<1x2x256xf32> to vector<2x256xf32>
    %c0_4 = arith.constant 0 : index
    %c0_5 = arith.constant 0 : index
    %c0_6 = arith.constant 0 : index
    %c0_7 = arith.constant 0 : index
    %9 = vector.load %arg2[%c0_4, %c0_5, %c0_6, %c0_7] : memref<1x1x2x1024xf32, #tpu.memory_space<vmem>>, vector<1x1x2x1024xf32>
    %10 = vector.shape_cast %9 : vector<1x1x2x1024xf32> to vector<2x1024xf32>
    %11 = arith.truncf %5 : vector<2x256xf32> to vector<2x256xbf16>
    %c0_8 = arith.constant 0 : index
    %c0_9 = arith.constant 0 : index
    %c0_10 = arith.constant 0 : index
    %12 = vector.load %arg3[%c0_8, %c0_9, %c0_10] : memref<1x256x1024xbf16, #tpu.memory_space<vmem>>, vector<1x256x1024xbf16>
    %13 = vector.shape_cast %12 : vector<1x256x1024xbf16> to vector<256x1024xbf16>
    %cst = arith.constant dense<0.000000e+00> : vector<2x1024xf32>
    %14 = tpu.matmul %11, %13, %cst {dimension_numbers = #tpu.dot_dimension_numbers<[1], [0], [0], [1], [0, 0, 1, 1], [], []>} : vector<2x256xbf16>, vector<256x1024xbf16>, vector<2x1024xf32> -> vector<2x1024xf32>
    %15 = arith.addf %10, %14 : vector<2x1024xf32>
    %16 = vector.extract_strided_slice %15 {offsets = [0, 0], sizes = [2, 256], strides = [1, 1]} : vector<2x1024xf32> to vector<2x256xf32>
    %17 = arith.negf %16 : vector<2x256xf32>
    %18 = math.exp %17 : vector<2x256xf32>
    %cst_11 = arith.constant 1.000000e+00 : f32
    %19 = vector.broadcast %cst_11 : f32 to vector<2x256xf32>
    %20 = arith.addf %19, %18 : vector<2x256xf32>
    %21 = arith.divf %19, %20 : vector<2x256xf32>
    %22 = vector.extract_strided_slice %15 {offsets = [0, 256], sizes = [2, 256], strides = [1, 1]} : vector<2x1024xf32> to vector<2x256xf32>
    %23 = arith.negf %22 : vector<2x256xf32>
    %24 = math.exp %23 : vector<2x256xf32>
    %cst_12 = arith.constant 1.000000e+00 : f32
    %25 = vector.broadcast %cst_12 : f32 to vector<2x256xf32>
    %26 = arith.addf %25, %24 : vector<2x256xf32>
    %27 = arith.divf %25, %26 : vector<2x256xf32>
    %28 = vector.extract_strided_slice %15 {offsets = [0, 512], sizes = [2, 256], strides = [1, 1]} : vector<2x1024xf32> to vector<2x256xf32>
    %29 = math.tanh %28 : vector<2x256xf32>
    %30 = vector.extract_strided_slice %15 {offsets = [0, 768], sizes = [2, 256], strides = [1, 1]} : vector<2x1024xf32> to vector<2x256xf32>
    %31 = arith.negf %30 : vector<2x256xf32>
    %32 = math.exp %31 : vector<2x256xf32>
    %cst_13 = arith.constant 1.000000e+00 : f32
    %33 = vector.broadcast %cst_13 : f32 to vector<2x256xf32>
    %34 = arith.addf %33, %32 : vector<2x256xf32>
    %35 = arith.divf %33, %34 : vector<2x256xf32>
    %36 = arith.mulf %27, %8 : vector<2x256xf32>
    %37 = arith.mulf %21, %29 : vector<2x256xf32>
    %38 = arith.addf %36, %37 : vector<2x256xf32>
    %39 = math.tanh %38 : vector<2x256xf32>
    %40 = arith.mulf %35, %39 : vector<2x256xf32>
    %41 = arith.index_cast %arg0 : i32 to index
    %c0_14 = arith.constant 0 : index
    %c0_15 = arith.constant 0 : index
    %42 = vector.load %arg6[%41, %c0_14, %c0_15] : memref<2x2x256xf32, #tpu.memory_space<vmem>>, vector<1x2x256xf32>
    %43 = vector.shape_cast %42 : vector<1x2x256xf32> to vector<2x256xf32>
    %44 = vector.shape_cast %38 : vector<2x256xf32> to vector<1x2x256xf32>
    tpu.vector_store %arg6[%41, %c0_14, %c0_15], %44 {strides = array<i32>} : memref<2x2x256xf32, #tpu.memory_space<vmem>>, vector<1x2x256xf32>,
    %45 = arith.index_cast %arg0 : i32 to index
    %c0_16 = arith.constant 0 : index
    %c0_17 = arith.constant 0 : index
    %46 = vector.load %arg5[%45, %c0_16, %c0_17] : memref<2x2x256xf32, #tpu.memory_space<vmem>>, vector<1x2x256xf32>
    %47 = vector.shape_cast %46 : vector<1x2x256xf32> to vector<2x256xf32>
    %48 = vector.shape_cast %40 : vector<2x256xf32> to vector<1x2x256xf32>
    tpu.vector_store %arg5[%45, %c0_16, %c0_17], %48 {strides = array<i32>} : memref<2x2x256xf32, #tpu.memory_space<vmem>>, vector<1x2x256xf32>,
    %c0_18 = arith.constant 0 : index
    %c0_19 = arith.constant 0 : index
    %c0_20 = arith.constant 0 : index
    %49 = vector.load %arg4[%c0_18, %c0_19, %c0_20] : memref<1x2x256xf32, #tpu.memory_space<vmem>>, vector<1x2x256xf32>
    %50 = vector.shape_cast %49 : vector<1x2x256xf32> to vector<2x256xf32>
    %51 = vector.shape_cast %40 : vector<2x256xf32> to vector<1x2x256xf32>
    tpu.vector_store %arg4[%c0_18, %c0_19, %c0_20], %51 {strides = array<i32>} : memref<1x2x256xf32, #tpu.memory_space<vmem>>, vector<1x2x256xf32>,
    return
  }
  func.func @transform_0(%arg0: i32, %arg1: i32) -> (i32, i32, i32, i32) {
    %c2_i32 = arith.constant 2 : i32
    %0 = arith.muli %c2_i32, %arg1 : i32
    %c7_i32 = arith.constant 7 : i32
    %1 = arith.subi %c7_i32, %0 : i32
    %2 = arith.muli %arg0, %1 : i32
    %3 = arith.addi %arg1, %2 : i32
    %c0_i32 = arith.constant 0 : i32
    %c0_i32_0 = arith.constant 0 : i32
    %c0_i32_1 = arith.constant 0 : i32
    return %arg0, %3, %c0_i32, %c0_i32_0 : i32, i32, i32, i32
  }
  func.func @transform_1(%arg0: i32, %arg1: i32) -> (i32, i32, i32) {
    %c0_i32 = arith.constant 0 : i32
    %c0_i32_0 = arith.constant 0 : i32
    %c0_i32_1 = arith.constant 0 : i32
    return %arg0, %c0_i32, %c0_i32_0 : i32, i32, i32
  }
  func.func @transform_2(%arg0: i32, %arg1: i32) -> (i32, i32, i32) {
    %c2_i32 = arith.constant 2 : i32
    %0 = arith.muli %c2_i32, %arg1 : i32
    %c7_i32 = arith.constant 7 : i32
    %1 = arith.subi %c7_i32, %0 : i32
    %2 = arith.muli %arg0, %1 : i32
    %3 = arith.addi %arg1, %2 : i32
    %c0_i32 = arith.constant 0 : i32
    %c0_i32_0 = arith.constant 0 : i32
    return %3, %c0_i32, %arg0 : i32, i32, i32
  }
}

module attributes {stable_mosaic.version = 11 : i64} {
  func.func @input_proj_kernel(%arg0: i32, %arg1: memref<16x512xbf16, #tpu.memory_space<vmem>>, %arg2: memref<1x512x1024xbf16, #tpu.memory_space<vmem>>, %arg3: memref<1x1x1024xf32, #tpu.memory_space<vmem>>, %arg4: memref<1x16x1024xf32, #tpu.memory_space<vmem>>) attributes {dimension_semantics = [#tpu.dimension_semantics<parallel>], iteration_bounds = array<i64: 2>, scalar_prefetch = 0 : i64, scratch_operands = 0 : i64, tpu.core_type = #tpu.core_type<tc>, window_params = [{pipeline_mode = #tpu.pipeline_mode<synchronous>, transform_indices = @transform_0, window_bounds = array<i64: 16, 512>}, {transform_indices = @transform_1, window_bounds = array<i64: 1, 512, 1024>}, {transform_indices = @transform_2, window_bounds = array<i64: 1, 1, 1024>}, {transform_indices = @transform_3, window_bounds = array<i64: 1, 16, 1024>}]} {
    %c0 = arith.constant 0 : index
    %c0_0 = arith.constant 0 : index
    %0 = vector.load %arg1[%c0, %c0_0] : memref<16x512xbf16, #tpu.memory_space<vmem>>, vector<16x512xbf16>
    %c0_1 = arith.constant 0 : index
    %c0_2 = arith.constant 0 : index
    %c0_3 = arith.constant 0 : index
    %1 = vector.load %arg2[%c0_1, %c0_2, %c0_3] : memref<1x512x1024xbf16, #tpu.memory_space<vmem>>, vector<1x512x1024xbf16>
    %2 = vector.shape_cast %1 : vector<1x512x1024xbf16> to vector<512x1024xbf16>
    %cst = arith.constant dense<0.000000e+00> : vector<16x1024xf32>
    %3 = tpu.matmul %0, %2, %cst {dimension_numbers = #tpu.dot_dimension_numbers<[1], [0], [0], [1], [0, 0, 1, 1], [], []>} : vector<16x512xbf16>, vector<512x1024xbf16>, vector<16x1024xf32> -> vector<16x1024xf32>
    %c0_4 = arith.constant 0 : index
    %c0_5 = arith.constant 0 : index
    %c0_6 = arith.constant 0 : index
    %4 = vector.load %arg3[%c0_4, %c0_5, %c0_6] : memref<1x1x1024xf32, #tpu.memory_space<vmem>>, vector<1x1x1024xf32>
    %5 = vector.shape_cast %4 : vector<1x1x1024xf32> to vector<1x1024xf32>
    %6 = vector.broadcast %5 : vector<1x1024xf32> to vector<16x1024xf32>
    %7 = arith.addf %3, %6 : vector<16x1024xf32>
    %c0_7 = arith.constant 0 : index
    %c0_8 = arith.constant 0 : index
    %c0_9 = arith.constant 0 : index
    %8 = vector.load %arg4[%c0_7, %c0_8, %c0_9] : memref<1x16x1024xf32, #tpu.memory_space<vmem>>, vector<1x16x1024xf32>
    %9 = vector.shape_cast %8 : vector<1x16x1024xf32> to vector<16x1024xf32>
    %10 = vector.shape_cast %7 : vector<16x1024xf32> to vector<1x16x1024xf32>
    tpu.vector_store %arg4[%c0_7, %c0_8, %c0_9], %10 {strides = array<i32>} : memref<1x16x1024xf32, #tpu.memory_space<vmem>>, vector<1x16x1024xf32>,
    return
  }
  func.func @transform_0(%arg0: i32) -> (i32, i32) {
    %c0_i32 = arith.constant 0 : i32
    %c0_i32_0 = arith.constant 0 : i32
    %c0_i32_1 = arith.constant 0 : i32
    return %c0_i32, %c0_i32_0 : i32, i32
  }
  func.func @transform_1(%arg0: i32) -> (i32, i32, i32) {
    %c0_i32 = arith.constant 0 : i32
    %c0_i32_0 = arith.constant 0 : i32
    %c0_i32_1 = arith.constant 0 : i32
    return %arg0, %c0_i32, %c0_i32_0 : i32, i32, i32
  }
  func.func @transform_2(%arg0: i32) -> (i32, i32, i32) {
    %c0_i32 = arith.constant 0 : i32
    %c0_i32_0 = arith.constant 0 : i32
    %c0_i32_1 = arith.constant 0 : i32
    return %arg0, %c0_i32, %c0_i32_0 : i32, i32, i32
  }
  func.func @transform_3(%arg0: i32) -> (i32, i32, i32) {
    %c0_i32 = arith.constant 0 : i32
    %c0_i32_0 = arith.constant 0 : i32
    %c0_i32_1 = arith.constant 0 : i32
    return %arg0, %c0_i32, %c0_i32_0 : i32, i32, i32
  }
}

</mosaic_0001>

<bundles_post_ra>
// kernel: deepfake_detector_forward.5
= control target key start
LH: loop header
LB: loop body
LE: loop exit
PB: predicated region body
PF: predicated region fallthrough
CT: control target
= control target key end

     0   :  { %s2266_s9 = smov 0   ;;  %s2268_s10 = smov 0   ;;  %s2638_s0 = inlined_call_operand.vmem [shape: f32[2,8,2,1024], index: 0, kind: input, shape index: {}]   ;;  %s2639_s1 = inlined_call_operand.vmem [shape: bf16[2,256,1024], index: 1, kind: input, shape index: {}]   ;;  %s2640_s2 = inlined_call_operand.vmem [shape: f32[8,2,512], index: 2, kind: output, shape index: {}]  }
   0x1   :  { %s2270_s11 = smov 0   ;;  %s2272_s12 = smov 0  }
   0x2   :  { %s2274_s13 = smov 0  }
   0x3 LB: > { %s21_s14 = sadd.s32 1, %s2240_s11  ;;  %s24_s15 = sadd.s32 1, %s2244_s12  ;;  %s2248_s13 = sphi %s2274_s13, %s12_s13   ;;  %s2244_s12 = sphi %s2272_s12, %s2646_s12   ;;  %s2240_s11 = sphi %s2270_s11, %s2645_s11   ;;  %s2236_s10 = sphi %s2268_s10, %s2644_s10   ;;  %s2232_s9 = sphi %s2266_s9, %s2643_s9  }
   0x4   : > { %p22_p0 = scmp.ge.s32.totalorder %s21_s14, 8  ;;  %p1485_p1 = scmp.ge.s32.totalorder %s2248_s13, 1 }
   0x5   : > { %p166_p2 = scmp.lt.s32.totalorder %s2248_s13, 17 }
   0x6   : > { %s2648_s14 = smov (%p22_p0, %s21_s14), 0  ;;  %s2650_s15 = smov (!%p22_p0, %s24_s15), %s2244_s12 }
   0x7   : > { %p167_p3 = pnand %p1485_p1, %p166_p2  ;;  %p26_p4 = scmp.ge.s32.totalorder %s2650_s15, 2 }
   0x8   : > { %s1486_s16 = sshll.u32 (!%p167_p3), %s2232_s9, 1  ;;  %p213_p5 = scmp.lt.s32.totalorder (!%p167_p3), %s2236_s10, 1 }
   0x9   : > { %s2652_s15 = smov (%p26_p4, %s2650_s15), 0  ;;  %170 = sbr.rel (%p167_p3) target bundleno = 337 (0x151), region = 28 }
   0xa   : > { %s210_s17 = ssub.s32 (!%p167_p3), 7, %s1486_s16  ;;  %s1493_s21 = sshll.u32 (!%p167_p3), %s2236_s10, 1 }
   0xb   : > { %s211_s18 = smul.u32 (!%p167_p3), %s2236_s10, %s210_s17  ;;  %p238_p7 = scmp.lt.s32.totalorder (!%p167_p3), %s1493_s21, 3 }
   0xc   : > { %p1496_p8 = scmp.ne.s32.totalorder (!%p167_p3), %s2232_s9, 0 }
   0xd   : > { %s212_s20 = sadd.s32 (!%p167_p3), %s2232_s9, %s211_s18 }
   0xe   : > { %s214_s19 = scalar_select %p213_p5, %s2236_s10, 1 }
   0xf   : > { %p215_p6 = scmp.lt.s32.totalorder %s212_s20, 7  ;;  %s2656_s21 = smov (!%p238_p7, %s1493_s21), 3 }
  0x10   : > { %s1488_s22 = sshll.u32 %s214_s19, 6  ;;  %s2020_s23 = sshll.u32 %s214_s19, 10 }
  0x11   : > { %s2654_s20 = smov (!%p215_p6, %s212_s20), 7  ;;  %s2309_s26 = scalar_lea.vmem %s2639_s1, %s2020_s23 }
  0x12   : > { %s1487_s27 = sshll.u32 %s2654_s20, 3  ;;  %s1494_s5 = sshll.u32 %s2654_s20, 2 }
  0x13   : > { %s219_s28 = sadd.s32 %s1488_s22, %s1487_s27  ;;  %s241_s6 = sadd.s32 %s1494_s5, %s2656_s21 }
  0x14   : > { %s1489_s29 = sshll.u32 %s219_s28, 1  ;;  %s1495_s7 = sshll.u32 %s241_s6, 1 }
  0x15   : > { %s2314_s4 = scalar_lea.vmem %s2638_s0, %s1489_s29  ;;  %s2319_s17 = scalar_lea.vmem %s2640_s2, %s1495_s7 }
  0x16   : > { %252 = sbr.rel (%p1496_p8) target bundleno = 30 (0x1e), region = 32  ;;  %s2021_s18 = sshll.u32 (!%p1496_p8), %s2236_s10, 2 }
  0x17   : > { %s255_s19 = scalar_lea.vmem (!%p1496_p8), [#allocation2], %s2021_s18  ;;  %s258_s22 = scalar_lea.vmem (!%p1496_p8), [#allocation3], %s2021_s18 }
  0x1b   : > { %v2250_v0 = vmov 0.0  }
  0x1c   : > { %256 = vst [vmem:[%s255_s19] sm:$0xf] %v2250_v0 }
  0x1d   : > { %259 = vst [vmem:[%s258_s22] sm:$0xf] %v2250_v0 }
  0x1e PF: > { %v1729_v1 = vld [vmem:[%s2309_s26 + $0x1c0] sm:$0xf]  ;;  %v2081_v6 = vld [vmem:[%s2309_s26 + $0x1c4] sm:$0xf]  ;;  %s2023_s9 = sshll.u32 %s2236_s10, 2  ;;  %vm1269_vm0 = vcmask 1045508  }
  0x1f   : > { %v2085_v2 = vld [vmem:[%s2309_s26 + $0x1dc] sm:$0xf0]  ;;  %v1731_v7 = vld [vmem:[%s2309_s26 + $0x1e0] sm:$0xf0]  ;;  %s2410_s20 = scalar_lea.vmem [#allocation2], %s2023_s9  ;;  %vm1267_vm1 = vcmask 1041408  }
  0x20   : > { %v1985_v3 = vld [vmem:[%s2309_s26 + $0x3c0] sm:$0xf]  ;;  %v1730_v4 = vor.u32 %v2085_v2, %v1729_v1  ;;  %v1734_v9 = vor.u32 %v2081_v6, %v1731_v7  ;;  %v2145_v10 = vld [vmem:[%s2309_s26 + $0x3c4] sm:$0xf]  ;;  %vm1271_vm2 = vcmask 1043456   ;;  %s265_s21 = scalar_lea.vmem [#allocation3], %s2023_s9 }
  0x21   : > { %v2149_v5 = vld [vmem:[%s2309_s26 + $0x3dc] sm:$0xf0]  ;;  %v1987_v11 = vld [vmem:[%s2309_s26 + $0x3e0] sm:$0xf0] }
  0x22   : > { %v1986_v8 = vor.u32 %v2149_v5, %v1985_v3  ;;  %v1697_v12 = vld [vmem:[%s2309_s26 + $0x180] sm:$0xf]  ;;  %1045 = vmatpush.bf16.msra.mxu0 %v1730_v4  ;;  %v1990_v13 = vor.u32 %v2145_v10, %v1987_v11  ;;  %1071 = vmatpush.bf16.msra.mxu2 %v1734_v9  ;;  %v2073_v19 = vld [vmem:[%s2309_s26 + $0x184] sm:$0xf] }
  0x23   : > { %v2077_v14 = vld [vmem:[%s2309_s26 + $0x19c] sm:$0xf0]  ;;  %v1699_v20 = vld [vmem:[%s2309_s26 + $0x1a0] sm:$0xf0] }
  0x24   : > { %v1953_v15 = vld [vmem:[%s2309_s26 + $0x380] sm:$0xf]  ;;  %1058 = vmatpush.bf16.msra.mxu1 %v1986_v8  ;;  %v1698_v17 = vor.u32 %v2077_v14, %v1697_v12  ;;  %v2137_v21 = vld [vmem:[%s2309_s26 + $0x384] sm:$0xf]  ;;  %1084 = vmatpush.bf16.msra.mxu3 %v1990_v13  ;;  %v1702_v22 = vor.u32 %v2073_v19, %v1699_v20 }
  0x25   : > { %v2141_v16 = vld [vmem:[%s2309_s26 + $0x39c] sm:$0xf0]  ;;  %v1955_v23 = vld [vmem:[%s2309_s26 + $0x3a0] sm:$0xf0] }
  0x26   : > { %v1954_v18 = vor.u32 %v2141_v16, %v1953_v15  ;;  %v1665_v24 = vld [vmem:[%s2309_s26 + $0x140] sm:$0xf]  ;;  %v1958_v26 = vor.u32 %v2137_v21, %v1955_v23  ;;  %v2065_v29 = vld [vmem:[%s2309_s26 + $0x144] sm:$0xf]  ;;  %1046 = vmatpush.bf16.msra.mxu0 %v1698_v17  ;;  %1072 = vmatpush.bf16.msra.mxu2 %v1702_v22 }
  0x27   : > { %v2069_v25 = vld [vmem:[%s2309_s26 + $0x15c] sm:$0xf0]  ;;  %v1667_v31 = vld [vmem:[%s2309_s26 + $0x160] sm:$0xf0] }
  0x28   : > { %v1921_v27 = vld [vmem:[%s2309_s26 + $0x340] sm:$0xf]  ;;  %v1666_v30 = vor.u32 %v2069_v25, %v1665_v24  ;;  %v2129_v32 = vld [vmem:[%s2309_s26 + $0x344] sm:$0xf]  ;;  %1059 = vmatpush.bf16.msra.mxu1 %v1954_v18  ;;  %v1670_v35 = vor.u32 %v2065_v29, %v1667_v31  ;;  %1085 = vmatpush.bf16.msra.mxu3 %v1958_v26  ;;  %v1737_v29 = vld [vmem:[%s2309_s26 + $0x1c8] sm:$0xf] }
  0x29   : > { %v2133_v28 = vld [vmem:[%s2309_s26 + $0x35c] sm:$0xf0]  ;;  %v1923_v33 = vld [vmem:[%s2309_s26 + $0x360] sm:$0xf0]  ;;  %v1993_v31 = vld [vmem:[%s2309_s26 + $0x3c8] sm:$0xf] }
  0x2a   : > { %v1922_v34 = vor.u32 %v2133_v28, %v1921_v27  ;;  %v1633_v36 = vld [vmem:[%s2309_s26 + $0x100] sm:$0xf]  ;;  %v1926_v39 = vor.u32 %v2129_v32, %v1923_v33  ;;  %v2057_v41 = vld [vmem:[%s2309_s26 + $0x104] sm:$0xf]  ;;  %1047 = vmatpush.bf16.msra.mxu0 %v1666_v30  ;;  %1073 = vmatpush.bf16.msra.mxu2 %v1670_v35  ;;  %v2086_v30 = vld [vmem:[%s2309_s26 + $0x1e4] sm:$0xf0] }
  0x2b   : > { %v2061_v37 = vld [vmem:[%s2309_s26 + $0x11c] sm:$0xf0]  ;;  %v1635_v42 = vld [vmem:[%s2309_s26 + $0x120] sm:$0xf0]  ;;  %v2150_v33 = vld [vmem:[%s2309_s26 + $0x3e4] sm:$0xf0] }
  0x2c   : > { %v1889_v38 = vld [vmem:[%s2309_s26 + $0x300] sm:$0xf]  ;;  %v2121_v43 = vld [vmem:[%s2309_s26 + $0x304] sm:$0xf]  ;;  %v1634_v45 = vor.u32 %v2061_v37, %v1633_v36  ;;  %1060 = vmatpush.bf16.msra.mxu1 %v1922_v34  ;;  %v1638_v47 = vor.u32 %v2057_v41, %v1635_v42  ;;  %1086 = vmatpush.bf16.msra.mxu3 %v1926_v39  ;;  %v2082_v34 = vld [vmem:[%s2309_s26 + $0x1cc] sm:$0xf]  ;;  %v1738_v41 = vor.u32 %v2086_v30, %v1737_v29 }
  0x2d   : > { %v2125_v40 = vld [vmem:[%s2309_s26 + $0x31c] sm:$0xf0]  ;;  %v1891_v44 = vld [vmem:[%s2309_s26 + $0x320] sm:$0xf0]  ;;  %v1739_v35 = vld [vmem:[%s2309_s26 + $0x1e8] sm:$0xf0]  ;;  %v1994_v42 = vor.u32 %v2150_v33, %v1993_v31 }
  0x2e   : > { %v1890_v46 = vor.u32 %v2125_v40, %v1889_v38  ;;  %v1601_v48 = vld [vmem:[%s2309_s26 + $0xc0] sm:$0xf]  ;;  %v1894_v51 = vor.u32 %v2121_v43, %v1891_v44  ;;  %v2049_v53 = vld [vmem:[%s2309_s26 + $0xc4] sm:$0xf]  ;;  %1048 = vmatpush.bf16.msra.mxu0 %v1634_v45  ;;  %1074 = vmatpush.bf16.msra.mxu2 %v1638_v47  ;;  %v2146_v38 = vld [vmem:[%s2309_s26 + $0x3cc] sm:$0xf]  ;;  %v1742_v43 = vor.u32 %v2082_v34, %v1739_v35 }
  0x2f   : > { %v2053_v49 = vld [vmem:[%s2309_s26 + $0xdc] sm:$0xf0]  ;;  %v1603_v54 = vld [vmem:[%s2309_s26 + $0xe0] sm:$0xf0]  ;;  %v1995_v39 = vld [vmem:[%s2309_s26 + $0x3e8] sm:$0xf0] }
  0x30   : > { %v1857_v50 = vld [vmem:[%s2309_s26 + $0x2c0] sm:$0xf]  ;;  %v2113_v55 = vld [vmem:[%s2309_s26 + $0x2c4] sm:$0xf]  ;;  %v1602_v57 = vor.u32 %v2053_v49, %v1601_v48  ;;  %1061 = vmatpush.bf16.msra.mxu1 %v1890_v46  ;;  %v1606_v59 = vor.u32 %v2049_v53, %v1603_v54  ;;  %1087 = vmatpush.bf16.msra.mxu3 %v1894_v51  ;;  %v1705_v44 = vld [vmem:[%s2309_s26 + $0x188] sm:$0xf]  ;;  %v1998_v47 = vor.u32 %v2146_v38, %v1995_v39 }
  0x31   : > { %v2117_v52 = vld [vmem:[%s2309_s26 + $0x2dc] sm:$0xf0]  ;;  %v1859_v56 = vld [vmem:[%s2309_s26 + $0x2e0] sm:$0xf0]  ;;  %v2078_v45 = vld [vmem:[%s2309_s26 + $0x1a4] sm:$0xf0] }
  0x32   : > { %v1858_v58 = vor.u32 %v2117_v52, %v1857_v50  ;;  %v1569_v60 = vld [vmem:[%s2309_s26 + $0x80] sm:$0xf]  ;;  %v1862_v63 = vor.u32 %v2113_v55, %v1859_v56  ;;  %v2041_v1 = vld [vmem:[%s2309_s26 + $0x84] sm:$0xf]  ;;  %1049 = vmatpush.bf16.msra.mxu0 %v1602_v57  ;;  %1075 = vmatpush.bf16.msra.mxu2 %v1606_v59  ;;  %v1961_v46 = vld [vmem:[%s2309_s26 + $0x388] sm:$0xf]  ;;  %v1706_v53 = vor.u32 %v2078_v45, %v1705_v44 }
  0x33   : > { %v2045_v61 = vld [vmem:[%s2309_s26 + $0x9c] sm:$0xf0]  ;;  %v1571_v2 = vld [vmem:[%s2309_s26 + $0xa0] sm:$0xf0]  ;;  %v2142_v48 = vld [vmem:[%s2309_s26 + $0x3a4] sm:$0xf0] }
  0x34   : > { %v1825_v62 = vld [vmem:[%s2309_s26 + $0x280] sm:$0xf]  ;;  %v2105_v3 = vld [vmem:[%s2309_s26 + $0x284] sm:$0xf]  ;;  %v1570_v5 = vor.u32 %v2045_v61, %v1569_v60  ;;  %1062 = vmatpush.bf16.msra.mxu1 %v1858_v58  ;;  %v1574_v7 = vor.u32 %v2041_v1, %v1571_v2  ;;  %1088 = vmatpush.bf16.msra.mxu3 %v1862_v63  ;;  %v2074_v49 = vld [vmem:[%s2309_s26 + $0x18c] sm:$0xf]  ;;  %v1962_v56 = vor.u32 %v2142_v48, %v1961_v46 }
  0x35   : > { %v2109_v0 = vld [vmem:[%s2309_s26 + $0x29c] sm:$0xf0]  ;;  %v1827_v4 = vld [vmem:[%s2309_s26 + $0x2a0] sm:$0xf0]  ;;  %v1707_v50 = vld [vmem:[%s2309_s26 + $0x1a8] sm:$0xf0] }
  0x36   : > { %v1826_v6 = vor.u32 %v2109_v0, %v1825_v62  ;;  %v1537_v8 = vld [vmem:[%s2309_s26 + $0x40] sm:$0xf]  ;;  %v1830_v11 = vor.u32 %v2105_v3, %v1827_v4  ;;  %v2033_v13 = vld [vmem:[%s2309_s26 + $0x44] sm:$0xf]  ;;  %1050 = vmatpush.bf16.msra.mxu0 %v1570_v5  ;;  %1076 = vmatpush.bf16.msra.mxu2 %v1574_v7  ;;  %v2138_v51 = vld [vmem:[%s2309_s26 + $0x38c] sm:$0xf]  ;;  %v1710_v57 = vor.u32 %v2074_v49, %v1707_v50 }
  0x37   : > { %v2037_v9 = vld [vmem:[%s2309_s26 + $0x5c] sm:$0xf0]  ;;  %v1539_v14 = vld [vmem:[%s2309_s26 + $0x60] sm:$0xf0]  ;;  %v1963_v52 = vld [vmem:[%s2309_s26 + $0x3a8] sm:$0xf0] }
  0x38   : > { %v1793_v10 = vld [vmem:[%s2309_s26 + $0x240] sm:$0xf]  ;;  %v2097_v15 = vld [vmem:[%s2309_s26 + $0x244] sm:$0xf]  ;;  %v1538_v17 = vor.u32 %v2037_v9, %v1537_v8  ;;  %1063 = vmatpush.bf16.msra.mxu1 %v1826_v6  ;;  %v1542_v21 = vor.u32 %v2033_v13, %v1539_v14  ;;  %1089 = vmatpush.bf16.msra.mxu3 %v1830_v11  ;;  %v1673_v54 = vld [vmem:[%s2309_s26 + $0x148] sm:$0xf]  ;;  %v1966_v61 = vor.u32 %v2138_v51, %v1963_v52 }
  0x39   : > { %v2101_v12 = vld [vmem:[%s2309_s26 + $0x25c] sm:$0xf0]  ;;  %v1795_v16 = vld [vmem:[%s2309_s26 + $0x260] sm:$0xf0]  ;;  %v2070_v55 = vld [vmem:[%s2309_s26 + $0x164] sm:$0xf0] }
  0x3a   : > { %v1505_v18 = vld [vmem:[%s2309_s26] sm:$0xf]  ;;  %v1794_v20 = vor.u32 %v2101_v12, %v1793_v10  ;;  %v2025_v24 = vld [vmem:[%s2309_s26 + $0x4] sm:$0xf]  ;;  %v1798_v25 = vor.u32 %v2097_v15, %v1795_v16  ;;  %1051 = vmatpush.bf16.msra.mxu0 %v1538_v17  ;;  %1077 = vmatpush.bf16.msra.mxu2 %v1542_v21  ;;  %v1929_v58 = vld [vmem:[%s2309_s26 + $0x348] sm:$0xf]  ;;  %v1674_v2 = vor.u32 %v2070_v55, %v1673_v54 }
  0x3b   : > { %v2029_v19 = vld [vmem:[%s2309_s26 + $0x1c] sm:$0xf0]  ;;  %v1507_v26 = vld [vmem:[%s2309_s26 + $0x20] sm:$0xf0]  ;;  %v2134_v59 = vld [vmem:[%s2309_s26 + $0x364] sm:$0xf0] }
  0x3c   : > { %v1761_v22 = vld [vmem:[%s2309_s26 + $0x200] sm:$0xf]  ;;  %v2089_v27 = vld [vmem:[%s2309_s26 + $0x204] sm:$0xf]  ;;  %v1506_v32 = vor.u32 %v2029_v19, %v1505_v18  ;;  %1064 = vmatpush.bf16.msra.mxu1 %v1794_v20  ;;  %v1510_v37 = vor.u32 %v2025_v24, %v1507_v26  ;;  %1090 = vmatpush.bf16.msra.mxu3 %v1798_v25  ;;  %v2066_v62 = vld [vmem:[%s2309_s26 + $0x14c] sm:$0xf]  ;;  %v1930_v3 = vor.u32 %v2134_v59, %v1929_v58 }
  0x3d   : > { %v2093_v23 = vld [vmem:[%s2309_s26 + $0x21c] sm:$0xf0]  ;;  %v1763_v28 = vld [vmem:[%s2309_s26 + $0x220] sm:$0xf0]  ;;  %v1675_v63 = vld [vmem:[%s2309_s26 + $0x168] sm:$0xf0] }
  0x3e   : > { %v1762_v36 = vor.u32 %v2093_v23, %v1761_v22  ;;  %v1766_v40 = vor.u32 %v2089_v27, %v1763_v28  ;;  %1052 = vmatpush.bf16.msra.mxu0 %v1506_v32  ;;  %1078 = vmatpush.bf16.msra.mxu2 %v1510_v37  ;;  %v263_v60 = vld [vmem:[%s2410_s20] sm:$0xf]  ;;  %v2130_v0 = vld [vmem:[%s2309_s26 + $0x34c] sm:$0xf]  ;;  %v1678_v4 = vor.u32 %v2066_v62, %v1675_v63  ;;  %v1641_v5 = vld [vmem:[%s2309_s26 + $0x108] sm:$0xf] }
  0x3f   : > { %270 = vst [vmem:[#allocation1] ss:$4 sm:$0xff] %v263_v60  ;;  %v1931_v1 = vld [vmem:[%s2309_s26 + $0x368] sm:$0xf0]  ;;  %v2062_v6 = vld [vmem:[%s2309_s26 + $0x124] sm:$0xf0] }
  0x40   : > { %1065 = vmatpush.bf16.msra.mxu1 %v1762_v36  ;;  %1091 = vmatpush.bf16.msra.mxu3 %v1766_v40  ;;  %v1897_v7 = vld [vmem:[%s2309_s26 + $0x308] sm:$0xf]  ;;  %v1934_v8 = vor.u32 %v2130_v0, %v1931_v1  ;;  %v2058_v10 = vld [vmem:[%s2309_s26 + $0x10c] sm:$0xf]  ;;  %v1642_v14 = vor.u32 %v2062_v6, %v1641_v5  ;;  %v2151_v6 = vld [vmem:[%s2309_s26 + $0x3ec] sm:$0xf0] }
  0x41   : > { %v2126_v9 = vld [vmem:[%s2309_s26 + $0x324] sm:$0xf0]  ;;  %v1643_v11 = vld [vmem:[%s2309_s26 + $0x128] sm:$0xf0] }
  0x42   : > { %1097 = vmatpush.bf16.msrb.mxu0 %v1738_v41  ;;  %1123 = vmatpush.bf16.msrb.mxu2 %v1742_v43  ;;  %v2122_v12 = vld [vmem:[%s2309_s26 + $0x30c] sm:$0xf]  ;;  %v1609_v15 = vld [vmem:[%s2309_s26 + $0xc8] sm:$0xf]  ;;  %v1898_v18 = vor.u32 %v2126_v9, %v1897_v7  ;;  %v1646_v19 = vor.u32 %v2058_v10, %v1643_v11  ;;  %v2083_v7 = vld [vmem:[%s2309_s26 + $0x1d4] sm:$0xf] }
  0x43   : > { %v1899_v13 = vld [vmem:[%s2309_s26 + $0x328] sm:$0xf0]  ;;  %v2054_v16 = vld [vmem:[%s2309_s26 + $0xe4] sm:$0xf0]  ;;  %v2147_v11 = vld [vmem:[%s2309_s26 + $0x3d4] sm:$0xf] }
  0x44   : > { %1110 = vmatpush.bf16.msrb.mxu1 %v1994_v42  ;;  %1136 = vmatpush.bf16.msrb.mxu3 %v1998_v47  ;;  %v1865_v17 = vld [vmem:[%s2309_s26 + $0x2c8] sm:$0xf]  ;;  %v1902_v22 = vor.u32 %v2122_v12, %v1899_v13  ;;  %v2050_v25 = vld [vmem:[%s2309_s26 + $0xcc] sm:$0xf]  ;;  %v1610_v30 = vor.u32 %v2054_v16, %v1609_v15  ;;  %v2003_v12 = vld [vmem:[%s2309_s26 + $0x3f0] sm:$0xf0] }
  0x45   : > { %v2118_v24 = vld [vmem:[%s2309_s26 + $0x2e4] sm:$0xf0]  ;;  %v1611_v26 = vld [vmem:[%s2309_s26 + $0xe8] sm:$0xf0] }
  0x46   : > { %1098 = vmatpush.bf16.msrb.mxu0 %v1706_v53  ;;  %1124 = vmatpush.bf16.msrb.mxu2 %v1710_v57  ;;  %v271_v20 = vld.sshfl [vmem:[#allocation1] sm:$0xff pattern:$0x73625140]  ;;  %v272_v21 = vld.sshfl [vmem:[#allocation1 + $0x8] sm:$0xff pattern:$0x73625140]  ;;  %v1866_v31 = vor.u32 %v2118_v24, %v1865_v17  ;;  %v1614_v32 = vor.u32 %v2050_v25, %v1611_v26 }
  0x47   : > { %v2428_v23 = vpack.c.bf16 %v271_v20, %v271_v20  ;;  %v2433_v27 = vpack.c.bf16 %v272_v21, %v272_v21  ;;  %v2114_v28 = vld [vmem:[%s2309_s26 + $0x2cc] sm:$0xf]  ;;  %v1577_v33 = vld [vmem:[%s2309_s26 + $0x88] sm:$0xf]  ;;  %v1713_v17 = vld [vmem:[%s2309_s26 + $0x190] sm:$0xf]  ;;  %v2006_v20 = vor.u32 %v2147_v11, %v2003_v12 }
  0x48   : > { %1111 = vmatpush.bf16.msrb.mxu1 %v1962_v56  ;;  %1137 = vmatpush.bf16.msrb.mxu3 %v1966_v61  ;;  %v1867_v29 = vld [vmem:[%s2309_s26 + $0x2e8] sm:$0xf0]  ;;  %v2046_v34 = vld [vmem:[%s2309_s26 + $0xa4] sm:$0xf0]  ;;  %v2143_v21 = vld [vmem:[%s2309_s26 + $0x3ac] sm:$0xf0] }
  0x49   : > { %1079 = vmatmul.bf16.vlgmr.msra.gmra.mxu2 %v2428_v23  ;;  %v1833_v35 = vld [vmem:[%s2309_s26 + $0x288] sm:$0xf]  ;;  %v1870_v36 = vor.u32 %v2114_v28, %v1867_v29  ;;  %v2042_v38 = vld [vmem:[%s2309_s26 + $0x8c] sm:$0xf]  ;;  %1053 = vmatmul.bf16.vlgmr.msra.gmra.mxu0 %v2428_v23  ;;  %v1578_v42 = vor.u32 %v2046_v34, %v1577_v33  ;;  %v1715_v24 = vld [vmem:[%s2309_s26 + $0x1b0] sm:$0xf0] }
  0x4a   : > { %1099 = vmatpush.bf16.msrb.mxu0 %v1674_v2  ;;  %1125 = vmatpush.bf16.msrb.mxu2 %v1678_v4  ;;  %v2110_v37 = vld [vmem:[%s2309_s26 + $0x2a4] sm:$0xf0]  ;;  %v1579_v39 = vld [vmem:[%s2309_s26 + $0xa8] sm:$0xf0]  ;;  %v1745_v2 = vld [vmem:[%s2309_s26 + $0x1d0] sm:$0xf] }
  0x4b   : > { %1092 = vmatmul.bf16.vlgmr.msra.gmra.mxu3 %v2433_v27  ;;  %v2106_v40 = vld [vmem:[%s2309_s26 + $0x28c] sm:$0xf]  ;;  %1066 = vmatmul.bf16.vlgmr.msra.gmra.mxu1 %v2433_v27  ;;  %v1834_v43 = vor.u32 %v2110_v37, %v1833_v35  ;;  %v1582_v44 = vor.u32 %v2042_v38, %v1579_v39  ;;  %v1545_v45 = vld [vmem:[%s2309_s26 + $0x48] sm:$0xf]  ;;  %v2001_v4 = vld [vmem:[%s2309_s26 + $0x3d0] sm:$0xf] }
  0x4c   : > { %1112 = vmatpush.bf16.msrb.mxu1 %v1930_v3  ;;  %1138 = vmatpush.bf16.msrb.mxu3 %v1934_v8  ;;  %v1835_v41 = vld [vmem:[%s2309_s26 + $0x2a8] sm:$0xf0]  ;;  %v2038_v46 = vld [vmem:[%s2309_s26 + $0x64] sm:$0xf0]  ;;  %v2087_v3 = vld [vmem:[%s2309_s26 + $0x1ec] sm:$0xf0]  ;;  %v2002_v15 = vor.u32 %v2151_v6, %v2001_v4 }
  0x4d   : > { %v1801_v47 = vld [vmem:[%s2309_s26 + $0x248] sm:$0xf]  ;;  %v1838_v48 = vor.u32 %v2106_v40, %v1835_v41  ;;  %v2034_v50 = vld [vmem:[%s2309_s26 + $0x4c] sm:$0xf]  ;;  %v1546_v54 = vor.u32 %v2038_v46, %v1545_v45  ;;  %v1747_v8 = vld [vmem:[%s2309_s26 + $0x1f0] sm:$0xf0] }
  0x4e   : > { %1100 = vmatpush.bf16.msrb.mxu0 %v1642_v14  ;;  %1126 = vmatpush.bf16.msrb.mxu2 %v1646_v19  ;;  %v2102_v49 = vld [vmem:[%s2309_s26 + $0x264] sm:$0xf0]  ;;  %v1547_v51 = vld [vmem:[%s2309_s26 + $0x68] sm:$0xf0]  ;;  %v1746_v14 = vor.u32 %v2087_v3, %v1745_v2  ;;  %v1750_v16 = vor.u32 %v2083_v7, %v1747_v8  ;;  %v1969_v19 = vld [vmem:[%s2309_s26 + $0x390] sm:$0xf] }
  0x4f   : > { %v2098_v52 = vld [vmem:[%s2309_s26 + $0x24c] sm:$0xf]  ;;  %v1513_v55 = vld [vmem:[%s2309_s26 + $0x8] sm:$0xf]  ;;  %v1802_v57 = vor.u32 %v2102_v49, %v1801_v47  ;;  %v1550_v58 = vor.u32 %v2034_v50, %v1547_v51  ;;  %v2139_v25 = vld [vmem:[%s2309_s26 + $0x394] sm:$0xf]  ;;  %v1970_v29 = vor.u32 %v2143_v21, %v1969_v19 }
  0x50   : > { %1113 = vmatpush.bf16.msrb.mxu1 %v1898_v18  ;;  %1139 = vmatpush.bf16.msrb.mxu3 %v1902_v22  ;;  %v1803_v53 = vld [vmem:[%s2309_s26 + $0x268] sm:$0xf0]  ;;  %v2030_v56 = vld [vmem:[%s2309_s26 + $0x24] sm:$0xf0]  ;;  %v2079_v18 = vld [vmem:[%s2309_s26 + $0x1ac] sm:$0xf0] }
  0x51   : > { %v1769_v59 = vld [vmem:[%s2309_s26 + $0x208] sm:$0xf]  ;;  %v2026_v61 = vld [vmem:[%s2309_s26 + $0xc] sm:$0xf]  ;;  %v1806_v62 = vor.u32 %v2098_v52, %v1803_v53  ;;  %v1514_v5 = vor.u32 %v2030_v56, %v1513_v55  ;;  %v2075_v22 = vld [vmem:[%s2309_s26 + $0x194] sm:$0xf]  ;;  %v1714_v28 = vor.u32 %v2079_v18, %v1713_v17 }
  0x52   : > { %1101 = vmatpush.bf16.msrb.mxu0 %v1610_v30  ;;  %1127 = vmatpush.bf16.msrb.mxu2 %v1614_v32  ;;  %v2094_v60 = vld [vmem:[%s2309_s26 + $0x224] sm:$0xf0]  ;;  %v1515_v63 = vld [vmem:[%s2309_s26 + $0x28] sm:$0xf0]  ;;  %v1971_v26 = vld [vmem:[%s2309_s26 + $0x3b0] sm:$0xf0]  ;;  %v1718_v30 = vor.u32 %v2075_v22, %v1715_v24 }
  0x53   : > { %v2090_v0 = vld [vmem:[%s2309_s26 + $0x20c] sm:$0xf]  ;;  %v1770_v9 = vor.u32 %v2094_v60, %v1769_v59  ;;  %v1518_v10 = vor.u32 %v2026_v61, %v1515_v63  ;;  %v2071_v32 = vld [vmem:[%s2309_s26 + $0x16c] sm:$0xf0]  ;;  %v1974_v34 = vor.u32 %v2139_v25, %v1971_v26  ;;  %v1683_v37 = vld [vmem:[%s2309_s26 + $0x170] sm:$0xf0] }
  0x54   : > { %1114 = vmatpush.bf16.msrb.mxu1 %v1866_v31  ;;  %1140 = vmatpush.bf16.msrb.mxu3 %v1870_v36  ;;  %v1771_v1 = vld [vmem:[%s2309_s26 + $0x228] sm:$0xf0]  ;;  %v1681_v31 = vld [vmem:[%s2309_s26 + $0x150] sm:$0xf]  ;;  %v2067_v36 = vld [vmem:[%s2309_s26 + $0x154] sm:$0xf] }
  0x55   : > { %v1774_v13 = vor.u32 %v2090_v0, %v1771_v1  ;;  %v1937_v33 = vld [vmem:[%s2309_s26 + $0x350] sm:$0xf]  ;;  %v2131_v38 = vld [vmem:[%s2309_s26 + $0x354] sm:$0xf]  ;;  %v1682_v40 = vor.u32 %v2071_v32, %v1681_v31 }
  0x56   : > { %1102 = vmatpush.bf16.msrb.mxu0 %v1578_v42  ;;  %1128 = vmatpush.bf16.msrb.mxu2 %v1582_v44  ;;  %v2135_v35 = vld [vmem:[%s2309_s26 + $0x36c] sm:$0xf0]  ;;  %v1939_v39 = vld [vmem:[%s2309_s26 + $0x370] sm:$0xf0]  ;;  %v1686_v42 = vor.u32 %v2067_v36, %v1683_v37 }
  0x57   : > { %v1938_v41 = vor.u32 %v2135_v35, %v1937_v33  ;;  %v2063_v44 = vld [vmem:[%s2309_s26 + $0x12c] sm:$0xf0]  ;;  %v1942_v46 = vor.u32 %v2131_v38, %v1939_v39  ;;  %v1651_v49 = vld [vmem:[%s2309_s26 + $0x130] sm:$0xf0]  ;;  %v1753_v38 = vld [vmem:[%s2309_s26 + $0x1d8] sm:$0xf] }
  0x58   : > { %1115 = vmatpush.bf16.msrb.mxu1 %v1834_v43  ;;  %1141 = vmatpush.bf16.msrb.mxu3 %v1838_v48  ;;  %v1649_v43 = vld [vmem:[%s2309_s26 + $0x110] sm:$0xf]  ;;  %v2059_v48 = vld [vmem:[%s2309_s26 + $0x114] sm:$0xf]  ;;  %v2088_v39 = vld [vmem:[%s2309_s26 + $0x1f4] sm:$0xf0] }
  0x59   : > { %v1905_v45 = vld [vmem:[%s2309_s26 + $0x310] sm:$0xf]  ;;  %v2123_v50 = vld [vmem:[%s2309_s26 + $0x314] sm:$0xf]  ;;  %v1650_v52 = vor.u32 %v2063_v44, %v1649_v43  ;;  %v2084_v43 = vld [vmem:[%s2309_s26 + $0x1dc] sm:$0xf] }
  0x5a   : > { %1103 = vmatpush.bf16.msrb.mxu0 %v1546_v54  ;;  %1129 = vmatpush.bf16.msrb.mxu2 %v1550_v58  ;;  %v2127_v47 = vld [vmem:[%s2309_s26 + $0x32c] sm:$0xf0]  ;;  %v1907_v51 = vld [vmem:[%s2309_s26 + $0x330] sm:$0xf0]  ;;  %v1654_v54 = vor.u32 %v2059_v48, %v1651_v49  ;;  %v1755_v44 = vld [vmem:[%s2309_s26 + $0x1f8] sm:$0xf0] }
  0x5b   : > { %v1906_v53 = vor.u32 %v2127_v47, %v1905_v45  ;;  %v1617_v55 = vld [vmem:[%s2309_s26 + $0xd0] sm:$0xf]  ;;  %v1910_v58 = vor.u32 %v2123_v50, %v1907_v51  ;;  %v2051_v60 = vld [vmem:[%s2309_s26 + $0xd4] sm:$0xf]  ;;  %v2148_v47 = vld [vmem:[%s2309_s26 + $0x3dc] sm:$0xf]  ;;  %v1754_v50 = vor.u32 %v2088_v39, %v1753_v38 }
  0x5c   : > { %1116 = vmatpush.bf16.msrb.mxu1 %v1802_v57  ;;  %1142 = vmatpush.bf16.msrb.mxu3 %v1806_v62  ;;  %v2055_v56 = vld [vmem:[%s2309_s26 + $0xec] sm:$0xf0]  ;;  %v1619_v61 = vld [vmem:[%s2309_s26 + $0xf0] sm:$0xf0]  ;;  %v2011_v48 = vld [vmem:[%s2309_s26 + $0x3f8] sm:$0xf0] }
  0x5d   : > { %v1873_v57 = vld [vmem:[%s2309_s26 + $0x2d0] sm:$0xf]  ;;  %v2115_v62 = vld [vmem:[%s2309_s26 + $0x2d4] sm:$0xf]  ;;  %v1618_v0 = vor.u32 %v2055_v56, %v1617_v55  ;;  %v1622_v2 = vor.u32 %v2051_v60, %v1619_v61  ;;  %v1977_v55 = vld [vmem:[%s2309_s26 + $0x398] sm:$0xf]  ;;  %v2014_v56 = vor.u32 %v2148_v47, %v2011_v48 }
  0x5e   : > { %1104 = vmatpush.bf16.msrb.mxu0 %v1514_v5  ;;  %1130 = vmatpush.bf16.msrb.mxu2 %v1518_v10  ;;  %v2119_v59 = vld [vmem:[%s2309_s26 + $0x2ec] sm:$0xf0]  ;;  %v1875_v63 = vld [vmem:[%s2309_s26 + $0x2f0] sm:$0xf0]  ;;  %v2140_v60 = vld [vmem:[%s2309_s26 + $0x39c] sm:$0xf] }
  0x5f   : > { %v1874_v1 = vor.u32 %v2119_v59, %v1873_v57  ;;  %v1585_v3 = vld [vmem:[%s2309_s26 + $0x90] sm:$0xf]  ;;  %v1878_v6 = vor.u32 %v2115_v62, %v1875_v63  ;;  %v2043_v8 = vld [vmem:[%s2309_s26 + $0x94] sm:$0xf]  ;;  %v2144_v57 = vld [vmem:[%s2309_s26 + $0x3b4] sm:$0xf0] }
  0x60   : > { %1117 = vmatpush.bf16.msrb.mxu1 %v1770_v9  ;;  %1143 = vmatpush.bf16.msrb.mxu3 %v1774_v13  ;;  %v2047_v4 = vld [vmem:[%s2309_s26 + $0xac] sm:$0xf0]  ;;  %v1587_v9 = vld [vmem:[%s2309_s26 + $0xb0] sm:$0xf0]  ;;  %v1723_v59 = vld [vmem:[%s2309_s26 + $0x1b8] sm:$0xf0]  ;;  %v1978_v63 = vor.u32 %v2144_v57, %v1977_v55 }
  0x61   : > { %1131 = vmatmul.bf16.vlgmr.msrb.gmra.mxu2 %v2428_v23  ;;  %1105 = vmatmul.bf16.vlgmr.msrb.gmra.mxu0 %v2428_v23  ;;  %v1841_v5 = vld [vmem:[%s2309_s26 + $0x290] sm:$0xf]  ;;  %v2107_v10 = vld [vmem:[%s2309_s26 + $0x294] sm:$0xf]  ;;  %v1586_v12 = vor.u32 %v2047_v4, %v1585_v3  ;;  %v1979_v61 = vld [vmem:[%s2309_s26 + $0x3b8] sm:$0xf0] }
  0x62   : > { %1149 = vmatpush.bf16.msra.mxu0 %v1746_v14  ;;  %1175 = vmatpush.bf16.msra.mxu2 %v1750_v16  ;;  %v2111_v7 = vld [vmem:[%s2309_s26 + $0x2ac] sm:$0xf0]  ;;  %v1843_v11 = vld [vmem:[%s2309_s26 + $0x2b0] sm:$0xf0]  ;;  %v1590_v14 = vor.u32 %v2043_v8, %v1587_v9  ;;  %v1945_v3 = vld [vmem:[%s2309_s26 + $0x358] sm:$0xf]  ;;  %v1982_v4 = vor.u32 %v2140_v60, %v1979_v61 }
  0x63   : > { %1144 = vmatmul.bf16.vlgmr.msrb.gmra.mxu3 %v2433_v27  ;;  %1118 = vmatmul.bf16.vlgmr.msrb.gmra.mxu1 %v2433_v27  ;;  %v1842_v13 = vor.u32 %v2111_v7, %v1841_v5  ;;  %v2039_v16 = vld [vmem:[%s2309_s26 + $0x6c] sm:$0xf0]  ;;  %v1846_v18 = vor.u32 %v2107_v10, %v1843_v11  ;;  %v1555_v21 = vld [vmem:[%s2309_s26 + $0x70] sm:$0xf0]  ;;  %v2136_v5 = vld [vmem:[%s2309_s26 + $0x374] sm:$0xf0] }
  0x64   : > { %1162 = vmatpush.bf16.msra.mxu1 %v2002_v15  ;;  %1188 = vmatpush.bf16.msra.mxu3 %v2006_v20  ;;  %v1553_v15 = vld [vmem:[%s2309_s26 + $0x50] sm:$0xf]  ;;  %v2035_v20 = vld [vmem:[%s2309_s26 + $0x54] sm:$0xf]  ;;  %v1691_v7 = vld [vmem:[%s2309_s26 + $0x178] sm:$0xf0]  ;;  %v1946_v11 = vor.u32 %v2136_v5, %v1945_v3 }
  0x65   : > { %v1809_v17 = vld [vmem:[%s2309_s26 + $0x250] sm:$0xf]  ;;  %v2099_v22 = vld [vmem:[%s2309_s26 + $0x254] sm:$0xf]  ;;  %v1554_v25 = vor.u32 %v2039_v16, %v1553_v15  ;;  %v2132_v8 = vld [vmem:[%s2309_s26 + $0x35c] sm:$0xf] }
  0x66   : > { %1150 = vmatpush.bf16.msra.mxu0 %v1714_v28  ;;  %1176 = vmatpush.bf16.msra.mxu2 %v1718_v30  ;;  %v2103_v19 = vld [vmem:[%s2309_s26 + $0x26c] sm:$0xf0]  ;;  %v1811_v24 = vld [vmem:[%s2309_s26 + $0x270] sm:$0xf0]  ;;  %v1558_v30 = vor.u32 %v2035_v20, %v1555_v21  ;;  %v1947_v9 = vld [vmem:[%s2309_s26 + $0x378] sm:$0xf0] }
  0x67   : > { %v1521_v26 = vld [vmem:[%s2309_s26 + $0x10] sm:$0xf]  ;;  %v2027_v33 = vld [vmem:[%s2309_s26 + $0x14] sm:$0xf]  ;;  %v1913_v15 = vld [vmem:[%s2309_s26 + $0x318] sm:$0xf]  ;;  %v1950_v16 = vor.u32 %v2132_v8, %v1947_v9 }
  0x68   : > { %1163 = vmatpush.bf16.msra.mxu1 %v1970_v29  ;;  %1189 = vmatpush.bf16.msra.mxu3 %v1974_v34  ;;  %v2031_v28 = vld [vmem:[%s2309_s26 + $0x2c] sm:$0xf0]  ;;  %v1810_v29 = vor.u32 %v2103_v19, %v1809_v17  ;;  %v1814_v34 = vor.u32 %v2099_v22, %v1811_v24  ;;  %v1523_v35 = vld [vmem:[%s2309_s26 + $0x30] sm:$0xf0]  ;;  %v2128_v17 = vld [vmem:[%s2309_s26 + $0x334] sm:$0xf0] }
  0x69   : > { %v1777_v31 = vld [vmem:[%s2309_s26 + $0x210] sm:$0xf]  ;;  %v2091_v36 = vld [vmem:[%s2309_s26 + $0x214] sm:$0xf]  ;;  %v1659_v19 = vld [vmem:[%s2309_s26 + $0x138] sm:$0xf0]  ;;  %v1914_v24 = vor.u32 %v2128_v17, %v1913_v15 }
  0x6a   : > { %1151 = vmatpush.bf16.msra.mxu0 %v1682_v40  ;;  %1177 = vmatpush.bf16.msra.mxu2 %v1686_v42  ;;  %v2095_v32 = vld [vmem:[%s2309_s26 + $0x22c] sm:$0xf0]  ;;  %v1779_v37 = vld [vmem:[%s2309_s26 + $0x230] sm:$0xf0]  ;;  %v2009_v40 = vld [vmem:[%s2309_s26 + $0x3d8] sm:$0xf] }
  0x6b   : > { %v2152_v42 = vld [vmem:[%s2309_s26 + $0x3f4] sm:$0xf0]  ;;  %v1778_v45 = vor.u32 %v2095_v32, %v1777_v31  ;;  %v1782_v49 = vor.u32 %v2091_v36, %v1779_v37  ;;  %v2124_v20 = vld [vmem:[%s2309_s26 + $0x31c] sm:$0xf] }
  0x6c   : > { %1164 = vmatpush.bf16.msra.mxu1 %v1938_v41  ;;  %1190 = vmatpush.bf16.msra.mxu3 %v1942_v46  ;;  %v1522_v41 = vor.u32 %v2031_v28, %v1521_v26  ;;  %v1526_v46 = vor.u32 %v2027_v33, %v1523_v35  ;;  %v2010_v51 = vor.u32 %v2152_v42, %v2009_v40  ;;  %v1915_v21 = vld [vmem:[%s2309_s26 + $0x338] sm:$0xf0]  ;;  %v1625_v26 = vld [vmem:[%s2309_s26 + $0xd8] sm:$0xf] }
  0x6d   : > { %v2056_v28 = vld [vmem:[%s2309_s26 + $0xf4] sm:$0xf0]  ;;  %v2052_v32 = vld [vmem:[%s2309_s26 + $0xdc] sm:$0xf] }
  0x6e   : > { %1152 = vmatpush.bf16.msra.mxu0 %v1650_v52  ;;  %1178 = vmatpush.bf16.msra.mxu2 %v1654_v54  ;;  %v1758_v52 = vor.u32 %v2084_v43, %v1755_v44  ;;  %v2080_v54 = vld [vmem:[%s2309_s26 + $0x1b4] sm:$0xf0]  ;;  %v1627_v33 = vld [vmem:[%s2309_s26 + $0xf8] sm:$0xf0]  ;;  %v1626_v36 = vor.u32 %v2056_v28, %v1625_v26 }
  0x6f   : > { %v2120_v31 = vld [vmem:[%s2309_s26 + $0x2f4] sm:$0xf0]  ;;  %v1883_v35 = vld [vmem:[%s2309_s26 + $0x2f8] sm:$0xf0]  ;;  %v1630_v38 = vor.u32 %v2052_v32, %v1627_v33 }
  0x70   : > { %1165 = vmatpush.bf16.msra.mxu1 %v1906_v53  ;;  %1191 = vmatpush.bf16.msra.mxu3 %v1910_v58  ;;  %v1721_v53 = vld [vmem:[%s2309_s26 + $0x198] sm:$0xf]  ;;  %v2076_v58 = vld [vmem:[%s2309_s26 + $0x19c] sm:$0xf] }
  0x71   : > { %v1722_v62 = vor.u32 %v2080_v54, %v1721_v53  ;;  %v1593_v39 = vld [vmem:[%s2309_s26 + $0x98] sm:$0xf]  ;;  %v2044_v44 = vld [vmem:[%s2309_s26 + $0x9c] sm:$0xf] }
  0x72   : > { %1153 = vmatpush.bf16.msra.mxu0 %v1618_v0  ;;  %1179 = vmatpush.bf16.msra.mxu2 %v1622_v2  ;;  %v1726_v0 = vor.u32 %v2076_v58, %v1723_v59  ;;  %v2072_v2 = vld [vmem:[%s2309_s26 + $0x174] sm:$0xf0]  ;;  %v1851_v47 = vld [vmem:[%s2309_s26 + $0x2b8] sm:$0xf0] }
  0x73   : > { %v2048_v40 = vld [vmem:[%s2309_s26 + $0xb4] sm:$0xf0]  ;;  %v1563_v57 = vld [vmem:[%s2309_s26 + $0x78] sm:$0xf0] }
  0x74   : > { %1166 = vmatpush.bf16.msra.mxu1 %v1874_v1  ;;  %1192 = vmatpush.bf16.msra.mxu3 %v1878_v6  ;;  %v1689_v1 = vld [vmem:[%s2309_s26 + $0x158] sm:$0xf]  ;;  %v2068_v6 = vld [vmem:[%s2309_s26 + $0x15c] sm:$0xf]  ;;  %v1594_v48 = vor.u32 %v2048_v40, %v1593_v39 }
  0x75   : > { %v1690_v10 = vor.u32 %v2072_v2, %v1689_v1  ;;  %v2112_v43 = vld [vmem:[%s2309_s26 + $0x2b4] sm:$0xf0]  ;;  %v2100_v58 = vld [vmem:[%s2309_s26 + $0x25c] sm:$0xf] }
  0x76   : > { %1154 = vmatpush.bf16.msra.mxu0 %v1586_v12  ;;  %1180 = vmatpush.bf16.msra.mxu2 %v1590_v14  ;;  %v1694_v12 = vor.u32 %v2068_v6, %v1691_v7  ;;  %v2064_v14 = vld [vmem:[%s2309_s26 + $0x134] sm:$0xf0]  ;;  %v1819_v59 = vld [vmem:[%s2309_s26 + $0x278] sm:$0xf0] }
  0x77   : > { %v1817_v53 = vld [vmem:[%s2309_s26 + $0x258] sm:$0xf]  ;;  %v1822_v2 = vor.u32 %v2100_v58, %v1819_v59  ;;  %v1531_v5 = vld [vmem:[%s2309_s26 + $0x38] sm:$0xf0] }
  0x78   : > { %1167 = vmatpush.bf16.msra.mxu1 %v1842_v13  ;;  %1193 = vmatpush.bf16.msra.mxu3 %v1846_v18  ;;  %v1657_v13 = vld [vmem:[%s2309_s26 + $0x118] sm:$0xf]  ;;  %v2060_v18 = vld [vmem:[%s2309_s26 + $0x11c] sm:$0xf] }
  0x79   : > { %v1658_v22 = vor.u32 %v2064_v14, %v1657_v13  ;;  %v2104_v55 = vld [vmem:[%s2309_s26 + $0x274] sm:$0xf0]  ;;  %v2092_v6 = vld [vmem:[%s2309_s26 + $0x21c] sm:$0xf] }
  0x7a   : > { %1155 = vmatpush.bf16.msra.mxu0 %v1554_v25  ;;  %1181 = vmatpush.bf16.msra.mxu2 %v1558_v30  ;;  %v1662_v25 = vor.u32 %v2060_v18, %v1659_v19  ;;  %v1918_v30 = vor.u32 %v2124_v20, %v1915_v21  ;;  %v1818_v61 = vor.u32 %v2104_v55, %v1817_v53  ;;  %v1785_v1 = vld [vmem:[%s2309_s26 + $0x218] sm:$0xf]  ;;  %v1787_v7 = vld [vmem:[%s2309_s26 + $0x238] sm:$0xf0] }
  0x7b   : > { %v2096_v3 = vld [vmem:[%s2309_s26 + $0x234] sm:$0xf0] }
  0x7c   : > { %1168 = vmatpush.bf16.msra.mxu1 %v1810_v29  ;;  %1194 = vmatpush.bf16.msra.mxu3 %v1814_v34  ;;  %v1881_v29 = vld [vmem:[%s2309_s26 + $0x2d8] sm:$0xf]  ;;  %v2116_v34 = vld [vmem:[%s2309_s26 + $0x2dc] sm:$0xf]  ;;  %v1786_v9 = vor.u32 %v2096_v3, %v1785_v1 }
  0x7d   : > { %v1882_v37 = vor.u32 %v2120_v31, %v1881_v29  ;;  %v1886_v42 = vor.u32 %v2116_v34, %v1883_v35 }
  0x7e   : > { %1156 = vmatpush.bf16.msra.mxu0 %v1522_v41  ;;  %1182 = vmatpush.bf16.msra.mxu2 %v1526_v46  ;;  %v1849_v41 = vld [vmem:[%s2309_s26 + $0x298] sm:$0xf]  ;;  %v2108_v46 = vld [vmem:[%s2309_s26 + $0x29c] sm:$0xf] }
  0x7f   : > { %v1854_v54 = vor.u32 %v2108_v46, %v1851_v47 }
  0x80   : > { %1169 = vmatpush.bf16.msra.mxu1 %v1778_v45  ;;  %1195 = vmatpush.bf16.msra.mxu3 %v1782_v49  ;;  %v1595_v45 = vld [vmem:[%s2309_s26 + $0xb8] sm:$0xf0]  ;;  %v1850_v49 = vor.u32 %v2112_v43, %v1849_v41 }
  0x81   : > { %1183 = vmatmul.bf16.vlgmr.msra.gmra.mxu2 %v2428_v23  ;;  %1157 = vmatmul.bf16.vlgmr.msra.gmra.mxu0 %v2428_v23 }
  0x82   : > { %1201 = vmatpush.bf16.msrb.mxu0 %v1754_v50  ;;  %1227 = vmatpush.bf16.msrb.mxu2 %v1758_v52  ;;  %v1598_v50 = vor.u32 %v2044_v44, %v1595_v45  ;;  %v2040_v52 = vld [vmem:[%s2309_s26 + $0x74] sm:$0xf0] }
  0x83   : > { %1196 = vmatmul.bf16.vlgmr.msra.gmra.mxu3 %v2433_v27  ;;  %1170 = vmatmul.bf16.vlgmr.msra.gmra.mxu1 %v2433_v27 }
  0x84   : > { %1214 = vmatpush.bf16.msrb.mxu1 %v2010_v51  ;;  %1240 = vmatpush.bf16.msrb.mxu3 %v2014_v56  ;;  %v1561_v51 = vld [vmem:[%s2309_s26 + $0x58] sm:$0xf]  ;;  %v2036_v56 = vld [vmem:[%s2309_s26 + $0x5c] sm:$0xf] }
  0x85   : > { %v1562_v60 = vor.u32 %v2040_v52, %v1561_v51 }
  0x86   : > { %1202 = vmatpush.bf16.msrb.mxu0 %v1722_v62  ;;  %1228 = vmatpush.bf16.msrb.mxu2 %v1726_v0  ;;  %v1566_v62 = vor.u32 %v2036_v56, %v1563_v57  ;;  %v2032_v0 = vld [vmem:[%s2309_s26 + $0x34] sm:$0xf0] }
  0x88   : > { %1215 = vmatpush.bf16.msrb.mxu1 %v1978_v63  ;;  %1241 = vmatpush.bf16.msrb.mxu3 %v1982_v4  ;;  %v1529_v63 = vld [vmem:[%s2309_s26 + $0x18] sm:$0xf]  ;;  %v2028_v4 = vld [vmem:[%s2309_s26 + $0x1c] sm:$0xf] }
  0x89   : > { %v1530_v8 = vor.u32 %v2032_v0, %v1529_v63 }
  0x8a   : > { %1203 = vmatpush.bf16.msrb.mxu0 %v1690_v10  ;;  %1229 = vmatpush.bf16.msrb.mxu2 %v1694_v12  ;;  %v1534_v10 = vor.u32 %v2028_v4, %v1531_v5 }
  0x8c   : > { %1216 = vmatpush.bf16.msrb.mxu1 %v1946_v11  ;;  %1242 = vmatpush.bf16.msrb.mxu3 %v1950_v16  ;;  %v1790_v11 = vor.u32 %v2092_v6, %v1787_v7 }
  0x8e   : > { %1204 = vmatpush.bf16.msrb.mxu0 %v1658_v22  ;;  %1230 = vmatpush.bf16.msrb.mxu2 %v1662_v25 }
  0x90   : > { %1217 = vmatpush.bf16.msrb.mxu1 %v1914_v24  ;;  %1243 = vmatpush.bf16.msrb.mxu3 %v1918_v30 }
  0x92   : > { %1205 = vmatpush.bf16.msrb.mxu0 %v1626_v36  ;;  %1231 = vmatpush.bf16.msrb.mxu2 %v1630_v38 }
  0x94   : > { %1218 = vmatpush.bf16.msrb.mxu1 %v1882_v37  ;;  %1244 = vmatpush.bf16.msrb.mxu3 %v1886_v42  ;;  %v267_v37 = vld [vmem:[%s2314_s4] sm:$0xff] }
  0x96   : > { %1206 = vmatpush.bf16.msrb.mxu0 %v1594_v48  ;;  %1232 = vmatpush.bf16.msrb.mxu2 %v1598_v50 }
  0x98   : > { %1219 = vmatpush.bf16.msrb.mxu1 %v1850_v49  ;;  %1245 = vmatpush.bf16.msrb.mxu3 %v1854_v54 }
  0x9a   : > { %1207 = vmatpush.bf16.msrb.mxu0 %v1562_v60  ;;  %1233 = vmatpush.bf16.msrb.mxu2 %v1566_v62 }
  0x9c   : > { %1220 = vmatpush.bf16.msrb.mxu1 %v1818_v61  ;;  %1246 = vmatpush.bf16.msrb.mxu3 %v1822_v2 }
  0x9e   : > { %1208 = vmatpush.bf16.msrb.mxu0 %v1530_v8  ;;  %1234 = vmatpush.bf16.msrb.mxu2 %v1534_v10 }
  0xa0   : > { %1221 = vmatpush.bf16.msrb.mxu1 %v1786_v9  ;;  %1247 = vmatpush.bf16.msrb.mxu3 %v1790_v11  ;;  %v268_v11 = vld [vmem:[%s2314_s4 + $0x8] sm:$0xff] }
  0xa1   : > { %1209 = vmatmul.bf16.vlgmr.msrb.gmra.mxu0 %v2428_v23  ;;  %1235 = vmatmul.bf16.vlgmr.msrb.gmra.mxu2 %v2428_v23 }
  0xa3   : > { %1222 = vmatmul.bf16.vlgmr.msrb.gmra.mxu1 %v2433_v27  ;;  %1248 = vmatmul.bf16.vlgmr.msrb.gmra.mxu3 %v2433_v27 }
  0xc6   : > { %v1054_v12 = vpop.f32.mrf.mxu0 }
  0xc8   : > { %v1067_v13 = vpop.f32.mrf.mxu1 }
  0xc9   : > { %v1068_v33 = vadd.f32 %v1067_v13, %v1054_v12 }
  0xcc   : > { %v1080_v14 = vpop.f32.mrf.mxu2 }
  0xce   : > { %v1093_v15 = vpop.f32.mrf.mxu3  ;;  %v1056_v16 = vpop.f32.mrf.mxu0 }
  0xcf   : > { %v1094_v30 = vadd.f32 %v1093_v15, %v1080_v14 }
  0xd0   : > { %v1069_v17 = vpop.f32.mrf.mxu1 }
  0xd1   : > { %v1261_v34 = vrot.slane %v1094_v30, 6 }
  0xd3   : > { %v1268_v36 = vsel %vm1267_vm1, %v1068_v33, %v1261_v34 }
  0xd4   : > { %v1082_v18 = vpop.f32.mrf.mxu2 }
  0xd6   : > { %v1095_v19 = vpop.f32.mrf.mxu3 }
  0xde   : > { %v1106_v20 = vpop.f32.mrf.mxu0 }
  0xe0   : > { %v1119_v21 = vpop.f32.mrf.mxu1 }
  0xe1   : > { %v1120_v28 = vadd.f32 %v1119_v21, %v1106_v20 }
  0xe3   : > { %v1262_v31 = vrot.slane %v1120_v28, 4 }
  0xe4   : > { %v1132_v22 = vpop.f32.mrf.mxu2 }
  0xe6   : > { %v1145_v24 = vpop.f32.mrf.mxu3  ;;  %v1108_v25 = vpop.f32.mrf.mxu0 }
  0xe7   : > { %v1146_v29 = vadd.f32 %v1145_v24, %v1132_v22 }
  0xe8   : > { %v1121_v26 = vpop.f32.mrf.mxu1 }
  0xe9   : > { %v1263_v32 = vrot.slane %v1146_v29, 2 }
  0xeb   : > { %v1270_v35 = vsel %vm1269_vm0, %v1262_v31, %v1263_v32  ;;  %v266_v31 = vld [vmem:[%s265_s21] sm:$0xf] }
  0xec   : > { %v1134_v23 = vpop.f32.mrf.mxu2  ;;  %v1272_v38 = vsel %vm1271_vm2, %v1268_v36, %v1270_v35 }
  0xed   : > { %v1278_v39 = vadd.f32 %v1272_v38, %v267_v37 }
  0xee   : > { %v1147_v27 = vpop.f32.mrf.mxu3 }
  0xef   : > { %v1300_v40 = vrot.slane %v1278_v39, 4  ;;  %v2015_v45 = vmul.f32 -1.442695, %v1278_v39 }
  0xf1   : > { %v2016_v43 = vmul.f32 -1.442695, %v1300_v40 }
  0xf3   : > { %2194 = vpow2.f32 %v2016_v43 }
  0xf4   : > { %2196 = vpow2.f32 %v2015_v45 }
  0xf9   : > { %v2195_v50 = vpop.eup %2194 }
  0xfa   : > { %v2197_v52 = vpop.eup %2196  ;;  %v1305_v53 = vadd.f32 1.0, %v2195_v50 }
  0xfb   : > { %v1283_v54 = vadd.f32 1.0, %v2197_v52 }
  0xfc   : > { %2198 = vrcp.f32 %v1305_v53  ;;  %v1317_v17 = vand.u32 2147483648, %v1305_v53  ;;  %vm1311_vm4 = vweird.f32 %v1305_v53  ;;  %v1315_v21 = vand.u32 2147483647, %v1305_v53 }
  0xfd   : > { %2200 = vrcp.f32 %v1283_v54  ;;  %v1295_v25 = vand.u32 2147483648, %v1283_v54  ;;  %vm1289_vm7 = vweird.f32 %v1283_v54  ;;  %v1293_v28 = vand.u32 2147483647, %v1283_v54 }
  0xfe   : > { %v1158_v41 = vpop.f32.mrf.mxu0  ;;  %v1318_v23 = vor.u32 1.1754944e-38, %v1317_v17  ;;  %vm1316_vm9 = vcmp.eq.f32.partialorder %v1315_v21, 8.507059e+37 }
  0xff   : > { %v1296_v32 = vor.u32 1.1754944e-38, %v1295_v25  ;;  %vm1294_vm10 = vcmp.eq.f32.partialorder %v1293_v28, 8.507059e+37 }
 0x100   : > { %v1171_v42 = vpop.f32.mrf.mxu1 }
 0x101   : > { %v1172_v4 = vadd.f32 %v1171_v42, %v1158_v41 }
 0x102   : > { %v2199_v55 = vpop.eup %2198 }
 0x103   : > { %v2201_v57 = vpop.eup %2200  ;;  %v1307_v59 = vmul.f32 %v2199_v55, %v1305_v53  ;;  %vm1312_vm3 = vweird.f32 %v2199_v55 }
 0x104   : > { %v1184_v44 = vpop.f32.mrf.mxu2  ;;  %v1285_v60 = vmul.f32 %v2201_v57, %v1283_v54  ;;  %vm1290_vm5 = vweird.f32 %v2201_v57  ;;  %vm2613_vm6 = vmor %vm1311_vm4, %vm1312_vm3 }
 0x105   : > { %v1308_v63 = vsub.f32 1.0, %v1307_v59  ;;  %vm1291_vm8 = vmor %vm1289_vm7, %vm1290_vm5 }
 0x106   : > { %v1197_v46 = vpop.f32.mrf.mxu3  ;;  %v1160_v47 = vpop.f32.mrf.mxu0  ;;  %v1286_v1 = vsub.f32 1.0, %v1285_v60 }
 0x107   : > { %v1198_v61 = vadd.f32 %v1197_v46, %v1184_v44  ;;  %v1309_v9 = vmul.f32 %v2199_v55, %v1308_v63 }
 0x108   : > { %v1173_v48 = vpop.f32.mrf.mxu1  ;;  %v1287_v12 = vmul.f32 %v2201_v57, %v1286_v1 }
 0x109   : > { %v1264_v5 = vrot.slane %v1198_v61, 6  ;;  %v1310_v16 = vadd.f32 %v2199_v55, %v1309_v9 }
 0x10a   : > { %v1288_v20 = vadd.f32 %v2201_v57, %v1287_v12 }
 0x10b   : > { %v1273_v13 = vsel %vm1267_vm1, %v1172_v4, %v1264_v5  ;;  %v1314_v29 = vsel %vm2613_vm6, %v2199_v55, %v1310_v16 }
 0x10c   : > { %v1186_v49 = vpop.f32.mrf.mxu2  ;;  %v1292_v27 = vsel %vm1291_vm8, %v2201_v57, %v1288_v20  ;;  %v1319_v33 = vsel %vm1316_vm9, %v1318_v23, %v1314_v29 }
 0x10d   : > { %v1297_v35 = vsel %vm1294_vm10, %v1296_v32, %v1292_v27  ;;  %v1344_v36 = vmul.f32 %v1319_v33, %v266_v31 }
 0x10e   : > { %v1199_v51 = vpop.f32.mrf.mxu3 }
 0x11e   : > { %v1210_v56 = vpop.f32.mrf.mxu0 }
 0x120   : > { %v1223_v58 = vpop.f32.mrf.mxu1 }
 0x121   : > { %v1224_v62 = vadd.f32 %v1223_v58, %v1210_v56 }
 0x123   : > { %v1265_v6 = vrot.slane %v1224_v62, 4 }
 0x124   : > { %v1236_v0 = vpop.f32.mrf.mxu2 }
 0x126   : > { %v1249_v2 = vpop.f32.mrf.mxu3  ;;  %v1212_v3 = vpop.f32.mrf.mxu0 }
 0x127   : > { %v1250_v7 = vadd.f32 %v1249_v2, %v1236_v0 }
 0x128   : > { %v1225_v8 = vpop.f32.mrf.mxu1 }
 0x129   : > { %v1266_v10 = vrot.slane %v1250_v7, 2 }
 0x12b   : > { %v1274_v14 = vsel %vm1269_vm0, %v1265_v6, %v1266_v10 }
 0x12c   : > { %v1275_v15 = vsel %vm1271_vm2, %v1273_v13, %v1274_v14  ;;  %v1238_v19 = vpop.f32.mrf.mxu2 }
 0x12d   : > { %v1279_v18 = vadd.f32 %v1275_v15, %v268_v11 }
 0x12e   : > { %v1251_v22 = vpop.f32.mrf.mxu3 }
 0x12f   : > { %2202 = vtanh.f32 %v1279_v18  ;;  %v1323_v26 = vrot.slane %v1279_v18, 4 }
 0x131   : > { %v2017_v30 = vmul.f32 -1.442695, %v1323_v26 }
 0x133   : > { %2204 = vpow2.f32 %v2017_v30 }
 0x135   : > { %v2203_v34 = vpop.eup %2202 }
 0x136   : > { %v1345_v37 = vmul.f32 %v2203_v34, %v1297_v35 }
 0x138   : > { %v1346_v38 = vadd.f32 %v1345_v37, %v1344_v36 }
 0x139   : > { %v2205_v39 = vpop.eup %2204 }
 0x13a   : > { %v1328_v40 = vadd.f32 1.0, %v2205_v39  ;;  %1349 = vst [vmem:[%s265_s21] sm:$0xf] %v1346_v38 }
 0x13c   : > { %2206 = vrcp.f32 %v1328_v40  ;;  %v1340_v44 = vand.u32 2147483648, %v1328_v40  ;;  %v1338_v46 = vand.u32 2147483647, %v1328_v40  ;;  %vm1334_vm12 = vweird.f32 %v1328_v40 }
 0x13d   : > { %2208 = vtanh.f32 %v1346_v38 }
 0x13e   : > { %v1341_v48 = vor.u32 1.1754944e-38, %v1340_v44  ;;  %vm1339_vm14 = vcmp.eq.f32.partialorder %v1338_v46, 8.507059e+37 }
 0x142   : > { %v2207_v41 = vpop.eup %2206 }
 0x143   : > { %v1330_v42 = vmul.f32 %v2207_v41, %v1328_v40  ;;  %vm1335_vm11 = vweird.f32 %v2207_v41  ;;  %v2209_v50 = vpop.eup %2208 }
 0x144   : > { %vm1336_vm13 = vmor %vm1334_vm12, %vm1335_vm11 }
 0x145   : > { %v1331_v43 = vsub.f32 1.0, %v1330_v42 }
 0x147   : > { %v1332_v45 = vmul.f32 %v2207_v41, %v1331_v43 }
 0x149   : > { %v1333_v47 = vadd.f32 %v2207_v41, %v1332_v45 }
 0x14b   : > { %v1337_v49 = vsel %vm1336_vm13, %v2207_v41, %v1333_v47 }
 0x14c   : > { %v1342_v51 = vsel %vm1339_vm14, %v1341_v48, %v1337_v49 }
 0x14d   : > { %v1348_v52 = vmul.f32 %v2209_v50, %v1342_v51 }
 0x14f   : > { %1350 = vst [vmem:[%s2410_s20] sm:$0xf] %v1348_v52 }
 0x150   : > { %1351 = vst [vmem:[%s2319_s17] sm:$0xf] %v1348_v52 }
 0x151 PF: > { %s12_s13 = sadd.s32 1, %s2248_s13   ;;  %s2643_s9 = smov %s2240_s11 }
 0x152   : > { %p9_p9 = scmp.ge.s32.totalorder %s12_s13, 18   ;;  %s2644_s10 = smov %s2244_s12 }
 0x153   : > { %s2645_s11 = smov %s2648_s14  ;;  %s2646_s12 = smov %s2652_s15 }
 0x154   :  { %11 = sbr.rel (!%p9_p9) target bundleno = 3 (0x3), region = 69 }

// kernel: deepfake_detector_forward.6
= control target key start
LH: loop header
LB: loop body
LE: loop exit
PB: predicated region body
PF: predicated region fallthrough
CT: control target
= control target key end

     0   :  { %s3647_s12 = smov 0   ;;  %s4282_s0 = inlined_call_operand.vmem [shape: bf16[16,512], index: 0, kind: input, shape index: {}]   ;;  %s4283_s1 = inlined_call_operand.vmem [shape: bf16[2,512,1024], index: 1, kind: input, shape index: {}]   ;;  %s4284_s2 = inlined_call_operand.vmem [shape: f32[2,1,1024], index: 2, kind: input, shape index: {}]   ;;  %s4285_s3 = inlined_call_operand.vmem [shape: f32[2,16,1024], index: 3, kind: output, shape index: {}]  }
   0x1 LB: > { %s2297_s13 = sadd.s32 4294967295, %s3625_s12   ;;  %p2301_p0 = scmp.ge.s32.totalorder %s3625_s12, 1  ;;  %s3625_s12 = sphi %s3647_s12, %s13_s12  }
   0x2   : > { %p146_p1 = scmp.lt.s32.totalorder %s3625_s12, 3 }
   0x4   : > { %p147_p2 = pnand %p2301_p0, %p146_p1 }
   0x5   : > { %p174_p3 = scmp.lt.s32.totalorder (!%p147_p2), %s2297_s13, 1 }
   0x6   : > { %150 = sbr.rel (%p147_p2) target bundleno = 451 (0x1c3), region = 32 }
   0xb   : > { %s4287_s13 = smov (!%p174_p3, %s2297_s13), 1 }
   0xc   : > { %s3349_s14 = sshll.u32 %s4287_s13, 11  ;;  %s2304_s7 = sshll.u32 %s4287_s13, 3 }
   0xd   : > { %s3661_s17 = scalar_lea.vmem %s4283_s1, %s3349_s14  ;;  %s182_s10 = scalar_lea.vmem %s4284_s2, %s2304_s7 }
   0xe   : > { %v2549_v0 = vld [vmem:[%s3661_s17 + $0x1c0] sm:$0xf]  ;;  %s3350_s11 = sshll.u32 %s4287_s13, 7 }
   0xf   : > { %v3415_v1 = vld [vmem:[%s3661_s17 + $0x1dc] sm:$0xf0]  ;;  %s4112_s15 = scalar_lea.vmem %s4285_s3, %s3350_s11 }
  0x10   : > { %v2805_v2 = vld [vmem:[%s3661_s17 + $0x3c0] sm:$0xf]  ;;  %v2550_v3 = vor.u32 %v3415_v1, %v2549_v0 }
  0x11   : > { %v3479_v4 = vld [vmem:[%s3661_s17 + $0x3dc] sm:$0xf0] }
  0x12   : > { %v3061_v5 = vld [vmem:[%s3661_s17 + $0x5c0] sm:$0xf]  ;;  %v2806_v7 = vor.u32 %v3479_v4, %v2805_v2  ;;  %1766 = vmatpush.bf16.msra.mxu0 %v2550_v3 }
  0x13   : > { %v3543_v6 = vld [vmem:[%s3661_s17 + $0x5dc] sm:$0xf0] }
  0x14   : > { %v3062_v8 = vor.u32 %v3543_v6, %v3061_v5  ;;  %v3317_v9 = vld [vmem:[%s3661_s17 + $0x7c0] sm:$0xf]  ;;  %1780 = vmatpush.bf16.msra.mxu1 %v2806_v7 }
  0x15   : > { %v3607_v10 = vld [vmem:[%s3661_s17 + $0x7dc] sm:$0xf0] }
  0x16   : > { %v2517_v11 = vld [vmem:[%s3661_s17 + $0x180] sm:$0xf]  ;;  %v3318_v12 = vor.u32 %v3607_v10, %v3317_v9  ;;  %1794 = vmatpush.bf16.msra.mxu2 %v3062_v8 }
  0x17   : > { %v3407_v13 = vld [vmem:[%s3661_s17 + $0x19c] sm:$0xf0] }
  0x18   : > { %v2773_v14 = vld [vmem:[%s3661_s17 + $0x380] sm:$0xf]  ;;  %v2518_v16 = vor.u32 %v3407_v13, %v2517_v11  ;;  %1808 = vmatpush.bf16.msra.mxu3 %v3318_v12 }
  0x19   : > { %v3471_v15 = vld [vmem:[%s3661_s17 + $0x39c] sm:$0xf0] }
  0x1a   : > { %v2774_v17 = vor.u32 %v3471_v15, %v2773_v14  ;;  %v3029_v18 = vld [vmem:[%s3661_s17 + $0x580] sm:$0xf]  ;;  %1767 = vmatpush.bf16.msra.mxu0 %v2518_v16 }
  0x1b   : > { %v3535_v19 = vld [vmem:[%s3661_s17 + $0x59c] sm:$0xf0] }
  0x1c   : > { %v3285_v20 = vld [vmem:[%s3661_s17 + $0x780] sm:$0xf]  ;;  %v3030_v21 = vor.u32 %v3535_v19, %v3029_v18  ;;  %1781 = vmatpush.bf16.msra.mxu1 %v2774_v17 }
  0x1d   : > { %v3599_v22 = vld [vmem:[%s3661_s17 + $0x79c] sm:$0xf0] }
  0x1e   : > { %v2485_v23 = vld [vmem:[%s3661_s17 + $0x140] sm:$0xf]  ;;  %v3286_v25 = vor.u32 %v3599_v22, %v3285_v20  ;;  %1795 = vmatpush.bf16.msra.mxu2 %v3030_v21 }
  0x1f   : > { %v3399_v24 = vld [vmem:[%s3661_s17 + $0x15c] sm:$0xf0] }
  0x20   : > { %v2741_v26 = vld [vmem:[%s3661_s17 + $0x340] sm:$0xf]  ;;  %v2486_v29 = vor.u32 %v3399_v24, %v2485_v23  ;;  %1809 = vmatpush.bf16.msra.mxu3 %v3286_v25 }
  0x21   : > { %v3463_v27 = vld [vmem:[%s3661_s17 + $0x35c] sm:$0xf0] }
  0x22   : > { %v2997_v28 = vld [vmem:[%s3661_s17 + $0x540] sm:$0xf]  ;;  %v2742_v33 = vor.u32 %v3463_v27, %v2741_v26  ;;  %1768 = vmatpush.bf16.msra.mxu0 %v2486_v29  ;;  %v2551_v29 = vld [vmem:[%s3661_s17 + $0x1e0] sm:$0xf0] }
  0x23   : > { %v3527_v30 = vld [vmem:[%s3661_s17 + $0x55c] sm:$0xf0] }
  0x24   : > { %v3253_v31 = vld [vmem:[%s3661_s17 + $0x740] sm:$0xf]  ;;  %v2998_v34 = vor.u32 %v3527_v30, %v2997_v28  ;;  %1782 = vmatpush.bf16.msra.mxu1 %v2742_v33  ;;  %v3411_v28 = vld [vmem:[%s3661_s17 + $0x1c4] sm:$0xf] }
  0x25   : > { %v3591_v32 = vld [vmem:[%s3661_s17 + $0x75c] sm:$0xf0]  ;;  %v3475_v30 = vld [vmem:[%s3661_s17 + $0x3c4] sm:$0xf] }
  0x26   : > { %v2453_v35 = vld [vmem:[%s3661_s17 + $0x100] sm:$0xf]  ;;  %v3254_v38 = vor.u32 %v3591_v32, %v3253_v31  ;;  %1796 = vmatpush.bf16.msra.mxu2 %v2998_v34  ;;  %v2807_v32 = vld [vmem:[%s3661_s17 + $0x3e0] sm:$0xf0] }
  0x27   : > { %v3391_v36 = vld [vmem:[%s3661_s17 + $0x11c] sm:$0xf0]  ;;  %v3539_v33 = vld [vmem:[%s3661_s17 + $0x5c4] sm:$0xf] }
  0x28   : > { %v2709_v37 = vld [vmem:[%s3661_s17 + $0x300] sm:$0xf]  ;;  %v2454_v44 = vor.u32 %v3391_v36, %v2453_v35  ;;  %1810 = vmatpush.bf16.msra.mxu3 %v3254_v38  ;;  %v3063_v34 = vld [vmem:[%s3661_s17 + $0x5e0] sm:$0xf0] }
  0x29   : > { %v3455_v39 = vld [vmem:[%s3661_s17 + $0x31c] sm:$0xf0]  ;;  %v3319_v38 = vld [vmem:[%s3661_s17 + $0x7e0] sm:$0xf0] }
  0x2a   : > { %v2965_v40 = vld [vmem:[%s3661_s17 + $0x500] sm:$0xf]  ;;  %v2710_v45 = vor.u32 %v3455_v39, %v2709_v37  ;;  %1769 = vmatpush.bf16.msra.mxu0 %v2454_v44  ;;  %v3603_v37 = vld [vmem:[%s3661_s17 + $0x7c4] sm:$0xf] }
  0x2b   : > { %v3519_v41 = vld [vmem:[%s3661_s17 + $0x51c] sm:$0xf0]  ;;  %v2519_v44 = vld [vmem:[%s3661_s17 + $0x1a0] sm:$0xf0] }
  0x2c   : > { %v3221_v42 = vld [vmem:[%s3661_s17 + $0x700] sm:$0xf]  ;;  %v2966_v46 = vor.u32 %v3519_v41, %v2965_v40  ;;  %1783 = vmatpush.bf16.msra.mxu1 %v2710_v45  ;;  %v2554_v40 = vor.u32 %v3411_v28, %v2551_v29  ;;  %v2810_v41 = vor.u32 %v3475_v30, %v2807_v32  ;;  %v3467_v45 = vld [vmem:[%s3661_s17 + $0x384] sm:$0xf]  ;;  %v2311_v28 = vld [vmem:[%s4282_s0 + $0x10] sm:$0xf0] }
  0x2d   : > { %v3583_v43 = vld [vmem:[%s3661_s17 + $0x71c] sm:$0xf0]  ;;  %v2679_v30 = vld [vmem:[%s3661_s17 + $0x2e0] sm:$0xf0] }
  0x2e   : > { %v2421_v47 = vld [vmem:[%s3661_s17 + $0xc0] sm:$0xf]  ;;  %v3222_v50 = vor.u32 %v3583_v43, %v3221_v42  ;;  %1797 = vmatpush.bf16.msra.mxu2 %v2966_v46  ;;  %v3066_v42 = vor.u32 %v3539_v33, %v3063_v34  ;;  %v3403_v43 = vld [vmem:[%s3661_s17 + $0x184] sm:$0xf]  ;;  %v3322_v46 = vor.u32 %v3603_v37, %v3319_v38 }
  0x2f   : > { %v3383_v48 = vld [vmem:[%s3661_s17 + $0xdc] sm:$0xf0]  ;;  %v2935_v32 = vld [vmem:[%s3661_s17 + $0x4e0] sm:$0xf0] }
  0x30   : > { %v2677_v49 = vld [vmem:[%s3661_s17 + $0x2c0] sm:$0xf]  ;;  %v2422_v56 = vor.u32 %v3383_v48, %v2421_v47  ;;  %1811 = vmatpush.bf16.msra.mxu3 %v3222_v50  ;;  %v2775_v47 = vld [vmem:[%s3661_s17 + $0x3a0] sm:$0xf0] }
  0x31   : > { %v3447_v51 = vld [vmem:[%s3661_s17 + $0x2dc] sm:$0xf0]  ;;  %v3531_v48 = vld [vmem:[%s3661_s17 + $0x584] sm:$0xf] }
  0x32   : > { %v2933_v52 = vld [vmem:[%s3661_s17 + $0x4c0] sm:$0xf]  ;;  %v2678_v57 = vor.u32 %v3447_v51, %v2677_v49  ;;  %1770 = vmatpush.bf16.msra.mxu0 %v2422_v56  ;;  %v3031_v49 = vld [vmem:[%s3661_s17 + $0x5a0] sm:$0xf0] }
  0x33   : > { %v3511_v53 = vld [vmem:[%s3661_s17 + $0x4dc] sm:$0xf0]  ;;  %v3595_v50 = vld [vmem:[%s3661_s17 + $0x784] sm:$0xf] }
  0x34   : > { %v3189_v54 = vld [vmem:[%s3661_s17 + $0x6c0] sm:$0xf]  ;;  %v2934_v58 = vor.u32 %v3511_v53, %v2933_v52  ;;  %1784 = vmatpush.bf16.msra.mxu1 %v2678_v57  ;;  %v3287_v51 = vld [vmem:[%s3661_s17 + $0x7a0] sm:$0xf0]  ;;  %v2522_v52 = vor.u32 %v3403_v43, %v2519_v44 }
  0x35   : > { %v3575_v55 = vld [vmem:[%s3661_s17 + $0x6dc] sm:$0xf0]  ;;  %v3395_v53 = vld [vmem:[%s3661_s17 + $0x144] sm:$0xf] }
  0x36   : > { %v2389_v59 = vld [vmem:[%s3661_s17 + $0x80] sm:$0xf]  ;;  %v3190_v62 = vor.u32 %v3575_v55, %v3189_v54  ;;  %1798 = vmatpush.bf16.msra.mxu2 %v2934_v58  ;;  %v2778_v54 = vor.u32 %v3467_v45, %v2775_v47  ;;  %v3034_v55 = vor.u32 %v3531_v48, %v3031_v49  ;;  %v2487_v56 = vld [vmem:[%s3661_s17 + $0x160] sm:$0xf0] }
  0x37   : > { %v3375_v60 = vld [vmem:[%s3661_s17 + $0x9c] sm:$0xf0]  ;;  %v3459_v57 = vld [vmem:[%s3661_s17 + $0x344] sm:$0xf] }
  0x38   : > { %v2645_v61 = vld [vmem:[%s3661_s17 + $0x280] sm:$0xf]  ;;  %v2390_v4 = vor.u32 %v3375_v60, %v2389_v59  ;;  %1812 = vmatpush.bf16.msra.mxu3 %v3190_v62  ;;  %v2743_v58 = vld [vmem:[%s3661_s17 + $0x360] sm:$0xf0]  ;;  %v3290_v59 = vor.u32 %v3595_v50, %v3287_v51 }
  0x39   : > { %v3439_v63 = vld [vmem:[%s3661_s17 + $0x29c] sm:$0xf0]  ;;  %v3523_v60 = vld [vmem:[%s3661_s17 + $0x544] sm:$0xf] }
  0x3a   : > { %v2901_v0 = vld [vmem:[%s3661_s17 + $0x480] sm:$0xf]  ;;  %v2646_v5 = vor.u32 %v3439_v63, %v2645_v61  ;;  %1771 = vmatpush.bf16.msra.mxu0 %v2390_v4  ;;  %v2999_v61 = vld [vmem:[%s3661_s17 + $0x560] sm:$0xf0] }
  0x3b   : > { %v3503_v1 = vld [vmem:[%s3661_s17 + $0x49c] sm:$0xf0]  ;;  %v3587_v62 = vld [vmem:[%s3661_s17 + $0x744] sm:$0xf] }
  0x3c   : > { %v3157_v2 = vld [vmem:[%s3661_s17 + $0x680] sm:$0xf]  ;;  %v2902_v6 = vor.u32 %v3503_v1, %v2901_v0  ;;  %1785 = vmatpush.bf16.msra.mxu1 %v2646_v5  ;;  %v3255_v63 = vld [vmem:[%s3661_s17 + $0x760] sm:$0xf0]  ;;  %v2317_v5 = vld [vmem:[%s4282_s0 + $0x8] sm:$0xf] }
  0x3d   : > { %v3567_v3 = vld [vmem:[%s3661_s17 + $0x69c] sm:$0xf0]  ;;  %v3387_v0 = vld [vmem:[%s3661_s17 + $0x104] sm:$0xf] }
  0x3e   : > { %v2357_v7 = vld [vmem:[%s3661_s17 + $0x40] sm:$0xf]  ;;  %v3158_v10 = vor.u32 %v3567_v3, %v3157_v2  ;;  %1799 = vmatpush.bf16.msra.mxu2 %v2902_v6  ;;  %v2455_v1 = vld [vmem:[%s3661_s17 + $0x120] sm:$0xf0]  ;;  %v2490_v2 = vor.u32 %v3395_v53, %v2487_v56  ;;  %v3354_v6 = vld [vmem:[%s4282_s0 + $0x14] sm:$0xf0] }
  0x3f   : > { %v3367_v8 = vld [vmem:[%s3661_s17 + $0x5c] sm:$0xf0]  ;;  %v3451_v3 = vld [vmem:[%s3661_s17 + $0x304] sm:$0xf] }
  0x40   : > { %v2613_v9 = vld [vmem:[%s3661_s17 + $0x240] sm:$0xf]  ;;  %v2358_v16 = vor.u32 %v3367_v8, %v2357_v7  ;;  %1813 = vmatpush.bf16.msra.mxu3 %v3158_v10  ;;  %v2711_v4 = vld [vmem:[%s3661_s17 + $0x320] sm:$0xf0]  ;;  %v2746_v7 = vor.u32 %v3459_v57, %v2743_v58  ;;  %v3002_v8 = vor.u32 %v3523_v60, %v2999_v61 }
  0x41   : > { %v3431_v11 = vld [vmem:[%s3661_s17 + $0x25c] sm:$0xf0]  ;;  %v3571_v34 = vld [vmem:[%s3661_s17 + $0x6c4] sm:$0xf] }
  0x42   : > { %v2869_v12 = vld [vmem:[%s3661_s17 + $0x440] sm:$0xf]  ;;  %v2614_v19 = vor.u32 %v3431_v11, %v2613_v9  ;;  %1772 = vmatpush.bf16.msra.mxu0 %v2358_v16  ;;  %v3761_v9 = vor.u32 %v3354_v6, %v2317_v5  ;;  %v3353_v11 = vld [vmem:[%s4282_s0 + $0xc] sm:$0xf0]  ;;  %v2647_v43 = vld [vmem:[%s3661_s17 + $0x2a0] sm:$0xf0] }
  0x43   : > { %v3495_v13 = vld [vmem:[%s3661_s17 + $0x45c] sm:$0xf0]  ;;  %v3499_v44 = vld [vmem:[%s3661_s17 + $0x484] sm:$0xf] }
  0x44   : > { %v3125_v14 = vld [vmem:[%s3661_s17 + $0x640] sm:$0xf]  ;;  %v2870_v20 = vor.u32 %v3495_v13, %v2869_v12  ;;  %1786 = vmatpush.bf16.msra.mxu1 %v2614_v19  ;;  %v3352_v12 = vld [vmem:[%s4282_s0 + $0xc] sm:$0xf]  ;;  %v3258_v13 = vor.u32 %v3587_v62, %v3255_v63  ;;  %v3223_v19 = vld [vmem:[%s3661_s17 + $0x720] sm:$0xf0] }
  0x45   : > { %v3559_v15 = vld [vmem:[%s3661_s17 + $0x65c] sm:$0xf0]  ;;  %v2903_v45 = vld [vmem:[%s3661_s17 + $0x4a0] sm:$0xf0] }
  0x46   : > { %v2325_v17 = vld [vmem:[%s3661_s17] sm:$0xf]  ;;  %v3126_v24 = vor.u32 %v3559_v15, %v3125_v14  ;;  %1800 = vmatpush.bf16.msra.mxu2 %v2870_v20  ;;  %v3515_v14 = vld [vmem:[%s3661_s17 + $0x504] sm:$0xf]  ;;  %v2906_v50 = vor.u32 %v3499_v44, %v2903_v45  ;;  %v3005_v44 = vld [vmem:[%s3661_s17 + $0x548] sm:$0xf] }
  0x47   : > { %v3359_v18 = vld [vmem:[%s3661_s17 + $0x1c] sm:$0xf0]  ;;  %v2967_v15 = vld [vmem:[%s3661_s17 + $0x520] sm:$0xf0]  ;;  %v3528_v45 = vld [vmem:[%s3661_s17 + $0x564] sm:$0xf0] }
  0x48   : > { %v2581_v21 = vld [vmem:[%s3661_s17 + $0x200] sm:$0xf]  ;;  %v2326_v31 = vor.u32 %v3359_v18, %v2325_v17  ;;  %1814 = vmatpush.bf16.msra.mxu3 %v3126_v24  ;;  %v2319_v17 = vld [vmem:[%s4282_s0 + $0x18] sm:$0xf0]  ;;  %v3579_v18 = vld [vmem:[%s3661_s17 + $0x704] sm:$0xf]  ;;  %v2714_v24 = vor.u32 %v3451_v3, %v2711_v4 }
  0x49   : > { %v3423_v22 = vld [vmem:[%s3661_s17 + $0x21c] sm:$0xf0]  ;;  %v3782_v20 = vor.u32 %v3352_v12, %v2319_v17  ;;  %v3226_v29 = vor.u32 %v3579_v18, %v3223_v19  ;;  %v3159_v47 = vld [vmem:[%s3661_s17 + $0x6a0] sm:$0xf0]  ;;  %v3325_v19 = vld [vmem:[%s3661_s17 + $0x7c8] sm:$0xf] }
  0x4a   : > { %v2837_v23 = vld [vmem:[%s3661_s17 + $0x400] sm:$0xf]  ;;  %v2582_v35 = vor.u32 %v3423_v22, %v2581_v21  ;;  %1773 = vmatpush.bf16.msra.mxu0 %v2326_v31  ;;  %v2458_v21 = vor.u32 %v3387_v0, %v2455_v1  ;;  %v3379_v22 = vld [vmem:[%s3661_s17 + $0xc4] sm:$0xf] }
  0x4b   : > { %v3487_v25 = vld [vmem:[%s3661_s17 + $0x41c] sm:$0xf0]  ;;  %v3507_v31 = vld [vmem:[%s3661_s17 + $0x4c4] sm:$0xf] }
  0x4c   : > { %v3093_v26 = vld [vmem:[%s3661_s17 + $0x600] sm:$0xf]  ;;  %v2838_v36 = vor.u32 %v3487_v25, %v2837_v23  ;;  %1787 = vmatpush.bf16.msra.mxu1 %v2582_v35  ;;  %v2423_v23 = vld [vmem:[%s3661_s17 + $0xe0] sm:$0xf0]  ;;  %v2970_v25 = vor.u32 %v3515_v14, %v2967_v15  ;;  %v2938_v38 = vor.u32 %v3507_v31, %v2935_v32  ;;  %v3069_v14 = vld [vmem:[%s3661_s17 + $0x5c8] sm:$0xf] }
  0x4d   : > { %v3551_v27 = vld [vmem:[%s3661_s17 + $0x61c] sm:$0xf0]  ;;  %v3191_v35 = vld [vmem:[%s3661_s17 + $0x6e0] sm:$0xf0]  ;;  %v3544_v15 = vld [vmem:[%s3661_s17 + $0x5e4] sm:$0xf0] }
  0x4e   : > { %v3094_v39 = vor.u32 %v3551_v27, %v3093_v26  ;;  %1801 = vmatpush.bf16.msra.mxu2 %v2838_v36  ;;  %1822 = vmatpush.bf16.msrb.mxu0 %v2554_v40  ;;  %v2309_v10 = vld [vmem:[%s4282_s0] sm:$0xf]  ;;  %v3443_v26 = vld [vmem:[%s3661_s17 + $0x2c4] sm:$0xf]  ;;  %v2426_v36 = vor.u32 %v3379_v22, %v2423_v23  ;;  %v3037_v31 = vld [vmem:[%s3661_s17 + $0x588] sm:$0xf] }
  0x4f   : > { %v3774_v16 = vor.u32 %v3353_v11, %v2309_v10  ;;  %v3351_v27 = vld [vmem:[%s4282_s0 + $0x4] sm:$0xf]  ;;  %v2682_v37 = vor.u32 %v3443_v26, %v2679_v30  ;;  %v3416_v10 = vld [vmem:[%s3661_s17 + $0x1e4] sm:$0xf0] }
  0x50   : > { %1815 = vmatpush.bf16.msra.mxu3 %v3094_v39  ;;  %1836 = vmatpush.bf16.msrb.mxu1 %v2810_v41  ;;  %v3797_v33 = vor.u32 %v3351_v27, %v2311_v28  ;;  %v3371_v39 = vld [vmem:[%s3661_s17 + $0x84] sm:$0xf]  ;;  %v2813_v11 = vld [vmem:[%s3661_s17 + $0x3c8] sm:$0xf] }
  0x51   : > { %1802 = vmatmul.bf16.vlgmr.msra.gmra.mxu2 %v3761_v9  ;;  %1774 = vmatmul.bf16.vlgmr.msra.gmra.mxu0 %v3774_v16  ;;  %v2391_v40 = vld [vmem:[%s3661_s17 + $0xa0] sm:$0xf0]  ;;  %v2525_v26 = vld [vmem:[%s3661_s17 + $0x188] sm:$0xf] }
  0x52   : > { %1850 = vmatpush.bf16.msrb.mxu2 %v3066_v42  ;;  %1823 = vmatpush.bf16.msrb.mxu0 %v2522_v52  ;;  %v3435_v41 = vld [vmem:[%s3661_s17 + $0x284] sm:$0xf]  ;;  %v3194_v42 = vor.u32 %v3571_v34, %v3191_v35  ;;  %v2394_v48 = vor.u32 %v3371_v39, %v2391_v40  ;;  %v3408_v27 = vld [vmem:[%s3661_s17 + $0x1a4] sm:$0xf0] }
  0x53   : > { %1816 = vmatmul.bf16.vlgmr.msra.gmra.mxu3 %v3782_v20  ;;  %1788 = vmatmul.bf16.vlgmr.msra.gmra.mxu1 %v3797_v33  ;;  %v2650_v49 = vor.u32 %v3435_v41, %v2647_v43  ;;  %v3363_v51 = vld [vmem:[%s3661_s17 + $0x44] sm:$0xf]  ;;  %v2781_v28 = vld [vmem:[%s3661_s17 + $0x388] sm:$0xf] }
  0x54   : > { %1864 = vmatpush.bf16.msrb.mxu3 %v3322_v46  ;;  %1837 = vmatpush.bf16.msrb.mxu1 %v2778_v54  ;;  %v3563_v46 = vld [vmem:[%s3661_s17 + $0x684] sm:$0xf]  ;;  %v3472_v30 = vld [vmem:[%s3661_s17 + $0x3a4] sm:$0xf0] }
  0x55   : > { %v2359_v52 = vld [vmem:[%s3661_s17 + $0x60] sm:$0xf0]  ;;  %v3162_v54 = vor.u32 %v3563_v46, %v3159_v47  ;;  %v3536_v32 = vld [vmem:[%s3661_s17 + $0x5a4] sm:$0xf0] }
  0x56   : > { %1851 = vmatpush.bf16.msrb.mxu2 %v3034_v55  ;;  %1824 = vmatpush.bf16.msrb.mxu0 %v2490_v2  ;;  %v3427_v53 = vld [vmem:[%s3661_s17 + $0x244] sm:$0xf]  ;;  %v2362_v60 = vor.u32 %v3363_v51, %v2359_v52  ;;  %v3293_v34 = vld [vmem:[%s3661_s17 + $0x788] sm:$0xf] }
  0x57   : > { %v2615_v55 = vld [vmem:[%s3661_s17 + $0x260] sm:$0xf0]  ;;  %v3600_v35 = vld [vmem:[%s3661_s17 + $0x7a4] sm:$0xf0] }
  0x58   : > { %1865 = vmatpush.bf16.msrb.mxu3 %v3290_v59  ;;  %1838 = vmatpush.bf16.msrb.mxu1 %v2746_v7  ;;  %v3491_v56 = vld [vmem:[%s3661_s17 + $0x444] sm:$0xf]  ;;  %v2618_v63 = vor.u32 %v3427_v53, %v2615_v55  ;;  %v2493_v39 = vld [vmem:[%s3661_s17 + $0x148] sm:$0xf] }
  0x59   : > { %v2871_v57 = vld [vmem:[%s3661_s17 + $0x460] sm:$0xf0]  ;;  %v3400_v40 = vld [vmem:[%s3661_s17 + $0x164] sm:$0xf0] }
  0x5a   : > { %1852 = vmatpush.bf16.msrb.mxu2 %v3002_v8  ;;  %1825 = vmatpush.bf16.msrb.mxu0 %v2458_v21  ;;  %v3555_v58 = vld [vmem:[%s3661_s17 + $0x644] sm:$0xf]  ;;  %v2874_v0 = vor.u32 %v3491_v56, %v2871_v57  ;;  %v2557_v8 = vld [vmem:[%s3661_s17 + $0x1c8] sm:$0xf] }
  0x5b   : > { %v3127_v59 = vld [vmem:[%s3661_s17 + $0x660] sm:$0xf0]  ;;  %v3608_v21 = vld [vmem:[%s3661_s17 + $0x7e4] sm:$0xf0]  ;;  %v2558_v23 = vor.u32 %v3416_v10, %v2557_v8 }
  0x5c   : > { %1866 = vmatpush.bf16.msrb.mxu3 %v3258_v13  ;;  %1839 = vmatpush.bf16.msrb.mxu1 %v2714_v24  ;;  %v3355_v61 = vld [vmem:[%s3661_s17 + $0x4] sm:$0xf]  ;;  %v3130_v4 = vor.u32 %v3555_v58, %v3127_v59  ;;  %v3480_v13 = vld [vmem:[%s3661_s17 + $0x3e4] sm:$0xf0] }
  0x5d   : > { %v2327_v62 = vld [vmem:[%s3661_s17 + $0x20] sm:$0xf0]  ;;  %v2814_v24 = vor.u32 %v3480_v13, %v2813_v11  ;;  %v2749_v41 = vld [vmem:[%s3661_s17 + $0x348] sm:$0xf] }
  0x5e   : > { %1853 = vmatpush.bf16.msrb.mxu2 %v2970_v25  ;;  %1826 = vmatpush.bf16.msrb.mxu0 %v2426_v36  ;;  %v3419_v1 = vld [vmem:[%s3661_s17 + $0x204] sm:$0xf]  ;;  %v2330_v12 = vor.u32 %v3355_v61, %v2327_v62  ;;  %v3070_v25 = vor.u32 %v3544_v15, %v3069_v14  ;;  %v2526_v36 = vor.u32 %v3408_v27, %v2525_v26  ;;  %v3464_v43 = vld [vmem:[%s3661_s17 + $0x364] sm:$0xf0] }
  0x5f   : > { %v2583_v2 = vld [vmem:[%s3661_s17 + $0x220] sm:$0xf0]  ;;  %v3261_v46 = vld [vmem:[%s3661_s17 + $0x748] sm:$0xf] }
  0x60   : > { %1867 = vmatpush.bf16.msrb.mxu3 %v3226_v29  ;;  %1840 = vmatpush.bf16.msrb.mxu1 %v2682_v37  ;;  %v3483_v3 = vld [vmem:[%s3661_s17 + $0x404] sm:$0xf]  ;;  %v2586_v17 = vor.u32 %v3419_v1, %v2583_v2  ;;  %v3326_v29 = vor.u32 %v3608_v21, %v3325_v19  ;;  %v2782_v37 = vor.u32 %v3472_v30, %v2781_v28  ;;  %v3592_v47 = vld [vmem:[%s3661_s17 + $0x764] sm:$0xf0] }
  0x61   : > { %v2839_v5 = vld [vmem:[%s3661_s17 + $0x420] sm:$0xf0]  ;;  %v2461_v51 = vld [vmem:[%s3661_s17 + $0x108] sm:$0xf] }
  0x62   : > { %1854 = vmatpush.bf16.msrb.mxu2 %v2938_v38  ;;  %1827 = vmatpush.bf16.msrb.mxu0 %v2394_v48  ;;  %v3547_v6 = vld [vmem:[%s3661_s17 + $0x604] sm:$0xf]  ;;  %v2842_v18 = vor.u32 %v3483_v3, %v2839_v5  ;;  %v3038_v38 = vor.u32 %v3536_v32, %v3037_v31  ;;  %v2494_v48 = vor.u32 %v3400_v40, %v2493_v39  ;;  %v3392_v52 = vld [vmem:[%s3661_s17 + $0x124] sm:$0xf0] }
  0x63   : > { %v3095_v7 = vld [vmem:[%s3661_s17 + $0x620] sm:$0xf0]  ;;  %v2717_v53 = vld [vmem:[%s3661_s17 + $0x308] sm:$0xf] }
  0x64   : > { %1868 = vmatpush.bf16.msrb.mxu3 %v3194_v42  ;;  %1841 = vmatpush.bf16.msrb.mxu1 %v2650_v49  ;;  %v3098_v22 = vor.u32 %v3547_v6, %v3095_v7  ;;  %v3294_v42 = vor.u32 %v3600_v35, %v3293_v34  ;;  %v2750_v49 = vor.u32 %v3464_v43, %v2749_v41  ;;  %v3456_v55 = vld [vmem:[%s3661_s17 + $0x324] sm:$0xf0] }
  0x65   : > { %v2973_v56 = vld [vmem:[%s3661_s17 + $0x508] sm:$0xf]  ;;  %v2718_v61 = vor.u32 %v3456_v55, %v2717_v53  ;;  %v3540_v53 = vld [vmem:[%s3661_s17 + $0x5cc] sm:$0xf] }
  0x66   : > { %1855 = vmatpush.bf16.msrb.mxu2 %v2906_v50  ;;  %1828 = vmatpush.bf16.msrb.mxu0 %v2362_v60  ;;  %v3006_v50 = vor.u32 %v3528_v45, %v3005_v44  ;;  %v3520_v57 = vld [vmem:[%s3661_s17 + $0x524] sm:$0xf0]  ;;  %v2462_v60 = vor.u32 %v3392_v52, %v2461_v51  ;;  %v2815_v52 = vld [vmem:[%s3661_s17 + $0x3e8] sm:$0xf0] }
  0x67   : > { %v3229_v58 = vld [vmem:[%s3661_s17 + $0x708] sm:$0xf]  ;;  %v2974_v62 = vor.u32 %v3520_v57, %v2973_v56  ;;  %v3604_v57 = vld [vmem:[%s3661_s17 + $0x7cc] sm:$0xf] }
  0x68   : > { %1869 = vmatpush.bf16.msrb.mxu3 %v3162_v54  ;;  %1842 = vmatpush.bf16.msrb.mxu1 %v2618_v63  ;;  %v3262_v54 = vor.u32 %v3592_v47, %v3261_v46  ;;  %v3584_v59 = vld [vmem:[%s3661_s17 + $0x724] sm:$0xf0] }
  0x69   : > { %v2429_v63 = vld [vmem:[%s3661_s17 + $0xc8] sm:$0xf]  ;;  %v3230_v2 = vor.u32 %v3584_v59, %v3229_v58  ;;  %v3327_v58 = vld [vmem:[%s3661_s17 + $0x7e8] sm:$0xf0] }
  0x6a   : > { %1856 = vmatpush.bf16.msrb.mxu2 %v2874_v0  ;;  %1829 = vmatpush.bf16.msrb.mxu0 %v2330_v12  ;;  %v3384_v0 = vld [vmem:[%s3661_s17 + $0xe4] sm:$0xf0] }
  0x6b   : > { %v2685_v1 = vld [vmem:[%s3661_s17 + $0x2c8] sm:$0xf]  ;;  %v2430_v8 = vor.u32 %v3384_v0, %v2429_v63  ;;  %v3404_v63 = vld [vmem:[%s3661_s17 + $0x18c] sm:$0xf] }
  0x6c   : > { %1870 = vmatpush.bf16.msrb.mxu3 %v3130_v4  ;;  %1843 = vmatpush.bf16.msrb.mxu1 %v2586_v17  ;;  %v3448_v3 = vld [vmem:[%s3661_s17 + $0x2e4] sm:$0xf0]  ;;  %v2527_v0 = vld [vmem:[%s3661_s17 + $0x1a8] sm:$0xf0] }
  0x6d   : > { %1830 = vmatmul.bf16.vlgmr.msrb.gmra.mxu0 %v3774_v16  ;;  %v2941_v4 = vld [vmem:[%s3661_s17 + $0x4c8] sm:$0xf]  ;;  %v2686_v10 = vor.u32 %v3448_v3, %v2685_v1  ;;  %v3468_v1 = vld [vmem:[%s3661_s17 + $0x38c] sm:$0xf] }
  0x6e   : > { %1857 = vmatpush.bf16.msrb.mxu2 %v2842_v18  ;;  %1878 = vmatpush.bf16.msra.mxu0 %v2558_v23  ;;  %v3512_v5 = vld [vmem:[%s3661_s17 + $0x4e4] sm:$0xf0]  ;;  %v2783_v3 = vld [vmem:[%s3661_s17 + $0x3a8] sm:$0xf0] }
  0x6f   : > { %1844 = vmatmul.bf16.vlgmr.msrb.gmra.mxu1 %v3797_v33  ;;  %v3197_v6 = vld [vmem:[%s3661_s17 + $0x6c8] sm:$0xf]  ;;  %v2942_v11 = vor.u32 %v3512_v5, %v2941_v4  ;;  %v3532_v4 = vld [vmem:[%s3661_s17 + $0x58c] sm:$0xf] }
  0x70   : > { %1871 = vmatpush.bf16.msrb.mxu3 %v3098_v22  ;;  %1892 = vmatpush.bf16.msra.mxu1 %v2814_v24  ;;  %v3576_v7 = vld [vmem:[%s3661_s17 + $0x6e4] sm:$0xf0]  ;;  %v3039_v5 = vld [vmem:[%s3661_s17 + $0x5a8] sm:$0xf0] }
  0x71   : > { %1858 = vmatmul.bf16.vlgmr.msrb.gmra.mxu2 %v3761_v9  ;;  %v2397_v12 = vld [vmem:[%s3661_s17 + $0x88] sm:$0xf]  ;;  %v3198_v15 = vor.u32 %v3576_v7, %v3197_v6  ;;  %v3596_v6 = vld [vmem:[%s3661_s17 + $0x78c] sm:$0xf] }
  0x72   : > { %1906 = vmatpush.bf16.msra.mxu2 %v3070_v25  ;;  %1879 = vmatpush.bf16.msra.mxu0 %v2526_v36  ;;  %v3376_v13 = vld [vmem:[%s3661_s17 + $0xa4] sm:$0xf0]  ;;  %v3295_v7 = vld [vmem:[%s3661_s17 + $0x7a8] sm:$0xf0] }
  0x73   : > { %1872 = vmatmul.bf16.vlgmr.msrb.gmra.mxu3 %v3782_v20  ;;  %v2653_v14 = vld [vmem:[%s3661_s17 + $0x288] sm:$0xf]  ;;  %v2398_v23 = vor.u32 %v3376_v13, %v2397_v12  ;;  %v3396_v12 = vld [vmem:[%s3661_s17 + $0x14c] sm:$0xf] }
  0x74   : > { %1920 = vmatpush.bf16.msra.mxu3 %v3326_v29  ;;  %1893 = vmatpush.bf16.msra.mxu1 %v2782_v37  ;;  %v3440_v17 = vld [vmem:[%s3661_s17 + $0x2a4] sm:$0xf0]  ;;  %v2495_v13 = vld [vmem:[%s3661_s17 + $0x168] sm:$0xf0] }
  0x75   : > { %v2909_v18 = vld [vmem:[%s3661_s17 + $0x488] sm:$0xf]  ;;  %v2654_v24 = vor.u32 %v3440_v17, %v2653_v14  ;;  %v3460_v14 = vld [vmem:[%s3661_s17 + $0x34c] sm:$0xf] }
  0x76   : > { %1907 = vmatpush.bf16.msra.mxu2 %v3038_v38  ;;  %1880 = vmatpush.bf16.msra.mxu0 %v2494_v48  ;;  %v3504_v19 = vld [vmem:[%s3661_s17 + $0x4a4] sm:$0xf0]  ;;  %v3412_v48 = vld [vmem:[%s3661_s17 + $0x1cc] sm:$0xf] }
  0x77   : > { %v3165_v21 = vld [vmem:[%s3661_s17 + $0x688] sm:$0xf]  ;;  %v2910_v25 = vor.u32 %v3504_v19, %v2909_v18  ;;  %v2751_v17 = vld [vmem:[%s3661_s17 + $0x368] sm:$0xf0] }
  0x78   : > { %1921 = vmatpush.bf16.msra.mxu3 %v3294_v42  ;;  %1894 = vmatpush.bf16.msra.mxu1 %v2750_v49  ;;  %v3568_v22 = vld [vmem:[%s3661_s17 + $0x6a4] sm:$0xf0]  ;;  %v2559_v49 = vld [vmem:[%s3661_s17 + $0x1e8] sm:$0xf0] }
  0x79   : > { %v2365_v26 = vld [vmem:[%s3661_s17 + $0x48] sm:$0xf]  ;;  %v3166_v29 = vor.u32 %v3568_v22, %v3165_v21  ;;  %v3524_v18 = vld [vmem:[%s3661_s17 + $0x54c] sm:$0xf] }
  0x7a   : > { %1908 = vmatpush.bf16.msra.mxu2 %v3006_v50  ;;  %1881 = vmatpush.bf16.msra.mxu0 %v2462_v60  ;;  %v3368_v27 = vld [vmem:[%s3661_s17 + $0x64] sm:$0xf0]  ;;  %v3476_v50 = vld [vmem:[%s3661_s17 + $0x3cc] sm:$0xf]  ;;  %v2562_v60 = vor.u32 %v3412_v48, %v2559_v49 }
  0x7b   : > { %v2621_v28 = vld [vmem:[%s3661_s17 + $0x248] sm:$0xf]  ;;  %v2366_v36 = vor.u32 %v3368_v27, %v2365_v26  ;;  %v3007_v19 = vld [vmem:[%s3661_s17 + $0x568] sm:$0xf0] }
  0x7c   : > { %1922 = vmatpush.bf16.msra.mxu3 %v3262_v54  ;;  %1895 = vmatpush.bf16.msra.mxu1 %v2718_v61  ;;  %v3432_v30 = vld [vmem:[%s3661_s17 + $0x264] sm:$0xf0]  ;;  %v3071_v54 = vld [vmem:[%s3661_s17 + $0x5e8] sm:$0xf0]  ;;  %v2818_v61 = vor.u32 %v3476_v50, %v2815_v52 }
  0x7d   : > { %v2877_v31 = vld [vmem:[%s3661_s17 + $0x448] sm:$0xf]  ;;  %v2622_v39 = vor.u32 %v3432_v30, %v2621_v28  ;;  %v3588_v21 = vld [vmem:[%s3661_s17 + $0x74c] sm:$0xf] }
  0x7e   : > { %1909 = vmatpush.bf16.msra.mxu2 %v2974_v62  ;;  %1882 = vmatpush.bf16.msra.mxu0 %v2430_v8  ;;  %v3496_v32 = vld [vmem:[%s3661_s17 + $0x464] sm:$0xf0]  ;;  %v3074_v62 = vor.u32 %v3540_v53, %v3071_v54  ;;  %v2530_v8 = vor.u32 %v3404_v63, %v2527_v0  ;;  %v3263_v22 = vld [vmem:[%s3661_s17 + $0x768] sm:$0xf0] }
  0x7f   : > { %v3133_v34 = vld [vmem:[%s3661_s17 + $0x648] sm:$0xf]  ;;  %v2878_v40 = vor.u32 %v3496_v32, %v2877_v31  ;;  %v3388_v26 = vld [vmem:[%s3661_s17 + $0x10c] sm:$0xf] }
  0x80   : > { %1923 = vmatpush.bf16.msra.mxu3 %v3230_v2  ;;  %1896 = vmatpush.bf16.msra.mxu1 %v2686_v10  ;;  %v3560_v35 = vld [vmem:[%s3661_s17 + $0x664] sm:$0xf0]  ;;  %v3330_v2 = vor.u32 %v3604_v57, %v3327_v58  ;;  %v2786_v10 = vor.u32 %v3468_v1, %v2783_v3  ;;  %v2463_v27 = vld [vmem:[%s3661_s17 + $0x128] sm:$0xf0] }
  0x81   : > { %v2333_v37 = vld [vmem:[%s3661_s17 + $0x8] sm:$0xf]  ;;  %v3134_v44 = vor.u32 %v3560_v35, %v3133_v34  ;;  %v3452_v28 = vld [vmem:[%s3661_s17 + $0x30c] sm:$0xf] }
  0x82   : > { %1910 = vmatpush.bf16.msra.mxu2 %v2942_v11  ;;  %1883 = vmatpush.bf16.msra.mxu0 %v2398_v23  ;;  %v3360_v38 = vld [vmem:[%s3661_s17 + $0x24] sm:$0xf0]  ;;  %v3042_v11 = vor.u32 %v3532_v4, %v3039_v5  ;;  %v2498_v23 = vor.u32 %v3396_v12, %v2495_v13  ;;  %v2719_v30 = vld [vmem:[%s3661_s17 + $0x328] sm:$0xf0] }
  0x83   : > { %v2589_v41 = vld [vmem:[%s3661_s17 + $0x208] sm:$0xf]  ;;  %v2334_v51 = vor.u32 %v3360_v38, %v2333_v37  ;;  %v3516_v31 = vld [vmem:[%s3661_s17 + $0x50c] sm:$0xf]  ;;  %v2722_v37 = vor.u32 %v3452_v28, %v2719_v30  ;;  %v3077_v28 = vld [vmem:[%s3661_s17 + $0x5d0] sm:$0xf] }
  0x84   : > { %1924 = vmatpush.bf16.msra.mxu3 %v3198_v15  ;;  %1897 = vmatpush.bf16.msra.mxu1 %v2654_v24  ;;  %v3424_v42 = vld [vmem:[%s3661_s17 + $0x224] sm:$0xf0]  ;;  %v3298_v15 = vor.u32 %v3596_v6, %v3295_v7  ;;  %v2754_v24 = vor.u32 %v3460_v14, %v2751_v17  ;;  %v2975_v32 = vld [vmem:[%s3661_s17 + $0x528] sm:$0xf0] }
  0x85   : > { %v2845_v43 = vld [vmem:[%s3661_s17 + $0x408] sm:$0xf]  ;;  %v2590_v55 = vor.u32 %v3424_v42, %v2589_v41  ;;  %v3580_v34 = vld [vmem:[%s3661_s17 + $0x70c] sm:$0xf]  ;;  %v2978_v38 = vor.u32 %v3516_v31, %v2975_v32  ;;  %v3333_v32 = vld [vmem:[%s3661_s17 + $0x7d0] sm:$0xf] }
  0x86   : > { %1911 = vmatpush.bf16.msra.mxu2 %v2910_v25  ;;  %v3488_v45 = vld [vmem:[%s3661_s17 + $0x424] sm:$0xf0]  ;;  %1884 = vmatpush.bf16.msra.mxu0 %v2366_v36  ;;  %v3010_v25 = vor.u32 %v3524_v18, %v3007_v19  ;;  %v3231_v35 = vld [vmem:[%s3661_s17 + $0x728] sm:$0xf0]  ;;  %v2466_v36 = vor.u32 %v3388_v26, %v2463_v27  ;;  %v3481_v27 = vld [vmem:[%s3661_s17 + $0x3ec] sm:$0xf0] }
  0x87   : > { %v3101_v46 = vld [vmem:[%s3661_s17 + $0x608] sm:$0xf]  ;;  %v2846_v56 = vor.u32 %v3488_v45, %v2845_v43  ;;  %v3444_v41 = vld [vmem:[%s3661_s17 + $0x2cc] sm:$0xf]  ;;  %v3234_v42 = vor.u32 %v3580_v34, %v3231_v35  ;;  %v3609_v34 = vld [vmem:[%s3661_s17 + $0x7ec] sm:$0xf0] }
  0x88   : > { %1925 = vmatpush.bf16.msra.mxu3 %v3166_v29  ;;  %v3552_v47 = vld [vmem:[%s3661_s17 + $0x624] sm:$0xf0]  ;;  %1898 = vmatpush.bf16.msra.mxu1 %v2622_v39  ;;  %v3266_v29 = vor.u32 %v3588_v21, %v3263_v22  ;;  %v3380_v39 = vld [vmem:[%s3661_s17 + $0xcc] sm:$0xf] }
  0x89   : > { %v3102_v59 = vor.u32 %v3552_v47, %v3101_v46  ;;  %v2687_v43 = vld [vmem:[%s3661_s17 + $0x2e8] sm:$0xf0] }
  0x8a   : > { %1912 = vmatpush.bf16.msra.mxu2 %v2878_v40  ;;  %1885 = vmatpush.bf16.msra.mxu0 %v2334_v51  ;;  %v2431_v40 = vld [vmem:[%s3661_s17 + $0xe8] sm:$0xf0]  ;;  %v2690_v49 = vor.u32 %v3444_v41, %v2687_v43  ;;  %v2789_v41 = vld [vmem:[%s3661_s17 + $0x390] sm:$0xf] }
  0x8b   : > { %v2943_v45 = vld [vmem:[%s3661_s17 + $0x4e8] sm:$0xf0]  ;;  %v2434_v48 = vor.u32 %v3380_v39, %v2431_v40  ;;  %v2533_v39 = vld [vmem:[%s3661_s17 + $0x190] sm:$0xf] }
  0x8c   : > { %1926 = vmatpush.bf16.msra.mxu3 %v3134_v44  ;;  %1899 = vmatpush.bf16.msra.mxu1 %v2590_v55  ;;  %v3508_v44 = vld [vmem:[%s3661_s17 + $0x4cc] sm:$0xf]  ;;  %v3409_v40 = vld [vmem:[%s3661_s17 + $0x1ac] sm:$0xf0] }
  0x8d   : > { %1886 = vmatmul.bf16.vlgmr.msra.gmra.mxu0 %v3774_v16  ;;  %v3572_v46 = vld [vmem:[%s3661_s17 + $0x6cc] sm:$0xf]  ;;  %v2946_v50 = vor.u32 %v3508_v44, %v2943_v45  ;;  %v3473_v43 = vld [vmem:[%s3661_s17 + $0x3ac] sm:$0xf0] }
  0x8e   : > { %1913 = vmatpush.bf16.msra.mxu2 %v2846_v56  ;;  %1934 = vmatpush.bf16.msrb.mxu0 %v2562_v60  ;;  %v3199_v47 = vld [vmem:[%s3661_s17 + $0x6e8] sm:$0xf0]  ;;  %v3045_v44 = vld [vmem:[%s3661_s17 + $0x590] sm:$0xf] }
  0x8f   : > { %1900 = vmatmul.bf16.vlgmr.msra.gmra.mxu1 %v3797_v33  ;;  %v3372_v51 = vld [vmem:[%s3661_s17 + $0x8c] sm:$0xf]  ;;  %v3202_v54 = vor.u32 %v3572_v46, %v3199_v47  ;;  %v3537_v45 = vld [vmem:[%s3661_s17 + $0x5ac] sm:$0xf0] }
  0x90   : > { %1927 = vmatpush.bf16.msra.mxu3 %v3102_v59  ;;  %1948 = vmatpush.bf16.msrb.mxu1 %v2818_v61  ;;  %v2399_v52 = vld [vmem:[%s3661_s17 + $0xa8] sm:$0xf0]  ;;  %v3301_v46 = vld [vmem:[%s3661_s17 + $0x790] sm:$0xf] }
  0x91   : > { %1914 = vmatmul.bf16.vlgmr.msra.gmra.mxu2 %v3761_v9  ;;  %v3436_v53 = vld [vmem:[%s3661_s17 + $0x28c] sm:$0xf]  ;;  %v2402_v60 = vor.u32 %v3372_v51, %v2399_v52  ;;  %v3601_v47 = vld [vmem:[%s3661_s17 + $0x7ac] sm:$0xf0] }
  0x92   : > { %1962 = vmatpush.bf16.msrb.mxu2 %v3074_v62  ;;  %1935 = vmatpush.bf16.msrb.mxu0 %v2530_v8  ;;  %v2655_v55 = vld [vmem:[%s3661_s17 + $0x2a8] sm:$0xf0]  ;;  %v2501_v51 = vld [vmem:[%s3661_s17 + $0x150] sm:$0xf] }
  0x93   : > { %1928 = vmatmul.bf16.vlgmr.msra.gmra.mxu3 %v3782_v20  ;;  %v3500_v56 = vld [vmem:[%s3661_s17 + $0x48c] sm:$0xf]  ;;  %v2658_v61 = vor.u32 %v3436_v53, %v2655_v55  ;;  %v3401_v52 = vld [vmem:[%s3661_s17 + $0x16c] sm:$0xf0] }
  0x94   : > { %1976 = vmatpush.bf16.msrb.mxu3 %v3330_v2  ;;  %1949 = vmatpush.bf16.msrb.mxu1 %v2786_v10  ;;  %v2911_v57 = vld [vmem:[%s3661_s17 + $0x4a8] sm:$0xf0]  ;;  %v2757_v53 = vld [vmem:[%s3661_s17 + $0x350] sm:$0xf] }
  0x95   : > { %v3564_v58 = vld [vmem:[%s3661_s17 + $0x68c] sm:$0xf]  ;;  %v2914_v62 = vor.u32 %v3500_v56, %v2911_v57  ;;  %v3465_v55 = vld [vmem:[%s3661_s17 + $0x36c] sm:$0xf0] }
  0x96   : > { %1963 = vmatpush.bf16.msrb.mxu2 %v3042_v11  ;;  %1936 = vmatpush.bf16.msrb.mxu0 %v2498_v23  ;;  %v3167_v59 = vld [vmem:[%s3661_s17 + $0x6a8] sm:$0xf0]  ;;  %v2565_v23 = vld [vmem:[%s3661_s17 + $0x1d0] sm:$0xf] }
  0x97   : > { %v3364_v63 = vld [vmem:[%s3661_s17 + $0x4c] sm:$0xf]  ;;  %v3170_v2 = vor.u32 %v3564_v58, %v3167_v59  ;;  %v3013_v56 = vld [vmem:[%s3661_s17 + $0x550] sm:$0xf] }
  0x98   : > { %1977 = vmatpush.bf16.msrb.mxu3 %v3298_v15  ;;  %1950 = vmatpush.bf16.msrb.mxu1 %v2754_v24  ;;  %v2367_v0 = vld [vmem:[%s3661_s17 + $0x68] sm:$0xf0]  ;;  %v3417_v24 = vld [vmem:[%s3661_s17 + $0x1ec] sm:$0xf0] }
  0x99   : > { %v3428_v1 = vld [vmem:[%s3661_s17 + $0x24c] sm:$0xf]  ;;  %v2370_v8 = vor.u32 %v3364_v63, %v2367_v0  ;;  %v3529_v57 = vld [vmem:[%s3661_s17 + $0x56c] sm:$0xf0] }
  0x9a   : > { %1964 = vmatpush.bf16.msrb.mxu2 %v3010_v25  ;;  %1937 = vmatpush.bf16.msrb.mxu0 %v2466_v36  ;;  %v2623_v3 = vld [vmem:[%s3661_s17 + $0x268] sm:$0xf0]  ;;  %v2821_v25 = vld [vmem:[%s3661_s17 + $0x3d0] sm:$0xf]  ;;  %v2566_v36 = vor.u32 %v3417_v24, %v2565_v23 }
  0x9b   : > { %v3492_v4 = vld [vmem:[%s3661_s17 + $0x44c] sm:$0xf]  ;;  %v2626_v12 = vor.u32 %v3428_v1, %v2623_v3  ;;  %v3269_v58 = vld [vmem:[%s3661_s17 + $0x750] sm:$0xf] }
  0x9c   : > { %1978 = vmatpush.bf16.msrb.mxu3 %v3266_v29  ;;  %1951 = vmatpush.bf16.msrb.mxu1 %v2722_v37  ;;  %v2879_v5 = vld [vmem:[%s3661_s17 + $0x468] sm:$0xf0]  ;;  %v3545_v29 = vld [vmem:[%s3661_s17 + $0x5ec] sm:$0xf0]  ;;  %v2822_v37 = vor.u32 %v3481_v27, %v2821_v25 }
  0x9d   : > { %v3556_v6 = vld [vmem:[%s3661_s17 + $0x64c] sm:$0xf]  ;;  %v2882_v13 = vor.u32 %v3492_v4, %v2879_v5  ;;  %v3593_v59 = vld [vmem:[%s3661_s17 + $0x76c] sm:$0xf0] }
  0x9e   : > { %1965 = vmatpush.bf16.msrb.mxu2 %v2978_v38  ;;  %1938 = vmatpush.bf16.msrb.mxu0 %v2434_v48  ;;  %v3135_v7 = vld [vmem:[%s3661_s17 + $0x668] sm:$0xf0]  ;;  %v3078_v38 = vor.u32 %v3545_v29, %v3077_v28  ;;  %v2534_v48 = vor.u32 %v3409_v40, %v2533_v39  ;;  %v2469_v63 = vld [vmem:[%s3661_s17 + $0x110] sm:$0xf] }
  0x9f   : > { %v3356_v10 = vld [vmem:[%s3661_s17 + $0xc] sm:$0xf]  ;;  %v3138_v18 = vor.u32 %v3556_v6, %v3135_v7  ;;  %v3393_v0 = vld [vmem:[%s3661_s17 + $0x12c] sm:$0xf0] }
  0xa0   : > { %1979 = vmatpush.bf16.msrb.mxu3 %v3234_v42  ;;  %1952 = vmatpush.bf16.msrb.mxu1 %v2690_v49  ;;  %v2335_v11 = vld [vmem:[%s3661_s17 + $0x28] sm:$0xf0]  ;;  %v3334_v42 = vor.u32 %v3609_v34, %v3333_v32  ;;  %v2790_v49 = vor.u32 %v3473_v43, %v2789_v41  ;;  %v2725_v1 = vld [vmem:[%s3661_s17 + $0x310] sm:$0xf] }
  0xa1   : > { %v3420_v14 = vld [vmem:[%s3661_s17 + $0x20c] sm:$0xf]  ;;  %v2338_v26 = vor.u32 %v3356_v10, %v2335_v11  ;;  %v3457_v3 = vld [vmem:[%s3661_s17 + $0x32c] sm:$0xf0] }
  0xa2   : > { %1966 = vmatpush.bf16.msrb.mxu2 %v2946_v50  ;;  %1939 = vmatpush.bf16.msrb.mxu0 %v2402_v60  ;;  %v2591_v15 = vld [vmem:[%s3661_s17 + $0x228] sm:$0xf0]  ;;  %v3046_v50 = vor.u32 %v3537_v45, %v3045_v44  ;;  %v2502_v60 = vor.u32 %v3401_v52, %v2501_v51  ;;  %v2981_v4 = vld [vmem:[%s3661_s17 + $0x510] sm:$0xf]  ;;  %v2726_v10 = vor.u32 %v3457_v3, %v2725_v1  ;;  %v3541_v1 = vld [vmem:[%s3661_s17 + $0x5d4] sm:$0xf] }
  0xa3   : > { %v3484_v17 = vld [vmem:[%s3661_s17 + $0x40c] sm:$0xf]  ;;  %v2594_v30 = vor.u32 %v3420_v14, %v2591_v15  ;;  %v3521_v5 = vld [vmem:[%s3661_s17 + $0x52c] sm:$0xf0] }
  0xa4   : > { %1980 = vmatpush.bf16.msrb.mxu3 %v3202_v54  ;;  %1953 = vmatpush.bf16.msrb.mxu1 %v2658_v61  ;;  %v2847_v19 = vld [vmem:[%s3661_s17 + $0x428] sm:$0xf0]  ;;  %v3302_v54 = vor.u32 %v3601_v47, %v3301_v46  ;;  %v2758_v61 = vor.u32 %v3465_v55, %v2757_v53  ;;  %v3237_v6 = vld [vmem:[%s3661_s17 + $0x710] sm:$0xf]  ;;  %v2982_v11 = vor.u32 %v3521_v5, %v2981_v4  ;;  %v3605_v5 = vld [vmem:[%s3661_s17 + $0x7d4] sm:$0xf] }
  0xa5   : > { %v3548_v21 = vld [vmem:[%s3661_s17 + $0x60c] sm:$0xf]  ;;  %v2850_v31 = vor.u32 %v3484_v17, %v2847_v19  ;;  %v3585_v7 = vld [vmem:[%s3661_s17 + $0x72c] sm:$0xf0] }
  0xa6   : > { %1967 = vmatpush.bf16.msrb.mxu2 %v2914_v62  ;;  %v3103_v22 = vld [vmem:[%s3661_s17 + $0x628] sm:$0xf0]  ;;  %1940 = vmatpush.bf16.msrb.mxu0 %v2370_v8  ;;  %v3014_v62 = vor.u32 %v3529_v57, %v3013_v56  ;;  %v2470_v8 = vor.u32 %v3393_v0, %v2469_v63  ;;  %v2693_v14 = vld [vmem:[%s3661_s17 + $0x2d0] sm:$0xf]  ;;  %v3238_v15 = vor.u32 %v3585_v7, %v3237_v6  ;;  %v2823_v0 = vld [vmem:[%s3661_s17 + $0x3f0] sm:$0xf0] }
  0xa7   : > { %v3106_v35 = vor.u32 %v3548_v21, %v3103_v22  ;;  %v3449_v17 = vld [vmem:[%s3661_s17 + $0x2ec] sm:$0xf0]  ;;  %v3335_v6 = vld [vmem:[%s3661_s17 + $0x7f0] sm:$0xf0] }
  0xa8   : > { %1981 = vmatpush.bf16.msrb.mxu3 %v3170_v2  ;;  %1954 = vmatpush.bf16.msrb.mxu1 %v2626_v12  ;;  %v3270_v2 = vor.u32 %v3593_v59, %v3269_v58  ;;  %v2437_v12 = vld [vmem:[%s3661_s17 + $0xd0] sm:$0xf]  ;;  %v2694_v24 = vor.u32 %v3449_v17, %v2693_v14  ;;  %v3469_v14 = vld [vmem:[%s3661_s17 + $0x394] sm:$0xf] }
  0xa9   : > { %v3513_v19 = vld [vmem:[%s3661_s17 + $0x4ec] sm:$0xf0]  ;;  %v2791_v17 = vld [vmem:[%s3661_s17 + $0x3b0] sm:$0xf0] }
  0xaa   : > { %1968 = vmatpush.bf16.msrb.mxu2 %v2882_v13  ;;  %1941 = vmatpush.bf16.msrb.mxu0 %v2338_v26  ;;  %v3385_v13 = vld [vmem:[%s3661_s17 + $0xec] sm:$0xf0] }
  0xab   : > { %v3205_v21 = vld [vmem:[%s3661_s17 + $0x6d0] sm:$0xf]  ;;  %v2438_v23 = vor.u32 %v3385_v13, %v2437_v12  ;;  %v3405_v12 = vld [vmem:[%s3661_s17 + $0x194] sm:$0xf] }
  0xac   : > { %1982 = vmatpush.bf16.msrb.mxu3 %v3138_v18  ;;  %1955 = vmatpush.bf16.msrb.mxu1 %v2594_v30  ;;  %v2949_v18 = vld [vmem:[%s3661_s17 + $0x4d0] sm:$0xf]  ;;  %v2535_v13 = vld [vmem:[%s3661_s17 + $0x1b0] sm:$0xf0] }
  0xad   : > { %1942 = vmatmul.bf16.vlgmr.msrb.gmra.mxu0 %v3774_v16  ;;  %v3577_v22 = vld [vmem:[%s3661_s17 + $0x6ec] sm:$0xf0]  ;;  %v2950_v25 = vor.u32 %v3513_v19, %v2949_v18  ;;  %v3533_v18 = vld [vmem:[%s3661_s17 + $0x594] sm:$0xf] }
  0xae   : > { %1969 = vmatpush.bf16.msrb.mxu2 %v2850_v31  ;;  %1990 = vmatpush.bf16.msra.mxu0 %v2566_v36  ;;  %v2405_v26 = vld [vmem:[%s3661_s17 + $0x90] sm:$0xf]  ;;  %v3206_v29 = vor.u32 %v3577_v22, %v3205_v21  ;;  %v3047_v19 = vld [vmem:[%s3661_s17 + $0x5b0] sm:$0xf0] }
  0xaf   : > { %1956 = vmatmul.bf16.vlgmr.msrb.gmra.mxu1 %v3797_v33  ;;  %v3377_v27 = vld [vmem:[%s3661_s17 + $0xac] sm:$0xf0]  ;;  %v3597_v21 = vld [vmem:[%s3661_s17 + $0x794] sm:$0xf] }
  0xb0   : > { %1983 = vmatpush.bf16.msrb.mxu3 %v3106_v35  ;;  %2004 = vmatpush.bf16.msra.mxu1 %v2822_v37  ;;  %v2661_v28 = vld [vmem:[%s3661_s17 + $0x290] sm:$0xf]  ;;  %v2406_v36 = vor.u32 %v3377_v27, %v2405_v26  ;;  %v3303_v22 = vld [vmem:[%s3661_s17 + $0x7b0] sm:$0xf0] }
  0xb1   : > { %1970 = vmatmul.bf16.vlgmr.msrb.gmra.mxu2 %v3761_v9  ;;  %v3441_v30 = vld [vmem:[%s3661_s17 + $0x2ac] sm:$0xf0]  ;;  %v3397_v26 = vld [vmem:[%s3661_s17 + $0x154] sm:$0xf] }
  0xb2   : > { %2018 = vmatpush.bf16.msra.mxu2 %v3078_v38  ;;  %1991 = vmatpush.bf16.msra.mxu0 %v2534_v48  ;;  %v2917_v31 = vld [vmem:[%s3661_s17 + $0x490] sm:$0xf]  ;;  %v2662_v37 = vor.u32 %v3441_v30, %v2661_v28  ;;  %v2503_v27 = vld [vmem:[%s3661_s17 + $0x170] sm:$0xf0] }
  0xb3   : > { %1984 = vmatmul.bf16.vlgmr.msrb.gmra.mxu3 %v3782_v20  ;;  %v3505_v32 = vld [vmem:[%s3661_s17 + $0x4ac] sm:$0xf0]  ;;  %v3461_v28 = vld [vmem:[%s3661_s17 + $0x354] sm:$0xf] }
  0xb4   : > { %2032 = vmatpush.bf16.msra.mxu3 %v3334_v42  ;;  %2005 = vmatpush.bf16.msra.mxu1 %v2790_v49  ;;  %v3173_v34 = vld [vmem:[%s3661_s17 + $0x690] sm:$0xf]  ;;  %v2918_v38 = vor.u32 %v3505_v32, %v2917_v31  ;;  %v2759_v30 = vld [vmem:[%s3661_s17 + $0x370] sm:$0xf0] }
  0xb5   : > { %v3569_v35 = vld [vmem:[%s3661_s17 + $0x6ac] sm:$0xf0]  ;;  %v3525_v31 = vld [vmem:[%s3661_s17 + $0x554] sm:$0xf] }
  0xb6   : > { %2019 = vmatpush.bf16.msra.mxu2 %v3046_v50  ;;  %1992 = vmatpush.bf16.msra.mxu0 %v2502_v60  ;;  %v2373_v39 = vld [vmem:[%s3661_s17 + $0x50] sm:$0xf]  ;;  %v3174_v42 = vor.u32 %v3569_v35, %v3173_v34  ;;  %v3413_v60 = vld [vmem:[%s3661_s17 + $0x1d4] sm:$0xf] }
  0xb7   : > { %v3369_v40 = vld [vmem:[%s3661_s17 + $0x6c] sm:$0xf0]  ;;  %v3015_v32 = vld [vmem:[%s3661_s17 + $0x570] sm:$0xf0] }
  0xb8   : > { %2033 = vmatpush.bf16.msra.mxu3 %v3302_v54  ;;  %2006 = vmatpush.bf16.msra.mxu1 %v2758_v61  ;;  %v2629_v41 = vld [vmem:[%s3661_s17 + $0x250] sm:$0xf]  ;;  %v2374_v48 = vor.u32 %v3369_v40, %v2373_v39  ;;  %v2567_v61 = vld [vmem:[%s3661_s17 + $0x1f0] sm:$0xf0] }
  0xb9   : > { %v3433_v43 = vld [vmem:[%s3661_s17 + $0x26c] sm:$0xf0]  ;;  %v3589_v34 = vld [vmem:[%s3661_s17 + $0x754] sm:$0xf] }
  0xba   : > { %2020 = vmatpush.bf16.msra.mxu2 %v3014_v62  ;;  %1993 = vmatpush.bf16.msra.mxu0 %v2470_v8  ;;  %v2885_v44 = vld [vmem:[%s3661_s17 + $0x450] sm:$0xf]  ;;  %v2630_v51 = vor.u32 %v3433_v43, %v2629_v41  ;;  %v3477_v62 = vld [vmem:[%s3661_s17 + $0x3d4] sm:$0xf]  ;;  %v2570_v8 = vor.u32 %v3413_v60, %v2567_v61 }
  0xbb   : > { %v3497_v45 = vld [vmem:[%s3661_s17 + $0x46c] sm:$0xf0]  ;;  %v3271_v35 = vld [vmem:[%s3661_s17 + $0x770] sm:$0xf0] }
  0xbc   : > { %2034 = vmatpush.bf16.msra.mxu3 %v3270_v2  ;;  %2007 = vmatpush.bf16.msra.mxu1 %v2726_v10  ;;  %v3141_v46 = vld [vmem:[%s3661_s17 + $0x650] sm:$0xf]  ;;  %v2886_v52 = vor.u32 %v3497_v45, %v2885_v44  ;;  %v3079_v2 = vld [vmem:[%s3661_s17 + $0x5f0] sm:$0xf0]  ;;  %v2826_v10 = vor.u32 %v3477_v62, %v2823_v0 }
  0xbd   : > { %v3561_v47 = vld [vmem:[%s3661_s17 + $0x66c] sm:$0xf0]  ;;  %v3389_v39 = vld [vmem:[%s3661_s17 + $0x114] sm:$0xf] }
  0xbe   : > { %2021 = vmatpush.bf16.msra.mxu2 %v2982_v11  ;;  %1994 = vmatpush.bf16.msra.mxu0 %v2438_v23  ;;  %v2341_v49 = vld [vmem:[%s3661_s17 + $0x10] sm:$0xf]  ;;  %v3142_v56 = vor.u32 %v3561_v47, %v3141_v46  ;;  %v3082_v11 = vor.u32 %v3541_v1, %v3079_v2  ;;  %v2538_v23 = vor.u32 %v3405_v12, %v2535_v13  ;;  %v2471_v40 = vld [vmem:[%s3661_s17 + $0x130] sm:$0xf0] }
  0xbf   : > { %v3361_v50 = vld [vmem:[%s3661_s17 + $0x2c] sm:$0xf0]  ;;  %v3453_v41 = vld [vmem:[%s3661_s17 + $0x314] sm:$0xf] }
  0xc0   : > { %2035 = vmatpush.bf16.msra.mxu3 %v3238_v15  ;;  %2008 = vmatpush.bf16.msra.mxu1 %v2694_v24  ;;  %v2597_v53 = vld [vmem:[%s3661_s17 + $0x210] sm:$0xf]  ;;  %v2342_v63 = vor.u32 %v3361_v50, %v2341_v49  ;;  %v3338_v15 = vor.u32 %v3605_v5, %v3335_v6  ;;  %v2794_v24 = vor.u32 %v3469_v14, %v2791_v17  ;;  %v2727_v43 = vld [vmem:[%s3661_s17 + $0x330] sm:$0xf0] }
  0xc1   : > { %v3425_v54 = vld [vmem:[%s3661_s17 + $0x22c] sm:$0xf0]  ;;  %v3517_v44 = vld [vmem:[%s3661_s17 + $0x514] sm:$0xf]  ;;  %v2730_v50 = vor.u32 %v3453_v41, %v2727_v43 }
  0xc2   : > { %2022 = vmatpush.bf16.msra.mxu2 %v2950_v25  ;;  %1995 = vmatpush.bf16.msra.mxu0 %v2406_v36  ;;  %v2853_v55 = vld [vmem:[%s3661_s17 + $0x410] sm:$0xf]  ;;  %v2598_v3 = vor.u32 %v3425_v54, %v2597_v53  ;;  %v3050_v25 = vor.u32 %v3533_v18, %v3047_v19  ;;  %v2506_v36 = vor.u32 %v3397_v26, %v2503_v27  ;;  %v2983_v45 = vld [vmem:[%s3661_s17 + $0x530] sm:$0xf0]  ;;  %v4074_v54 = vld [vmem:[%s182_s10] sm:$0xff] }
  0xc3   : > { %v3489_v57 = vld [vmem:[%s3661_s17 + $0x42c] sm:$0xf0]  ;;  %v3581_v46 = vld [vmem:[%s3661_s17 + $0x714] sm:$0xf]  ;;  %v450_v62 = vperm.slane %v4074_v54, 0 }
  0xc4   : > { %2036 = vmatpush.bf16.msra.mxu3 %v3206_v29  ;;  %2009 = vmatpush.bf16.msra.mxu1 %v2662_v37  ;;  %v3109_v58 = vld [vmem:[%s3661_s17 + $0x610] sm:$0xf]  ;;  %v2854_v4 = vor.u32 %v3489_v57, %v2853_v55  ;;  %v3306_v29 = vor.u32 %v3597_v21, %v3303_v22  ;;  %v2762_v37 = vor.u32 %v3461_v28, %v2759_v30  ;;  %v3239_v47 = vld [vmem:[%s3661_s17 + $0x730] sm:$0xf0] }
  0xc5   : > { %v3553_v59 = vld [vmem:[%s3661_s17 + $0x62c] sm:$0xf0]  ;;  %v3381_v49 = vld [vmem:[%s3661_s17 + $0xd4] sm:$0xf]  ;;  %v3242_v55 = vor.u32 %v3581_v46, %v3239_v47  ;;  %v3418_v46 = vld [vmem:[%s3661_s17 + $0x1f4] sm:$0xf0] }
  0xc6   : > { %2023 = vmatpush.bf16.msra.mxu2 %v2918_v38  ;;  %1996 = vmatpush.bf16.msra.mxu0 %v2374_v48  ;;  %v3110_v7 = vor.u32 %v3553_v59, %v3109_v58  ;;  %v3018_v38 = vor.u32 %v3525_v31, %v3015_v32  ;;  %v2474_v48 = vor.u32 %v3389_v39, %v2471_v40  ;;  %v3445_v53 = vld [vmem:[%s3661_s17 + $0x2d4] sm:$0xf]  ;;  %v2829_v47 = vld [vmem:[%s3661_s17 + $0x3d8] sm:$0xf] }
  0xc7   : > { %v3509_v57 = vld [vmem:[%s3661_s17 + $0x4d4] sm:$0xf] }
  0xc8   : > { %2037 = vmatpush.bf16.msra.mxu3 %v3174_v42  ;;  %2010 = vmatpush.bf16.msra.mxu1 %v2630_v51  ;;  %v3274_v42 = vor.u32 %v3589_v34, %v3271_v35  ;;  %v2986_v51 = vor.u32 %v3517_v44, %v2983_v45  ;;  %v2951_v58 = vld [vmem:[%s3661_s17 + $0x4f0] sm:$0xf0]  ;;  %v2573_v45 = vld [vmem:[%s3661_s17 + $0x1d8] sm:$0xf] }
  0xc9   : > { %v3573_v59 = vld [vmem:[%s3661_s17 + $0x6d4] sm:$0xf]  ;;  %v2954_v0 = vor.u32 %v3509_v57, %v2951_v58  ;;  %v3341_v58 = vld [vmem:[%s3661_s17 + $0x7d8] sm:$0xf] }
  0xca   : > { %2024 = vmatpush.bf16.msra.mxu2 %v2886_v52  ;;  %1997 = vmatpush.bf16.msra.mxu0 %v2342_v63  ;;  %v2439_v52 = vld [vmem:[%s3661_s17 + $0xf0] sm:$0xf0] }
  0xcb   : > { %v3207_v60 = vld [vmem:[%s3661_s17 + $0x6f0] sm:$0xf0]  ;;  %v2442_v61 = vor.u32 %v3381_v49, %v2439_v52  ;;  %v3085_v52 = vld [vmem:[%s3661_s17 + $0x5d8] sm:$0xf] }
  0xcc   : > { %2038 = vmatpush.bf16.msra.mxu3 %v3142_v56  ;;  %2011 = vmatpush.bf16.msra.mxu1 %v2598_v3  ;;  %v2695_v56 = vld [vmem:[%s3661_s17 + $0x2f0] sm:$0xf0] }
  0xcd   : > { %1998 = vmatmul.bf16.vlgmr.msra.gmra.mxu0 %v3774_v16  ;;  %v2698_v63 = vor.u32 %v3445_v53, %v2695_v56  ;;  %v3373_v1 = vld [vmem:[%s3661_s17 + $0x94] sm:$0xf]  ;;  %v3546_v53 = vld [vmem:[%s3661_s17 + $0x5f4] sm:$0xf0] }
  0xce   : > { %2025 = vmatpush.bf16.msra.mxu2 %v2854_v4  ;;  %2046 = vmatpush.bf16.msrb.mxu0 %v2570_v8  ;;  %v2407_v2 = vld [vmem:[%s3661_s17 + $0xb0] sm:$0xf0]  ;;  %v3210_v4 = vor.u32 %v3573_v59, %v3207_v60  ;;  %v3610_v59 = vld [vmem:[%s3661_s17 + $0x7f4] sm:$0xf0] }
  0xcf   : > { %2012 = vmatmul.bf16.vlgmr.msra.gmra.mxu1 %v3797_v33  ;;  %v3437_v3 = vld [vmem:[%s3661_s17 + $0x294] sm:$0xf]  ;;  %v2410_v12 = vor.u32 %v3373_v1, %v2407_v2  ;;  %v3086_v2 = vor.u32 %v3546_v53, %v3085_v52 }
  0xd0   : > { %2039 = vmatpush.bf16.msra.mxu3 %v3110_v7  ;;  %2060 = vmatpush.bf16.msrb.mxu1 %v2826_v10  ;;  %v2663_v5 = vld [vmem:[%s3661_s17 + $0x2b0] sm:$0xf0]  ;;  %v1789_v21 = vpop.f32.mrf.mxu1 }
  0xd1   : > { %2026 = vmatmul.bf16.vlgmr.msra.gmra.mxu2 %v3761_v9  ;;  %v3501_v6 = vld [vmem:[%s3661_s17 + $0x494] sm:$0xf]  ;;  %v2666_v14 = vor.u32 %v3437_v3, %v2663_v5  ;;  %v2541_v3 = vld [vmem:[%s3661_s17 + $0x198] sm:$0xf] }
  0xd2   : > { %2074 = vmatpush.bf16.msrb.mxu2 %v3082_v11  ;;  %2047 = vmatpush.bf16.msrb.mxu0 %v2538_v23  ;;  %v2919_v7 = vld [vmem:[%s3661_s17 + $0x4b0] sm:$0xf0]  ;;  %v1775_v11 = vpop.f32.mrf.mxu0  ;;  %v2797_v5 = vld [vmem:[%s3661_s17 + $0x398] sm:$0xf] }
  0xd3   : > { %2040 = vmatmul.bf16.vlgmr.msra.gmra.mxu3 %v3782_v20  ;;  %v3565_v8 = vld [vmem:[%s3661_s17 + $0x694] sm:$0xf]  ;;  %v1776_v13 = vadd.f32 %v1775_v11, %v450_v62 }
  0xd4   : > { %2088 = vmatpush.bf16.msrb.mxu3 %v3338_v15  ;;  %2061 = vmatpush.bf16.msrb.mxu1 %v2794_v24  ;;  %v3175_v10 = vld [vmem:[%s3661_s17 + $0x6b0] sm:$0xf0]  ;;  %v2922_v15 = vor.u32 %v3501_v6, %v2919_v7  ;;  %v1803_v27 = vpop.f32.mrf.mxu2  ;;  %v3342_v6 = vor.u32 %v3610_v59, %v3341_v58  ;;  %v3474_v7 = vld [vmem:[%s3661_s17 + $0x3b4] sm:$0xf0] }
  0xd5   : > { %v3365_v17 = vld [vmem:[%s3661_s17 + $0x54] sm:$0xf]  ;;  %v3178_v22 = vor.u32 %v3565_v8, %v3175_v10  ;;  %v1790_v26 = vadd.f32 %v1789_v21, %v1776_v13  ;;  %v3053_v8 = vld [vmem:[%s3661_s17 + $0x598] sm:$0xf] }
  0xd6   : > { %2075 = vmatpush.bf16.msrb.mxu2 %v3050_v25  ;;  %2048 = vmatpush.bf16.msrb.mxu0 %v2506_v36  ;;  %v2375_v18 = vld [vmem:[%s3661_s17 + $0x70] sm:$0xf0]  ;;  %v1817_v44 = vpop.f32.mrf.mxu3  ;;  %v3538_v10 = vld [vmem:[%s3661_s17 + $0x5b4] sm:$0xf0] }
  0xd7   : > { %v3429_v19 = vld [vmem:[%s3661_s17 + $0x254] sm:$0xf]  ;;  %v2378_v30 = vor.u32 %v3365_v17, %v2375_v18  ;;  %v1804_v34 = vadd.f32 %v1803_v27, %v1790_v26  ;;  %v3602_v13 = vld [vmem:[%s3661_s17 + $0x7b4] sm:$0xf0]  ;;  %v2798_v17 = vor.u32 %v3474_v7, %v2797_v5  ;;  %v3054_v18 = vor.u32 %v3538_v10, %v3053_v8 }
  0xd8   : > { %2089 = vmatpush.bf16.msrb.mxu3 %v3306_v29  ;;  %2062 = vmatpush.bf16.msrb.mxu1 %v2762_v37  ;;  %v2631_v23 = vld [vmem:[%s3661_s17 + $0x270] sm:$0xf0]  ;;  %v1791_v60 = vpop.f32.mrf.mxu1  ;;  %v3402_v21 = vld [vmem:[%s3661_s17 + $0x174] sm:$0xf0] }
  0xd9   : > { %v3493_v24 = vld [vmem:[%s3661_s17 + $0x454] sm:$0xf]  ;;  %v2634_v35 = vor.u32 %v3429_v19, %v2631_v23  ;;  %v2509_v19 = vld [vmem:[%s3661_s17 + $0x158] sm:$0xf] }
  0xda   : > { %2076 = vmatpush.bf16.msrb.mxu2 %v3018_v38  ;;  %2049 = vmatpush.bf16.msrb.mxu0 %v2474_v48  ;;  %v2887_v25 = vld [vmem:[%s3661_s17 + $0x470] sm:$0xf0]  ;;  %v1818_v48 = vadd.f32 %v1817_v44, %v1804_v34  ;;  %v1777_v49 = vpop.f32.mrf.mxu0  ;;  %v3021_v26 = vld [vmem:[%s3661_s17 + $0x558] sm:$0xf] }
  0xdb   : > { %v3557_v28 = vld [vmem:[%s3661_s17 + $0x654] sm:$0xf]  ;;  %v2890_v36 = vor.u32 %v3493_v24, %v2887_v25  ;;  %v3466_v25 = vld [vmem:[%s3661_s17 + $0x374] sm:$0xf0] }
  0xdc   : > { %2090 = vmatpush.bf16.msrb.mxu3 %v3274_v42  ;;  %2063 = vmatpush.bf16.msrb.mxu1 %v2730_v50  ;;  %v3143_v29 = vld [vmem:[%s3661_s17 + $0x670] sm:$0xf0]  ;;  %2214 = vst [vmem:[%s4112_s15] sm:$0xff] %v1818_v48  ;;  %v3530_v27 = vld [vmem:[%s3661_s17 + $0x574] sm:$0xf0] }
  0xdd   : > { %v3357_v31 = vld [vmem:[%s3661_s17 + $0x14] sm:$0xf]  ;;  %v3146_v40 = vor.u32 %v3557_v28, %v3143_v29  ;;  %v3277_v28 = vld [vmem:[%s3661_s17 + $0x758] sm:$0xf]  ;;  %v3022_v34 = vor.u32 %v3530_v27, %v3021_v26 }
  0xde   : > { %2077 = vmatpush.bf16.msrb.mxu2 %v2986_v51  ;;  %2050 = vmatpush.bf16.msrb.mxu0 %v2442_v61  ;;  %v2343_v32 = vld [vmem:[%s3661_s17 + $0x30] sm:$0xf0]  ;;  %v3482_v51 = vld [vmem:[%s3661_s17 + $0x3f4] sm:$0xf0] }
  0xdf   : > { %v3421_v37 = vld [vmem:[%s3661_s17 + $0x214] sm:$0xf]  ;;  %v2346_v50 = vor.u32 %v3357_v31, %v2343_v32  ;;  %v2830_v1 = vor.u32 %v3482_v51, %v2829_v47  ;;  %v3594_v29 = vld [vmem:[%s3661_s17 + $0x774] sm:$0xf0] }
  0xe0   : > { %2091 = vmatpush.bf16.msrb.mxu3 %v3242_v55  ;;  %2064 = vmatpush.bf16.msrb.mxu1 %v2698_v63  ;;  %v2599_v38 = vld [vmem:[%s3661_s17 + $0x230] sm:$0xf0]  ;;  %v1778_v55 = vadd.f32 %v1777_v49, %v450_v62  ;;  %v2574_v63 = vor.u32 %v3418_v46, %v2573_v45  ;;  %v1805_v62 = vpop.f32.mrf.mxu2  ;;  %v2477_v31 = vld [vmem:[%s3661_s17 + $0x118] sm:$0xf] }
  0xe1   : > { %v3485_v39 = vld [vmem:[%s3661_s17 + $0x414] sm:$0xf]  ;;  %v2602_v56 = vor.u32 %v3421_v37, %v2599_v38  ;;  %v451_v37 = vperm.slane %v4074_v54, 1  ;;  %v3278_v38 = vor.u32 %v3594_v29, %v3277_v28  ;;  %v2445_v48 = vld [vmem:[%s3661_s17 + $0xd8] sm:$0xf] }
  0xe2   : > { %2078 = vmatpush.bf16.msrb.mxu2 %v2954_v0  ;;  %2051 = vmatpush.bf16.msrb.mxu0 %v2410_v12  ;;  %v2855_v41 = vld [vmem:[%s3661_s17 + $0x430] sm:$0xf0]  ;;  %v1792_v0 = vadd.f32 %v1791_v60, %v1778_v55  ;;  %v3309_v12 = vld [vmem:[%s3661_s17 + $0x798] sm:$0xf] }
  0xe3   : > { %v3549_v42 = vld [vmem:[%s3661_s17 + $0x614] sm:$0xf]  ;;  %v2858_v57 = vor.u32 %v3485_v39, %v2855_v41  ;;  %v3310_v24 = vor.u32 %v3602_v13, %v3309_v12  ;;  %v3458_v39 = vld [vmem:[%s3661_s17 + $0x334] sm:$0xf0] }
  0xe4   : > { %2092 = vmatpush.bf16.msrb.mxu3 %v3210_v4  ;;  %2065 = vmatpush.bf16.msrb.mxu1 %v2666_v14  ;;  %v3111_v43 = vld [vmem:[%s3661_s17 + $0x630] sm:$0xf0]  ;;  %v3410_v4 = vld [vmem:[%s3661_s17 + $0x1b4] sm:$0xf0]  ;;  %v1806_v11 = vadd.f32 %v1805_v62, %v1792_v0 }
  0xe5   : > { %v3114_v61 = vor.u32 %v3549_v42, %v3111_v43  ;;  %v2542_v14 = vor.u32 %v3410_v4, %v2541_v3  ;;  %v3522_v41 = vld [vmem:[%s3661_s17 + $0x534] sm:$0xf0] }
  0xe6   : > { %2079 = vmatpush.bf16.msrb.mxu2 %v2922_v15  ;;  %2052 = vmatpush.bf16.msrb.mxu0 %v2378_v30  ;;  %v1819_v15 = vpop.f32.mrf.mxu3  ;;  %v2510_v30 = vor.u32 %v3402_v21, %v2509_v19  ;;  %v3245_v42 = vld [vmem:[%s3661_s17 + $0x718] sm:$0xf] }
  0xe7   : > { %v1820_v23 = vadd.f32 %v1819_v15, %v1806_v11  ;;  %v3586_v43 = vld [vmem:[%s3661_s17 + $0x734] sm:$0xf0] }
  0xe8   : > { %2093 = vmatpush.bf16.msrb.mxu3 %v3178_v22  ;;  %2066 = vmatpush.bf16.msrb.mxu1 %v2634_v35  ;;  %v2765_v22 = vld [vmem:[%s3661_s17 + $0x358] sm:$0xf]  ;;  %v3246_v53 = vor.u32 %v3586_v43, %v3245_v42 }
  0xe9   : > { %2222 = vst [vmem:[%s4112_s15 + $0x40] sm:$0xff] %v1820_v23  ;;  %v2766_v32 = vor.u32 %v3466_v25, %v2765_v22  ;;  %v3394_v35 = vld [vmem:[%s3661_s17 + $0x134] sm:$0xf0] }
  0xea   : > { %2080 = vmatpush.bf16.msrb.mxu2 %v2890_v36  ;;  %2053 = vmatpush.bf16.msrb.mxu0 %v2346_v50  ;;  %v2733_v36 = vld [vmem:[%s3661_s17 + $0x318] sm:$0xf]  ;;  %v2478_v44 = vor.u32 %v3394_v35, %v2477_v31  ;;  %v1831_v45 = vpop.f32.mrf.mxu0 }
  0xeb   : > { %v2734_v46 = vor.u32 %v3458_v39, %v2733_v36  ;;  %v3386_v49 = vld [vmem:[%s3661_s17 + $0xf4] sm:$0xf0]  ;;  %v1832_v51 = vadd.f32 %v1831_v45, %v451_v37 }
  0xec   : > { %2094 = vmatpush.bf16.msrb.mxu3 %v3146_v40  ;;  %2067 = vmatpush.bf16.msrb.mxu1 %v2602_v56  ;;  %v2989_v40 = vld [vmem:[%s3661_s17 + $0x518] sm:$0xf]  ;;  %v1845_v52 = vpop.f32.mrf.mxu1 }
  0xed   : > { %2054 = vmatmul.bf16.vlgmr.msrb.gmra.mxu0 %v3774_v16  ;;  %v2990_v47 = vor.u32 %v3522_v41, %v2989_v40  ;;  %v2701_v50 = vld [vmem:[%s3661_s17 + $0x2d8] sm:$0xf]  ;;  %v1846_v60 = vadd.f32 %v1845_v52, %v1832_v51  ;;  %v2831_v52 = vld [vmem:[%s3661_s17 + $0x3f8] sm:$0xf0] }
  0xee   : > { %2081 = vmatpush.bf16.msrb.mxu2 %v2858_v57  ;;  %2102 = vmatpush.bf16.msra.mxu0 %v2574_v63  ;;  %v3450_v55 = vld [vmem:[%s3661_s17 + $0x2f4] sm:$0xf0] }
  0xef   : > { %2068 = vmatmul.bf16.vlgmr.msrb.gmra.mxu1 %v3797_v33  ;;  %v2957_v56 = vld [vmem:[%s3661_s17 + $0x4d8] sm:$0xf]  ;;  %v2702_v63 = vor.u32 %v3450_v55, %v2701_v50  ;;  %v3478_v50 = vld [vmem:[%s3661_s17 + $0x3dc] sm:$0xf] }
  0xf0   : > { %2095 = vmatpush.bf16.msrb.mxu3 %v3114_v61  ;;  %2116 = vmatpush.bf16.msra.mxu1 %v2830_v1  ;;  %v3514_v57 = vld [vmem:[%s3661_s17 + $0x4f4] sm:$0xf0]  ;;  %v2446_v61 = vor.u32 %v3386_v49, %v2445_v48  ;;  %v3414_v48 = vld [vmem:[%s3661_s17 + $0x1dc] sm:$0xf] }
  0xf1   : > { %2082 = vmatmul.bf16.vlgmr.msrb.gmra.mxu2 %v3761_v9  ;;  %v3213_v58 = vld [vmem:[%s3661_s17 + $0x6d8] sm:$0xf]  ;;  %v2958_v0 = vor.u32 %v3514_v57, %v2957_v56  ;;  %v2575_v49 = vld [vmem:[%s3661_s17 + $0x1f8] sm:$0xf0] }
  0xf2   : > { %2130 = vmatpush.bf16.msra.mxu2 %v3086_v2  ;;  %2103 = vmatpush.bf16.msra.mxu0 %v2542_v14  ;;  %v3578_v59 = vld [vmem:[%s3661_s17 + $0x6f4] sm:$0xf0]  ;;  %v3087_v55 = vld [vmem:[%s3661_s17 + $0x5f8] sm:$0xf0] }
  0xf3   : > { %2096 = vmatmul.bf16.vlgmr.msrb.gmra.mxu3 %v3782_v20  ;;  %v2413_v62 = vld [vmem:[%s3661_s17 + $0x98] sm:$0xf]  ;;  %v3214_v4 = vor.u32 %v3578_v59, %v3213_v58  ;;  %v3606_v59 = vld [vmem:[%s3661_s17 + $0x7dc] sm:$0xf] }
  0xf4   : > { %2144 = vmatpush.bf16.msra.mxu3 %v3342_v6  ;;  %2117 = vmatpush.bf16.msra.mxu1 %v2798_v17  ;;  %v3378_v1 = vld [vmem:[%s3661_s17 + $0xb4] sm:$0xf0]  ;;  %v1859_v3 = vpop.f32.mrf.mxu2  ;;  %v1833_v17 = vpop.f32.mrf.mxu0 }
  0xf5   : > { %v2669_v2 = vld [vmem:[%s3661_s17 + $0x298] sm:$0xf]  ;;  %v1860_v8 = vadd.f32 %v1859_v3, %v1846_v60  ;;  %v2414_v13 = vor.u32 %v3378_v1, %v2413_v62  ;;  %v1847_v25 = vpop.f32.mrf.mxu1  ;;  %v3343_v60 = vld [vmem:[%s3661_s17 + $0x7f8] sm:$0xf0] }
  0xf6   : > { %2131 = vmatpush.bf16.msra.mxu2 %v3054_v18  ;;  %2104 = vmatpush.bf16.msra.mxu0 %v2510_v30  ;;  %v3442_v5 = vld [vmem:[%s3661_s17 + $0x2b4] sm:$0xf0]  ;;  %v1873_v10 = vpop.f32.mrf.mxu3  ;;  %v3406_v1 = vld [vmem:[%s3661_s17 + $0x19c] sm:$0xf] }
  0xf7   : > { %v2925_v6 = vld [vmem:[%s3661_s17 + $0x498] sm:$0xf]  ;;  %v1874_v15 = vadd.f32 %v1873_v10, %v1860_v8  ;;  %v2670_v18 = vor.u32 %v3442_v5, %v2669_v2  ;;  %v2543_v2 = vld [vmem:[%s3661_s17 + $0x1b8] sm:$0xf0] }
  0xf8   : > { %2145 = vmatpush.bf16.msra.mxu3 %v3310_v24  ;;  %2118 = vmatpush.bf16.msra.mxu1 %v2766_v32  ;;  %v3506_v7 = vld [vmem:[%s3661_s17 + $0x4b4] sm:$0xf0]  ;;  %v1834_v24 = vadd.f32 %v1833_v17, %v451_v37  ;;  %v3470_v3 = vld [vmem:[%s3661_s17 + $0x39c] sm:$0xf] }
  0xf9   : > { %v3181_v11 = vld [vmem:[%s3661_s17 + $0x698] sm:$0xf]  ;;  %v2926_v19 = vor.u32 %v3506_v7, %v2925_v6  ;;  %2215 = vst [vmem:[%s4112_s15 + $0x8] sm:$0xff] %v1874_v15  ;;  %v2799_v5 = vld [vmem:[%s3661_s17 + $0x3b8] sm:$0xf0] }
  0xfa   : > { %2132 = vmatpush.bf16.msra.mxu2 %v3022_v34  ;;  %2105 = vmatpush.bf16.msra.mxu0 %v2478_v44  ;;  %v3570_v12 = vld [vmem:[%s3661_s17 + $0x6b4] sm:$0xf0]  ;;  %v1848_v31 = vadd.f32 %v1847_v25, %v1834_v24  ;;  %v3534_v6 = vld [vmem:[%s3661_s17 + $0x59c] sm:$0xf] }
  0xfb   : > { %v2381_v14 = vld [vmem:[%s3661_s17 + $0x58] sm:$0xf]  ;;  %v3182_v26 = vor.u32 %v3570_v12, %v3181_v11  ;;  %v3055_v7 = vld [vmem:[%s3661_s17 + $0x5b8] sm:$0xf0]  ;;  %v2546_v11 = vor.u32 %v3406_v1, %v2543_v2  ;;  %v2802_v12 = vor.u32 %v3470_v3, %v2799_v5 }
  0xfc   : > { %2146 = vmatpush.bf16.msra.mxu3 %v3278_v38  ;;  %2119 = vmatpush.bf16.msra.mxu1 %v2734_v46  ;;  %v3370_v21 = vld [vmem:[%s3661_s17 + $0x74] sm:$0xf0]  ;;  %v1861_v41 = vpop.f32.mrf.mxu2  ;;  %v3598_v8 = vld [vmem:[%s3661_s17 + $0x79c] sm:$0xf] }
  0xfd   : > { %v2637_v22 = vld [vmem:[%s3661_s17 + $0x258] sm:$0xf]  ;;  %v2382_v32 = vor.u32 %v3370_v21, %v2381_v14  ;;  %v1862_v46 = vadd.f32 %v1861_v41, %v1848_v31  ;;  %v3311_v10 = vld [vmem:[%s3661_s17 + $0x7b8] sm:$0xf0]  ;;  %v452_v31 = vperm.slane %v4074_v54, 2 }
  0xfe   : > { %2133 = vmatpush.bf16.msra.mxu2 %v2990_v47  ;;  %2106 = vmatpush.bf16.msra.mxu0 %v2446_v61  ;;  %v3434_v23 = vld [vmem:[%s3661_s17 + $0x274] sm:$0xf0]  ;;  %v1875_v47 = vpop.f32.mrf.mxu3  ;;  %v3398_v14 = vld [vmem:[%s3661_s17 + $0x15c] sm:$0xf] }
  0xff   : > { %v2893_v27 = vld [vmem:[%s3661_s17 + $0x458] sm:$0xf]  ;;  %v2638_v36 = vor.u32 %v3434_v23, %v2637_v22  ;;  %v1876_v56 = vadd.f32 %v1875_v47, %v1862_v46  ;;  %v2511_v15 = vld [vmem:[%s3661_s17 + $0x178] sm:$0xf0] }
 0x100   : > { %2147 = vmatpush.bf16.msra.mxu3 %v3246_v53  ;;  %2120 = vmatpush.bf16.msra.mxu1 %v2702_v63  ;;  %v3498_v28 = vld [vmem:[%s3661_s17 + $0x474] sm:$0xf0]  ;;  %v3542_v53 = vld [vmem:[%s3661_s17 + $0x5dc] sm:$0xf]  ;;  %v2578_v63 = vor.u32 %v3414_v48, %v2575_v49  ;;  %v2514_v25 = vor.u32 %v3398_v14, %v2511_v15 }
 0x101   : > { %v3149_v29 = vld [vmem:[%s3661_s17 + $0x658] sm:$0xf]  ;;  %v2894_v37 = vor.u32 %v3498_v28, %v2893_v27  ;;  %2223 = vst [vmem:[%s4112_s15 + $0x48] sm:$0xff] %v1876_v56  ;;  %v3090_v62 = vor.u32 %v3542_v53, %v3087_v55  ;;  %v3462_v17 = vld [vmem:[%s3661_s17 + $0x35c] sm:$0xf] }
 0x102   : > { %2134 = vmatpush.bf16.msra.mxu2 %v2958_v0  ;;  %v3562_v30 = vld [vmem:[%s3661_s17 + $0x674] sm:$0xf0]  ;;  %2107 = vmatpush.bf16.msra.mxu0 %v2414_v13  ;;  %v2834_v0 = vor.u32 %v3478_v50, %v2831_v52  ;;  %v3058_v13 = vor.u32 %v3534_v6, %v3055_v7  ;;  %v3526_v21 = vld [vmem:[%s3661_s17 + $0x55c] sm:$0xf] }
 0x103   : > { %v2349_v34 = vld [vmem:[%s3661_s17 + $0x18] sm:$0xf]  ;;  %v3150_v42 = vor.u32 %v3562_v30, %v3149_v29  ;;  %v3023_v22 = vld [vmem:[%s3661_s17 + $0x578] sm:$0xf0] }
 0x104   : > { %2148 = vmatpush.bf16.msra.mxu3 %v3214_v4  ;;  %v3362_v35 = vld [vmem:[%s3661_s17 + $0x34] sm:$0xf0]  ;;  %2121 = vmatpush.bf16.msra.mxu1 %v2670_v18  ;;  %v3346_v4 = vor.u32 %v3606_v59, %v3343_v60  ;;  %v3314_v18 = vor.u32 %v3598_v8, %v3311_v10  ;;  %v3590_v23 = vld [vmem:[%s3661_s17 + $0x75c] sm:$0xf]  ;;  %v3026_v28 = vor.u32 %v3526_v21, %v3023_v22 }
 0x105   : > { %v2605_v38 = vld [vmem:[%s3661_s17 + $0x218] sm:$0xf]  ;;  %v2350_v51 = vor.u32 %v3362_v35, %v2349_v34  ;;  %v3279_v24 = vld [vmem:[%s3661_s17 + $0x778] sm:$0xf0] }
 0x106   : > { %2135 = vmatpush.bf16.msra.mxu2 %v2926_v19  ;;  %v3426_v39 = vld [vmem:[%s3661_s17 + $0x234] sm:$0xf0]  ;;  %2108 = vmatpush.bf16.msra.mxu0 %v2382_v32  ;;  %v2767_v19 = vld [vmem:[%s3661_s17 + $0x378] sm:$0xf0]  ;;  %v3282_v32 = vor.u32 %v3590_v23, %v3279_v24 }
 0x107   : > { %v2861_v40 = vld [vmem:[%s3661_s17 + $0x418] sm:$0xf]  ;;  %v2606_v57 = vor.u32 %v3426_v39, %v2605_v38  ;;  %v2770_v27 = vor.u32 %v3462_v17, %v2767_v19  ;;  %v2479_v29 = vld [vmem:[%s3661_s17 + $0x138] sm:$0xf0] }
 0x108   : > { %2149 = vmatpush.bf16.msra.mxu3 %v3182_v26  ;;  %v3490_v43 = vld [vmem:[%s3661_s17 + $0x434] sm:$0xf0]  ;;  %2122 = vmatpush.bf16.msra.mxu1 %v2638_v36  ;;  %v3390_v26 = vld [vmem:[%s3661_s17 + $0x11c] sm:$0xf] }
 0x109   : > { %v3117_v44 = vld [vmem:[%s3661_s17 + $0x618] sm:$0xf]  ;;  %v2862_v58 = vor.u32 %v3490_v43, %v2861_v40  ;;  %v3454_v30 = vld [vmem:[%s3661_s17 + $0x31c] sm:$0xf]  ;;  %v2482_v39 = vor.u32 %v3390_v26, %v2479_v29 }
 0x10a   : > { %v3554_v45 = vld [vmem:[%s3661_s17 + $0x634] sm:$0xf0]  ;;  %2136 = vmatpush.bf16.msra.mxu2 %v2894_v37  ;;  %2109 = vmatpush.bf16.msra.mxu0 %v2350_v51  ;;  %v2735_v34 = vld [vmem:[%s3661_s17 + $0x338] sm:$0xf0]  ;;  %v1887_v40 = vpop.f32.mrf.mxu0 }
 0x10b   : > { %v3118_v61 = vor.u32 %v3554_v45, %v3117_v44  ;;  %v3518_v35 = vld [vmem:[%s3661_s17 + $0x51c] sm:$0xf]  ;;  %v2738_v41 = vor.u32 %v3454_v30, %v2735_v34  ;;  %v1888_v46 = vadd.f32 %v1887_v40, %v452_v31 }
 0x10c   : > { %2150 = vmatpush.bf16.msra.mxu3 %v3150_v42  ;;  %2123 = vmatpush.bf16.msra.mxu1 %v2606_v57  ;;  %v2991_v36 = vld [vmem:[%s3661_s17 + $0x538] sm:$0xf0]  ;;  %v1901_v47 = vpop.f32.mrf.mxu1 }
 0x10d   : > { %2110 = vmatmul.bf16.vlgmr.msra.gmra.mxu0 %v3774_v16  ;;  %v3582_v37 = vld [vmem:[%s3661_s17 + $0x71c] sm:$0xf]  ;;  %v2994_v42 = vor.u32 %v3518_v35, %v2991_v36  ;;  %v1902_v55 = vadd.f32 %v1901_v47, %v1888_v46 }
 0x10e   : > { %2137 = vmatpush.bf16.msra.mxu2 %v2862_v58  ;;  %2158 = vmatpush.bf16.msrb.mxu0 %v2578_v63  ;;  %v3247_v38 = vld [vmem:[%s3661_s17 + $0x738] sm:$0xf0] }
 0x10f   : > { %2124 = vmatmul.bf16.vlgmr.msra.gmra.mxu1 %v3797_v33  ;;  %v3382_v43 = vld [vmem:[%s3661_s17 + $0xdc] sm:$0xf]  ;;  %v3250_v48 = vor.u32 %v3582_v37, %v3247_v38 }
 0x110   : > { %2151 = vmatpush.bf16.msra.mxu3 %v3118_v61  ;;  %2172 = vmatpush.bf16.msrb.mxu1 %v2834_v0  ;;  %v2447_v44 = vld [vmem:[%s3661_s17 + $0xf8] sm:$0xf0] }
 0x111   : > { %2138 = vmatmul.bf16.vlgmr.msra.gmra.mxu2 %v3761_v9  ;;  %v3446_v45 = vld [vmem:[%s3661_s17 + $0x2dc] sm:$0xf]  ;;  %v2450_v56 = vor.u32 %v3382_v43, %v2447_v44 }
 0x112   : > { %2186 = vmatpush.bf16.msrb.mxu2 %v3090_v62  ;;  %2159 = vmatpush.bf16.msrb.mxu0 %v2546_v11  ;;  %v2703_v49 = vld [vmem:[%s3661_s17 + $0x2f8] sm:$0xf0]  ;;  %v1889_v11 = vpop.f32.mrf.mxu0 }
 0x113   : > { %2152 = vmatmul.bf16.vlgmr.msra.gmra.mxu3 %v3782_v20  ;;  %v3510_v50 = vld [vmem:[%s3661_s17 + $0x4dc] sm:$0xf]  ;;  %v2706_v57 = vor.u32 %v3446_v45, %v2703_v49 }
 0x114   : > { %2200 = vmatpush.bf16.msrb.mxu3 %v3346_v4  ;;  %2173 = vmatpush.bf16.msrb.mxu1 %v2802_v12  ;;  %v2959_v51 = vld [vmem:[%s3661_s17 + $0x4f8] sm:$0xf0]  ;;  %v1915_v63 = vpop.f32.mrf.mxu2  ;;  %v1903_v19 = vpop.f32.mrf.mxu1 }
 0x115   : > { %v3574_v52 = vld [vmem:[%s3661_s17 + $0x6dc] sm:$0xf]  ;;  %v2962_v58 = vor.u32 %v3510_v50, %v2959_v51  ;;  %v1916_v3 = vadd.f32 %v1915_v63, %v1902_v55  ;;  %v454_v63 = vperm.slane %v4074_v54, 4 }
 0x116   : > { %2187 = vmatpush.bf16.msrb.mxu2 %v3058_v13  ;;  %2160 = vmatpush.bf16.msrb.mxu0 %v2514_v25  ;;  %v3215_v53 = vld [vmem:[%s3661_s17 + $0x6f8] sm:$0xf0]  ;;  %v1929_v4 = vpop.f32.mrf.mxu3 }
 0x117   : > { %v3374_v59 = vld [vmem:[%s3661_s17 + $0x9c] sm:$0xf]  ;;  %v3218_v0 = vor.u32 %v3574_v52, %v3215_v53  ;;  %v1930_v10 = vadd.f32 %v1929_v4, %v1916_v3 }
 0x118   : > { %2201 = vmatpush.bf16.msrb.mxu3 %v3314_v18  ;;  %2174 = vmatpush.bf16.msrb.mxu1 %v2770_v27  ;;  %v2415_v60 = vld [vmem:[%s3661_s17 + $0xb8] sm:$0xf0]  ;;  %v1890_v18 = vadd.f32 %v1889_v11, %v452_v31 }
 0x119   : > { %v3438_v61 = vld [vmem:[%s3661_s17 + $0x29c] sm:$0xf]  ;;  %v2418_v7 = vor.u32 %v3374_v59, %v2415_v60  ;;  %2216 = vst [vmem:[%s4112_s15 + $0x10] sm:$0xff] %v1930_v10 }
 0x11a   : > { %2188 = vmatpush.bf16.msrb.mxu2 %v3026_v28  ;;  %2161 = vmatpush.bf16.msrb.mxu0 %v2482_v39  ;;  %v2671_v62 = vld [vmem:[%s3661_s17 + $0x2b8] sm:$0xf0]  ;;  %v1904_v26 = vadd.f32 %v1903_v19, %v1890_v18 }
 0x11b   : > { %v3502_v1 = vld [vmem:[%s3661_s17 + $0x49c] sm:$0xf]  ;;  %v2674_v12 = vor.u32 %v3438_v61, %v2671_v62 }
 0x11c   : > { %2202 = vmatpush.bf16.msrb.mxu3 %v3282_v32  ;;  %2175 = vmatpush.bf16.msrb.mxu1 %v2738_v41  ;;  %v2927_v2 = vld [vmem:[%s3661_s17 + $0x4b8] sm:$0xf0]  ;;  %v1917_v34 = vpop.f32.mrf.mxu2 }
 0x11d   : > { %v3566_v5 = vld [vmem:[%s3661_s17 + $0x69c] sm:$0xf]  ;;  %v2930_v13 = vor.u32 %v3502_v1, %v2927_v2  ;;  %v1918_v39 = vadd.f32 %v1917_v34, %v1904_v26 }
 0x11e   : > { %2189 = vmatpush.bf16.msrb.mxu2 %v2994_v42  ;;  %v3183_v6 = vld [vmem:[%s3661_s17 + $0x6b8] sm:$0xf0]  ;;  %2162 = vmatpush.bf16.msrb.mxu0 %v2450_v56  ;;  %v1931_v40 = vpop.f32.mrf.mxu3 }
 0x11f   : > { %v3366_v8 = vld [vmem:[%s3661_s17 + $0x5c] sm:$0xf]  ;;  %v3186_v21 = vor.u32 %v3566_v5, %v3183_v6  ;;  %v1932_v44 = vadd.f32 %v1931_v40, %v1918_v39 }
 0x120   : > { %2203 = vmatpush.bf16.msrb.mxu3 %v3250_v48  ;;  %2176 = vmatpush.bf16.msrb.mxu1 %v2706_v57  ;;  %v2383_v14 = vld [vmem:[%s3661_s17 + $0x78] sm:$0xf0]  ;;  %v453_v48 = vperm.slane %v4074_v54, 3 }
 0x121   : > { %v3430_v15 = vld [vmem:[%s3661_s17 + $0x25c] sm:$0xf]  ;;  %v2386_v27 = vor.u32 %v3366_v8, %v2383_v14  ;;  %2224 = vst [vmem:[%s4112_s15 + $0x50] sm:$0xff] %v1932_v44 }
 0x122   : > { %2190 = vmatpush.bf16.msrb.mxu2 %v2962_v58  ;;  %v2639_v17 = vld [vmem:[%s3661_s17 + $0x278] sm:$0xf0]  ;;  %2163 = vmatpush.bf16.msrb.mxu0 %v2418_v7 }
 0x123   : > { %v3494_v22 = vld [vmem:[%s3661_s17 + $0x45c] sm:$0xf]  ;;  %v2642_v28 = vor.u32 %v3430_v15, %v2639_v17  ;;  %v455_v17 = vperm.slane %v4074_v54, 5 }
 0x124   : > { %2204 = vmatpush.bf16.msrb.mxu3 %v3218_v0  ;;  %v2895_v23 = vld [vmem:[%s3661_s17 + $0x478] sm:$0xf0]  ;;  %2177 = vmatpush.bf16.msrb.mxu1 %v2674_v12 }
 0x125   : > { %v3558_v24 = vld [vmem:[%s3661_s17 + $0x65c] sm:$0xf]  ;;  %v2898_v29 = vor.u32 %v3494_v22, %v2895_v23 }
 0x126   : > { %v3151_v25 = vld [vmem:[%s3661_s17 + $0x678] sm:$0xf0]  ;;  %2191 = vmatpush.bf16.msrb.mxu2 %v2930_v13  ;;  %2164 = vmatpush.bf16.msrb.mxu0 %v2386_v27 }
 0x127   : > { %v3358_v30 = vld [vmem:[%s3661_s17 + $0x1c] sm:$0xf]  ;;  %v3154_v35 = vor.u32 %v3558_v24, %v3151_v25 }
 0x128   : > { %v2351_v31 = vld [vmem:[%s3661_s17 + $0x38] sm:$0xf0]  ;;  %2205 = vmatpush.bf16.msrb.mxu3 %v3186_v21  ;;  %2178 = vmatpush.bf16.msrb.mxu1 %v2642_v28 }
 0x129   : > { %v3422_v32 = vld [vmem:[%s3661_s17 + $0x21c] sm:$0xf]  ;;  %v2354_v43 = vor.u32 %v3358_v30, %v2351_v31 }
 0x12a   : > { %v2607_v36 = vld [vmem:[%s3661_s17 + $0x238] sm:$0xf0]  ;;  %2192 = vmatpush.bf16.msrb.mxu2 %v2898_v29  ;;  %v1943_v49 = vpop.f32.mrf.mxu0 }
 0x12b   : > { %v3486_v37 = vld [vmem:[%s3661_s17 + $0x41c] sm:$0xf]  ;;  %v2610_v45 = vor.u32 %v3422_v32, %v2607_v36  ;;  %2165 = vmatpush.bf16.msrb.mxu0 %v2354_v43  ;;  %v1944_v50 = vadd.f32 %v1943_v49, %v453_v48  ;;  %v456_v36 = vperm.slane %v4074_v54, 6 }
 0x12c   : > { %v2863_v38 = vld [vmem:[%s3661_s17 + $0x438] sm:$0xf0]  ;;  %2206 = vmatpush.bf16.msrb.mxu3 %v3154_v35  ;;  %v1957_v51 = vpop.f32.mrf.mxu1 }
 0x12d   : > { %v3550_v41 = vld [vmem:[%s3661_s17 + $0x61c] sm:$0xf]  ;;  %v2866_v46 = vor.u32 %v3486_v37, %v2863_v38  ;;  %2179 = vmatpush.bf16.msrb.mxu1 %v2610_v45  ;;  %v1958_v52 = vadd.f32 %v1957_v51, %v1944_v50 }
 0x12e   : > { %v3119_v42 = vld [vmem:[%s3661_s17 + $0x638] sm:$0xf0]  ;;  %2166 = vmatmul.bf16.vlgmr.msrb.gmra.mxu0 %v3774_v16 }
 0x12f   : > { %v3122_v47 = vor.u32 %v3550_v41, %v3119_v42  ;;  %2193 = vmatpush.bf16.msrb.mxu2 %v2866_v46 }
 0x130   : > { %2180 = vmatmul.bf16.vlgmr.msrb.gmra.mxu1 %v3797_v33 }
 0x131   : > { %2207 = vmatpush.bf16.msrb.mxu3 %v3122_v47 }
 0x132   : > { %2194 = vmatmul.bf16.vlgmr.msrb.gmra.mxu2 %v3761_v9  ;;  %v1945_v58 = vpop.f32.mrf.mxu0 }
 0x133   : > { %v1946_v16 = vadd.f32 %v1945_v58, %v453_v48 }
 0x134   : > { %2208 = vmatmul.bf16.vlgmr.msrb.gmra.mxu3 %v3782_v20  ;;  %v1971_v53 = vpop.f32.mrf.mxu2  ;;  %v1959_v59 = vpop.f32.mrf.mxu1 }
 0x135   : > { %v1972_v55 = vadd.f32 %v1971_v53, %v1958_v52  ;;  %v1960_v33 = vadd.f32 %v1959_v59, %v1946_v16  ;;  %v457_v53 = vperm.slane %v4074_v54, 7 }
 0x136   : > { %v1985_v56 = vpop.f32.mrf.mxu3 }
 0x137   : > { %v1986_v57 = vadd.f32 %v1985_v56, %v1972_v55 }
 0x139   : > { %2217 = vst [vmem:[%s4112_s15 + $0x18] sm:$0xff] %v1986_v57 }
 0x13c   : > { %v1973_v60 = vpop.f32.mrf.mxu2 }
 0x13d   : > { %v1974_v9 = vadd.f32 %v1973_v60, %v1960_v33 }
 0x13e   : > { %v1987_v20 = vpop.f32.mrf.mxu3 }
 0x13f   : > { %v1988_v61 = vadd.f32 %v1987_v20, %v1974_v9 }
 0x141   : > { %2225 = vst [vmem:[%s4112_s15 + $0x58] sm:$0xff] %v1988_v61 }
 0x14a   : > { %v1999_v0 = vpop.f32.mrf.mxu0 }
 0x14b   : > { %v2000_v62 = vadd.f32 %v1999_v0, %v454_v63 }
 0x14c   : > { %v2013_v1 = vpop.f32.mrf.mxu1 }
 0x14d   : > { %v2014_v2 = vadd.f32 %v2013_v1, %v2000_v62 }
 0x152   : > { %v2001_v7 = vpop.f32.mrf.mxu0 }
 0x153   : > { %v2002_v8 = vadd.f32 %v2001_v7, %v454_v63 }
 0x154   : > { %v2027_v3 = vpop.f32.mrf.mxu2  ;;  %v2015_v10 = vpop.f32.mrf.mxu1 }
 0x155   : > { %v2028_v4 = vadd.f32 %v2027_v3, %v2014_v2  ;;  %v2016_v11 = vadd.f32 %v2015_v10, %v2002_v8 }
 0x156   : > { %v2041_v5 = vpop.f32.mrf.mxu3 }
 0x157   : > { %v2042_v6 = vadd.f32 %v2041_v5, %v2028_v4 }
 0x159   : > { %2218 = vst [vmem:[%s4112_s15 + $0x20] sm:$0xff] %v2042_v6 }
 0x15c   : > { %v2029_v12 = vpop.f32.mrf.mxu2 }
 0x15d   : > { %v2030_v13 = vadd.f32 %v2029_v12, %v2016_v11 }
 0x15e   : > { %v2043_v14 = vpop.f32.mrf.mxu3 }
 0x15f   : > { %v2044_v15 = vadd.f32 %v2043_v14, %v2030_v13 }
 0x161   : > { %2226 = vst [vmem:[%s4112_s15 + $0x60] sm:$0xff] %v2044_v15 }
 0x16a   : > { %v2055_v18 = vpop.f32.mrf.mxu0 }
 0x16b   : > { %v2056_v19 = vadd.f32 %v2055_v18, %v455_v17 }
 0x16c   : > { %v2069_v21 = vpop.f32.mrf.mxu1 }
 0x16d   : > { %v2070_v22 = vadd.f32 %v2069_v21, %v2056_v19 }
 0x172   : > { %v2057_v27 = vpop.f32.mrf.mxu0 }
 0x173   : > { %v2058_v28 = vadd.f32 %v2057_v27, %v455_v17 }
 0x174   : > { %v2083_v23 = vpop.f32.mrf.mxu2  ;;  %v2071_v29 = vpop.f32.mrf.mxu1 }
 0x175   : > { %v2084_v24 = vadd.f32 %v2083_v23, %v2070_v22  ;;  %v2072_v30 = vadd.f32 %v2071_v29, %v2058_v28 }
 0x176   : > { %v2097_v25 = vpop.f32.mrf.mxu3 }
 0x177   : > { %v2098_v26 = vadd.f32 %v2097_v25, %v2084_v24 }
 0x179   : > { %2219 = vst [vmem:[%s4112_s15 + $0x28] sm:$0xff] %v2098_v26 }
 0x17c   : > { %v2085_v31 = vpop.f32.mrf.mxu2 }
 0x17d   : > { %v2086_v32 = vadd.f32 %v2085_v31, %v2072_v30 }
 0x17e   : > { %v2099_v34 = vpop.f32.mrf.mxu3 }
 0x17f   : > { %v2100_v35 = vadd.f32 %v2099_v34, %v2086_v32 }
 0x181   : > { %2227 = vst [vmem:[%s4112_s15 + $0x68] sm:$0xff] %v2100_v35 }
 0x18a   : > { %v2111_v37 = vpop.f32.mrf.mxu0 }
 0x18b   : > { %v2112_v38 = vadd.f32 %v2111_v37, %v456_v36 }
 0x18c   : > { %v2125_v39 = vpop.f32.mrf.mxu1 }
 0x18d   : > { %v2126_v40 = vadd.f32 %v2125_v39, %v2112_v38 }
 0x192   : > { %v2113_v45 = vpop.f32.mrf.mxu0 }
 0x193   : > { %v2114_v46 = vadd.f32 %v2113_v45, %v456_v36 }
 0x194   : > { %v2139_v41 = vpop.f32.mrf.mxu2  ;;  %v2127_v47 = vpop.f32.mrf.mxu1 }
 0x195   : > { %v2140_v42 = vadd.f32 %v2139_v41, %v2126_v40  ;;  %v2128_v48 = vadd.f32 %v2127_v47, %v2114_v46 }
 0x196   : > { %v2153_v43 = vpop.f32.mrf.mxu3 }
 0x197   : > { %v2154_v44 = vadd.f32 %v2153_v43, %v2140_v42 }
 0x199   : > { %2220 = vst [vmem:[%s4112_s15 + $0x30] sm:$0xff] %v2154_v44 }
 0x19c   : > { %v2141_v49 = vpop.f32.mrf.mxu2 }
 0x19d   : > { %v2142_v50 = vadd.f32 %v2141_v49, %v2128_v48 }
 0x19e   : > { %v2155_v51 = vpop.f32.mrf.mxu3 }
 0x19f   : > { %v2156_v52 = vadd.f32 %v2155_v51, %v2142_v50 }
 0x1a1   : > { %2228 = vst [vmem:[%s4112_s15 + $0x70] sm:$0xff] %v2156_v52 }
 0x1ab   : > { %v2167_v55 = vpop.f32.mrf.mxu0 }
 0x1ac   : > { %v2168_v56 = vadd.f32 %v2167_v55, %v457_v53 }
 0x1ad   : > { %v2181_v57 = vpop.f32.mrf.mxu1 }
 0x1ae   : > { %v2182_v58 = vadd.f32 %v2181_v57, %v2168_v56 }
 0x1b3   : > { %v2169_v60 = vpop.f32.mrf.mxu0 }
 0x1b4   : > { %v2170_v20 = vadd.f32 %v2169_v60, %v457_v53 }
 0x1b5   : > { %v2195_v16 = vpop.f32.mrf.mxu2  ;;  %v2183_v61 = vpop.f32.mrf.mxu1 }
 0x1b6   : > { %v2196_v59 = vadd.f32 %v2195_v16, %v2182_v58  ;;  %v2184_v63 = vadd.f32 %v2183_v61, %v2170_v20 }
 0x1b7   : > { %v2209_v33 = vpop.f32.mrf.mxu3 }
 0x1b8   : > { %v2210_v9 = vadd.f32 %v2209_v33, %v2196_v59 }
 0x1ba   : > { %2221 = vst [vmem:[%s4112_s15 + $0x38] sm:$0xff] %v2210_v9 }
 0x1bd   : > { %v2197_v0 = vpop.f32.mrf.mxu2 }
 0x1be   : > { %v2198_v62 = vadd.f32 %v2197_v0, %v2184_v63 }
 0x1bf   : > { %v2211_v1 = vpop.f32.mrf.mxu3 }
 0x1c0   : > { %v2212_v2 = vadd.f32 %v2211_v1, %v2198_v62 }
 0x1c2   : > { %2229 = vst [vmem:[%s4112_s15 + $0x78] sm:$0xff] %v2212_v2 }
 0x1c3 PF: > { %s13_s12 = sadd.s32 1, %s3625_s12  }
 0x1c4   : > { %p10_p4 = scmp.ge.s32.totalorder %s13_s12, 4  }
 0x1c6   :  { %12 = sbr.rel (!%p10_p4) target bundleno = 1 (0x1), region = 65 }

// kernel: deepfake_detector_forward.4
= control target key start
LH: loop header
LB: loop body
LE: loop exit
PB: predicated region body
PF: predicated region fallthrough
CT: control target
= control target key end

     0   :  { %8 = vsyncpa [#allocation3], 0  ;;  %s16563_s0 = inlined_call_operand.vmem [shape: bf16[16,2048], index: 0, kind: input, shape index: {}]   ;;  %s16564_s1 = inlined_call_operand.hbm [shape: bf16[2,2048,1024], index: 1, kind: input, shape index: {}]   ;;  %s16565_s2 = inlined_call_operand.hbm [shape: f32[2,1,1024], index: 2, kind: input, shape index: {}]   ;;  %s16566_s3 = inlined_call_operand.vmem [shape: f32[2,16,1024], index: 3, kind: output, shape index: {}]  }
   0x1   :  { %10 = vsyncpa [#allocation3 + $0x1], 0 }
   0x2   :  { %11 = vsyncpa [#allocation5], 0 }
   0x3   :  { %13 = vsyncpa [#allocation5 + $0x1], 0  ;;  %s13779_s12 = smov 0   ;;  %s13781_s13 = smov 0  }
   0x4   :  { %s13783_s14 = smov 0   ;;  %s13785_s15 = smov 0  }
   0x5 LB: > { %s13798_s16 = sadd.s32 4294967295, %s13755_s15   ;;  %s13801_s17 = sadd.s32 1, %s13755_s15   ;;  %s13755_s15 = sphi %s13785_s15, %s16574_s15   ;;  %s13751_s14 = sphi %s13783_s14, %s16573_s14   ;;  %s13747_s13 = sphi %s13781_s13, %s16572_s13   ;;  %s13743_s12 = sphi %s13779_s12, %s16571_s12  }
   0x6   : > { %s44_s18 = ssub.s32 %s13755_s15, %s13801_s17  ;;  %s47_s19 = sadd.s32 1, %s13751_s14 }
   0x7   : > { %p45_p0 = scmp.eq.s32.totalorder %s44_s18, 0  ;;  %p54_p1 = scmp.ne.s32.totalorder %s13751_s14, %s13747_s13 }
   0x8   : > { %p55_p2 = scmp.eq.s32.totalorder %s13755_s15, 0  ;;  %p60_p3 = scmp.ne.s32.totalorder %s13747_s13, %s13743_s12 }
   0x9   : > { %s13811_s20 = scalar_select %p45_p0, %s13751_s14, %s47_s19  }
   0xa   : > { %p13813_p4 = por %p55_p2, %p54_p1  ;;  %p61_p5 = scmp.eq.s32.totalorder %s13798_s16, 0 }
   0xb   : > { %p13616_p6 = scmp.lt.s32.totalorder %s13755_s15, 2  ;;  %s13824_s23 = sand.u32 1, %s13751_s14  }
   0xc   : > { %p13819_p7 = por %p61_p5, %p60_p3  ;;  %s8391_s24 = sshll.u32 %s13824_s23, 13 }
   0xd   : > { %s12563_s25 = sshll.u32 %s13755_s15, 13  ;;  %s143_s29 = scalar_lea.vmem [#allocation2], %s8391_s24 }
   0xe   : > { %s148_s28 = scalar_lea.hbm %s16564_s1, %s12563_s25  ;;  %s151_s30 = sshll.u32 %s143_s29, 4  ;;  %s152_s30 = int_to_ptr.vmem [resolvable:$true] %s151_s30 }
   0xf   : > { %s149_s4 = sshll.u32 %s148_s28, 4  ;;  %p13833_p8 = pnand %p13616_p6, %p13813_p4  ;;  %s150_s4 = int_to_ptr.hbm [resolvable:$true] %s149_s4 }
  0x10   : > { %p8396_p9 = scmp.ge.s32.totalorder %s13755_s15, 1  ;;  %s140_s6 = scalar_lea.sflag [#allocation3], %s13824_s23 }
  0x11   : > { %s13657_s7 = sshra.s32 %s150_s4, 4  ;;  %p13661_p11 = pneg %p13833_p8  ;;  %s13658_s7 = int_to_ptr.hbm [resolvable:$true] %s13657_s7 }
  0x12   : > { %s13659_s8 = scalar_lea.hbm %s13658_s7, 8192  ;;  %s13664_s11 = scalar_lea.hbm %s16564_s1, 16384 }
  0x13   : > { %p13660_p10 = scmp.ne.s32.totalorder %s13658_s7, %s13659_s8  ;;  %p13665_p0 = scmp.lt.s32.totalorder %s13658_s7, %s16564_s1 }
  0x14   : > { %p13666_p1 = scmp.lt.s32.totalorder %s13664_s11, %s13659_s8 }
  0x15   : > { %p13662_p12 = pnand %p13661_p11, %p13660_p10 }
  0x16   : > { %p13667_p2 = por %p13666_p1, %p13665_p0 }
  0x17   : > { %p13663_p13 = pneg %p13662_p12 }
  0x19   : > { %p13668_p3 = pnand %p13667_p2, %p13663_p13 }
  0x1b   : > { %13671 = shalt.err (!%p13668_p3)
}
  0x1c   : > { %s13757_s19 = smov 512   ;;  %s13758_s21 = smov 32  }
  0x1d   : > { %13612 = dma.hbm_to_vmem [thread:$0]  (!%p13833_p8), %s150_s4, 131072, %s152_s30, %s140_s6, %s13757_s19, %s13757_s19, %s13758_s21  }
  0x1e   : > { %p178_p4 = scmp.lt.s32.totalorder %s13755_s15, 3  ;;  %s8394_s24 = sshll.u32 %s13824_s23, 3 }
  0x1f   : > { %s8395_s25 = sshll.u32 %s13755_s15, 3  ;;  %s165_s7 = scalar_lea.vmem [#allocation4], %s8394_s24 }
  0x20   : > { %p13857_p5 = pnand %p8396_p9, %p178_p4  ;;  %s169_s29 = scalar_lea.hbm %s16565_s2, %s8395_s25 }
  0x21   : > { %s173_s8 = sshll.u32 %s165_s7, 4  ;;  %s171_s9 = sshll.u32 %s169_s29, 4  ;;  %s174_s8 = int_to_ptr.vmem [resolvable:$true] %s173_s8  ;;  %s172_s9 = int_to_ptr.hbm [resolvable:$true] %s171_s9 }
  0x22   : > { %s162_s10 = scalar_lea.sflag [#allocation5], %s13824_s23  ;;  %s13687_s30 = sshra.s32 %s172_s9, 4  ;;  %s13688_s30 = int_to_ptr.hbm [resolvable:$true] %s13687_s30 }
  0x23   : > { %s13689_s4 = scalar_lea.hbm %s13688_s30, 8  ;;  %s13694_s11 = scalar_lea.hbm %s16565_s2, 16 }
  0x24   : > { %p13690_p6 = scmp.ne.s32.totalorder %s13688_s30, %s13689_s4  ;;  %p13695_p12 = scmp.lt.s32.totalorder %s13688_s30, %s16565_s2 }
  0x25   : > { %p13696_p13 = scmp.lt.s32.totalorder %s13694_s11, %s13689_s4 }
  0x26   : > { %p13692_p9 = pnand %p13690_p6, %p13661_p11 }
  0x27   : > { %p13697_p0 = por %p13696_p13, %p13695_p12 }
  0x28   : > { %p13693_p10 = pneg %p13692_p9 }
  0x2a   : > { %p13698_p1 = pnand %p13697_p0, %p13693_p10 }
  0x2c   : > { %13701 = shalt.err (!%p13698_p1)
}
  0x2d   : > { %13615 = dma.hbm_to_vmem [thread:$0]  (!%p13833_p8), %s172_s9, 128, %s174_s8, %s162_s10  }
  0x2e   : > { %182 = sbr.rel (%p13857_p5) target bundleno = 2058 (0x80a), region = 32  ;;  %s184_s23 = sand.u32 (!%p13857_p5), 1, %s13747_s13  }
  0x2f   : > { %s8397_s19 = sshll.u32 (!%p13857_p5), %s184_s23, 13  ;;  %s185_s21 = scalar_lea.sflag (!%p13857_p5), [#allocation3], %s184_s23 }
  0x30   : > { %s13879_s24 = scalar_lea.vmem (!%p13857_p5), [#allocation2], %s8397_s19 }
  0x33   : > { %13734 = dma.done.wait (%p13819_p7), %s185_s21, 131072  }
  0x34   : > { %13736 = vsyncadd (%p13819_p7), %s185_s21, 4294836224  ;;  %s8398_s25 = sshll.u32 %s184_s23, 3  ;;  %s195_s27 = scalar_lea.sflag [#allocation5], %s184_s23 }
  0x35   : > { %s13885_s5 = scalar_lea.vmem [#allocation4], %s8398_s25 }
  0x36   : > { %13738 = dma.done.wait (%p13819_p7), %s195_s27, 128  }
  0x37   : > { %13740 = vsyncadd (%p13819_p7), %s195_s27, 4294967168  ;;  %v8691_v0 = vld [vmem:[%s13879_s24 + $0x1c0] sm:$0xf]  ;;  %p227_p7 = scmp.lt.s32.totalorder %s13798_s16, 1 }
  0x38   : > { %v12641_v1 = vld [vmem:[%s13879_s24 + $0x1dc] sm:$0xf0] }
  0x39   : > { %v8947_v2 = vld [vmem:[%s13879_s24 + $0x3c0] sm:$0xf]  ;;  %v8692_v3 = vor.u32 %v12641_v1, %v8691_v0  ;;  %s16576_s16 = smov (!%p227_p7, %s13798_s16), 1 }
  0x3a   : > { %v12705_v4 = vld [vmem:[%s13879_s24 + $0x3dc] sm:$0xf0]  ;;  %s12564_s7 = sshll.u32 %s16576_s16, 7 }
  0x3b   : > { %v9203_v5 = vld [vmem:[%s13879_s24 + $0x5c0] sm:$0xf]  ;;  %v8948_v7 = vor.u32 %v12705_v4, %v8947_v2  ;;  %6490 = vmatpush.bf16.msra.mxu0 %v8692_v3  ;;  %s14668_s9 = scalar_lea.vmem %s16566_s3, %s12564_s7 }
  0x3c   : > { %v12769_v6 = vld [vmem:[%s13879_s24 + $0x5dc] sm:$0xf0] }
  0x3d   : > { %v9204_v8 = vor.u32 %v12769_v6, %v9203_v5  ;;  %v9459_v9 = vld [vmem:[%s13879_s24 + $0x7c0] sm:$0xf]  ;;  %6504 = vmatpush.bf16.msra.mxu1 %v8948_v7 }
  0x3e   : > { %v12833_v10 = vld [vmem:[%s13879_s24 + $0x7dc] sm:$0xf0] }
  0x3f   : > { %v8659_v11 = vld [vmem:[%s13879_s24 + $0x180] sm:$0xf]  ;;  %v9460_v12 = vor.u32 %v12833_v10, %v9459_v9  ;;  %6518 = vmatpush.bf16.msra.mxu2 %v9204_v8 }
  0x40   : > { %v12633_v13 = vld [vmem:[%s13879_s24 + $0x19c] sm:$0xf0] }
  0x41   : > { %v8915_v14 = vld [vmem:[%s13879_s24 + $0x380] sm:$0xf]  ;;  %v8660_v16 = vor.u32 %v12633_v13, %v8659_v11  ;;  %6532 = vmatpush.bf16.msra.mxu3 %v9460_v12 }
  0x42   : > { %v12697_v15 = vld [vmem:[%s13879_s24 + $0x39c] sm:$0xf0] }
  0x43   : > { %v8916_v17 = vor.u32 %v12697_v15, %v8915_v14  ;;  %v9171_v18 = vld [vmem:[%s13879_s24 + $0x580] sm:$0xf]  ;;  %6491 = vmatpush.bf16.msra.mxu0 %v8660_v16 }
  0x44   : > { %v12761_v19 = vld [vmem:[%s13879_s24 + $0x59c] sm:$0xf0] }
  0x45   : > { %v9427_v20 = vld [vmem:[%s13879_s24 + $0x780] sm:$0xf]  ;;  %v9172_v21 = vor.u32 %v12761_v19, %v9171_v18  ;;  %6505 = vmatpush.bf16.msra.mxu1 %v8916_v17 }
  0x46   : > { %v12825_v22 = vld [vmem:[%s13879_s24 + $0x79c] sm:$0xf0] }
  0x47   : > { %v8627_v23 = vld [vmem:[%s13879_s24 + $0x140] sm:$0xf]  ;;  %v9428_v25 = vor.u32 %v12825_v22, %v9427_v20  ;;  %6519 = vmatpush.bf16.msra.mxu2 %v9172_v21 }
  0x48   : > { %v12625_v24 = vld [vmem:[%s13879_s24 + $0x15c] sm:$0xf0] }
  0x49   : > { %v8883_v26 = vld [vmem:[%s13879_s24 + $0x340] sm:$0xf]  ;;  %v8628_v29 = vor.u32 %v12625_v24, %v8627_v23  ;;  %6533 = vmatpush.bf16.msra.mxu3 %v9428_v25 }
  0x4a   : > { %v12689_v27 = vld [vmem:[%s13879_s24 + $0x35c] sm:$0xf0] }
  0x4b   : > { %v9139_v28 = vld [vmem:[%s13879_s24 + $0x540] sm:$0xf]  ;;  %v8884_v33 = vor.u32 %v12689_v27, %v8883_v26  ;;  %6492 = vmatpush.bf16.msra.mxu0 %v8628_v29 }
  0x4c   : > { %v12753_v30 = vld [vmem:[%s13879_s24 + $0x55c] sm:$0xf0] }
  0x4d   : > { %v9395_v31 = vld [vmem:[%s13879_s24 + $0x740] sm:$0xf]  ;;  %v9140_v34 = vor.u32 %v12753_v30, %v9139_v28  ;;  %6506 = vmatpush.bf16.msra.mxu1 %v8884_v33 }
  0x4e   : > { %v12817_v32 = vld [vmem:[%s13879_s24 + $0x75c] sm:$0xf0] }
  0x4f   : > { %v8595_v35 = vld [vmem:[%s13879_s24 + $0x100] sm:$0xf]  ;;  %v9396_v38 = vor.u32 %v12817_v32, %v9395_v31  ;;  %6520 = vmatpush.bf16.msra.mxu2 %v9140_v34 }
  0x50   : > { %v12617_v36 = vld [vmem:[%s13879_s24 + $0x11c] sm:$0xf0] }
  0x51   : > { %v8851_v37 = vld [vmem:[%s13879_s24 + $0x300] sm:$0xf]  ;;  %v8596_v44 = vor.u32 %v12617_v36, %v8595_v35  ;;  %6534 = vmatpush.bf16.msra.mxu3 %v9396_v38 }
  0x52   : > { %v12681_v39 = vld [vmem:[%s13879_s24 + $0x31c] sm:$0xf0] }
  0x53   : > { %v9107_v40 = vld [vmem:[%s13879_s24 + $0x500] sm:$0xf]  ;;  %v8852_v45 = vor.u32 %v12681_v39, %v8851_v37  ;;  %6493 = vmatpush.bf16.msra.mxu0 %v8596_v44 }
  0x54   : > { %v12745_v41 = vld [vmem:[%s13879_s24 + $0x51c] sm:$0xf0] }
  0x55   : > { %v9363_v42 = vld [vmem:[%s13879_s24 + $0x700] sm:$0xf]  ;;  %v9108_v46 = vor.u32 %v12745_v41, %v9107_v40  ;;  %6507 = vmatpush.bf16.msra.mxu1 %v8852_v45 }
  0x56   : > { %v12809_v43 = vld [vmem:[%s13879_s24 + $0x71c] sm:$0xf0] }
  0x57   : > { %v8563_v47 = vld [vmem:[%s13879_s24 + $0xc0] sm:$0xf]  ;;  %v9364_v50 = vor.u32 %v12809_v43, %v9363_v42  ;;  %6521 = vmatpush.bf16.msra.mxu2 %v9108_v46 }
  0x58   : > { %v12609_v48 = vld [vmem:[%s13879_s24 + $0xdc] sm:$0xf0] }
  0x59   : > { %v8819_v49 = vld [vmem:[%s13879_s24 + $0x2c0] sm:$0xf]  ;;  %v8564_v56 = vor.u32 %v12609_v48, %v8563_v47  ;;  %6535 = vmatpush.bf16.msra.mxu3 %v9364_v50 }
  0x5a   : > { %v12673_v51 = vld [vmem:[%s13879_s24 + $0x2dc] sm:$0xf0] }
  0x5b   : > { %v9075_v52 = vld [vmem:[%s13879_s24 + $0x4c0] sm:$0xf]  ;;  %v8820_v57 = vor.u32 %v12673_v51, %v8819_v49  ;;  %6494 = vmatpush.bf16.msra.mxu0 %v8564_v56 }
  0x5c   : > { %v12737_v53 = vld [vmem:[%s13879_s24 + $0x4dc] sm:$0xf0] }
  0x5d   : > { %v9331_v54 = vld [vmem:[%s13879_s24 + $0x6c0] sm:$0xf]  ;;  %v9076_v58 = vor.u32 %v12737_v53, %v9075_v52  ;;  %6508 = vmatpush.bf16.msra.mxu1 %v8820_v57 }
  0x5e   : > { %v12801_v55 = vld [vmem:[%s13879_s24 + $0x6dc] sm:$0xf0] }
  0x5f   : > { %v8531_v59 = vld [vmem:[%s13879_s24 + $0x80] sm:$0xf]  ;;  %v9332_v62 = vor.u32 %v12801_v55, %v9331_v54  ;;  %6522 = vmatpush.bf16.msra.mxu2 %v9076_v58  ;;  %v8411_v54 = vld [vmem:[%s16563_s0 + $0x8] sm:$0xf] }
  0x60   : > { %v12601_v60 = vld [vmem:[%s13879_s24 + $0x9c] sm:$0xf0] }
  0x61   : > { %v8787_v61 = vld [vmem:[%s13879_s24 + $0x280] sm:$0xf]  ;;  %v8532_v4 = vor.u32 %v12601_v60, %v8531_v59  ;;  %6536 = vmatpush.bf16.msra.mxu3 %v9332_v62  ;;  %v12574_v59 = vld [vmem:[%s16563_s0 + $0x44] sm:$0xf0] }
  0x62   : > { %v12665_v63 = vld [vmem:[%s13879_s24 + $0x29c] sm:$0xf0] }
  0x63   : > { %v9043_v0 = vld [vmem:[%s13879_s24 + $0x480] sm:$0xf]  ;;  %v8788_v5 = vor.u32 %v12665_v63, %v8787_v61  ;;  %6495 = vmatpush.bf16.msra.mxu0 %v8532_v4 }
  0x64   : > { %v12729_v1 = vld [vmem:[%s13879_s24 + $0x49c] sm:$0xf0] }
  0x65   : > { %v9299_v2 = vld [vmem:[%s13879_s24 + $0x680] sm:$0xf]  ;;  %v9044_v6 = vor.u32 %v12729_v1, %v9043_v0  ;;  %6509 = vmatpush.bf16.msra.mxu1 %v8788_v5  ;;  %v13990_v1 = vor.u32 %v12574_v59, %v8411_v54 }
  0x66   : > { %v12793_v3 = vld [vmem:[%s13879_s24 + $0x69c] sm:$0xf0] }
  0x67   : > { %v8499_v7 = vld [vmem:[%s13879_s24 + $0x40] sm:$0xf]  ;;  %v9300_v10 = vor.u32 %v12793_v3, %v9299_v2  ;;  %6523 = vmatpush.bf16.msra.mxu2 %v9044_v6  ;;  %v12565_v6 = vld [vmem:[%s16563_s0 + $0x4] sm:$0xf] }
  0x68   : > { %v12593_v8 = vld [vmem:[%s13879_s24 + $0x5c] sm:$0xf0] }
  0x69   : > { %v8755_v9 = vld [vmem:[%s13879_s24 + $0x240] sm:$0xf]  ;;  %v8500_v16 = vor.u32 %v12593_v8, %v8499_v7  ;;  %6537 = vmatpush.bf16.msra.mxu3 %v9300_v10  ;;  %v8405_v7 = vld [vmem:[%s16563_s0 + $0x40] sm:$0xf0]  ;;  %v12566_v8 = vld [vmem:[%s16563_s0 + $0xc] sm:$0xf] }
  0x6a   : > { %v12657_v11 = vld [vmem:[%s13879_s24 + $0x25c] sm:$0xf0]  ;;  %v14006_v10 = vor.u32 %v12565_v6, %v8405_v7 }
  0x6b   : > { %v9011_v12 = vld [vmem:[%s13879_s24 + $0x440] sm:$0xf]  ;;  %v8756_v19 = vor.u32 %v12657_v11, %v8755_v9  ;;  %6496 = vmatpush.bf16.msra.mxu0 %v8500_v16  ;;  %v8413_v11 = vld [vmem:[%s16563_s0 + $0x48] sm:$0xf0] }
  0x6c   : > { %v12721_v13 = vld [vmem:[%s13879_s24 + $0x45c] sm:$0xf0] }
  0x6d   : > { %v9267_v14 = vld [vmem:[%s13879_s24 + $0x640] sm:$0xf]  ;;  %v9012_v20 = vor.u32 %v12721_v13, %v9011_v12  ;;  %6510 = vmatpush.bf16.msra.mxu1 %v8756_v19 }
  0x6e   : > { %v12785_v15 = vld [vmem:[%s13879_s24 + $0x65c] sm:$0xf0] }
  0x6f   : > { %v8467_v17 = vld [vmem:[%s13879_s24] sm:$0xf]  ;;  %v9268_v24 = vor.u32 %v12785_v15, %v9267_v14  ;;  %6524 = vmatpush.bf16.msra.mxu2 %v9012_v20 }
  0x70   : > { %v12585_v18 = vld [vmem:[%s13879_s24 + $0x1c] sm:$0xf0] }
  0x71   : > { %v8723_v21 = vld [vmem:[%s13879_s24 + $0x200] sm:$0xf]  ;;  %v8468_v31 = vor.u32 %v12585_v18, %v8467_v17  ;;  %6538 = vmatpush.bf16.msra.mxu3 %v9268_v24  ;;  %v14014_v17 = vor.u32 %v12566_v8, %v8413_v11 }
  0x72   : > { %v12649_v22 = vld [vmem:[%s13879_s24 + $0x21c] sm:$0xf0] }
  0x73   : > { %v8979_v23 = vld [vmem:[%s13879_s24 + $0x400] sm:$0xf]  ;;  %v8724_v35 = vor.u32 %v12649_v22, %v8723_v21  ;;  %6497 = vmatpush.bf16.msra.mxu0 %v8468_v31 }
  0x74   : > { %v12713_v25 = vld [vmem:[%s13879_s24 + $0x41c] sm:$0xf0] }
  0x75   : > { %v9235_v26 = vld [vmem:[%s13879_s24 + $0x600] sm:$0xf]  ;;  %v8980_v36 = vor.u32 %v12713_v25, %v8979_v23  ;;  %6511 = vmatpush.bf16.msra.mxu1 %v8724_v35 }
  0x76   : > { %v12777_v27 = vld [vmem:[%s13879_s24 + $0x61c] sm:$0xf0] }
  0x77   : > { %v9715_v28 = vld [vmem:[%s13879_s24 + $0x9c0] sm:$0xf]  ;;  %v9236_v39 = vor.u32 %v12777_v27, %v9235_v26  ;;  %6525 = vmatpush.bf16.msra.mxu2 %v8980_v36 }
  0x78   : > { %v12897_v29 = vld [vmem:[%s13879_s24 + $0x9dc] sm:$0xf0]  ;;  %6512 = vmatmul.bf16.vlgmr.msra.gmra.mxu1 %v14006_v10 }
  0x79   : > { %v9971_v30 = vld [vmem:[%s13879_s24 + $0xbc0] sm:$0xf]  ;;  %v9716_v40 = vor.u32 %v12897_v29, %v9715_v28  ;;  %6539 = vmatpush.bf16.msra.mxu3 %v9236_v39 }
  0x7a   : > { %v12961_v32 = vld [vmem:[%s13879_s24 + $0xbdc] sm:$0xf0]  ;;  %6526 = vmatmul.bf16.vlgmr.msra.gmra.mxu2 %v13990_v1 }
  0x7b   : > { %v10227_v33 = vld [vmem:[%s13879_s24 + $0xdc0] sm:$0xf]  ;;  %v9972_v43 = vor.u32 %v12961_v32, %v9971_v30  ;;  %6546 = vmatpush.bf16.msrb.mxu0 %v9716_v40 }
  0x7c   : > { %v13025_v34 = vld [vmem:[%s13879_s24 + $0xddc] sm:$0xf0]  ;;  %6540 = vmatmul.bf16.vlgmr.msra.gmra.mxu3 %v14014_v17 }
  0x7d   : > { %v10483_v37 = vld [vmem:[%s13879_s24 + $0xfc0] sm:$0xf]  ;;  %v10228_v44 = vor.u32 %v13025_v34, %v10227_v33  ;;  %6560 = vmatpush.bf16.msrb.mxu1 %v9972_v43 }
  0x7e   : > { %v13089_v38 = vld [vmem:[%s13879_s24 + $0xfdc] sm:$0xf0] }
  0x7f   : > { %v9683_v41 = vld [vmem:[%s13879_s24 + $0x980] sm:$0xf]  ;;  %v10484_v48 = vor.u32 %v13089_v38, %v10483_v37  ;;  %6574 = vmatpush.bf16.msrb.mxu2 %v10228_v44 }
  0x80   : > { %v12889_v42 = vld [vmem:[%s13879_s24 + $0x99c] sm:$0xf0] }
  0x81   : > { %v9939_v45 = vld [vmem:[%s13879_s24 + $0xb80] sm:$0xf]  ;;  %v9684_v55 = vor.u32 %v12889_v42, %v9683_v41  ;;  %6588 = vmatpush.bf16.msrb.mxu3 %v10484_v48 }
  0x82   : > { %v12953_v46 = vld [vmem:[%s13879_s24 + $0xb9c] sm:$0xf0] }
  0x83   : > { %v10195_v47 = vld [vmem:[%s13879_s24 + $0xd80] sm:$0xf]  ;;  %v9940_v60 = vor.u32 %v12953_v46, %v9939_v45  ;;  %6547 = vmatpush.bf16.msrb.mxu0 %v9684_v55 }
  0x84   : > { %v13017_v49 = vld [vmem:[%s13879_s24 + $0xd9c] sm:$0xf0] }
  0x85   : > { %v10451_v50 = vld [vmem:[%s13879_s24 + $0xf80] sm:$0xf]  ;;  %v10196_v61 = vor.u32 %v13017_v49, %v10195_v47  ;;  %6561 = vmatpush.bf16.msrb.mxu1 %v9940_v60 }
  0x86   : > { %v13081_v51 = vld [vmem:[%s13879_s24 + $0xf9c] sm:$0xf0] }
  0x87   : > { %v8403_v52 = vld [vmem:[%s16563_s0] sm:$0xf]  ;;  %v10452_v2 = vor.u32 %v13081_v51, %v10451_v50  ;;  %6575 = vmatpush.bf16.msrb.mxu2 %v10196_v61 }
  0x88   : > { %v12573_v53 = vld [vmem:[%s16563_s0 + $0x3c] sm:$0xf0] }
  0x89   : > { %v9651_v56 = vld [vmem:[%s13879_s24 + $0x940] sm:$0xf]  ;;  %v13982_v58 = vor.u32 %v12573_v53, %v8403_v52  ;;  %6589 = vmatpush.bf16.msrb.mxu3 %v10452_v2 }
  0x8a   : > { %v12881_v57 = vld [vmem:[%s13879_s24 + $0x95c] sm:$0xf0] }
  0x8b   : > { %v9907_v62 = vld [vmem:[%s13879_s24 + $0xb40] sm:$0xf]  ;;  %6498 = vmatmul.bf16.vlgmr.msra.gmra.mxu0 %v13982_v58  ;;  %v9652_v9 = vor.u32 %v12881_v57, %v9651_v56 }
  0x8c   : > { %v12945_v63 = vld [vmem:[%s13879_s24 + $0xb5c] sm:$0xf0] }
  0x8d   : > { %v10163_v0 = vld [vmem:[%s13879_s24 + $0xd40] sm:$0xf]  ;;  %v9908_v12 = vor.u32 %v12945_v63, %v9907_v62  ;;  %6548 = vmatpush.bf16.msrb.mxu0 %v9652_v9 }
  0x8e   : > { %v13009_v3 = vld [vmem:[%s13879_s24 + $0xd5c] sm:$0xf0] }
  0x8f   : > { %v10419_v4 = vld [vmem:[%s13879_s24 + $0xf40] sm:$0xf]  ;;  %v10164_v13 = vor.u32 %v13009_v3, %v10163_v0  ;;  %6562 = vmatpush.bf16.msrb.mxu1 %v9908_v12 }
  0x90   : > { %v13073_v5 = vld [vmem:[%s13879_s24 + $0xf5c] sm:$0xf0] }
  0x91   : > { %v9619_v14 = vld [vmem:[%s13879_s24 + $0x900] sm:$0xf]  ;;  %v10420_v18 = vor.u32 %v13073_v5, %v10419_v4  ;;  %6576 = vmatpush.bf16.msrb.mxu2 %v10164_v13 }
  0x92   : > { %v12873_v15 = vld [vmem:[%s13879_s24 + $0x91c] sm:$0xf0] }
  0x93   : > { %v9875_v16 = vld [vmem:[%s13879_s24 + $0xb00] sm:$0xf]  ;;  %v9620_v24 = vor.u32 %v12873_v15, %v9619_v14  ;;  %6590 = vmatpush.bf16.msrb.mxu3 %v10420_v18 }
  0x94   : > { %v12937_v19 = vld [vmem:[%s13879_s24 + $0xb1c] sm:$0xf0] }
  0x95   : > { %v10131_v20 = vld [vmem:[%s13879_s24 + $0xd00] sm:$0xf]  ;;  %v9876_v25 = vor.u32 %v12937_v19, %v9875_v16  ;;  %6549 = vmatpush.bf16.msrb.mxu0 %v9620_v24 }
  0x96   : > { %v13001_v21 = vld [vmem:[%s13879_s24 + $0xd1c] sm:$0xf0] }
  0x97   : > { %v10387_v22 = vld [vmem:[%s13879_s24 + $0xf00] sm:$0xf]  ;;  %v10132_v26 = vor.u32 %v13001_v21, %v10131_v20  ;;  %6563 = vmatpush.bf16.msrb.mxu1 %v9876_v25  ;;  %v8419_v21 = vld [vmem:[%s16563_s0 + $0x10] sm:$0xf]  ;;  %v8427_v25 = vld [vmem:[%s16563_s0 + $0x18] sm:$0xf] }
  0x98   : > { %v13065_v23 = vld [vmem:[%s13879_s24 + $0xf1c] sm:$0xf0] }
  0x99   : > { %v9587_v27 = vld [vmem:[%s13879_s24 + $0x8c0] sm:$0xf]  ;;  %v10388_v30 = vor.u32 %v13065_v23, %v10387_v22  ;;  %6577 = vmatpush.bf16.msrb.mxu2 %v10132_v26  ;;  %v12575_v22 = vld [vmem:[%s16563_s0 + $0x4c] sm:$0xf0]  ;;  %v12576_v26 = vld [vmem:[%s16563_s0 + $0x54] sm:$0xf0] }
  0x9a   : > { %v12865_v28 = vld [vmem:[%s13879_s24 + $0x8dc] sm:$0xf0] }
  0x9b   : > { %v9843_v29 = vld [vmem:[%s13879_s24 + $0xac0] sm:$0xf]  ;;  %v9588_v36 = vor.u32 %v12865_v28, %v9587_v27  ;;  %6591 = vmatpush.bf16.msrb.mxu3 %v10388_v30  ;;  %v12567_v27 = vld [vmem:[%s16563_s0 + $0x14] sm:$0xf] }
  0x9c   : > { %v12929_v31 = vld [vmem:[%s13879_s24 + $0xadc] sm:$0xf0]  ;;  %v8421_v30 = vld [vmem:[%s16563_s0 + $0x50] sm:$0xf0] }
  0x9d   : > { %v10099_v32 = vld [vmem:[%s13879_s24 + $0xcc0] sm:$0xf]  ;;  %v9844_v37 = vor.u32 %v12929_v31, %v9843_v29  ;;  %6550 = vmatpush.bf16.msrb.mxu0 %v9588_v36  ;;  %v12568_v31 = vld [vmem:[%s16563_s0 + $0x1c] sm:$0xf] }
  0x9e   : > { %v12993_v33 = vld [vmem:[%s13879_s24 + $0xcdc] sm:$0xf0] }
  0x9f   : > { %v10355_v34 = vld [vmem:[%s13879_s24 + $0xec0] sm:$0xf]  ;;  %v10100_v38 = vor.u32 %v12993_v33, %v10099_v32  ;;  %6564 = vmatpush.bf16.msrb.mxu1 %v9844_v37  ;;  %v8429_v32 = vld [vmem:[%s16563_s0 + $0x58] sm:$0xf0] }
  0xa0   : > { %v13057_v35 = vld [vmem:[%s13879_s24 + $0xedc] sm:$0xf0] }
  0xa1   : > { %v9555_v39 = vld [vmem:[%s13879_s24 + $0x880] sm:$0xf]  ;;  %v10356_v42 = vor.u32 %v13057_v35, %v10355_v34  ;;  %6578 = vmatpush.bf16.msrb.mxu2 %v10100_v38 }
  0xa2   : > { %v12857_v40 = vld [vmem:[%s13879_s24 + $0x89c] sm:$0xf0] }
  0xa3   : > { %v9811_v41 = vld [vmem:[%s13879_s24 + $0xa80] sm:$0xf]  ;;  %v9556_v48 = vor.u32 %v12857_v40, %v9555_v39  ;;  %6592 = vmatpush.bf16.msrb.mxu3 %v10356_v42  ;;  %v14090_v39 = vor.u32 %v12575_v22, %v8419_v21 }
  0xa4   : > { %v12921_v43 = vld [vmem:[%s13879_s24 + $0xa9c] sm:$0xf0] }
  0xa5   : > { %v10067_v44 = vld [vmem:[%s13879_s24 + $0xc80] sm:$0xf]  ;;  %v9812_v50 = vor.u32 %v12921_v43, %v9811_v41  ;;  %6551 = vmatpush.bf16.msrb.mxu0 %v9556_v48  ;;  %v14095_v43 = vor.u32 %v12576_v26, %v8427_v25 }
  0xa6   : > { %v12985_v45 = vld [vmem:[%s13879_s24 + $0xc9c] sm:$0xf0] }
  0xa7   : > { %v10323_v46 = vld [vmem:[%s13879_s24 + $0xe80] sm:$0xf]  ;;  %v10068_v51 = vor.u32 %v12985_v45, %v10067_v44  ;;  %6565 = vmatpush.bf16.msrb.mxu1 %v9812_v50  ;;  %v14097_v44 = vor.u32 %v12567_v27, %v8421_v30 }
  0xa8   : > { %v13049_v47 = vld [vmem:[%s13879_s24 + $0xe9c] sm:$0xf0] }
  0xa9   : > { %v9523_v49 = vld [vmem:[%s13879_s24 + $0x840] sm:$0xf]  ;;  %v10324_v55 = vor.u32 %v13049_v47, %v10323_v46  ;;  %6579 = vmatpush.bf16.msrb.mxu2 %v10068_v51  ;;  %v14101_v47 = vor.u32 %v12568_v31, %v8429_v32 }
  0xaa   : > { %v12849_v52 = vld [vmem:[%s13879_s24 + $0x85c] sm:$0xf0] }
  0xab   : > { %v9779_v53 = vld [vmem:[%s13879_s24 + $0xa40] sm:$0xf]  ;;  %v9524_v63 = vor.u32 %v12849_v52, %v9523_v49  ;;  %6593 = vmatpush.bf16.msrb.mxu3 %v10324_v55 }
  0xac   : > { %v12913_v54 = vld [vmem:[%s13879_s24 + $0xa5c] sm:$0xf0] }
  0xad   : > { %v10035_v56 = vld [vmem:[%s13879_s24 + $0xc40] sm:$0xf]  ;;  %v9780_v5 = vor.u32 %v12913_v54, %v9779_v53  ;;  %6552 = vmatpush.bf16.msrb.mxu0 %v9524_v63 }
  0xae   : > { %v12977_v57 = vld [vmem:[%s13879_s24 + $0xc5c] sm:$0xf0] }
  0xaf   : > { %v10291_v59 = vld [vmem:[%s13879_s24 + $0xe40] sm:$0xf]  ;;  %v10036_v6 = vor.u32 %v12977_v57, %v10035_v56  ;;  %6566 = vmatpush.bf16.msrb.mxu1 %v9780_v5 }
  0xb0   : > { %v13041_v60 = vld [vmem:[%s13879_s24 + $0xe5c] sm:$0xf0] }
  0xb1   : > { %v9491_v61 = vld [vmem:[%s13879_s24 + $0x800] sm:$0xf]  ;;  %v10292_v11 = vor.u32 %v13041_v60, %v10291_v59  ;;  %6580 = vmatpush.bf16.msrb.mxu2 %v10036_v6 }
  0xb2   : > { %v12841_v62 = vld [vmem:[%s13879_s24 + $0x81c] sm:$0xf0] }
  0xb3   : > { %v9747_v0 = vld [vmem:[%s13879_s24 + $0xa00] sm:$0xf]  ;;  %v9492_v19 = vor.u32 %v12841_v62, %v9491_v61  ;;  %6594 = vmatpush.bf16.msrb.mxu3 %v10292_v11 }
  0xb4   : > { %v12905_v2 = vld [vmem:[%s13879_s24 + $0xa1c] sm:$0xf0] }
  0xb5   : > { %v10003_v3 = vld [vmem:[%s13879_s24 + $0xc00] sm:$0xf]  ;;  %v9748_v23 = vor.u32 %v12905_v2, %v9747_v0  ;;  %6553 = vmatpush.bf16.msrb.mxu0 %v9492_v19 }
  0xb6   : > { %v12969_v4 = vld [vmem:[%s13879_s24 + $0xc1c] sm:$0xf0] }
  0xb7   : > { %v10259_v7 = vld [vmem:[%s13879_s24 + $0xe00] sm:$0xf]  ;;  %v10004_v24 = vor.u32 %v12969_v4, %v10003_v3  ;;  %6567 = vmatpush.bf16.msrb.mxu1 %v9748_v23 }
  0xb8   : > { %v13033_v8 = vld [vmem:[%s13879_s24 + $0xe1c] sm:$0xf0]  ;;  %6554 = vmatmul.bf16.vlgmr.msrb.gmra.mxu0 %v14090_v39 }
  0xb9   : > { %v10739_v9 = vld [vmem:[%s13879_s24 + $0x11c0] sm:$0xf]  ;;  %v10260_v28 = vor.u32 %v13033_v8, %v10259_v7  ;;  %6581 = vmatpush.bf16.msrb.mxu2 %v10004_v24 }
  0xba   : > { %v13153_v12 = vld [vmem:[%s13879_s24 + $0x11dc] sm:$0xf0]  ;;  %6568 = vmatmul.bf16.vlgmr.msrb.gmra.mxu1 %v14097_v44 }
  0xbb   : > { %v10995_v13 = vld [vmem:[%s13879_s24 + $0x13c0] sm:$0xf]  ;;  %v10740_v29 = vor.u32 %v13153_v12, %v10739_v9  ;;  %6595 = vmatpush.bf16.msrb.mxu3 %v10260_v28 }
  0xbc   : > { %v13217_v14 = vld [vmem:[%s13879_s24 + $0x13dc] sm:$0xf0]  ;;  %6582 = vmatmul.bf16.vlgmr.msrb.gmra.mxu2 %v14095_v43 }
  0xbd   : > { %v11251_v15 = vld [vmem:[%s13879_s24 + $0x15c0] sm:$0xf]  ;;  %v10996_v33 = vor.u32 %v13217_v14, %v10995_v13  ;;  %6602 = vmatpush.bf16.msra.mxu0 %v10740_v29 }
  0xbe   : > { %v13281_v16 = vld [vmem:[%s13879_s24 + $0x15dc] sm:$0xf0]  ;;  %6596 = vmatmul.bf16.vlgmr.msrb.gmra.mxu3 %v14101_v47 }
  0xbf   : > { %v11507_v18 = vld [vmem:[%s13879_s24 + $0x17c0] sm:$0xf]  ;;  %v11252_v34 = vor.u32 %v13281_v16, %v11251_v15  ;;  %6616 = vmatpush.bf16.msra.mxu1 %v10996_v33 }
  0xc0   : > { %v13345_v20 = vld [vmem:[%s13879_s24 + $0x17dc] sm:$0xf0] }
  0xc1   : > { %v10707_v35 = vld [vmem:[%s13879_s24 + $0x1180] sm:$0xf]  ;;  %v11508_v38 = vor.u32 %v13345_v20, %v11507_v18  ;;  %6630 = vmatpush.bf16.msra.mxu2 %v11252_v34 }
  0xc2   : > { %v13145_v36 = vld [vmem:[%s13879_s24 + $0x119c] sm:$0xf0] }
  0xc3   : > { %v10963_v37 = vld [vmem:[%s13879_s24 + $0x1380] sm:$0xf]  ;;  %v10708_v48 = vor.u32 %v13145_v36, %v10707_v35  ;;  %6644 = vmatpush.bf16.msra.mxu3 %v11508_v38 }
  0xc4   : > { %v13209_v40 = vld [vmem:[%s13879_s24 + $0x139c] sm:$0xf0] }
  0xc5   : > { %v11219_v41 = vld [vmem:[%s13879_s24 + $0x1580] sm:$0xf]  ;;  %v10964_v49 = vor.u32 %v13209_v40, %v10963_v37  ;;  %6603 = vmatpush.bf16.msra.mxu0 %v10708_v48 }
  0xc6   : > { %v13273_v42 = vld [vmem:[%s13879_s24 + $0x159c] sm:$0xf0] }
  0xc7   : > { %v11475_v45 = vld [vmem:[%s13879_s24 + $0x1780] sm:$0xf]  ;;  %v11220_v50 = vor.u32 %v13273_v42, %v11219_v41  ;;  %6617 = vmatpush.bf16.msra.mxu1 %v10964_v49 }
  0xc8   : > { %v13337_v46 = vld [vmem:[%s13879_s24 + $0x179c] sm:$0xf0] }
  0xc9   : > { %v10675_v51 = vld [vmem:[%s13879_s24 + $0x1140] sm:$0xf]  ;;  %v11476_v54 = vor.u32 %v13337_v46, %v11475_v45  ;;  %6631 = vmatpush.bf16.msra.mxu2 %v11220_v50 }
  0xca   : > { %v13137_v52 = vld [vmem:[%s13879_s24 + $0x115c] sm:$0xf0] }
  0xcb   : > { %v10931_v53 = vld [vmem:[%s13879_s24 + $0x1340] sm:$0xf]  ;;  %v10676_v61 = vor.u32 %v13137_v52, %v10675_v51  ;;  %6645 = vmatpush.bf16.msra.mxu3 %v11476_v54 }
  0xcc   : > { %v13201_v55 = vld [vmem:[%s13879_s24 + $0x135c] sm:$0xf0] }
  0xcd   : > { %v11187_v56 = vld [vmem:[%s13879_s24 + $0x1540] sm:$0xf]  ;;  %v10932_v62 = vor.u32 %v13201_v55, %v10931_v53  ;;  %6604 = vmatpush.bf16.msra.mxu0 %v10676_v61 }
  0xce   : > { %v13265_v57 = vld [vmem:[%s13879_s24 + $0x155c] sm:$0xf0] }
  0xcf   : > { %v11443_v59 = vld [vmem:[%s13879_s24 + $0x1740] sm:$0xf]  ;;  %v11188_v63 = vor.u32 %v13265_v57, %v11187_v56  ;;  %6618 = vmatpush.bf16.msra.mxu1 %v10932_v62 }
  0xd0   : > { %v13329_v60 = vld [vmem:[%s13879_s24 + $0x175c] sm:$0xf0] }
  0xd1   : > { %v10643_v0 = vld [vmem:[%s13879_s24 + $0x1100] sm:$0xf]  ;;  %v11444_v4 = vor.u32 %v13329_v60, %v11443_v59  ;;  %6632 = vmatpush.bf16.msra.mxu2 %v11188_v63 }
  0xd2   : > { %v13129_v2 = vld [vmem:[%s13879_s24 + $0x111c] sm:$0xf0] }
  0xd3   : > { %v10899_v3 = vld [vmem:[%s13879_s24 + $0x1300] sm:$0xf]  ;;  %v10644_v11 = vor.u32 %v13129_v2, %v10643_v0  ;;  %6646 = vmatpush.bf16.msra.mxu3 %v11444_v4 }
  0xd4   : > { %v13193_v5 = vld [vmem:[%s13879_s24 + $0x131c] sm:$0xf0] }
  0xd5   : > { %v11155_v6 = vld [vmem:[%s13879_s24 + $0x1500] sm:$0xf]  ;;  %v10900_v12 = vor.u32 %v13193_v5, %v10899_v3  ;;  %6605 = vmatpush.bf16.msra.mxu0 %v10644_v11 }
  0xd6   : > { %v13257_v7 = vld [vmem:[%s13879_s24 + $0x151c] sm:$0xf0] }
  0xd7   : > { %v11411_v8 = vld [vmem:[%s13879_s24 + $0x1700] sm:$0xf]  ;;  %v11156_v13 = vor.u32 %v13257_v7, %v11155_v6  ;;  %6619 = vmatpush.bf16.msra.mxu1 %v10900_v12 }
  0xd8   : > { %v13321_v9 = vld [vmem:[%s13879_s24 + $0x171c] sm:$0xf0] }
  0xd9   : > { %v10611_v14 = vld [vmem:[%s13879_s24 + $0x10c0] sm:$0xf]  ;;  %v11412_v18 = vor.u32 %v13321_v9, %v11411_v8  ;;  %6633 = vmatpush.bf16.msra.mxu2 %v11156_v13 }
  0xda   : > { %v13121_v15 = vld [vmem:[%s13879_s24 + $0x10dc] sm:$0xf0] }
  0xdb   : > { %v10867_v16 = vld [vmem:[%s13879_s24 + $0x12c0] sm:$0xf]  ;;  %v10612_v24 = vor.u32 %v13121_v15, %v10611_v14  ;;  %6647 = vmatpush.bf16.msra.mxu3 %v11412_v18  ;;  %v12578_v18 = vld [vmem:[%s16563_s0 + $0x64] sm:$0xf0] }
  0xdc   : > { %v13185_v19 = vld [vmem:[%s13879_s24 + $0x12dc] sm:$0xf0] }
  0xdd   : > { %v11123_v20 = vld [vmem:[%s13879_s24 + $0x14c0] sm:$0xf]  ;;  %v10868_v25 = vor.u32 %v13185_v19, %v10867_v16  ;;  %6606 = vmatpush.bf16.msra.mxu0 %v10612_v24  ;;  %v8443_v16 = vld [vmem:[%s16563_s0 + $0x28] sm:$0xf]  ;;  %v12569_v19 = vld [vmem:[%s16563_s0 + $0x24] sm:$0xf] }
  0xde   : > { %v13249_v21 = vld [vmem:[%s13879_s24 + $0x14dc] sm:$0xf0]  ;;  %v8445_v24 = vld [vmem:[%s16563_s0 + $0x68] sm:$0xf0] }
  0xdf   : > { %v11379_v22 = vld [vmem:[%s13879_s24 + $0x16c0] sm:$0xf]  ;;  %v11124_v26 = vor.u32 %v13249_v21, %v11123_v20  ;;  %6620 = vmatpush.bf16.msra.mxu1 %v10868_v25 }
  0xe0   : > { %v13313_v23 = vld [vmem:[%s13879_s24 + $0x16dc] sm:$0xf0] }
  0xe1   : > { %v10579_v27 = vld [vmem:[%s13879_s24 + $0x1080] sm:$0xf]  ;;  %v11380_v30 = vor.u32 %v13313_v23, %v11379_v22  ;;  %6634 = vmatpush.bf16.msra.mxu2 %v11124_v26  ;;  %v8437_v22 = vld [vmem:[%s16563_s0 + $0x60] sm:$0xf0]  ;;  %v12570_v23 = vld [vmem:[%s16563_s0 + $0x2c] sm:$0xf] }
  0xe2   : > { %v13113_v28 = vld [vmem:[%s13879_s24 + $0x109c] sm:$0xf0] }
  0xe3   : > { %v10835_v29 = vld [vmem:[%s13879_s24 + $0x1280] sm:$0xf]  ;;  %v10580_v36 = vor.u32 %v13113_v28, %v10579_v27  ;;  %6648 = vmatpush.bf16.msra.mxu3 %v11380_v30 }
  0xe4   : > { %v13177_v31 = vld [vmem:[%s13879_s24 + $0x129c] sm:$0xf0] }
  0xe5   : > { %v11091_v32 = vld [vmem:[%s13879_s24 + $0x1480] sm:$0xf]  ;;  %v10836_v38 = vor.u32 %v13177_v31, %v10835_v29  ;;  %6607 = vmatpush.bf16.msra.mxu0 %v10580_v36  ;;  %v14197_v36 = vor.u32 %v12569_v19, %v8437_v22 }
  0xe6   : > { %v13241_v33 = vld [vmem:[%s13879_s24 + $0x149c] sm:$0xf0] }
  0xe7   : > { %v11347_v34 = vld [vmem:[%s13879_s24 + $0x1680] sm:$0xf]  ;;  %v11092_v40 = vor.u32 %v13241_v33, %v11091_v32  ;;  %6621 = vmatpush.bf16.msra.mxu1 %v10836_v38 }
  0xe8   : > { %v13305_v35 = vld [vmem:[%s13879_s24 + $0x169c] sm:$0xf0] }
  0xe9   : > { %v10547_v37 = vld [vmem:[%s13879_s24 + $0x1040] sm:$0xf]  ;;  %v11348_v46 = vor.u32 %v13305_v35, %v11347_v34  ;;  %6635 = vmatpush.bf16.msra.mxu2 %v11092_v40  ;;  %v14195_v35 = vor.u32 %v12578_v18, %v8443_v16  ;;  %v14201_v40 = vor.u32 %v12570_v23, %v8445_v24 }
  0xea   : > { %v13105_v41 = vld [vmem:[%s13879_s24 + $0x105c] sm:$0xf0] }
  0xeb   : > { %v10803_v42 = vld [vmem:[%s13879_s24 + $0x1240] sm:$0xf]  ;;  %v10548_v54 = vor.u32 %v13105_v41, %v10547_v37  ;;  %6649 = vmatpush.bf16.msra.mxu3 %v11348_v46 }
  0xec   : > { %v13169_v45 = vld [vmem:[%s13879_s24 + $0x125c] sm:$0xf0] }
  0xed   : > { %v11059_v48 = vld [vmem:[%s13879_s24 + $0x1440] sm:$0xf]  ;;  %v10804_v60 = vor.u32 %v13169_v45, %v10803_v42  ;;  %6608 = vmatpush.bf16.msra.mxu0 %v10548_v54 }
  0xee   : > { %v13233_v49 = vld [vmem:[%s13879_s24 + $0x145c] sm:$0xf0] }
  0xef   : > { %v11315_v50 = vld [vmem:[%s13879_s24 + $0x1640] sm:$0xf]  ;;  %v11060_v61 = vor.u32 %v13233_v49, %v11059_v48  ;;  %6622 = vmatpush.bf16.msra.mxu1 %v10804_v60 }
  0xf0   : > { %v13297_v51 = vld [vmem:[%s13879_s24 + $0x165c] sm:$0xf0] }
  0xf1   : > { %v10515_v52 = vld [vmem:[%s13879_s24 + $0x1000] sm:$0xf]  ;;  %v11316_v2 = vor.u32 %v13297_v51, %v11315_v50  ;;  %6636 = vmatpush.bf16.msra.mxu2 %v11060_v61 }
  0xf2   : > { %v13097_v53 = vld [vmem:[%s13879_s24 + $0x101c] sm:$0xf0] }
  0xf3   : > { %v10771_v55 = vld [vmem:[%s13879_s24 + $0x1200] sm:$0xf]  ;;  %v10516_v9 = vor.u32 %v13097_v53, %v10515_v52  ;;  %6650 = vmatpush.bf16.msra.mxu3 %v11316_v2 }
  0xf4   : > { %v13161_v56 = vld [vmem:[%s13879_s24 + $0x121c] sm:$0xf0] }
  0xf5   : > { %v11027_v57 = vld [vmem:[%s13879_s24 + $0x1400] sm:$0xf]  ;;  %v10772_v14 = vor.u32 %v13161_v56, %v10771_v55  ;;  %6609 = vmatpush.bf16.msra.mxu0 %v10516_v9 }
  0xf6   : > { %v13225_v59 = vld [vmem:[%s13879_s24 + $0x141c] sm:$0xf0] }
  0xf7   : > { %v11283_v62 = vld [vmem:[%s13879_s24 + $0x1600] sm:$0xf]  ;;  %v11028_v15 = vor.u32 %v13225_v59, %v11027_v57  ;;  %6623 = vmatpush.bf16.msra.mxu1 %v10772_v14 }
  0xf8   : > { %v13289_v63 = vld [vmem:[%s13879_s24 + $0x161c] sm:$0xf0] }
  0xf9   : > { %v11763_v0 = vld [vmem:[%s13879_s24 + $0x19c0] sm:$0xf]  ;;  %v11284_v20 = vor.u32 %v13289_v63, %v11283_v62  ;;  %6637 = vmatpush.bf16.msra.mxu2 %v11028_v15 }
  0xfa   : > { %v13409_v3 = vld [vmem:[%s13879_s24 + $0x19dc] sm:$0xf0]  ;;  %6624 = vmatmul.bf16.vlgmr.msra.gmra.mxu1 %v14197_v36 }
  0xfb   : > { %v12019_v4 = vld [vmem:[%s13879_s24 + $0x1bc0] sm:$0xf]  ;;  %v11764_v21 = vor.u32 %v13409_v3, %v11763_v0  ;;  %6651 = vmatpush.bf16.msra.mxu3 %v11284_v20 }
  0xfc   : > { %v13473_v5 = vld [vmem:[%s13879_s24 + $0x1bdc] sm:$0xf0]  ;;  %6638 = vmatmul.bf16.vlgmr.msra.gmra.mxu2 %v14195_v35 }
  0xfd   : > { %v12275_v6 = vld [vmem:[%s13879_s24 + $0x1dc0] sm:$0xf]  ;;  %v12020_v25 = vor.u32 %v13473_v5, %v12019_v4  ;;  %6658 = vmatpush.bf16.msrb.mxu0 %v11764_v21 }
  0xfe   : > { %v13537_v7 = vld [vmem:[%s13879_s24 + $0x1ddc] sm:$0xf0]  ;;  %6652 = vmatmul.bf16.vlgmr.msra.gmra.mxu3 %v14201_v40 }
  0xff   : > { %v12531_v8 = vld [vmem:[%s13879_s24 + $0x1fc0] sm:$0xf]  ;;  %v12276_v26 = vor.u32 %v13537_v7, %v12275_v6  ;;  %6672 = vmatpush.bf16.msrb.mxu1 %v12020_v25 }
 0x100   : > { %v13601_v11 = vld [vmem:[%s13879_s24 + $0x1fdc] sm:$0xf0] }
 0x101   : > { %v8435_v12 = vld [vmem:[%s16563_s0 + $0x20] sm:$0xf]  ;;  %v12532_v30 = vor.u32 %v13601_v11, %v12531_v8  ;;  %6686 = vmatpush.bf16.msrb.mxu2 %v12276_v26 }
 0x102   : > { %v12577_v13 = vld [vmem:[%s16563_s0 + $0x5c] sm:$0xf0] }
 0x103   : > { %v11731_v27 = vld [vmem:[%s13879_s24 + $0x1980] sm:$0xf]  ;;  %v14190_v31 = vor.u32 %v12577_v13, %v8435_v12  ;;  %6700 = vmatpush.bf16.msrb.mxu3 %v12532_v30 }
 0x104   : > { %v13401_v28 = vld [vmem:[%s13879_s24 + $0x199c] sm:$0xf0] }
 0x105   : > { %v11987_v29 = vld [vmem:[%s13879_s24 + $0x1b80] sm:$0xf]  ;;  %v11732_v41 = vor.u32 %v13401_v28, %v11731_v27  ;;  %6610 = vmatmul.bf16.vlgmr.msra.gmra.mxu0 %v14190_v31 }
 0x106   : > { %v13465_v32 = vld [vmem:[%s13879_s24 + $0x1b9c] sm:$0xf0] }
 0x107   : > { %v12243_v33 = vld [vmem:[%s13879_s24 + $0x1d80] sm:$0xf]  ;;  %v11988_v42 = vor.u32 %v13465_v32, %v11987_v29  ;;  %6659 = vmatpush.bf16.msrb.mxu0 %v11732_v41 }
 0x108   : > { %v13529_v34 = vld [vmem:[%s13879_s24 + $0x1d9c] sm:$0xf0] }
 0x109   : > { %v12499_v37 = vld [vmem:[%s13879_s24 + $0x1f80] sm:$0xf]  ;;  %v12244_v45 = vor.u32 %v13529_v34, %v12243_v33  ;;  %6673 = vmatpush.bf16.msrb.mxu1 %v11988_v42 }
 0x10a   : > { %v13593_v38 = vld [vmem:[%s13879_s24 + $0x1f9c] sm:$0xf0] }
 0x10b   : > { %v11699_v46 = vld [vmem:[%s13879_s24 + $0x1940] sm:$0xf]  ;;  %v12500_v50 = vor.u32 %v13593_v38, %v12499_v37  ;;  %6687 = vmatpush.bf16.msrb.mxu2 %v12244_v45 }
 0x10c   : > { %v13393_v48 = vld [vmem:[%s13879_s24 + $0x195c] sm:$0xf0] }
 0x10d   : > { %v11955_v49 = vld [vmem:[%s13879_s24 + $0x1b40] sm:$0xf]  ;;  %v11700_v56 = vor.u32 %v13393_v48, %v11699_v46  ;;  %6701 = vmatpush.bf16.msrb.mxu3 %v12500_v50 }
 0x10e   : > { %v13457_v51 = vld [vmem:[%s13879_s24 + $0x1b5c] sm:$0xf0] }
 0x10f   : > { %v12211_v52 = vld [vmem:[%s13879_s24 + $0x1d40] sm:$0xf]  ;;  %v11956_v57 = vor.u32 %v13457_v51, %v11955_v49  ;;  %6660 = vmatpush.bf16.msrb.mxu0 %v11700_v56 }
 0x110   : > { %v13521_v53 = vld [vmem:[%s13879_s24 + $0x1d5c] sm:$0xf0] }
 0x111   : > { %v12467_v54 = vld [vmem:[%s13879_s24 + $0x1f40] sm:$0xf]  ;;  %v12212_v59 = vor.u32 %v13521_v53, %v12211_v52  ;;  %6674 = vmatpush.bf16.msrb.mxu1 %v11956_v57 }
 0x112   : > { %v13585_v55 = vld [vmem:[%s13879_s24 + $0x1f5c] sm:$0xf0] }
 0x113   : > { %v11667_v60 = vld [vmem:[%s13879_s24 + $0x1900] sm:$0xf]  ;;  %v12468_v63 = vor.u32 %v13585_v55, %v12467_v54  ;;  %6688 = vmatpush.bf16.msrb.mxu2 %v12212_v59 }
 0x114   : > { %v13385_v61 = vld [vmem:[%s13879_s24 + $0x191c] sm:$0xf0] }
 0x115   : > { %v11923_v62 = vld [vmem:[%s13879_s24 + $0x1b00] sm:$0xf]  ;;  %v11668_v6 = vor.u32 %v13385_v61, %v11667_v60  ;;  %6702 = vmatpush.bf16.msrb.mxu3 %v12468_v63 }
 0x116   : > { %v13449_v0 = vld [vmem:[%s13879_s24 + $0x1b1c] sm:$0xf0] }
 0x117   : > { %v12179_v2 = vld [vmem:[%s13879_s24 + $0x1d00] sm:$0xf]  ;;  %v11924_v7 = vor.u32 %v13449_v0, %v11923_v62  ;;  %6661 = vmatpush.bf16.msrb.mxu0 %v11668_v6  ;;  %v12637_v0 = vld [vmem:[%s13879_s24 + $0x1c4] sm:$0xf] }
 0x118   : > { %v13513_v3 = vld [vmem:[%s13879_s24 + $0x1d1c] sm:$0xf0]  ;;  %v12765_v6 = vld [vmem:[%s13879_s24 + $0x5c4] sm:$0xf] }
 0x119   : > { %v12435_v4 = vld [vmem:[%s13879_s24 + $0x1f00] sm:$0xf]  ;;  %v12180_v8 = vor.u32 %v13513_v3, %v12179_v2  ;;  %6675 = vmatpush.bf16.msrb.mxu1 %v11924_v7  ;;  %v8693_v3 = vld [vmem:[%s13879_s24 + $0x1e0] sm:$0xf0] }
 0x11a   : > { %v13577_v5 = vld [vmem:[%s13879_s24 + $0x1f1c] sm:$0xf0]  ;;  %v9205_v7 = vld [vmem:[%s13879_s24 + $0x5e0] sm:$0xf0] }
 0x11b   : > { %v11635_v9 = vld [vmem:[%s13879_s24 + $0x18c0] sm:$0xf]  ;;  %v12436_v13 = vor.u32 %v13577_v5, %v12435_v4  ;;  %6689 = vmatpush.bf16.msrb.mxu2 %v12180_v8  ;;  %v12701_v4 = vld [vmem:[%s13879_s24 + $0x3c4] sm:$0xf] }
 0x11c   : > { %v13377_v11 = vld [vmem:[%s13879_s24 + $0x18dc] sm:$0xf0]  ;;  %v8949_v5 = vld [vmem:[%s13879_s24 + $0x3e0] sm:$0xf0] }
 0x11d   : > { %v11891_v12 = vld [vmem:[%s13879_s24 + $0x1ac0] sm:$0xf]  ;;  %v11636_v20 = vor.u32 %v13377_v11, %v11635_v9  ;;  %6703 = vmatpush.bf16.msrb.mxu3 %v12436_v13  ;;  %v12829_v8 = vld [vmem:[%s13879_s24 + $0x7c4] sm:$0xf]  ;;  %v12579_v13 = vld [vmem:[%s16563_s0 + $0x6c] sm:$0xf0] }
 0x11e   : > { %v13441_v14 = vld [vmem:[%s13879_s24 + $0x1adc] sm:$0xf0]  ;;  %v9461_v11 = vld [vmem:[%s13879_s24 + $0x7e0] sm:$0xf0] }
 0x11f   : > { %v12147_v15 = vld [vmem:[%s13879_s24 + $0x1cc0] sm:$0xf]  ;;  %v11892_v21 = vor.u32 %v13441_v14, %v11891_v12  ;;  %6662 = vmatpush.bf16.msrb.mxu0 %v11636_v20  ;;  %v8451_v12 = vld [vmem:[%s16563_s0 + $0x30] sm:$0xf] }
 0x120   : > { %v13505_v16 = vld [vmem:[%s13879_s24 + $0x1cdc] sm:$0xf0] }
 0x121   : > { %v12403_v18 = vld [vmem:[%s13879_s24 + $0x1ec0] sm:$0xf]  ;;  %v12148_v22 = vor.u32 %v13505_v16, %v12147_v15  ;;  %6676 = vmatpush.bf16.msrb.mxu1 %v11892_v21  ;;  %v8459_v16 = vld [vmem:[%s16563_s0 + $0x38] sm:$0xf]  ;;  %v8696_v21 = vor.u32 %v12637_v0, %v8693_v3  ;;  %v12613_v0 = vld [vmem:[%s13879_s24 + $0x104] sm:$0xf] }
 0x122   : > { %v13569_v19 = vld [vmem:[%s13879_s24 + $0x1edc] sm:$0xf0]  ;;  %v12677_v3 = vld [vmem:[%s13879_s24 + $0x304] sm:$0xf] }
 0x123   : > { %v11603_v23 = vld [vmem:[%s13879_s24 + $0x1880] sm:$0xf]  ;;  %v12404_v26 = vor.u32 %v13569_v19, %v12403_v18  ;;  %6690 = vmatpush.bf16.msrb.mxu2 %v12148_v22  ;;  %v12580_v18 = vld [vmem:[%s16563_s0 + $0x74] sm:$0xf0]  ;;  %v12571_v19 = vld [vmem:[%s16563_s0 + $0x34] sm:$0xf] }
 0x124   : > { %v13369_v24 = vld [vmem:[%s13879_s24 + $0x189c] sm:$0xf0]  ;;  %v8453_v22 = vld [vmem:[%s16563_s0 + $0x70] sm:$0xf0] }
 0x125   : > { %v11859_v25 = vld [vmem:[%s13879_s24 + $0x1a80] sm:$0xf]  ;;  %v11604_v33 = vor.u32 %v13369_v24, %v11603_v23  ;;  %6704 = vmatpush.bf16.msrb.mxu3 %v12404_v26  ;;  %v12572_v23 = vld [vmem:[%s16563_s0 + $0x3c] sm:$0xf]  ;;  %v9208_v26 = vor.u32 %v12765_v6, %v9205_v7  ;;  %v12741_v6 = vld [vmem:[%s13879_s24 + $0x504] sm:$0xf] }
 0x126   : > { %v13433_v27 = vld [vmem:[%s13879_s24 + $0x1a9c] sm:$0xf0]  ;;  %v8461_v24 = vld [vmem:[%s16563_s0 + $0x78] sm:$0xf0]  ;;  %v9109_v7 = vld [vmem:[%s13879_s24 + $0x520] sm:$0xf0] }
 0x127   : > { %v12115_v28 = vld [vmem:[%s13879_s24 + $0x1c80] sm:$0xf]  ;;  %v11860_v37 = vor.u32 %v13433_v27, %v11859_v25  ;;  %6663 = vmatpush.bf16.msrb.mxu0 %v11604_v33  ;;  %v8952_v25 = vor.u32 %v12701_v4, %v8949_v5  ;;  %v12629_v27 = vld [vmem:[%s13879_s24 + $0x184] sm:$0xf] }
 0x128   : > { %v13497_v29 = vld [vmem:[%s13879_s24 + $0x1c9c] sm:$0xf0]  ;;  %v8917_v33 = vld [vmem:[%s13879_s24 + $0x3a0] sm:$0xf0] }
 0x129   : > { %v12371_v30 = vld [vmem:[%s13879_s24 + $0x1e80] sm:$0xf]  ;;  %v12116_v38 = vor.u32 %v13497_v29, %v12115_v28  ;;  %6677 = vmatpush.bf16.msrb.mxu1 %v11860_v37  ;;  %v8661_v28 = vld [vmem:[%s13879_s24 + $0x1a0] sm:$0xf0] }
 0x12a   : > { %v13561_v32 = vld [vmem:[%s13879_s24 + $0x1e9c] sm:$0xf0]  ;;  %v12693_v29 = vld [vmem:[%s13879_s24 + $0x384] sm:$0xf] }
 0x12b   : > { %v11571_v34 = vld [vmem:[%s13879_s24 + $0x1840] sm:$0xf]  ;;  %v12372_v46 = vor.u32 %v13561_v32, %v12371_v30  ;;  %6691 = vmatpush.bf16.msrb.mxu2 %v12116_v38  ;;  %v9464_v30 = vor.u32 %v12829_v8, %v9461_v11  ;;  %v14290_v32 = vor.u32 %v12579_v13, %v8451_v12  ;;  %v9173_v37 = vld [vmem:[%s13879_s24 + $0x5a0] sm:$0xf0]  ;;  %v14295_v38 = vor.u32 %v12580_v18, %v8459_v16 }
 0x12c   : > { %v13361_v41 = vld [vmem:[%s13879_s24 + $0x185c] sm:$0xf0]  ;;  %v8853_v5 = vld [vmem:[%s13879_s24 + $0x320] sm:$0xf0]  ;;  %v9112_v13 = vor.u32 %v12741_v6, %v9109_v7 }
 0x12d   : > { %v11827_v42 = vld [vmem:[%s13879_s24 + $0x1a40] sm:$0xf]  ;;  %v11572_v54 = vor.u32 %v13361_v41, %v11571_v34  ;;  %6705 = vmatpush.bf16.msrb.mxu3 %v12372_v46  ;;  %v12757_v34 = vld [vmem:[%s13879_s24 + $0x584] sm:$0xf]  ;;  %v14297_v41 = vor.u32 %v12571_v19, %v8453_v22  ;;  %v14301_v46 = vor.u32 %v12572_v23, %v8461_v24  ;;  %v8856_v12 = vor.u32 %v12677_v3, %v8853_v5 }
 0x12e   : > { %v13425_v45 = vld [vmem:[%s13879_s24 + $0x1a5c] sm:$0xf0]  ;;  %v12805_v8 = vld [vmem:[%s13879_s24 + $0x704] sm:$0xf] }
 0x12f   : > { %v12083_v48 = vld [vmem:[%s13879_s24 + $0x1c40] sm:$0xf]  ;;  %v11828_v60 = vor.u32 %v13425_v45, %v11827_v42  ;;  %6664 = vmatpush.bf16.msrb.mxu0 %v11572_v54  ;;  %v12821_v42 = vld [vmem:[%s13879_s24 + $0x784] sm:$0xf] }
 0x130   : > { %v13489_v49 = vld [vmem:[%s13879_s24 + $0x1c5c] sm:$0xf0]  ;;  %v9429_v45 = vld [vmem:[%s13879_s24 + $0x7a0] sm:$0xf0] }
 0x131   : > { %v12339_v50 = vld [vmem:[%s13879_s24 + $0x1e40] sm:$0xf]  ;;  %v12084_v61 = vor.u32 %v13489_v49, %v12083_v48  ;;  %6678 = vmatpush.bf16.msrb.mxu1 %v11828_v60  ;;  %v8664_v48 = vor.u32 %v12629_v27, %v8661_v28  ;;  %v8920_v49 = vor.u32 %v12693_v29, %v8917_v33  ;;  %v9432_v54 = vor.u32 %v12821_v42, %v9429_v45  ;;  %v9397_v60 = vld [vmem:[%s13879_s24 + $0x760] sm:$0xf0] }
 0x132   : > { %v13553_v51 = vld [vmem:[%s13879_s24 + $0x1e5c] sm:$0xf0]  ;;  %v12669_v16 = vld [vmem:[%s13879_s24 + $0x2c4] sm:$0xf] }
 0x133   : > { %v11539_v52 = vld [vmem:[%s13879_s24 + $0x1800] sm:$0xf]  ;;  %v12340_v2 = vor.u32 %v13553_v51, %v12339_v50  ;;  %6692 = vmatpush.bf16.msrb.mxu2 %v12084_v61  ;;  %v9176_v50 = vor.u32 %v12757_v34, %v9173_v37  ;;  %v12621_v51 = vld [vmem:[%s13879_s24 + $0x144] sm:$0xf] }
 0x134   : > { %v13353_v53 = vld [vmem:[%s13879_s24 + $0x181c] sm:$0xf0]  ;;  %v8821_v19 = vld [vmem:[%s13879_s24 + $0x2e0] sm:$0xf0] }
 0x135   : > { %v11795_v55 = vld [vmem:[%s13879_s24 + $0x1a00] sm:$0xf]  ;;  %v11540_v9 = vor.u32 %v13353_v53, %v11539_v52  ;;  %6706 = vmatpush.bf16.msrb.mxu3 %v12340_v2  ;;  %v8629_v52 = vld [vmem:[%s13879_s24 + $0x160] sm:$0xf0] }
 0x136   : > { %v13417_v56 = vld [vmem:[%s13879_s24 + $0x1a1c] sm:$0xf0]  ;;  %v12685_v53 = vld [vmem:[%s13879_s24 + $0x344] sm:$0xf]  ;;  %v8632_v61 = vor.u32 %v12621_v51, %v8629_v52 }
 0x137   : > { %v12051_v57 = vld [vmem:[%s13879_s24 + $0x1c00] sm:$0xf]  ;;  %v11796_v14 = vor.u32 %v13417_v56, %v11795_v55  ;;  %6665 = vmatpush.bf16.msrb.mxu0 %v11540_v9  ;;  %v8885_v55 = vld [vmem:[%s13879_s24 + $0x360] sm:$0xf0] }
 0x138   : > { %v13481_v59 = vld [vmem:[%s13879_s24 + $0x1c1c] sm:$0xf0]  ;;  %v12749_v56 = vld [vmem:[%s13879_s24 + $0x544] sm:$0xf] }
 0x139   : > { %v12307_v62 = vld [vmem:[%s13879_s24 + $0x1e00] sm:$0xf]  ;;  %v12052_v15 = vor.u32 %v13481_v59, %v12051_v57  ;;  %6679 = vmatpush.bf16.msrb.mxu1 %v11796_v14  ;;  %v9141_v57 = vld [vmem:[%s13879_s24 + $0x560] sm:$0xf0] }
 0x13a   : > { %v13545_v63 = vld [vmem:[%s13879_s24 + $0x1e1c] sm:$0xf0]  ;;  %6666 = vmatmul.bf16.vlgmr.msrb.gmra.mxu0 %v14290_v32  ;;  %v12813_v59 = vld [vmem:[%s13879_s24 + $0x744] sm:$0xf] }
 0x13b   : > { %v12308_v20 = vor.u32 %v13545_v63, %v12307_v62  ;;  %6693 = vmatpush.bf16.msrb.mxu2 %v12052_v15  ;;  %6714 = vmatpush.bf16.msra.mxu0 %v8696_v21  ;;  %v8888_v62 = vor.u32 %v12685_v53, %v8885_v55  ;;  %v9144_v63 = vor.u32 %v12749_v56, %v9141_v57  ;;  %v8597_v2 = vld [vmem:[%s13879_s24 + $0x120] sm:$0xf0] }
 0x13c   : > { %6680 = vmatmul.bf16.vlgmr.msrb.gmra.mxu1 %v14297_v41  ;;  %v9400_v4 = vor.u32 %v12813_v59, %v9397_v60  ;;  %v9365_v9 = vld [vmem:[%s13879_s24 + $0x720] sm:$0xf0]  ;;  %v8600_v11 = vor.u32 %v12613_v0, %v8597_v2 }
 0x13d   : > { %6707 = vmatpush.bf16.msrb.mxu3 %v12308_v20  ;;  %6728 = vmatpush.bf16.msra.mxu1 %v8952_v25  ;;  %v12605_v14 = vld [vmem:[%s13879_s24 + $0xc4] sm:$0xf]  ;;  %v9368_v18 = vor.u32 %v12805_v8, %v9365_v9  ;;  %v8824_v25 = vor.u32 %v12669_v16, %v8821_v19 }
 0x13e   : > { %6694 = vmatmul.bf16.vlgmr.msrb.gmra.mxu2 %v14295_v38  ;;  %v8565_v15 = vld [vmem:[%s13879_s24 + $0xe0] sm:$0xf0] }
 0x13f   : > { %6742 = vmatpush.bf16.msra.mxu2 %v9208_v26  ;;  %6715 = vmatpush.bf16.msra.mxu0 %v8664_v48  ;;  %v12733_v20 = vld [vmem:[%s13879_s24 + $0x4c4] sm:$0xf]  ;;  %v8568_v24 = vor.u32 %v12605_v14, %v8565_v15 }
 0x140   : > { %6708 = vmatmul.bf16.vlgmr.msrb.gmra.mxu3 %v14301_v46  ;;  %v9077_v21 = vld [vmem:[%s13879_s24 + $0x4e0] sm:$0xf0] }
 0x141   : > { %6756 = vmatpush.bf16.msra.mxu3 %v9464_v30  ;;  %6729 = vmatpush.bf16.msra.mxu1 %v8920_v49  ;;  %v12797_v22 = vld [vmem:[%s13879_s24 + $0x6c4] sm:$0xf]  ;;  %v9080_v26 = vor.u32 %v12733_v20, %v9077_v21 }
 0x142   : > { %v9333_v23 = vld [vmem:[%s13879_s24 + $0x6e0] sm:$0xf0] }
 0x143   : > { %6743 = vmatpush.bf16.msra.mxu2 %v9176_v50  ;;  %6716 = vmatpush.bf16.msra.mxu0 %v8632_v61  ;;  %v12597_v27 = vld [vmem:[%s13879_s24 + $0x84] sm:$0xf]  ;;  %v9336_v30 = vor.u32 %v12797_v22, %v9333_v23 }
 0x144   : > { %v8533_v28 = vld [vmem:[%s13879_s24 + $0xa0] sm:$0xf0] }
 0x145   : > { %6757 = vmatpush.bf16.msra.mxu3 %v9432_v54  ;;  %6730 = vmatpush.bf16.msra.mxu1 %v8888_v62  ;;  %v12661_v29 = vld [vmem:[%s13879_s24 + $0x284] sm:$0xf]  ;;  %v8536_v48 = vor.u32 %v12597_v27, %v8533_v28 }
 0x146   : > { %v8789_v33 = vld [vmem:[%s13879_s24 + $0x2a0] sm:$0xf0] }
 0x147   : > { %6744 = vmatpush.bf16.msra.mxu2 %v9144_v63  ;;  %6717 = vmatpush.bf16.msra.mxu0 %v8600_v11  ;;  %v12725_v34 = vld [vmem:[%s13879_s24 + $0x484] sm:$0xf]  ;;  %v8792_v49 = vor.u32 %v12661_v29, %v8789_v33 }
 0x148   : > { %v9045_v37 = vld [vmem:[%s13879_s24 + $0x4a0] sm:$0xf0] }
 0x149   : > { %6758 = vmatpush.bf16.msra.mxu3 %v9400_v4  ;;  %6731 = vmatpush.bf16.msra.mxu1 %v8856_v12  ;;  %v12789_v42 = vld [vmem:[%s13879_s24 + $0x684] sm:$0xf]  ;;  %v9048_v50 = vor.u32 %v12725_v34, %v9045_v37 }
 0x14a   : > { %v9301_v45 = vld [vmem:[%s13879_s24 + $0x6a0] sm:$0xf0] }
 0x14b   : > { %6745 = vmatpush.bf16.msra.mxu2 %v9112_v13  ;;  %6718 = vmatpush.bf16.msra.mxu0 %v8568_v24  ;;  %v12589_v51 = vld [vmem:[%s13879_s24 + $0x44] sm:$0xf]  ;;  %v9304_v54 = vor.u32 %v12789_v42, %v9301_v45 }
 0x14c   : > { %v8501_v52 = vld [vmem:[%s13879_s24 + $0x60] sm:$0xf0] }
 0x14d   : > { %6759 = vmatpush.bf16.msra.mxu3 %v9368_v18  ;;  %6732 = vmatpush.bf16.msra.mxu1 %v8824_v25  ;;  %v12653_v53 = vld [vmem:[%s13879_s24 + $0x244] sm:$0xf]  ;;  %v8504_v61 = vor.u32 %v12589_v51, %v8501_v52 }
 0x14e   : > { %v8757_v55 = vld [vmem:[%s13879_s24 + $0x260] sm:$0xf0] }
 0x14f   : > { %6746 = vmatpush.bf16.msra.mxu2 %v9080_v26  ;;  %v12717_v56 = vld [vmem:[%s13879_s24 + $0x444] sm:$0xf]  ;;  %6719 = vmatpush.bf16.msra.mxu0 %v8536_v48  ;;  %v8760_v0 = vor.u32 %v12653_v53, %v8757_v55 }
 0x150   : > { %v9013_v57 = vld [vmem:[%s13879_s24 + $0x460] sm:$0xf0] }
 0x151   : > { %6760 = vmatpush.bf16.msra.mxu3 %v9336_v30  ;;  %v12781_v59 = vld [vmem:[%s13879_s24 + $0x644] sm:$0xf]  ;;  %6733 = vmatpush.bf16.msra.mxu1 %v8792_v49  ;;  %v9016_v2 = vor.u32 %v12717_v56, %v9013_v57 }
 0x152   : > { %v9269_v60 = vld [vmem:[%s13879_s24 + $0x660] sm:$0xf0] }
 0x153   : > { %v12581_v62 = vld [vmem:[%s13879_s24 + $0x4] sm:$0xf]  ;;  %6747 = vmatpush.bf16.msra.mxu2 %v9048_v50  ;;  %v9272_v6 = vor.u32 %v12781_v59, %v9269_v60  ;;  %6720 = vmatpush.bf16.msra.mxu0 %v8504_v61 }
 0x154   : > { %v8469_v63 = vld [vmem:[%s13879_s24 + $0x20] sm:$0xf0] }
 0x155   : > { %v12645_v3 = vld [vmem:[%s13879_s24 + $0x204] sm:$0xf]  ;;  %6761 = vmatpush.bf16.msra.mxu3 %v9304_v54  ;;  %v8472_v14 = vor.u32 %v12581_v62, %v8469_v63  ;;  %6734 = vmatpush.bf16.msra.mxu1 %v8760_v0 }
 0x156   : > { %v8725_v4 = vld [vmem:[%s13879_s24 + $0x220] sm:$0xf0] }
 0x157   : > { %v12709_v5 = vld [vmem:[%s13879_s24 + $0x404] sm:$0xf]  ;;  %6748 = vmatpush.bf16.msra.mxu2 %v9016_v2  ;;  %v8728_v19 = vor.u32 %v12645_v3, %v8725_v4  ;;  %6721 = vmatpush.bf16.msra.mxu0 %v8472_v14 }
 0x158   : > { %v8981_v7 = vld [vmem:[%s13879_s24 + $0x420] sm:$0xf0] }
 0x159   : > { %v12773_v8 = vld [vmem:[%s13879_s24 + $0x604] sm:$0xf]  ;;  %v8984_v20 = vor.u32 %v12709_v5, %v8981_v7  ;;  %6762 = vmatpush.bf16.msra.mxu3 %v9272_v6  ;;  %6735 = vmatpush.bf16.msra.mxu1 %v8728_v19 }
 0x15a   : > { %v9237_v9 = vld [vmem:[%s13879_s24 + $0x620] sm:$0xf0]  ;;  %6722 = vmatmul.bf16.vlgmr.msra.gmra.mxu0 %v13982_v58 }
 0x15b   : > { %v12893_v11 = vld [vmem:[%s13879_s24 + $0x9c4] sm:$0xf]  ;;  %v9240_v23 = vor.u32 %v12773_v8, %v9237_v9  ;;  %6749 = vmatpush.bf16.msra.mxu2 %v8984_v20 }
 0x15c   : > { %v9717_v12 = vld [vmem:[%s13879_s24 + $0x9e0] sm:$0xf0]  ;;  %6736 = vmatmul.bf16.vlgmr.msra.gmra.mxu1 %v14006_v10 }
 0x15d   : > { %v12957_v13 = vld [vmem:[%s13879_s24 + $0xbc4] sm:$0xf]  ;;  %v9720_v24 = vor.u32 %v12893_v11, %v9717_v12  ;;  %6763 = vmatpush.bf16.msra.mxu3 %v9240_v23 }
 0x15e   : > { %v9973_v15 = vld [vmem:[%s13879_s24 + $0xbe0] sm:$0xf0]  ;;  %6750 = vmatmul.bf16.vlgmr.msra.gmra.mxu2 %v13990_v1 }
 0x15f   : > { %v13021_v16 = vld [vmem:[%s13879_s24 + $0xdc4] sm:$0xf]  ;;  %v9976_v25 = vor.u32 %v12957_v13, %v9973_v15  ;;  %6770 = vmatpush.bf16.msrb.mxu0 %v9720_v24 }
 0x160   : > { %v10229_v18 = vld [vmem:[%s13879_s24 + $0xde0] sm:$0xf0]  ;;  %6764 = vmatmul.bf16.vlgmr.msra.gmra.mxu3 %v14014_v17 }
 0x161   : > { %v13085_v21 = vld [vmem:[%s13879_s24 + $0xfc4] sm:$0xf]  ;;  %v10232_v26 = vor.u32 %v13021_v16, %v10229_v18  ;;  %6784 = vmatpush.bf16.msrb.mxu1 %v9976_v25 }
 0x162   : > { %v10485_v22 = vld [vmem:[%s13879_s24 + $0xfe0] sm:$0xf0] }
 0x163   : > { %v12885_v27 = vld [vmem:[%s13879_s24 + $0x984] sm:$0xf]  ;;  %v10488_v30 = vor.u32 %v13085_v21, %v10485_v22  ;;  %6798 = vmatpush.bf16.msrb.mxu2 %v10232_v26 }
 0x164   : > { %v9685_v28 = vld [vmem:[%s13879_s24 + $0x9a0] sm:$0xf0] }
 0x165   : > { %v12949_v29 = vld [vmem:[%s13879_s24 + $0xb84] sm:$0xf]  ;;  %v9688_v48 = vor.u32 %v12885_v27, %v9685_v28  ;;  %6812 = vmatpush.bf16.msrb.mxu3 %v10488_v30 }
 0x166   : > { %v9941_v33 = vld [vmem:[%s13879_s24 + $0xba0] sm:$0xf0] }
 0x167   : > { %v13013_v34 = vld [vmem:[%s13879_s24 + $0xd84] sm:$0xf]  ;;  %v9944_v49 = vor.u32 %v12949_v29, %v9941_v33  ;;  %6771 = vmatpush.bf16.msrb.mxu0 %v9688_v48 }
 0x168   : > { %v10197_v37 = vld [vmem:[%s13879_s24 + $0xda0] sm:$0xf0] }
 0x169   : > { %v13077_v42 = vld [vmem:[%s13879_s24 + $0xf84] sm:$0xf]  ;;  %v10200_v50 = vor.u32 %v13013_v34, %v10197_v37  ;;  %6785 = vmatpush.bf16.msrb.mxu1 %v9944_v49 }
 0x16a   : > { %v10453_v45 = vld [vmem:[%s13879_s24 + $0xfa0] sm:$0xf0] }
 0x16b   : > { %v12877_v51 = vld [vmem:[%s13879_s24 + $0x944] sm:$0xf]  ;;  %v10456_v54 = vor.u32 %v13077_v42, %v10453_v45  ;;  %6799 = vmatpush.bf16.msrb.mxu2 %v10200_v50 }
 0x16c   : > { %v9653_v52 = vld [vmem:[%s13879_s24 + $0x960] sm:$0xf0] }
 0x16d   : > { %v12941_v53 = vld [vmem:[%s13879_s24 + $0xb44] sm:$0xf]  ;;  %v9656_v61 = vor.u32 %v12877_v51, %v9653_v52  ;;  %6813 = vmatpush.bf16.msrb.mxu3 %v10456_v54 }
 0x16e   : > { %v9909_v55 = vld [vmem:[%s13879_s24 + $0xb60] sm:$0xf0] }
 0x16f   : > { %v13005_v56 = vld [vmem:[%s13879_s24 + $0xd44] sm:$0xf]  ;;  %v9912_v62 = vor.u32 %v12941_v53, %v9909_v55  ;;  %6772 = vmatpush.bf16.msrb.mxu0 %v9656_v61 }
 0x170   : > { %v10165_v57 = vld [vmem:[%s13879_s24 + $0xd60] sm:$0xf0] }
 0x171   : > { %v13069_v59 = vld [vmem:[%s13879_s24 + $0xf44] sm:$0xf]  ;;  %v10168_v63 = vor.u32 %v13005_v56, %v10165_v57  ;;  %6786 = vmatpush.bf16.msrb.mxu1 %v9912_v62 }
 0x172   : > { %v10421_v60 = vld [vmem:[%s13879_s24 + $0xf60] sm:$0xf0] }
 0x173   : > { %v12869_v0 = vld [vmem:[%s13879_s24 + $0x904] sm:$0xf]  ;;  %v10424_v4 = vor.u32 %v13069_v59, %v10421_v60  ;;  %6800 = vmatpush.bf16.msrb.mxu2 %v10168_v63 }
 0x174   : > { %v9621_v2 = vld [vmem:[%s13879_s24 + $0x920] sm:$0xf0] }
 0x175   : > { %v12933_v3 = vld [vmem:[%s13879_s24 + $0xb04] sm:$0xf]  ;;  %v9624_v11 = vor.u32 %v12869_v0, %v9621_v2  ;;  %6814 = vmatpush.bf16.msrb.mxu3 %v10424_v4 }
 0x176   : > { %v9877_v5 = vld [vmem:[%s13879_s24 + $0xb20] sm:$0xf0] }
 0x177   : > { %v12997_v6 = vld [vmem:[%s13879_s24 + $0xd04] sm:$0xf]  ;;  %v9880_v12 = vor.u32 %v12933_v3, %v9877_v5  ;;  %6773 = vmatpush.bf16.msrb.mxu0 %v9624_v11 }
 0x178   : > { %v10133_v7 = vld [vmem:[%s13879_s24 + $0xd20] sm:$0xf0] }
 0x179   : > { %v13061_v8 = vld [vmem:[%s13879_s24 + $0xf04] sm:$0xf]  ;;  %v10136_v13 = vor.u32 %v12997_v6, %v10133_v7  ;;  %6787 = vmatpush.bf16.msrb.mxu1 %v9880_v12 }
 0x17a   : > { %v10389_v9 = vld [vmem:[%s13879_s24 + $0xf20] sm:$0xf0] }
 0x17b   : > { %v12861_v14 = vld [vmem:[%s13879_s24 + $0x8c4] sm:$0xf]  ;;  %v10392_v18 = vor.u32 %v13061_v8, %v10389_v9  ;;  %6801 = vmatpush.bf16.msrb.mxu2 %v10136_v13 }
 0x17c   : > { %v9589_v15 = vld [vmem:[%s13879_s24 + $0x8e0] sm:$0xf0] }
 0x17d   : > { %v12925_v16 = vld [vmem:[%s13879_s24 + $0xac4] sm:$0xf]  ;;  %v9592_v24 = vor.u32 %v12861_v14, %v9589_v15  ;;  %6815 = vmatpush.bf16.msrb.mxu3 %v10392_v18 }
 0x17e   : > { %v9845_v19 = vld [vmem:[%s13879_s24 + $0xae0] sm:$0xf0] }
 0x17f   : > { %v12989_v20 = vld [vmem:[%s13879_s24 + $0xcc4] sm:$0xf]  ;;  %v9848_v25 = vor.u32 %v12925_v16, %v9845_v19  ;;  %6774 = vmatpush.bf16.msrb.mxu0 %v9592_v24 }
 0x180   : > { %v10101_v21 = vld [vmem:[%s13879_s24 + $0xce0] sm:$0xf0] }
 0x181   : > { %v13053_v22 = vld [vmem:[%s13879_s24 + $0xec4] sm:$0xf]  ;;  %v10104_v26 = vor.u32 %v12989_v20, %v10101_v21  ;;  %6788 = vmatpush.bf16.msrb.mxu1 %v9848_v25 }
 0x182   : > { %v10357_v23 = vld [vmem:[%s13879_s24 + $0xee0] sm:$0xf0] }
 0x183   : > { %v12853_v27 = vld [vmem:[%s13879_s24 + $0x884] sm:$0xf]  ;;  %v10360_v30 = vor.u32 %v13053_v22, %v10357_v23  ;;  %6802 = vmatpush.bf16.msrb.mxu2 %v10104_v26 }
 0x184   : > { %v9557_v28 = vld [vmem:[%s13879_s24 + $0x8a0] sm:$0xf0] }
 0x185   : > { %v12917_v29 = vld [vmem:[%s13879_s24 + $0xa84] sm:$0xf]  ;;  %v9560_v48 = vor.u32 %v12853_v27, %v9557_v28  ;;  %6816 = vmatpush.bf16.msrb.mxu3 %v10360_v30 }
 0x186   : > { %v9813_v33 = vld [vmem:[%s13879_s24 + $0xaa0] sm:$0xf0] }
 0x187   : > { %v12981_v34 = vld [vmem:[%s13879_s24 + $0xc84] sm:$0xf]  ;;  %v9816_v49 = vor.u32 %v12917_v29, %v9813_v33  ;;  %6775 = vmatpush.bf16.msrb.mxu0 %v9560_v48 }
 0x188   : > { %v10069_v37 = vld [vmem:[%s13879_s24 + $0xca0] sm:$0xf0] }
 0x189   : > { %v13045_v42 = vld [vmem:[%s13879_s24 + $0xe84] sm:$0xf]  ;;  %v10072_v50 = vor.u32 %v12981_v34, %v10069_v37  ;;  %6789 = vmatpush.bf16.msrb.mxu1 %v9816_v49 }
 0x18a   : > { %v10325_v45 = vld [vmem:[%s13879_s24 + $0xea0] sm:$0xf0] }
 0x18b   : > { %v12845_v51 = vld [vmem:[%s13879_s24 + $0x844] sm:$0xf]  ;;  %v10328_v54 = vor.u32 %v13045_v42, %v10325_v45  ;;  %6803 = vmatpush.bf16.msrb.mxu2 %v10072_v50 }
 0x18c   : > { %v9525_v52 = vld [vmem:[%s13879_s24 + $0x860] sm:$0xf0] }
 0x18d   : > { %v12909_v53 = vld [vmem:[%s13879_s24 + $0xa44] sm:$0xf]  ;;  %v9528_v61 = vor.u32 %v12845_v51, %v9525_v52  ;;  %6817 = vmatpush.bf16.msrb.mxu3 %v10328_v54 }
 0x18e   : > { %v9781_v55 = vld [vmem:[%s13879_s24 + $0xa60] sm:$0xf0] }
 0x18f   : > { %v12973_v56 = vld [vmem:[%s13879_s24 + $0xc44] sm:$0xf]  ;;  %v9784_v0 = vor.u32 %v12909_v53, %v9781_v55  ;;  %6776 = vmatpush.bf16.msrb.mxu0 %v9528_v61 }
 0x190   : > { %v10037_v57 = vld [vmem:[%s13879_s24 + $0xc60] sm:$0xf0] }
 0x191   : > { %v13037_v59 = vld [vmem:[%s13879_s24 + $0xe44] sm:$0xf]  ;;  %v10040_v2 = vor.u32 %v12973_v56, %v10037_v57  ;;  %6790 = vmatpush.bf16.msrb.mxu1 %v9784_v0 }
 0x192   : > { %v10293_v60 = vld [vmem:[%s13879_s24 + $0xe60] sm:$0xf0] }
 0x193   : > { %v12837_v62 = vld [vmem:[%s13879_s24 + $0x804] sm:$0xf]  ;;  %v10296_v6 = vor.u32 %v13037_v59, %v10293_v60  ;;  %6804 = vmatpush.bf16.msrb.mxu2 %v10040_v2 }
 0x194   : > { %v9493_v63 = vld [vmem:[%s13879_s24 + $0x820] sm:$0xf0] }
 0x195   : > { %v12901_v3 = vld [vmem:[%s13879_s24 + $0xa04] sm:$0xf]  ;;  %v9496_v14 = vor.u32 %v12837_v62, %v9493_v63  ;;  %6818 = vmatpush.bf16.msrb.mxu3 %v10296_v6 }
 0x196   : > { %v9749_v4 = vld [vmem:[%s13879_s24 + $0xa20] sm:$0xf0] }
 0x197   : > { %v12965_v5 = vld [vmem:[%s13879_s24 + $0xc04] sm:$0xf]  ;;  %v9752_v19 = vor.u32 %v12901_v3, %v9749_v4  ;;  %6777 = vmatpush.bf16.msrb.mxu0 %v9496_v14 }
 0x198   : > { %v10005_v7 = vld [vmem:[%s13879_s24 + $0xc20] sm:$0xf0] }
 0x199   : > { %v13029_v8 = vld [vmem:[%s13879_s24 + $0xe04] sm:$0xf]  ;;  %v10008_v20 = vor.u32 %v12965_v5, %v10005_v7  ;;  %6791 = vmatpush.bf16.msrb.mxu1 %v9752_v19 }
 0x19a   : > { %v10261_v9 = vld [vmem:[%s13879_s24 + $0xe20] sm:$0xf0]  ;;  %6778 = vmatmul.bf16.vlgmr.msrb.gmra.mxu0 %v14090_v39 }
 0x19b   : > { %v13149_v11 = vld [vmem:[%s13879_s24 + $0x11c4] sm:$0xf]  ;;  %v10264_v23 = vor.u32 %v13029_v8, %v10261_v9  ;;  %6805 = vmatpush.bf16.msrb.mxu2 %v10008_v20 }
 0x19c   : > { %v10741_v12 = vld [vmem:[%s13879_s24 + $0x11e0] sm:$0xf0]  ;;  %6792 = vmatmul.bf16.vlgmr.msrb.gmra.mxu1 %v14097_v44 }
 0x19d   : > { %v13213_v13 = vld [vmem:[%s13879_s24 + $0x13c4] sm:$0xf]  ;;  %v10744_v24 = vor.u32 %v13149_v11, %v10741_v12  ;;  %6819 = vmatpush.bf16.msrb.mxu3 %v10264_v23 }
 0x19e   : > { %v10997_v15 = vld [vmem:[%s13879_s24 + $0x13e0] sm:$0xf0]  ;;  %6806 = vmatmul.bf16.vlgmr.msrb.gmra.mxu2 %v14095_v43 }
 0x19f   : > { %v13277_v16 = vld [vmem:[%s13879_s24 + $0x15c4] sm:$0xf]  ;;  %v11000_v25 = vor.u32 %v13213_v13, %v10997_v15  ;;  %6826 = vmatpush.bf16.msra.mxu0 %v10744_v24 }
 0x1a0   : > { %v11253_v18 = vld [vmem:[%s13879_s24 + $0x15e0] sm:$0xf0]  ;;  %6820 = vmatmul.bf16.vlgmr.msrb.gmra.mxu3 %v14101_v47 }
 0x1a1   : > { %v13341_v21 = vld [vmem:[%s13879_s24 + $0x17c4] sm:$0xf]  ;;  %v11256_v26 = vor.u32 %v13277_v16, %v11253_v18  ;;  %6840 = vmatpush.bf16.msra.mxu1 %v11000_v25  ;;  %v14469_v25 = vpop.f32.mrf.mxu1 }
 0x1a2   : > { %v11509_v22 = vld [vmem:[%s13879_s24 + $0x17e0] sm:$0xf0] }
 0x1a3   : > { %v13141_v27 = vld [vmem:[%s13879_s24 + $0x1184] sm:$0xf]  ;;  %v11512_v30 = vor.u32 %v13341_v21, %v11509_v22  ;;  %6854 = vmatpush.bf16.msra.mxu2 %v11256_v26  ;;  %v14465_v22 = vpop.f32.mrf.mxu0 }
 0x1a4   : > { %v10709_v28 = vld [vmem:[%s13879_s24 + $0x11a0] sm:$0xf0] }
 0x1a5   : > { %v13205_v29 = vld [vmem:[%s13879_s24 + $0x1384] sm:$0xf]  ;;  %v10712_v48 = vor.u32 %v13141_v27, %v10709_v28  ;;  %6868 = vmatpush.bf16.msra.mxu3 %v11512_v30 }
 0x1a6   : > { %v10965_v33 = vld [vmem:[%s13879_s24 + $0x13a0] sm:$0xf0] }
 0x1a7   : > { %v13269_v34 = vld [vmem:[%s13879_s24 + $0x1584] sm:$0xf]  ;;  %v10968_v49 = vor.u32 %v13205_v29, %v10965_v33  ;;  %6827 = vmatpush.bf16.msra.mxu0 %v10712_v48 }
 0x1a8   : > { %v11221_v37 = vld [vmem:[%s13879_s24 + $0x15a0] sm:$0xf0] }
 0x1a9   : > { %v13333_v42 = vld [vmem:[%s13879_s24 + $0x1784] sm:$0xf]  ;;  %v11224_v50 = vor.u32 %v13269_v34, %v11221_v37  ;;  %6841 = vmatpush.bf16.msra.mxu1 %v10968_v49 }
 0x1aa   : > { %v11477_v45 = vld [vmem:[%s13879_s24 + $0x17a0] sm:$0xf0] }
 0x1ab   : > { %v13133_v51 = vld [vmem:[%s13879_s24 + $0x1144] sm:$0xf]  ;;  %v11480_v54 = vor.u32 %v13333_v42, %v11477_v45  ;;  %6855 = vmatpush.bf16.msra.mxu2 %v11224_v50 }
 0x1ac   : > { %v10677_v52 = vld [vmem:[%s13879_s24 + $0x1160] sm:$0xf0] }
 0x1ad   : > { %v13197_v53 = vld [vmem:[%s13879_s24 + $0x1344] sm:$0xf]  ;;  %v10680_v61 = vor.u32 %v13133_v51, %v10677_v52  ;;  %6869 = vmatpush.bf16.msra.mxu3 %v11480_v54 }
 0x1ae   : > { %v10933_v55 = vld [vmem:[%s13879_s24 + $0x1360] sm:$0xf0] }
 0x1af   : > { %v13261_v56 = vld [vmem:[%s13879_s24 + $0x1544] sm:$0xf]  ;;  %v10936_v62 = vor.u32 %v13197_v53, %v10933_v55  ;;  %6828 = vmatpush.bf16.msra.mxu0 %v10680_v61 }
 0x1b0   : > { %v11189_v57 = vld [vmem:[%s13879_s24 + $0x1560] sm:$0xf0] }
 0x1b1   : > { %v13325_v59 = vld [vmem:[%s13879_s24 + $0x1744] sm:$0xf]  ;;  %v11192_v63 = vor.u32 %v13261_v56, %v11189_v57  ;;  %6842 = vmatpush.bf16.msra.mxu1 %v10936_v62  ;;  %v14485_v57 = vpop.f32.mrf.mxu2 }
 0x1b2   : > { %v11445_v60 = vld [vmem:[%s13879_s24 + $0x1760] sm:$0xf0] }
 0x1b3   : > { %v13125_v0 = vld [vmem:[%s13879_s24 + $0x1104] sm:$0xf]  ;;  %v11448_v4 = vor.u32 %v13325_v59, %v11445_v60  ;;  %6856 = vmatpush.bf16.msra.mxu2 %v11192_v63  ;;  %v14490_v63 = vpop.f32.mrf.mxu3 }
 0x1b4   : > { %v10645_v2 = vld [vmem:[%s13879_s24 + $0x1120] sm:$0xf0] }
 0x1b5   : > { %v13189_v3 = vld [vmem:[%s13879_s24 + $0x1304] sm:$0xf]  ;;  %v10648_v11 = vor.u32 %v13125_v0, %v10645_v2  ;;  %6870 = vmatpush.bf16.msra.mxu3 %v11448_v4 }
 0x1b6   : > { %v10901_v5 = vld [vmem:[%s13879_s24 + $0x1320] sm:$0xf0] }
 0x1b7   : > { %v13253_v6 = vld [vmem:[%s13879_s24 + $0x1504] sm:$0xf]  ;;  %v10904_v12 = vor.u32 %v13189_v3, %v10901_v5  ;;  %6829 = vmatpush.bf16.msra.mxu0 %v10648_v11 }
 0x1b8   : > { %v11157_v7 = vld [vmem:[%s13879_s24 + $0x1520] sm:$0xf0] }
 0x1b9   : > { %v13317_v8 = vld [vmem:[%s13879_s24 + $0x1704] sm:$0xf]  ;;  %v11160_v13 = vor.u32 %v13253_v6, %v11157_v7  ;;  %6843 = vmatpush.bf16.msra.mxu1 %v10904_v12  ;;  %v14497_v7 = vpop.f32.mrf.mxu0 }
 0x1ba   : > { %v11413_v9 = vld [vmem:[%s13879_s24 + $0x1720] sm:$0xf0] }
 0x1bb   : > { %v13117_v14 = vld [vmem:[%s13879_s24 + $0x10c4] sm:$0xf]  ;;  %v11416_v18 = vor.u32 %v13317_v8, %v11413_v9  ;;  %6857 = vmatpush.bf16.msra.mxu2 %v11160_v13 }
 0x1bc   : > { %v10613_v15 = vld [vmem:[%s13879_s24 + $0x10e0] sm:$0xf0] }
 0x1bd   : > { %v13181_v16 = vld [vmem:[%s13879_s24 + $0x12c4] sm:$0xf]  ;;  %v10616_v26 = vor.u32 %v13117_v14, %v10613_v15  ;;  %6871 = vmatpush.bf16.msra.mxu3 %v11416_v18  ;;  %v14502_v14 = vpop.f32.mrf.mxu1 }
 0x1be   : > { %v10869_v19 = vld [vmem:[%s13879_s24 + $0x12e0] sm:$0xf0] }
 0x1bf   : > { %v13245_v20 = vld [vmem:[%s13879_s24 + $0x14c4] sm:$0xf]  ;;  %v10872_v27 = vor.u32 %v13181_v16, %v10869_v19  ;;  %6830 = vmatpush.bf16.msra.mxu0 %v10616_v26 }
 0x1c0   : > { %v11125_v21 = vld [vmem:[%s13879_s24 + $0x14e0] sm:$0xf0] }
 0x1c1   : > { %v13309_v23 = vld [vmem:[%s13879_s24 + $0x16c4] sm:$0xf]  ;;  %v11128_v28 = vor.u32 %v13245_v20, %v11125_v21  ;;  %6844 = vmatpush.bf16.msra.mxu1 %v10872_v27 }
 0x1c2   : > { %v11381_v24 = vld [vmem:[%s13879_s24 + $0x16e0] sm:$0xf0] }
 0x1c3   : > { %v13109_v29 = vld [vmem:[%s13879_s24 + $0x1084] sm:$0xf]  ;;  %v11384_v34 = vor.u32 %v13309_v23, %v11381_v24  ;;  %6858 = vmatpush.bf16.msra.mxu2 %v11128_v28 }
 0x1c4   : > { %v10581_v30 = vld [vmem:[%s13879_s24 + $0x10a0] sm:$0xf0] }
 0x1c5   : > { %v13173_v33 = vld [vmem:[%s13879_s24 + $0x1284] sm:$0xf]  ;;  %v10584_v51 = vor.u32 %v13109_v29, %v10581_v30  ;;  %6872 = vmatpush.bf16.msra.mxu3 %v11384_v34 }
 0x1c6   : > { %v10837_v37 = vld [vmem:[%s13879_s24 + $0x12a0] sm:$0xf0] }
 0x1c7   : > { %v13237_v42 = vld [vmem:[%s13879_s24 + $0x1484] sm:$0xf]  ;;  %v10840_v52 = vor.u32 %v13173_v33, %v10837_v37  ;;  %6831 = vmatpush.bf16.msra.mxu0 %v10584_v51 }
 0x1c8   : > { %v11093_v45 = vld [vmem:[%s13879_s24 + $0x14a0] sm:$0xf0] }
 0x1c9   : > { %v13301_v48 = vld [vmem:[%s13879_s24 + $0x1684] sm:$0xf]  ;;  %v11096_v53 = vor.u32 %v13237_v42, %v11093_v45  ;;  %6845 = vmatpush.bf16.msra.mxu1 %v10840_v52 }
 0x1ca   : > { %v11349_v49 = vld [vmem:[%s13879_s24 + $0x16a0] sm:$0xf0] }
 0x1cb   : > { %v14480_v50 = vld [vmem:[%s13885_s5] sm:$0xff]  ;;  %v11352_v59 = vor.u32 %v13301_v48, %v11349_v49  ;;  %6859 = vmatpush.bf16.msra.mxu2 %v11096_v53 }
 0x1cc   : > { %v13101_v54 = vld [vmem:[%s13879_s24 + $0x1044] sm:$0xf]  ;;  %v1274_v3 = vperm.slane %v14480_v50, 0 }
 0x1cd   : > { %v10549_v55 = vld [vmem:[%s13879_s24 + $0x1060] sm:$0xf0]  ;;  %6873 = vmatpush.bf16.msra.mxu3 %v11352_v59 }
 0x1ce   : > { %v13165_v56 = vld [vmem:[%s13879_s24 + $0x1244] sm:$0xf]  ;;  %v10552_v4 = vor.u32 %v13101_v54, %v10549_v55  ;;  %v6500_v45 = vadd.f32 %v14465_v22, %v1274_v3  ;;  %v14521_v54 = vpop.f32.mrf.mxu2 }
 0x1cf   : > { %v10805_v60 = vld [vmem:[%s13879_s24 + $0x1260] sm:$0xf0] }
 0x1d0   : > { %v13229_v61 = vld [vmem:[%s13879_s24 + $0x1444] sm:$0xf]  ;;  %v10808_v8 = vor.u32 %v13165_v56, %v10805_v60  ;;  %6832 = vmatpush.bf16.msra.mxu0 %v10552_v4  ;;  %v6555_v4 = vpop.f32.mrf.mxu0 }
 0x1d1   : > { %v11061_v62 = vld [vmem:[%s13879_s24 + $0x1460] sm:$0xf0] }
 0x1d2   : > { %v13293_v0 = vld [vmem:[%s13879_s24 + $0x1644] sm:$0xf]  ;;  %v11064_v9 = vor.u32 %v13229_v61, %v11061_v62  ;;  %6846 = vmatpush.bf16.msra.mxu1 %v10808_v8  ;;  %v14526_v61 = vpop.f32.mrf.mxu3 }
 0x1d3   : > { %v11317_v2 = vld [vmem:[%s13879_s24 + $0x1660] sm:$0xf0] }
 0x1d4   : > { %v13093_v5 = vld [vmem:[%s13879_s24 + $0x1004] sm:$0xf]  ;;  %v11320_v15 = vor.u32 %v13293_v0, %v11317_v2  ;;  %6860 = vmatpush.bf16.msra.mxu2 %v11064_v9  ;;  %v6514_v2 = vadd.f32 %v14469_v25, %v6500_v45 }
 0x1d5   : > { %v10517_v6 = vld [vmem:[%s13879_s24 + $0x1020] sm:$0xf0] }
 0x1d6   : > { %v13157_v11 = vld [vmem:[%s13879_s24 + $0x1204] sm:$0xf]  ;;  %v10520_v24 = vor.u32 %v13093_v5, %v10517_v6  ;;  %6874 = vmatpush.bf16.msra.mxu3 %v11320_v15  ;;  %v14557_v45 = vpop.f32.mrf.mxu2 }
 0x1d7   : > { %v10773_v12 = vld [vmem:[%s13879_s24 + $0x1220] sm:$0xf0] }
 0x1d8   : > { %v13221_v13 = vld [vmem:[%s13879_s24 + $0x1404] sm:$0xf]  ;;  %v10776_v29 = vor.u32 %v13157_v11, %v10773_v12  ;;  %6833 = vmatpush.bf16.msra.mxu0 %v10520_v24  ;;  %v14534_v12 = vpop.f32.mrf.mxu1 }
 0x1d9   : > { %v11029_v16 = vld [vmem:[%s13879_s24 + $0x1420] sm:$0xf0] }
 0x1da   : > { %v13285_v18 = vld [vmem:[%s13879_s24 + $0x1604] sm:$0xf]  ;;  %v11032_v30 = vor.u32 %v13221_v13, %v11029_v16  ;;  %6847 = vmatpush.bf16.msra.mxu1 %v10776_v29 }
 0x1db   : > { %v11285_v19 = vld [vmem:[%s13879_s24 + $0x1620] sm:$0xf0]  ;;  %6834 = vmatmul.bf16.vlgmr.msra.gmra.mxu0 %v14190_v31 }
 0x1dc   : > { %v13405_v20 = vld [vmem:[%s13879_s24 + $0x19c4] sm:$0xf]  ;;  %v11288_v37 = vor.u32 %v13285_v18, %v11285_v19  ;;  %6861 = vmatpush.bf16.msra.mxu2 %v11032_v30 }
 0x1dd   : > { %v11765_v21 = vld [vmem:[%s13879_s24 + $0x19e0] sm:$0xf0]  ;;  %6848 = vmatmul.bf16.vlgmr.msra.gmra.mxu1 %v14197_v36 }
 0x1de   : > { %v13469_v23 = vld [vmem:[%s13879_s24 + $0x1bc4] sm:$0xf]  ;;  %v11768_v42 = vor.u32 %v13405_v20, %v11765_v21  ;;  %6875 = vmatpush.bf16.msra.mxu3 %v11288_v37  ;;  %v6528_v21 = vadd.f32 %v14485_v57, %v6514_v2  ;;  %v6502_v37 = vadd.f32 %v14497_v7, %v1274_v3 }
 0x1df   : > { %v12021_v26 = vld [vmem:[%s13879_s24 + $0x1be0] sm:$0xf0]  ;;  %6862 = vmatmul.bf16.vlgmr.msra.gmra.mxu2 %v14195_v35 }
 0x1e0   : > { %v13533_v27 = vld [vmem:[%s13879_s24 + $0x1dc4] sm:$0xf]  ;;  %v12024_v48 = vor.u32 %v13469_v23, %v12021_v26  ;;  %6882 = vmatpush.bf16.msrb.mxu0 %v11768_v42  ;;  %v14571_v2 = vpop.f32.mrf.mxu1 }
 0x1e1   : > { %v12277_v28 = vld [vmem:[%s13879_s24 + $0x1de0] sm:$0xf0]  ;;  %6876 = vmatmul.bf16.vlgmr.msra.gmra.mxu3 %v14201_v40 }
 0x1e2   : > { %v13597_v33 = vld [vmem:[%s13879_s24 + $0x1fc4] sm:$0xf]  ;;  %v12280_v49 = vor.u32 %v13533_v27, %v12277_v28  ;;  %6896 = vmatpush.bf16.msrb.mxu1 %v12024_v48 }
 0x1e3   : > { %v12533_v34 = vld [vmem:[%s13879_s24 + $0x1fe0] sm:$0xf0] }
 0x1e4   : > { %v13397_v51 = vld [vmem:[%s13879_s24 + $0x1984] sm:$0xf]  ;;  %v12536_v55 = vor.u32 %v13597_v33, %v12533_v34  ;;  %6910 = vmatpush.bf16.msrb.mxu2 %v12280_v49  ;;  %v6542_v49 = vadd.f32 %v14490_v63, %v6528_v21  ;;  %v6516_v63 = vadd.f32 %v14502_v14, %v6502_v37 }
 0x1e5   : > { %v11733_v52 = vld [vmem:[%s13879_s24 + $0x19a0] sm:$0xf0] }
 0x1e6   : > { %v13461_v53 = vld [vmem:[%s13879_s24 + $0x1b84] sm:$0xf]  ;;  %v11736_v0 = vor.u32 %v13397_v51, %v11733_v52  ;;  %6924 = vmatpush.bf16.msrb.mxu3 %v12536_v55  ;;  %v14560_v51 = vpop.f32.mrf.mxu3 }
 0x1e7   : > { %v11989_v56 = vld [vmem:[%s13879_s24 + $0x1ba0] sm:$0xf0] }
 0x1e8   : > { %v13525_v59 = vld [vmem:[%s13879_s24 + $0x1d84] sm:$0xf]  ;;  %v11992_v5 = vor.u32 %v13461_v53, %v11989_v56  ;;  %6883 = vmatpush.bf16.msrb.mxu0 %v11736_v0 }
 0x1e9   : > { %v12245_v60 = vld [vmem:[%s13879_s24 + $0x1da0] sm:$0xf0] }
 0x1ea   : > { %v13589_v22 = vld [vmem:[%s13879_s24 + $0x1f84] sm:$0xf]  ;;  %v12248_v6 = vor.u32 %v13525_v59, %v12245_v60  ;;  %6897 = vmatpush.bf16.msrb.mxu1 %v11992_v5 }
 0x1eb   : > { %v12501_v62 = vld [vmem:[%s13879_s24 + $0x1fa0] sm:$0xf0] }
 0x1ec   : > { %v13389_v8 = vld [vmem:[%s13879_s24 + $0x1944] sm:$0xf]  ;;  %v12504_v13 = vor.u32 %v13589_v22, %v12501_v62  ;;  %6911 = vmatpush.bf16.msrb.mxu2 %v12248_v6  ;;  %v6557_v22 = vpop.f32.mrf.mxu0  ;;  %v6556_v6 = vadd.f32 %v6555_v4, %v6542_v49 }
 0x1ed   : > { %v11701_v9 = vld [vmem:[%s13879_s24 + $0x1960] sm:$0xf0] }
 0x1ee   : > { %v13453_v11 = vld [vmem:[%s13879_s24 + $0x1b44] sm:$0xf]  ;;  %v11704_v20 = vor.u32 %v13389_v8, %v11701_v9  ;;  %6925 = vmatpush.bf16.msrb.mxu3 %v12504_v13 }
 0x1ef   : > { %v11957_v15 = vld [vmem:[%s13879_s24 + $0x1b60] sm:$0xf0] }
 0x1f0   : > { %v13517_v25 = vld [vmem:[%s13879_s24 + $0x1d44] sm:$0xf]  ;;  %v11960_v23 = vor.u32 %v13453_v11, %v11957_v15  ;;  %6884 = vmatpush.bf16.msrb.mxu0 %v11704_v20 }
 0x1f1   : > { %v12213_v16 = vld [vmem:[%s13879_s24 + $0x1d60] sm:$0xf0] }
 0x1f2   : > { %v13581_v18 = vld [vmem:[%s13879_s24 + $0x1f44] sm:$0xf]  ;;  %v12216_v24 = vor.u32 %v13517_v25, %v12213_v16  ;;  %6898 = vmatpush.bf16.msrb.mxu1 %v11960_v23  ;;  %v6570_v23 = vadd.f32 %v14534_v12, %v6556_v6 }
 0x1f3   : > { %v12469_v19 = vld [vmem:[%s13879_s24 + $0x1f60] sm:$0xf0] }
 0x1f4   : > { %v13381_v26 = vld [vmem:[%s13879_s24 + $0x1904] sm:$0xf]  ;;  %v12472_v29 = vor.u32 %v13581_v18, %v12469_v19  ;;  %6912 = vmatpush.bf16.msrb.mxu2 %v12216_v24  ;;  %v6530_v19 = vadd.f32 %v14521_v54, %v6516_v63  ;;  %v6585_v54 = vpop.f32.mrf.mxu2 }
 0x1f5   : > { %v11669_v27 = vld [vmem:[%s13879_s24 + $0x1920] sm:$0xf0] }
 0x1f6   : > { %v13445_v28 = vld [vmem:[%s13879_s24 + $0x1b04] sm:$0xf]  ;;  %v11672_v48 = vor.u32 %v13381_v26, %v11669_v27  ;;  %6926 = vmatpush.bf16.msrb.mxu3 %v12472_v29  ;;  %v6544_v12 = vadd.f32 %v14526_v61, %v6530_v19  ;;  %v9467_v19 = vld [vmem:[%s13879_s24 + $0x7c8] sm:$0xf] }
 0x1f7   : > { %v11925_v30 = vld [vmem:[%s13879_s24 + $0x1b20] sm:$0xf0] }
 0x1f8   : > { %v13509_v33 = vld [vmem:[%s13879_s24 + $0x1d04] sm:$0xf]  ;;  %v11928_v50 = vor.u32 %v13445_v28, %v11925_v30  ;;  %6885 = vmatpush.bf16.msrb.mxu0 %v11672_v48  ;;  %v6558_v6 = vadd.f32 %v6557_v22, %v6544_v12  ;;  %v12834_v22 = vld [vmem:[%s13879_s24 + $0x7e4] sm:$0xf0] }
 0x1f9   : > { %v12181_v34 = vld [vmem:[%s13879_s24 + $0x1d20] sm:$0xf0]  ;;  %v12762_v12 = vld [vmem:[%s13879_s24 + $0x5a4] sm:$0xf0] }
 0x1fa   : > { %v13573_v57 = vld [vmem:[%s13879_s24 + $0x1f04] sm:$0xf]  ;;  %v12184_v52 = vor.u32 %v13509_v33, %v12181_v34  ;;  %6899 = vmatpush.bf16.msrb.mxu1 %v11928_v50  ;;  %v6625_v50 = vpop.f32.mrf.mxu1 }
 0x1fb   : > { %v12437_v42 = vld [vmem:[%s13879_s24 + $0x1f20] sm:$0xf0] }
 0x1fc   : > { %v13373_v3 = vld [vmem:[%s13879_s24 + $0x18c4] sm:$0xf]  ;;  %v12440_v55 = vor.u32 %v13573_v57, %v12437_v42  ;;  %6913 = vmatpush.bf16.msrb.mxu2 %v12184_v52  ;;  %v14590_v57 = vpop.f32.mrf.mxu3  ;;  %v6611_v42 = vpop.f32.mrf.mxu0 }
 0x1fd   : > { %v11637_v7 = vld [vmem:[%s13879_s24 + $0x18e0] sm:$0xf0] }
 0x1fe   : > { %v13437_v53 = vld [vmem:[%s13879_s24 + $0x1ac4] sm:$0xf]  ;;  %v11640_v5 = vor.u32 %v13373_v3, %v11637_v7  ;;  %6927 = vmatpush.bf16.msrb.mxu3 %v12440_v55 }
 0x1ff   : > { %v11893_v56 = vld [vmem:[%s13879_s24 + $0x1ae0] sm:$0xf0] }
 0x200   : > { %v13501_v59 = vld [vmem:[%s13879_s24 + $0x1cc4] sm:$0xf]  ;;  %v11896_v8 = vor.u32 %v13437_v53, %v11893_v56  ;;  %6886 = vmatpush.bf16.msrb.mxu0 %v11640_v5  ;;  %v6584_v53 = vadd.f32 %v14557_v45, %v6570_v23  ;;  %v8699_v45 = vld [vmem:[%s13879_s24 + $0x1c8] sm:$0xf]  ;;  %v6572_v23 = vadd.f32 %v14571_v2, %v6558_v6 }
 0x201   : > { %v12149_v60 = vld [vmem:[%s13879_s24 + $0x1ce0] sm:$0xf0]  ;;  %v9435_v2 = vld [vmem:[%s13879_s24 + $0x788] sm:$0xf] }
 0x202   : > { %v13565_v62 = vld [vmem:[%s13879_s24 + $0x1ec4] sm:$0xf]  ;;  %v12152_v9 = vor.u32 %v13501_v59, %v12149_v60  ;;  %6900 = vmatpush.bf16.msrb.mxu1 %v11896_v8  ;;  %v12642_v8 = vld [vmem:[%s13879_s24 + $0x1e4] sm:$0xf0] }
 0x203   : > { %v12405_v0 = vld [vmem:[%s13879_s24 + $0x1ee0] sm:$0xf0]  ;;  %v12818_v6 = vld [vmem:[%s13879_s24 + $0x764] sm:$0xf0] }
 0x204   : > { %v13365_v11 = vld [vmem:[%s13879_s24 + $0x1884] sm:$0xf]  ;;  %v12408_v15 = vor.u32 %v13565_v62, %v12405_v0  ;;  %6914 = vmatpush.bf16.msrb.mxu2 %v12152_v9  ;;  %v8955_v9 = vld [vmem:[%s13879_s24 + $0x3c8] sm:$0xf] }
 0x205   : > { %v11605_v13 = vld [vmem:[%s13879_s24 + $0x18a0] sm:$0xf0] }
 0x206   : > { %v13429_v14 = vld [vmem:[%s13879_s24 + $0x1a84] sm:$0xf]  ;;  %v11608_v21 = vor.u32 %v13365_v11, %v11605_v13  ;;  %6928 = vmatpush.bf16.msrb.mxu3 %v12408_v15  ;;  %v12706_v13 = vld [vmem:[%s13879_s24 + $0x3e4] sm:$0xf0] }
 0x207   : > { %v11861_v25 = vld [vmem:[%s13879_s24 + $0x1aa0] sm:$0xf0]  ;;  %v12770_v15 = vld [vmem:[%s13879_s24 + $0x5e4] sm:$0xf0] }
 0x208   : > { %v13493_v16 = vld [vmem:[%s13879_s24 + $0x1c84] sm:$0xf]  ;;  %v11864_v24 = vor.u32 %v13429_v14, %v11861_v25  ;;  %6887 = vmatpush.bf16.msrb.mxu0 %v11608_v21  ;;  %v9211_v14 = vld [vmem:[%s13879_s24 + $0x5c8] sm:$0xf]  ;;  %v6598_v25 = vadd.f32 %v14560_v51, %v6584_v53  ;;  %v8700_v21 = vor.u32 %v12642_v8, %v8699_v45  ;;  %v6653_v51 = vpop.f32.mrf.mxu3 }
 0x209   : > { %v12117_v18 = vld [vmem:[%s13879_s24 + $0x1ca0] sm:$0xf0]  ;;  %v8603_v8 = vld [vmem:[%s13879_s24 + $0x108] sm:$0xf] }
 0x20a   : > { %v13557_v20 = vld [vmem:[%s13879_s24 + $0x1e84] sm:$0xf]  ;;  %v12120_v26 = vor.u32 %v13493_v16, %v12117_v18  ;;  %6901 = vmatpush.bf16.msrb.mxu1 %v11864_v24  ;;  %v6612_v24 = vadd.f32 %v6611_v42, %v6598_v25  ;;  %v12826_v42 = vld [vmem:[%s13879_s24 + $0x7a4] sm:$0xf0] }
 0x20b   : > { %v12373_v4 = vld [vmem:[%s13879_s24 + $0x1ea0] sm:$0xf0] }
 0x20c   : > { %v13357_v27 = vld [vmem:[%s13879_s24 + $0x1844] sm:$0xf]  ;;  %v12376_v30 = vor.u32 %v13557_v20, %v12373_v4  ;;  %6915 = vmatpush.bf16.msrb.mxu2 %v12120_v26  ;;  %v6639_v20 = vpop.f32.mrf.mxu2  ;;  %v8956_v26 = vor.u32 %v12706_v13, %v8955_v9  ;;  %v12618_v13 = vld [vmem:[%s13879_s24 + $0x124] sm:$0xf0] }
 0x20d   : > { %v11573_v28 = vld [vmem:[%s13879_s24 + $0x1860] sm:$0xf0] }
 0x20e   : > { %v13421_v29 = vld [vmem:[%s13879_s24 + $0x1a44] sm:$0xf]  ;;  %v11576_v52 = vor.u32 %v13357_v27, %v11573_v28  ;;  %6929 = vmatpush.bf16.msrb.mxu3 %v12376_v30  ;;  %v9212_v27 = vor.u32 %v12770_v15, %v9211_v14  ;;  %v8667_v28 = vld [vmem:[%s13879_s24 + $0x188] sm:$0xf] }
 0x20f   : > { %v11829_v33 = vld [vmem:[%s13879_s24 + $0x1a60] sm:$0xf0]  ;;  %v8923_v30 = vld [vmem:[%s13879_s24 + $0x388] sm:$0xf] }
 0x210   : > { %v13485_v34 = vld [vmem:[%s13879_s24 + $0x1c44] sm:$0xf]  ;;  %v11832_v61 = vor.u32 %v13421_v29, %v11829_v33  ;;  %6888 = vmatpush.bf16.msrb.mxu0 %v11576_v52  ;;  %v12634_v29 = vld [vmem:[%s13879_s24 + $0x1a4] sm:$0xf0]  ;;  %v9468_v33 = vor.u32 %v12834_v22, %v9467_v19  ;;  %v6627_v52 = vpop.f32.mrf.mxu1 }
 0x211   : > { %v12085_v37 = vld [vmem:[%s13879_s24 + $0x1c60] sm:$0xf0]  ;;  %v8859_v14 = vld [vmem:[%s13879_s24 + $0x308] sm:$0xf] }
 0x212   : > { %v13549_v48 = vld [vmem:[%s13879_s24 + $0x1e44] sm:$0xf]  ;;  %v12088_v55 = vor.u32 %v13485_v34, %v12085_v37  ;;  %6902 = vmatpush.bf16.msrb.mxu1 %v11832_v61  ;;  %v12698_v34 = vld [vmem:[%s13879_s24 + $0x3a4] sm:$0xf0] }
 0x213   : > { %v12341_v49 = vld [vmem:[%s13879_s24 + $0x1e60] sm:$0xf0]  ;;  %v9179_v37 = vld [vmem:[%s13879_s24 + $0x588] sm:$0xf]  ;;  %v8924_v53 = vor.u32 %v12698_v34, %v8923_v30 }
 0x214   : > { %v13349_v3 = vld [vmem:[%s13879_s24 + $0x1804] sm:$0xf]  ;;  %v12344_v63 = vor.u32 %v13549_v48, %v12341_v49  ;;  %6916 = vmatpush.bf16.msrb.mxu2 %v12088_v55  ;;  %v6586_v48 = vadd.f32 %v6585_v54, %v6572_v23  ;;  %v6613_v49 = vpop.f32.mrf.mxu0  ;;  %v9180_v54 = vor.u32 %v12762_v12, %v9179_v37  ;;  %v8635_v61 = vld [vmem:[%s13879_s24 + $0x148] sm:$0xf]  ;;  %v6641_v25 = vpop.f32.mrf.mxu2 }
 0x215   : > { %v11541_v7 = vld [vmem:[%s13879_s24 + $0x1820] sm:$0xf0]  ;;  %v12626_v55 = vld [vmem:[%s13879_s24 + $0x164] sm:$0xf0] }
 0x216   : > { %v13413_v56 = vld [vmem:[%s13879_s24 + $0x1a04] sm:$0xf]  ;;  %v11544_v11 = vor.u32 %v13349_v3, %v11541_v7  ;;  %6930 = vmatpush.bf16.msrb.mxu3 %v12344_v63  ;;  %v8668_v3 = vor.u32 %v12634_v29, %v8667_v28  ;;  %v6626_v7 = vadd.f32 %v6625_v50, %v6612_v24  ;;  %v9147_v63 = vld [vmem:[%s13879_s24 + $0x548] sm:$0xf]  ;;  %v6600_v50 = vadd.f32 %v14590_v57, %v6586_v48 }
 0x217   : > { %v11797_v59 = vld [vmem:[%s13879_s24 + $0x1a20] sm:$0xf0]  ;;  %v8636_v45 = vor.u32 %v12626_v55, %v8635_v61  ;;  %v12682_v15 = vld [vmem:[%s13879_s24 + $0x324] sm:$0xf0]  ;;  %v8604_v24 = vor.u32 %v12618_v13, %v8603_v8 }
 0x218   : > { %v13477_v60 = vld [vmem:[%s13879_s24 + $0x1c04] sm:$0xf]  ;;  %v11800_v16 = vor.u32 %v13413_v56, %v11797_v59  ;;  %6889 = vmatpush.bf16.msrb.mxu0 %v11544_v11  ;;  %v8891_v56 = vld [vmem:[%s13879_s24 + $0x348] sm:$0xf]  ;;  %v9436_v59 = vor.u32 %v12826_v42, %v9435_v2  ;;  %v6614_v9 = vadd.f32 %v6613_v49, %v6600_v50 }
 0x219   : > { %v12053_v62 = vld [vmem:[%s13879_s24 + $0x1c20] sm:$0xf0]  ;;  %v12746_v19 = vld [vmem:[%s13879_s24 + $0x524] sm:$0xf0] }
 0x21a   : > { %v13541_v0 = vld [vmem:[%s13879_s24 + $0x1e04] sm:$0xf]  ;;  %v12056_v18 = vor.u32 %v13477_v60, %v12053_v62  ;;  %6903 = vmatpush.bf16.msrb.mxu1 %v11800_v16  ;;  %v12690_v60 = vld [vmem:[%s13879_s24 + $0x364] sm:$0xf0]  ;;  %v6628_v28 = vadd.f32 %v6627_v52, %v6614_v9 }
 0x21b   : > { %v12309_v5 = vld [vmem:[%s13879_s24 + $0x1e20] sm:$0xf0]  ;;  %6890 = vmatmul.bf16.vlgmr.msrb.gmra.mxu0 %v14290_v32  ;;  %v12754_v62 = vld [vmem:[%s13879_s24 + $0x564] sm:$0xf0]  ;;  %v8892_v57 = vor.u32 %v12690_v60, %v8891_v56 }
 0x21c   : > { %v12312_v4 = vor.u32 %v13541_v0, %v12309_v5  ;;  %6917 = vmatpush.bf16.msrb.mxu2 %v12056_v18  ;;  %6938 = vmatpush.bf16.msra.mxu0 %v8700_v21  ;;  %v6640_v0 = vadd.f32 %v6639_v20, %v6626_v7  ;;  %v9403_v5 = vld [vmem:[%s13879_s24 + $0x748] sm:$0xf]  ;;  %v9148_v11 = vor.u32 %v12754_v62, %v9147_v63  ;;  %v6655_v20 = vpop.f32.mrf.mxu3  ;;  %v6695_v63 = vpop.f32.mrf.mxu2 }
 0x21d   : > { %6904 = vmatmul.bf16.vlgmr.msrb.gmra.mxu1 %v14297_v41  ;;  %v9404_v16 = vor.u32 %v12818_v6, %v9403_v5  ;;  %v9115_v18 = vld [vmem:[%s13879_s24 + $0x508] sm:$0xf]  ;;  %v6642_v2 = vadd.f32 %v6641_v25, %v6628_v28 }
 0x21e   : > { %6931 = vmatpush.bf16.msrb.mxu3 %v12312_v4  ;;  %6952 = vmatpush.bf16.msra.mxu1 %v8956_v26  ;;  %v6654_v22 = vadd.f32 %v6653_v51, %v6640_v0  ;;  %v6667_v4 = vpop.f32.mrf.mxu0  ;;  %v9371_v21 = vld [vmem:[%s13879_s24 + $0x708] sm:$0xf]  ;;  %v8860_v26 = vor.u32 %v12682_v15, %v8859_v14  ;;  %v9116_v29 = vor.u32 %v12746_v19, %v9115_v18 }
 0x21f   : > { %6918 = vmatmul.bf16.vlgmr.msrb.gmra.mxu2 %v14295_v38  ;;  %v12810_v23 = vld [vmem:[%s13879_s24 + $0x724] sm:$0xf0]  ;;  %v6656_v0 = vadd.f32 %v6655_v20, %v6642_v2 }
 0x220   : > { %6966 = vmatpush.bf16.msra.mxu2 %v9212_v27  ;;  %6939 = vmatpush.bf16.msra.mxu0 %v8668_v3  ;;  %v6681_v27 = vpop.f32.mrf.mxu1  ;;  %v6668_v51 = vadd.f32 %v6667_v4, %v6654_v22  ;;  %v8571_v30 = vld [vmem:[%s13879_s24 + $0xc8] sm:$0xf]  ;;  %v9372_v37 = vor.u32 %v12810_v23, %v9371_v21 }
 0x221   : > { %6932 = vmatmul.bf16.vlgmr.msrb.gmra.mxu3 %v14301_v46  ;;  %v8827_v34 = vld [vmem:[%s13879_s24 + $0x2c8] sm:$0xf] }
 0x222   : > { %6980 = vmatpush.bf16.msra.mxu3 %v9468_v33  ;;  %6953 = vmatpush.bf16.msra.mxu1 %v8924_v53  ;;  %v12610_v33 = vld [vmem:[%s13879_s24 + $0xe4] sm:$0xf0]  ;;  %v6682_v53 = vadd.f32 %v6681_v27, %v6668_v51 }
 0x223   : > { %v12674_v12 = vld [vmem:[%s13879_s24 + $0x2e4] sm:$0xf0]  ;;  %v8572_v3 = vor.u32 %v12610_v33, %v8571_v30 }
 0x224   : > { %6967 = vmatpush.bf16.msra.mxu2 %v9180_v54  ;;  %6940 = vmatpush.bf16.msra.mxu0 %v8636_v45  ;;  %v9083_v48 = vld [vmem:[%s13879_s24 + $0x4c8] sm:$0xf]  ;;  %v8828_v54 = vor.u32 %v12674_v12, %v8827_v34  ;;  %v6696_v5 = vadd.f32 %v6695_v63, %v6682_v53  ;;  %v6709_v45 = vpop.f32.mrf.mxu3 }
 0x225   : > { %v12738_v49 = vld [vmem:[%s13879_s24 + $0x4e4] sm:$0xf0] }
 0x226   : > { %6981 = vmatpush.bf16.msra.mxu3 %v9436_v59  ;;  %6954 = vmatpush.bf16.msra.mxu1 %v8892_v57  ;;  %v9339_v42 = vld [vmem:[%s13879_s24 + $0x6c8] sm:$0xf]  ;;  %v9084_v61 = vor.u32 %v12738_v49, %v9083_v48  ;;  %v6669_v6 = vpop.f32.mrf.mxu0  ;;  %v6710_v14 = vadd.f32 %v6709_v45, %v6696_v5  ;;  %v6697_v48 = vpop.f32.mrf.mxu2 }
 0x227   : > { %v12802_v52 = vld [vmem:[%s13879_s24 + $0x6e4] sm:$0xf0]  ;;  %v6670_v13 = vadd.f32 %v6669_v6, %v6656_v0 }
 0x228   : > { %6968 = vmatpush.bf16.msra.mxu2 %v9148_v11  ;;  %6941 = vmatpush.bf16.msra.mxu0 %v8604_v24  ;;  %v8539_v7 = vld [vmem:[%s13879_s24 + $0x88] sm:$0xf]  ;;  %v9340_v60 = vor.u32 %v12802_v52, %v9339_v42  ;;  %v6683_v22 = vpop.f32.mrf.mxu1  ;;  %8282 = vst [vmem:[%s14668_s9] sm:$0xff] %v6710_v14 }
 0x229   : > { %v12602_v55 = vld [vmem:[%s13879_s24 + $0xa4] sm:$0xf0]  ;;  %v6684_v51 = vadd.f32 %v6683_v22, %v6670_v13 }
 0x22a   : > { %6982 = vmatpush.bf16.msra.mxu3 %v9404_v16  ;;  %6955 = vmatpush.bf16.msra.mxu1 %v8860_v26  ;;  %v8795_v56 = vld [vmem:[%s13879_s24 + $0x288] sm:$0xf]  ;;  %v8540_v57 = vor.u32 %v12602_v55, %v8539_v7 }
 0x22b   : > { %v12666_v59 = vld [vmem:[%s13879_s24 + $0x2a4] sm:$0xf0]  ;;  %v6698_v52 = vadd.f32 %v6697_v48, %v6684_v51 }
 0x22c   : > { %6969 = vmatpush.bf16.msra.mxu2 %v9116_v29  ;;  %v9051_v62 = vld [vmem:[%s13879_s24 + $0x488] sm:$0xf]  ;;  %6942 = vmatpush.bf16.msra.mxu0 %v8572_v3  ;;  %v8796_v11 = vor.u32 %v12666_v59, %v8795_v56  ;;  %v6711_v3 = vpop.f32.mrf.mxu3 }
 0x22d   : > { %v12730_v50 = vld [vmem:[%s13879_s24 + $0x4a4] sm:$0xf0] }
 0x22e   : > { %6983 = vmatpush.bf16.msra.mxu3 %v9372_v37  ;;  %v9307_v8 = vld [vmem:[%s13879_s24 + $0x688] sm:$0xf]  ;;  %6956 = vmatpush.bf16.msra.mxu1 %v8828_v54  ;;  %v9052_v15 = vor.u32 %v12730_v50, %v9051_v62 }
 0x22f   : > { %v12794_v9 = vld [vmem:[%s13879_s24 + $0x6a4] sm:$0xf0] }
 0x230   : > { %6970 = vmatpush.bf16.msra.mxu2 %v9084_v61  ;;  %v8507_v25 = vld [vmem:[%s13879_s24 + $0x48] sm:$0xf]  ;;  %v9308_v19 = vor.u32 %v12794_v9, %v9307_v8  ;;  %6943 = vmatpush.bf16.msra.mxu0 %v8540_v57 }
 0x231   : > { %v12594_v16 = vld [vmem:[%s13879_s24 + $0x64] sm:$0xf0] }
 0x232   : > { %v8763_v18 = vld [vmem:[%s13879_s24 + $0x248] sm:$0xf]  ;;  %6984 = vmatpush.bf16.msra.mxu3 %v9340_v60  ;;  %v8508_v26 = vor.u32 %v12594_v16, %v8507_v25  ;;  %6957 = vmatpush.bf16.msra.mxu1 %v8796_v11  ;;  %v6712_v60 = vadd.f32 %v6711_v3, %v6698_v52 }
 0x233   : > { %v12658_v20 = vld [vmem:[%s13879_s24 + $0x264] sm:$0xf0] }
 0x234   : > { %v9019_v4 = vld [vmem:[%s13879_s24 + $0x448] sm:$0xf]  ;;  %6971 = vmatpush.bf16.msra.mxu2 %v9052_v15  ;;  %v8764_v29 = vor.u32 %v12658_v20, %v8763_v18  ;;  %6944 = vmatpush.bf16.msra.mxu0 %v8508_v26  ;;  %8290 = vst [vmem:[%s14668_s9 + $0x40] sm:$0xff] %v6712_v60 }
 0x235   : > { %v12722_v21 = vld [vmem:[%s13879_s24 + $0x464] sm:$0xf0] }
 0x236   : > { %v9275_v23 = vld [vmem:[%s13879_s24 + $0x648] sm:$0xf]  ;;  %v9020_v30 = vor.u32 %v12722_v21, %v9019_v4  ;;  %6985 = vmatpush.bf16.msra.mxu3 %v9308_v19  ;;  %6958 = vmatpush.bf16.msra.mxu1 %v8764_v29 }
 0x237   : > { %v12786_v24 = vld [vmem:[%s13879_s24 + $0x664] sm:$0xf0] }
 0x238   : > { %v8475_v27 = vld [vmem:[%s13879_s24 + $0x8] sm:$0xf]  ;;  %v9276_v12 = vor.u32 %v12786_v24, %v9275_v23  ;;  %6972 = vmatpush.bf16.msra.mxu2 %v9020_v30 }
 0x239   : > { %v12586_v28 = vld [vmem:[%s13879_s24 + $0x24] sm:$0xf0] }
 0x23a   : > { %v8731_v33 = vld [vmem:[%s13879_s24 + $0x208] sm:$0xf]  ;;  %v8476_v61 = vor.u32 %v12586_v28, %v8475_v27  ;;  %6986 = vmatpush.bf16.msra.mxu3 %v9276_v12 }
 0x23b   : > { %v12650_v34 = vld [vmem:[%s13879_s24 + $0x224] sm:$0xf0] }
 0x23c   : > { %v8987_v37 = vld [vmem:[%s13879_s24 + $0x408] sm:$0xf]  ;;  %v8732_v63 = vor.u32 %v12650_v34, %v8731_v33  ;;  %6945 = vmatpush.bf16.msra.mxu0 %v8476_v61 }
 0x23d   : > { %v12714_v49 = vld [vmem:[%s13879_s24 + $0x424] sm:$0xf0] }
 0x23e   : > { %v9243_v2 = vld [vmem:[%s13879_s24 + $0x608] sm:$0xf]  ;;  %v8988_v62 = vor.u32 %v12714_v49, %v8987_v37  ;;  %6959 = vmatpush.bf16.msra.mxu1 %v8732_v63 }
 0x23f   : > { %v12778_v42 = vld [vmem:[%s13879_s24 + $0x624] sm:$0xf0]  ;;  %6946 = vmatmul.bf16.vlgmr.msra.gmra.mxu0 %v13982_v58 }
 0x240   : > { %v9723_v7 = vld [vmem:[%s13879_s24 + $0x9c8] sm:$0xf]  ;;  %v9244_v5 = vor.u32 %v12778_v42, %v9243_v2  ;;  %6973 = vmatpush.bf16.msra.mxu2 %v8988_v62 }
 0x241   : > { %v12898_v53 = vld [vmem:[%s13879_s24 + $0x9e4] sm:$0xf0]  ;;  %6960 = vmatmul.bf16.vlgmr.msra.gmra.mxu1 %v14006_v10 }
 0x242   : > { %v9979_v54 = vld [vmem:[%s13879_s24 + $0xbc8] sm:$0xf]  ;;  %v9724_v6 = vor.u32 %v12898_v53, %v9723_v7  ;;  %6987 = vmatpush.bf16.msra.mxu3 %v9244_v5 }
 0x243   : > { %v12962_v55 = vld [vmem:[%s13879_s24 + $0xbe4] sm:$0xf0]  ;;  %6974 = vmatmul.bf16.vlgmr.msra.gmra.mxu2 %v13990_v1 }
 0x244   : > { %v10235_v56 = vld [vmem:[%s13879_s24 + $0xdc8] sm:$0xf]  ;;  %v9980_v8 = vor.u32 %v12962_v55, %v9979_v54  ;;  %6994 = vmatpush.bf16.msrb.mxu0 %v9724_v6 }
 0x245   : > { %v13026_v59 = vld [vmem:[%s13879_s24 + $0xde4] sm:$0xf0]  ;;  %6988 = vmatmul.bf16.vlgmr.msra.gmra.mxu3 %v14014_v17 }
 0x246   : > { %v10491_v50 = vld [vmem:[%s13879_s24 + $0xfc8] sm:$0xf]  ;;  %v10236_v9 = vor.u32 %v13026_v59, %v10235_v56  ;;  %7008 = vmatpush.bf16.msrb.mxu1 %v9980_v8 }
 0x247   : > { %v13090_v0 = vld [vmem:[%s13879_s24 + $0xfe4] sm:$0xf0] }
 0x248   : > { %v9691_v45 = vld [vmem:[%s13879_s24 + $0x988] sm:$0xf]  ;;  %v10492_v13 = vor.u32 %v13090_v0, %v10491_v50  ;;  %7022 = vmatpush.bf16.msrb.mxu2 %v10236_v9 }
 0x249   : > { %v12890_v57 = vld [vmem:[%s13879_s24 + $0x9a4] sm:$0xf0] }
 0x24a   : > { %v9947_v11 = vld [vmem:[%s13879_s24 + $0xb88] sm:$0xf]  ;;  %v9692_v19 = vor.u32 %v12890_v57, %v9691_v45  ;;  %7036 = vmatpush.bf16.msrb.mxu3 %v10492_v13 }
 0x24b   : > { %v12954_v14 = vld [vmem:[%s13879_s24 + $0xba4] sm:$0xf0] }
 0x24c   : > { %v10203_v15 = vld [vmem:[%s13879_s24 + $0xd88] sm:$0xf]  ;;  %v9948_v22 = vor.u32 %v12954_v14, %v9947_v11  ;;  %6995 = vmatpush.bf16.msrb.mxu0 %v9692_v19 }
 0x24d   : > { %v13018_v25 = vld [vmem:[%s13879_s24 + $0xda4] sm:$0xf0] }
 0x24e   : > { %v10459_v16 = vld [vmem:[%s13879_s24 + $0xf88] sm:$0xf]  ;;  %v10204_v20 = vor.u32 %v13018_v25, %v10203_v15  ;;  %7009 = vmatpush.bf16.msrb.mxu1 %v9948_v22 }
 0x24f   : > { %v13082_v18 = vld [vmem:[%s13879_s24 + $0xfa4] sm:$0xf0] }
 0x250   : > { %v9659_v4 = vld [vmem:[%s13879_s24 + $0x948] sm:$0xf]  ;;  %v10460_v24 = vor.u32 %v13082_v18, %v10459_v16  ;;  %7023 = vmatpush.bf16.msrb.mxu2 %v10204_v20 }
 0x251   : > { %v12882_v21 = vld [vmem:[%s13879_s24 + $0x964] sm:$0xf0] }
 0x252   : > { %v9915_v23 = vld [vmem:[%s13879_s24 + $0xb48] sm:$0xf]  ;;  %v9660_v30 = vor.u32 %v12882_v21, %v9659_v4  ;;  %7037 = vmatpush.bf16.msrb.mxu3 %v10460_v24 }
 0x253   : > { %v12946_v26 = vld [vmem:[%s13879_s24 + $0xb64] sm:$0xf0] }
 0x254   : > { %v10171_v27 = vld [vmem:[%s13879_s24 + $0xd48] sm:$0xf]  ;;  %v9916_v33 = vor.u32 %v12946_v26, %v9915_v23  ;;  %6996 = vmatpush.bf16.msrb.mxu0 %v9660_v30 }
 0x255   : > { %v13010_v28 = vld [vmem:[%s13879_s24 + $0xd64] sm:$0xf0] }
 0x256   : > { %v10427_v51 = vld [vmem:[%s13879_s24 + $0xf48] sm:$0xf]  ;;  %v10172_v34 = vor.u32 %v13010_v28, %v10171_v27  ;;  %7010 = vmatpush.bf16.msrb.mxu1 %v9916_v33 }
 0x257   : > { %v13074_v29 = vld [vmem:[%s13879_s24 + $0xf64] sm:$0xf0] }
 0x258   : > { %v9627_v37 = vld [vmem:[%s13879_s24 + $0x908] sm:$0xf]  ;;  %v10428_v49 = vor.u32 %v13074_v29, %v10427_v51  ;;  %7024 = vmatpush.bf16.msrb.mxu2 %v10172_v34 }
 0x259   : > { %v12874_v12 = vld [vmem:[%s13879_s24 + $0x924] sm:$0xf0] }
 0x25a   : > { %v9883_v48 = vld [vmem:[%s13879_s24 + $0xb08] sm:$0xf]  ;;  %v9628_v53 = vor.u32 %v12874_v12, %v9627_v37  ;;  %7038 = vmatpush.bf16.msrb.mxu3 %v10428_v49 }
 0x25b   : > { %v12938_v2 = vld [vmem:[%s13879_s24 + $0xb24] sm:$0xf0] }
 0x25c   : > { %v10139_v42 = vld [vmem:[%s13879_s24 + $0xd08] sm:$0xf]  ;;  %v9884_v54 = vor.u32 %v12938_v2, %v9883_v48  ;;  %6997 = vmatpush.bf16.msrb.mxu0 %v9628_v53 }
 0x25d   : > { %v13002_v52 = vld [vmem:[%s13879_s24 + $0xd24] sm:$0xf0] }
 0x25e   : > { %v10395_v3 = vld [vmem:[%s13879_s24 + $0xf08] sm:$0xf]  ;;  %v10140_v61 = vor.u32 %v13002_v52, %v10139_v42  ;;  %7011 = vmatpush.bf16.msrb.mxu1 %v9884_v54 }
 0x25f   : > { %v13066_v7 = vld [vmem:[%s13879_s24 + $0xf24] sm:$0xf0] }
 0x260   : > { %v9595_v55 = vld [vmem:[%s13879_s24 + $0x8c8] sm:$0xf]  ;;  %v10396_v60 = vor.u32 %v13066_v7, %v10395_v3  ;;  %7025 = vmatpush.bf16.msrb.mxu2 %v10140_v61 }
 0x261   : > { %v12866_v56 = vld [vmem:[%s13879_s24 + $0x8e4] sm:$0xf0] }
 0x262   : > { %v9851_v59 = vld [vmem:[%s13879_s24 + $0xac8] sm:$0xf]  ;;  %v9596_v6 = vor.u32 %v12866_v56, %v9595_v55  ;;  %7039 = vmatpush.bf16.msrb.mxu3 %v10396_v60 }
 0x263   : > { %v12930_v63 = vld [vmem:[%s13879_s24 + $0xae4] sm:$0xf0] }
 0x264   : > { %v10107_v62 = vld [vmem:[%s13879_s24 + $0xcc8] sm:$0xf]  ;;  %v9852_v45 = vor.u32 %v12930_v63, %v9851_v59  ;;  %6998 = vmatpush.bf16.msrb.mxu0 %v9596_v6 }
 0x265   : > { %v12994_v50 = vld [vmem:[%s13879_s24 + $0xce4] sm:$0xf0] }
 0x266   : > { %v10363_v0 = vld [vmem:[%s13879_s24 + $0xec8] sm:$0xf]  ;;  %v10108_v8 = vor.u32 %v12994_v50, %v10107_v62  ;;  %7012 = vmatpush.bf16.msrb.mxu1 %v9852_v45 }
 0x267   : > { %v13058_v5 = vld [vmem:[%s13879_s24 + $0xee4] sm:$0xf0] }
 0x268   : > { %v9563_v9 = vld [vmem:[%s13879_s24 + $0x888] sm:$0xf]  ;;  %v10364_v13 = vor.u32 %v13058_v5, %v10363_v0  ;;  %7026 = vmatpush.bf16.msrb.mxu2 %v10108_v8 }
 0x269   : > { %v12858_v57 = vld [vmem:[%s13879_s24 + $0x8a4] sm:$0xf0] }
 0x26a   : > { %v9819_v11 = vld [vmem:[%s13879_s24 + $0xa88] sm:$0xf]  ;;  %v9564_v19 = vor.u32 %v12858_v57, %v9563_v9  ;;  %7040 = vmatpush.bf16.msrb.mxu3 %v10364_v13 }
 0x26b   : > { %v12922_v14 = vld [vmem:[%s13879_s24 + $0xaa4] sm:$0xf0] }
 0x26c   : > { %v10075_v15 = vld [vmem:[%s13879_s24 + $0xc88] sm:$0xf]  ;;  %v9820_v22 = vor.u32 %v12922_v14, %v9819_v11  ;;  %6999 = vmatpush.bf16.msrb.mxu0 %v9564_v19 }
 0x26d   : > { %v12986_v25 = vld [vmem:[%s13879_s24 + $0xca4] sm:$0xf0] }
 0x26e   : > { %v10331_v16 = vld [vmem:[%s13879_s24 + $0xe88] sm:$0xf]  ;;  %v10076_v20 = vor.u32 %v12986_v25, %v10075_v15  ;;  %7013 = vmatpush.bf16.msrb.mxu1 %v9820_v22 }
 0x26f   : > { %v13050_v18 = vld [vmem:[%s13879_s24 + $0xea4] sm:$0xf0] }
 0x270   : > { %v9531_v4 = vld [vmem:[%s13879_s24 + $0x848] sm:$0xf]  ;;  %v10332_v24 = vor.u32 %v13050_v18, %v10331_v16  ;;  %7027 = vmatpush.bf16.msrb.mxu2 %v10076_v20 }
 0x271   : > { %v12850_v21 = vld [vmem:[%s13879_s24 + $0x864] sm:$0xf0] }
 0x272   : > { %v9787_v23 = vld [vmem:[%s13879_s24 + $0xa48] sm:$0xf]  ;;  %v9532_v30 = vor.u32 %v12850_v21, %v9531_v4  ;;  %7041 = vmatpush.bf16.msrb.mxu3 %v10332_v24 }
 0x273   : > { %v12914_v26 = vld [vmem:[%s13879_s24 + $0xa64] sm:$0xf0] }
 0x274   : > { %v10043_v27 = vld [vmem:[%s13879_s24 + $0xc48] sm:$0xf]  ;;  %v9788_v37 = vor.u32 %v12914_v26, %v9787_v23  ;;  %7000 = vmatpush.bf16.msrb.mxu0 %v9532_v30 }
 0x275   : > { %v12978_v28 = vld [vmem:[%s13879_s24 + $0xc64] sm:$0xf0] }
 0x276   : > { %v10299_v51 = vld [vmem:[%s13879_s24 + $0xe48] sm:$0xf]  ;;  %v10044_v12 = vor.u32 %v12978_v28, %v10043_v27  ;;  %7014 = vmatpush.bf16.msrb.mxu1 %v9788_v37 }
 0x277   : > { %v13042_v29 = vld [vmem:[%s13879_s24 + $0xe64] sm:$0xf0] }
 0x278   : > { %v9499_v33 = vld [vmem:[%s13879_s24 + $0x808] sm:$0xf]  ;;  %v10300_v42 = vor.u32 %v13042_v29, %v10299_v51  ;;  %7028 = vmatpush.bf16.msrb.mxu2 %v10044_v12 }
 0x279   : > { %v12842_v34 = vld [vmem:[%s13879_s24 + $0x824] sm:$0xf0] }
 0x27a   : > { %v9755_v48 = vld [vmem:[%s13879_s24 + $0xa08] sm:$0xf]  ;;  %v9500_v55 = vor.u32 %v12842_v34, %v9499_v33  ;;  %7042 = vmatpush.bf16.msrb.mxu3 %v10300_v42 }
 0x27b   : > { %v12906_v49 = vld [vmem:[%s13879_s24 + $0xa24] sm:$0xf0] }
 0x27c   : > { %v10011_v2 = vld [vmem:[%s13879_s24 + $0xc08] sm:$0xf]  ;;  %v9756_v63 = vor.u32 %v12906_v49, %v9755_v48  ;;  %7001 = vmatpush.bf16.msrb.mxu0 %v9500_v55 }
 0x27d   : > { %v12970_v52 = vld [vmem:[%s13879_s24 + $0xc24] sm:$0xf0] }
 0x27e   : > { %v10267_v3 = vld [vmem:[%s13879_s24 + $0xe08] sm:$0xf]  ;;  %v10012_v62 = vor.u32 %v12970_v52, %v10011_v2  ;;  %7015 = vmatpush.bf16.msrb.mxu1 %v9756_v63 }
 0x27f   : > { %v13034_v7 = vld [vmem:[%s13879_s24 + $0xe24] sm:$0xf0]  ;;  %7002 = vmatmul.bf16.vlgmr.msrb.gmra.mxu0 %v14090_v39 }
 0x280   : > { %v10747_v53 = vld [vmem:[%s13879_s24 + $0x11c8] sm:$0xf]  ;;  %v10268_v5 = vor.u32 %v13034_v7, %v10267_v3  ;;  %7029 = vmatpush.bf16.msrb.mxu2 %v10012_v62 }
 0x281   : > { %v13154_v54 = vld [vmem:[%s13879_s24 + $0x11e4] sm:$0xf0]  ;;  %7016 = vmatmul.bf16.vlgmr.msrb.gmra.mxu1 %v14097_v44 }
 0x282   : > { %v11003_v61 = vld [vmem:[%s13879_s24 + $0x13c8] sm:$0xf]  ;;  %v10748_v6 = vor.u32 %v13154_v54, %v10747_v53  ;;  %7043 = vmatpush.bf16.msrb.mxu3 %v10268_v5 }
 0x283   : > { %v13218_v56 = vld [vmem:[%s13879_s24 + $0x13e4] sm:$0xf0]  ;;  %7030 = vmatmul.bf16.vlgmr.msrb.gmra.mxu2 %v14095_v43 }
 0x284   : > { %v11259_v59 = vld [vmem:[%s13879_s24 + $0x15c8] sm:$0xf]  ;;  %v11004_v45 = vor.u32 %v13218_v56, %v11003_v61  ;;  %7050 = vmatpush.bf16.msra.mxu0 %v10748_v6 }
 0x285   : > { %v13282_v60 = vld [vmem:[%s13879_s24 + $0x15e4] sm:$0xf0]  ;;  %7044 = vmatmul.bf16.vlgmr.msrb.gmra.mxu3 %v14101_v47 }
 0x286   : > { %v11515_v50 = vld [vmem:[%s13879_s24 + $0x17c8] sm:$0xf]  ;;  %v11260_v8 = vor.u32 %v13282_v60, %v11259_v59  ;;  %7064 = vmatpush.bf16.msra.mxu1 %v11004_v45  ;;  %v14802_v45 = vpop.f32.mrf.mxu1 }
 0x287   : > { %v13346_v0 = vld [vmem:[%s13879_s24 + $0x17e4] sm:$0xf0] }
 0x288   : > { %v10715_v9 = vld [vmem:[%s13879_s24 + $0x1188] sm:$0xf]  ;;  %v11516_v13 = vor.u32 %v13346_v0, %v11515_v50  ;;  %7078 = vmatpush.bf16.msra.mxu2 %v11260_v8  ;;  %v14798_v0 = vpop.f32.mrf.mxu0 }
 0x289   : > { %v13146_v57 = vld [vmem:[%s13879_s24 + $0x11a4] sm:$0xf0] }
 0x28a   : > { %v10971_v11 = vld [vmem:[%s13879_s24 + $0x1388] sm:$0xf]  ;;  %v10716_v19 = vor.u32 %v13146_v57, %v10715_v9  ;;  %7092 = vmatpush.bf16.msra.mxu3 %v11516_v13 }
 0x28b   : > { %v13210_v14 = vld [vmem:[%s13879_s24 + $0x13a4] sm:$0xf0] }
 0x28c   : > { %v11227_v15 = vld [vmem:[%s13879_s24 + $0x1588] sm:$0xf]  ;;  %v10972_v22 = vor.u32 %v13210_v14, %v10971_v11  ;;  %7051 = vmatpush.bf16.msra.mxu0 %v10716_v19 }
 0x28d   : > { %v13274_v25 = vld [vmem:[%s13879_s24 + $0x15a4] sm:$0xf0] }
 0x28e   : > { %v11483_v16 = vld [vmem:[%s13879_s24 + $0x1788] sm:$0xf]  ;;  %v11228_v20 = vor.u32 %v13274_v25, %v11227_v15  ;;  %7065 = vmatpush.bf16.msra.mxu1 %v10972_v22 }
 0x28f   : > { %v13338_v18 = vld [vmem:[%s13879_s24 + $0x17a4] sm:$0xf0] }
 0x290   : > { %v10683_v4 = vld [vmem:[%s13879_s24 + $0x1148] sm:$0xf]  ;;  %v11484_v24 = vor.u32 %v13338_v18, %v11483_v16  ;;  %7079 = vmatpush.bf16.msra.mxu2 %v11228_v20 }
 0x291   : > { %v13138_v21 = vld [vmem:[%s13879_s24 + $0x1164] sm:$0xf0] }
 0x292   : > { %v10939_v23 = vld [vmem:[%s13879_s24 + $0x1348] sm:$0xf]  ;;  %v10684_v30 = vor.u32 %v13138_v21, %v10683_v4  ;;  %7093 = vmatpush.bf16.msra.mxu3 %v11484_v24 }
 0x293   : > { %v13202_v26 = vld [vmem:[%s13879_s24 + $0x1364] sm:$0xf0] }
 0x294   : > { %v11195_v27 = vld [vmem:[%s13879_s24 + $0x1548] sm:$0xf]  ;;  %v10940_v33 = vor.u32 %v13202_v26, %v10939_v23  ;;  %7052 = vmatpush.bf16.msra.mxu0 %v10684_v30 }
 0x295   : > { %v13266_v28 = vld [vmem:[%s13879_s24 + $0x1564] sm:$0xf0] }
 0x296   : > { %v11451_v51 = vld [vmem:[%s13879_s24 + $0x1748] sm:$0xf]  ;;  %v11196_v34 = vor.u32 %v13266_v28, %v11195_v27  ;;  %7066 = vmatpush.bf16.msra.mxu1 %v10940_v33  ;;  %v14815_v27 = vpop.f32.mrf.mxu2  ;;  %v14820_v33 = vpop.f32.mrf.mxu3 }
 0x297   : > { %v13330_v29 = vld [vmem:[%s13879_s24 + $0x1764] sm:$0xf0] }
 0x298   : > { %v10651_v37 = vld [vmem:[%s13879_s24 + $0x1108] sm:$0xf]  ;;  %v11452_v49 = vor.u32 %v13330_v29, %v11451_v51  ;;  %7080 = vmatpush.bf16.msra.mxu2 %v11196_v34 }
 0x299   : > { %v13130_v12 = vld [vmem:[%s13879_s24 + $0x1124] sm:$0xf0] }
 0x29a   : > { %v10907_v48 = vld [vmem:[%s13879_s24 + $0x1308] sm:$0xf]  ;;  %v10652_v53 = vor.u32 %v13130_v12, %v10651_v37  ;;  %7094 = vmatpush.bf16.msra.mxu3 %v11452_v49 }
 0x29b   : > { %v13194_v2 = vld [vmem:[%s13879_s24 + $0x1324] sm:$0xf0] }
 0x29c   : > { %v11163_v42 = vld [vmem:[%s13879_s24 + $0x1508] sm:$0xf]  ;;  %v10908_v54 = vor.u32 %v13194_v2, %v10907_v48  ;;  %7053 = vmatpush.bf16.msra.mxu0 %v10652_v53 }
 0x29d   : > { %v13258_v52 = vld [vmem:[%s13879_s24 + $0x1524] sm:$0xf0] }
 0x29e   : > { %v11419_v3 = vld [vmem:[%s13879_s24 + $0x1708] sm:$0xf]  ;;  %v11164_v61 = vor.u32 %v13258_v52, %v11163_v42  ;;  %7067 = vmatpush.bf16.msra.mxu1 %v10908_v54  ;;  %v14830_v52 = vpop.f32.mrf.mxu0 }
 0x29f   : > { %v13322_v7 = vld [vmem:[%s13879_s24 + $0x1724] sm:$0xf0] }
 0x2a0   : > { %v10619_v55 = vld [vmem:[%s13879_s24 + $0x10c8] sm:$0xf]  ;;  %v11420_v60 = vor.u32 %v13322_v7, %v11419_v3  ;;  %7081 = vmatpush.bf16.msra.mxu2 %v11164_v61 }
 0x2a1   : > { %v13122_v56 = vld [vmem:[%s13879_s24 + $0x10e4] sm:$0xf0] }
 0x2a2   : > { %v10875_v59 = vld [vmem:[%s13879_s24 + $0x12c8] sm:$0xf]  ;;  %v10620_v8 = vor.u32 %v13122_v56, %v10619_v55  ;;  %7095 = vmatpush.bf16.msra.mxu3 %v11420_v60  ;;  %v14835_v55 = vpop.f32.mrf.mxu1 }
 0x2a3   : > { %v13186_v63 = vld [vmem:[%s13879_s24 + $0x12e4] sm:$0xf0] }
 0x2a4   : > { %v11131_v62 = vld [vmem:[%s13879_s24 + $0x14c8] sm:$0xf]  ;;  %v10876_v9 = vor.u32 %v13186_v63, %v10875_v59  ;;  %7054 = vmatpush.bf16.msra.mxu0 %v10620_v8 }
 0x2a5   : > { %v13250_v50 = vld [vmem:[%s13879_s24 + $0x14e4] sm:$0xf0] }
 0x2a6   : > { %v11387_v5 = vld [vmem:[%s13879_s24 + $0x16c8] sm:$0xf]  ;;  %v11132_v57 = vor.u32 %v13250_v50, %v11131_v62  ;;  %7068 = vmatpush.bf16.msra.mxu1 %v10876_v9 }
 0x2a7   : > { %v13314_v6 = vld [vmem:[%s13879_s24 + $0x16e4] sm:$0xf0] }
 0x2a8   : > { %v10587_v11 = vld [vmem:[%s13879_s24 + $0x1088] sm:$0xf]  ;;  %v11388_v15 = vor.u32 %v13314_v6, %v11387_v5  ;;  %7082 = vmatpush.bf16.msra.mxu2 %v11132_v57 }
 0x2a9   : > { %v13114_v13 = vld [vmem:[%s13879_s24 + $0x10a4] sm:$0xf0] }
 0x2aa   : > { %v10843_v14 = vld [vmem:[%s13879_s24 + $0x1288] sm:$0xf]  ;;  %v10588_v20 = vor.u32 %v13114_v13, %v10587_v11  ;;  %7096 = vmatpush.bf16.msra.mxu3 %v11388_v15 }
 0x2ab   : > { %v13178_v25 = vld [vmem:[%s13879_s24 + $0x12a4] sm:$0xf0] }
 0x2ac   : > { %v11099_v16 = vld [vmem:[%s13879_s24 + $0x1488] sm:$0xf]  ;;  %v10844_v4 = vor.u32 %v13178_v25, %v10843_v14  ;;  %7055 = vmatpush.bf16.msra.mxu0 %v10588_v20 }
 0x2ad   : > { %v13242_v18 = vld [vmem:[%s13879_s24 + $0x14a4] sm:$0xf0] }
 0x2ae   : > { %v11355_v19 = vld [vmem:[%s13879_s24 + $0x1688] sm:$0xf]  ;;  %v11100_v21 = vor.u32 %v13242_v18, %v11099_v16  ;;  %7069 = vmatpush.bf16.msra.mxu1 %v10844_v4 }
 0x2af   : > { %v13306_v22 = vld [vmem:[%s13879_s24 + $0x16a4] sm:$0xf0] }
 0x2b0   : > { %v10555_v23 = vld [vmem:[%s13879_s24 + $0x1048] sm:$0xf]  ;;  %v11356_v28 = vor.u32 %v13306_v22, %v11355_v19  ;;  %7083 = vmatpush.bf16.msra.mxu2 %v11100_v21 }
 0x2b1   : > { %v13106_v24 = vld [vmem:[%s13879_s24 + $0x1064] sm:$0xf0] }
 0x2b2   : > { %v10811_v26 = vld [vmem:[%s13879_s24 + $0x1248] sm:$0xf]  ;;  %v10556_v49 = vor.u32 %v13106_v24, %v10555_v23  ;;  %7097 = vmatpush.bf16.msra.mxu3 %v11356_v28  ;;  %v14854_v23 = vpop.f32.mrf.mxu2 }
 0x2b3   : > { %v13170_v51 = vld [vmem:[%s13879_s24 + $0x1264] sm:$0xf0] }
 0x2b4   : > { %v11067_v29 = vld [vmem:[%s13879_s24 + $0x1448] sm:$0xf]  ;;  %v10812_v3 = vor.u32 %v13170_v51, %v10811_v26  ;;  %7056 = vmatpush.bf16.msra.mxu0 %v10556_v49  ;;  %v6779_v49 = vpop.f32.mrf.mxu0 }
 0x2b5   : > { %v13234_v30 = vld [vmem:[%s13879_s24 + $0x1464] sm:$0xf0] }
 0x2b6   : > { %v11323_v34 = vld [vmem:[%s13879_s24 + $0x1648] sm:$0xf]  ;;  %v11068_v7 = vor.u32 %v13234_v30, %v11067_v29  ;;  %7070 = vmatpush.bf16.msra.mxu1 %v10812_v3  ;;  %v14859_v29 = vpop.f32.mrf.mxu3 }
 0x2b7   : > { %v13298_v37 = vld [vmem:[%s13879_s24 + $0x1664] sm:$0xf0] }
 0x2b8   : > { %v14825_v12 = vld [vmem:[%s13885_s5] sm:$0xff]  ;;  %v11324_v56 = vor.u32 %v13298_v37, %v11323_v34  ;;  %7084 = vmatpush.bf16.msra.mxu2 %v11068_v7 }
 0x2b9   : > { %v1275_v48 = vperm.slane %v14825_v12, 1  ;;  %v10523_v2 = vld [vmem:[%s13879_s24 + $0x1008] sm:$0xf] }
 0x2ba   : > { %v13098_v42 = vld [vmem:[%s13879_s24 + $0x1024] sm:$0xf0]  ;;  %7098 = vmatpush.bf16.msra.mxu3 %v11324_v56 }
 0x2bb   : > { %v10779_v53 = vld [vmem:[%s13879_s24 + $0x1208] sm:$0xf]  ;;  %v10524_v6 = vor.u32 %v13098_v42, %v10523_v2  ;;  %v6724_v18 = vadd.f32 %v14798_v0, %v1275_v48 }
 0x2bc   : > { %v13162_v54 = vld [vmem:[%s13879_s24 + $0x1224] sm:$0xf0] }
 0x2bd   : > { %v11035_v61 = vld [vmem:[%s13879_s24 + $0x1408] sm:$0xf]  ;;  %v10780_v11 = vor.u32 %v13162_v54, %v10779_v53  ;;  %7057 = vmatpush.bf16.msra.mxu0 %v10524_v6  ;;  %v6738_v37 = vadd.f32 %v14802_v45, %v6724_v18  ;;  %v14867_v54 = vpop.f32.mrf.mxu1  ;;  %v14890_v18 = vpop.f32.mrf.mxu2 }
 0x2be   : > { %v13226_v59 = vld [vmem:[%s13879_s24 + $0x1424] sm:$0xf0] }
 0x2bf   : > { %v11291_v60 = vld [vmem:[%s13879_s24 + $0x1608] sm:$0xf]  ;;  %v11036_v13 = vor.u32 %v13226_v59, %v11035_v61  ;;  %7071 = vmatpush.bf16.msra.mxu1 %v10780_v11 }
 0x2c0   : > { %v13290_v63 = vld [vmem:[%s13879_s24 + $0x1624] sm:$0xf0]  ;;  %7058 = vmatmul.bf16.vlgmr.msra.gmra.mxu0 %v14190_v31 }
 0x2c1   : > { %v11771_v62 = vld [vmem:[%s13879_s24 + $0x19c8] sm:$0xf]  ;;  %v11292_v25 = vor.u32 %v13290_v63, %v11291_v60  ;;  %7085 = vmatpush.bf16.msra.mxu2 %v11036_v13 }
 0x2c2   : > { %v13410_v50 = vld [vmem:[%s13879_s24 + $0x19e4] sm:$0xf0]  ;;  %7072 = vmatmul.bf16.vlgmr.msra.gmra.mxu1 %v14197_v36 }
 0x2c3   : > { %v12027_v5 = vld [vmem:[%s13879_s24 + $0x1bc8] sm:$0xf]  ;;  %v11772_v16 = vor.u32 %v13410_v50, %v11771_v62  ;;  %7099 = vmatpush.bf16.msra.mxu3 %v11292_v25  ;;  %v6752_v50 = vadd.f32 %v14815_v27, %v6738_v37  ;;  %v6726_v25 = vadd.f32 %v14830_v52, %v1275_v48 }
 0x2c4   : > { %v13474_v8 = vld [vmem:[%s13879_s24 + $0x1be4] sm:$0xf0]  ;;  %7086 = vmatmul.bf16.vlgmr.msra.gmra.mxu2 %v14195_v35 }
 0x2c5   : > { %v12283_v9 = vld [vmem:[%s13879_s24 + $0x1dc8] sm:$0xf]  ;;  %v12028_v19 = vor.u32 %v13474_v8, %v12027_v5  ;;  %7106 = vmatpush.bf16.msrb.mxu0 %v11772_v16  ;;  %v14904_v37 = vpop.f32.mrf.mxu1 }
 0x2c6   : > { %v13538_v57 = vld [vmem:[%s13879_s24 + $0x1de4] sm:$0xf0]  ;;  %7100 = vmatmul.bf16.vlgmr.msra.gmra.mxu3 %v14201_v40 }
 0x2c7   : > { %v12539_v14 = vld [vmem:[%s13879_s24 + $0x1fc8] sm:$0xf]  ;;  %v12284_v22 = vor.u32 %v13538_v57, %v12283_v9  ;;  %7120 = vmatpush.bf16.msrb.mxu1 %v12028_v19 }
 0x2c8   : > { %v13602_v15 = vld [vmem:[%s13879_s24 + $0x1fe4] sm:$0xf0] }
 0x2c9   : > { %v11739_v20 = vld [vmem:[%s13879_s24 + $0x1988] sm:$0xf]  ;;  %v12540_v24 = vor.u32 %v13602_v15, %v12539_v14  ;;  %7134 = vmatpush.bf16.msrb.mxu2 %v12284_v22  ;;  %v6766_v22 = vadd.f32 %v14820_v33, %v6752_v50  ;;  %v6740_v33 = vadd.f32 %v14835_v55, %v6726_v25 }
 0x2ca   : > { %v13402_v4 = vld [vmem:[%s13879_s24 + $0x19a4] sm:$0xf0] }
 0x2cb   : > { %v11995_v21 = vld [vmem:[%s13879_s24 + $0x1b88] sm:$0xf]  ;;  %v11740_v34 = vor.u32 %v13402_v4, %v11739_v20  ;;  %7148 = vmatpush.bf16.msrb.mxu3 %v12540_v24  ;;  %v14893_v20 = vpop.f32.mrf.mxu3 }
 0x2cc   : > { %v13466_v26 = vld [vmem:[%s13879_s24 + $0x1ba4] sm:$0xf0] }
 0x2cd   : > { %v12251_v28 = vld [vmem:[%s13879_s24 + $0x1d88] sm:$0xf]  ;;  %v11996_v2 = vor.u32 %v13466_v26, %v11995_v21  ;;  %7107 = vmatpush.bf16.msrb.mxu0 %v11740_v34 }
 0x2ce   : > { %v13530_v51 = vld [vmem:[%s13879_s24 + $0x1da4] sm:$0xf0] }
 0x2cf   : > { %v12507_v0 = vld [vmem:[%s13879_s24 + $0x1f88] sm:$0xf]  ;;  %v12252_v42 = vor.u32 %v13530_v51, %v12251_v28  ;;  %7121 = vmatpush.bf16.msrb.mxu1 %v11996_v2 }
 0x2d0   : > { %v13594_v30 = vld [vmem:[%s13879_s24 + $0x1fa4] sm:$0xf0] }
 0x2d1   : > { %v11707_v3 = vld [vmem:[%s13879_s24 + $0x1948] sm:$0xf]  ;;  %v12508_v61 = vor.u32 %v13594_v30, %v12507_v0  ;;  %7135 = vmatpush.bf16.msrb.mxu2 %v12252_v42  ;;  %v6781_v0 = vpop.f32.mrf.mxu0  ;;  %v6780_v42 = vadd.f32 %v6779_v49, %v6766_v22 }
 0x2d2   : > { %v13394_v7 = vld [vmem:[%s13879_s24 + $0x1964] sm:$0xf0] }
 0x2d3   : > { %v11963_v53 = vld [vmem:[%s13879_s24 + $0x1b48] sm:$0xf]  ;;  %v11708_v62 = vor.u32 %v13394_v7, %v11707_v3  ;;  %7149 = vmatpush.bf16.msrb.mxu3 %v12508_v61 }
 0x2d4   : > { %v13458_v56 = vld [vmem:[%s13879_s24 + $0x1b64] sm:$0xf0] }
 0x2d5   : > { %v12219_v45 = vld [vmem:[%s13879_s24 + $0x1d48] sm:$0xf]  ;;  %v11964_v5 = vor.u32 %v13458_v56, %v11963_v53  ;;  %7108 = vmatpush.bf16.msrb.mxu0 %v11708_v62 }
 0x2d6   : > { %v13522_v59 = vld [vmem:[%s13879_s24 + $0x1d64] sm:$0xf0] }
 0x2d7   : > { %v12475_v60 = vld [vmem:[%s13879_s24 + $0x1f48] sm:$0xf]  ;;  %v12220_v6 = vor.u32 %v13522_v59, %v12219_v45  ;;  %7122 = vmatpush.bf16.msrb.mxu1 %v11964_v5  ;;  %v6794_v5 = vadd.f32 %v14867_v54, %v6780_v42 }
 0x2d8   : > { %v13586_v63 = vld [vmem:[%s13879_s24 + $0x1f64] sm:$0xf0] }
 0x2d9   : > { %v11675_v8 = vld [vmem:[%s13879_s24 + $0x1908] sm:$0xf]  ;;  %v12476_v11 = vor.u32 %v13586_v63, %v12475_v60  ;;  %7136 = vmatpush.bf16.msrb.mxu2 %v12220_v6  ;;  %v6754_v63 = vadd.f32 %v14854_v23, %v6740_v33  ;;  %v6809_v23 = vpop.f32.mrf.mxu2 }
 0x2da   : > { %v13386_v9 = vld [vmem:[%s13879_s24 + $0x1924] sm:$0xf0] }
 0x2db   : > { %v11931_v57 = vld [vmem:[%s13879_s24 + $0x1b08] sm:$0xf]  ;;  %v11676_v19 = vor.u32 %v13386_v9, %v11675_v8  ;;  %7150 = vmatpush.bf16.msrb.mxu3 %v12476_v11  ;;  %v6768_v54 = vadd.f32 %v14859_v29, %v6754_v63  ;;  %v12830_v63 = vld [vmem:[%s13879_s24 + $0x7cc] sm:$0xf] }
 0x2dc   : > { %v13450_v13 = vld [vmem:[%s13879_s24 + $0x1b24] sm:$0xf0] }
 0x2dd   : > { %v12187_v14 = vld [vmem:[%s13879_s24 + $0x1d08] sm:$0xf]  ;;  %v11932_v12 = vor.u32 %v13450_v13, %v11931_v57  ;;  %7109 = vmatpush.bf16.msrb.mxu0 %v11676_v19  ;;  %v6782_v42 = vadd.f32 %v6781_v0, %v6768_v54  ;;  %v9469_v0 = vld [vmem:[%s13879_s24 + $0x7e8] sm:$0xf0] }
 0x2de   : > { %v13514_v15 = vld [vmem:[%s13879_s24 + $0x1d24] sm:$0xf0]  ;;  %v9181_v54 = vld [vmem:[%s13879_s24 + $0x5a8] sm:$0xf0] }
 0x2df   : > { %v12443_v27 = vld [vmem:[%s13879_s24 + $0x1f08] sm:$0xf]  ;;  %v12188_v4 = vor.u32 %v13514_v15, %v12187_v14  ;;  %7123 = vmatpush.bf16.msrb.mxu1 %v11932_v12  ;;  %v6849_v12 = vpop.f32.mrf.mxu1 }
 0x2e0   : > { %v13578_v16 = vld [vmem:[%s13879_s24 + $0x1f24] sm:$0xf0] }
 0x2e1   : > { %v11643_v48 = vld [vmem:[%s13879_s24 + $0x18c8] sm:$0xf]  ;;  %v12444_v24 = vor.u32 %v13578_v16, %v12443_v27  ;;  %7137 = vmatpush.bf16.msrb.mxu2 %v12188_v4  ;;  %v14923_v27 = vpop.f32.mrf.mxu3  ;;  %v6835_v16 = vpop.f32.mrf.mxu0 }
 0x2e2   : > { %v13378_v52 = vld [vmem:[%s13879_s24 + $0x18e4] sm:$0xf0] }
 0x2e3   : > { %v11899_v21 = vld [vmem:[%s13879_s24 + $0x1ac8] sm:$0xf]  ;;  %v11644_v2 = vor.u32 %v13378_v52, %v11643_v48  ;;  %7151 = vmatpush.bf16.msrb.mxu3 %v12444_v24 }
 0x2e4   : > { %v13442_v26 = vld [vmem:[%s13879_s24 + $0x1ae4] sm:$0xf0] }
 0x2e5   : > { %v12155_v28 = vld [vmem:[%s13879_s24 + $0x1cc8] sm:$0xf]  ;;  %v11900_v3 = vor.u32 %v13442_v26, %v11899_v21  ;;  %7110 = vmatpush.bf16.msrb.mxu0 %v11644_v2  ;;  %v6808_v21 = vadd.f32 %v14890_v18, %v6794_v5  ;;  %v12638_v18 = vld [vmem:[%s13879_s24 + $0x1cc] sm:$0xf]  ;;  %v6796_v5 = vadd.f32 %v14904_v37, %v6782_v42 }
 0x2e6   : > { %v13506_v51 = vld [vmem:[%s13879_s24 + $0x1ce4] sm:$0xf0]  ;;  %v12822_v37 = vld [vmem:[%s13879_s24 + $0x78c] sm:$0xf] }
 0x2e7   : > { %v12411_v30 = vld [vmem:[%s13879_s24 + $0x1ec8] sm:$0xf]  ;;  %v12156_v7 = vor.u32 %v13506_v51, %v12155_v28  ;;  %7124 = vmatpush.bf16.msrb.mxu1 %v11900_v3  ;;  %v8701_v3 = vld [vmem:[%s13879_s24 + $0x1e8] sm:$0xf0] }
 0x2e8   : > { %v13570_v34 = vld [vmem:[%s13879_s24 + $0x1ee4] sm:$0xf0]  ;;  %v9405_v42 = vld [vmem:[%s13879_s24 + $0x768] sm:$0xf0] }
 0x2e9   : > { %v11611_v53 = vld [vmem:[%s13879_s24 + $0x1888] sm:$0xf]  ;;  %v12412_v56 = vor.u32 %v13570_v34, %v12411_v30  ;;  %7138 = vmatpush.bf16.msrb.mxu2 %v12156_v7  ;;  %v12702_v7 = vld [vmem:[%s13879_s24 + $0x3cc] sm:$0xf] }
 0x2ea   : > { %v13370_v61 = vld [vmem:[%s13879_s24 + $0x18a4] sm:$0xf0] }
 0x2eb   : > { %v11867_v55 = vld [vmem:[%s13879_s24 + $0x1a88] sm:$0xf]  ;;  %v11612_v50 = vor.u32 %v13370_v61, %v11611_v53  ;;  %7152 = vmatpush.bf16.msrb.mxu3 %v12412_v56  ;;  %v8957_v61 = vld [vmem:[%s13879_s24 + $0x3e8] sm:$0xf0] }
 0x2ec   : > { %v13434_v45 = vld [vmem:[%s13879_s24 + $0x1aa4] sm:$0xf0]  ;;  %v9213_v56 = vld [vmem:[%s13879_s24 + $0x5e8] sm:$0xf0] }
 0x2ed   : > { %v12123_v59 = vld [vmem:[%s13879_s24 + $0x1c88] sm:$0xf]  ;;  %v11868_v6 = vor.u32 %v13434_v45, %v11867_v55  ;;  %7111 = vmatpush.bf16.msrb.mxu0 %v11612_v50  ;;  %v12766_v55 = vld [vmem:[%s13879_s24 + $0x5cc] sm:$0xf]  ;;  %v6822_v45 = vadd.f32 %v14893_v20, %v6808_v21  ;;  %v8704_v50 = vor.u32 %v12638_v18, %v8701_v3  ;;  %v6877_v20 = vpop.f32.mrf.mxu3 }
 0x2ee   : > { %v13498_v60 = vld [vmem:[%s13879_s24 + $0x1ca4] sm:$0xf0]  ;;  %v12614_v3 = vld [vmem:[%s13879_s24 + $0x10c] sm:$0xf] }
 0x2ef   : > { %v12379_v62 = vld [vmem:[%s13879_s24 + $0x1e88] sm:$0xf]  ;;  %v12124_v8 = vor.u32 %v13498_v60, %v12123_v59  ;;  %7125 = vmatpush.bf16.msrb.mxu1 %v11868_v6  ;;  %v6836_v6 = vadd.f32 %v6835_v16, %v6822_v45  ;;  %v9437_v16 = vld [vmem:[%s13879_s24 + $0x7a8] sm:$0xf0] }
 0x2f0   : > { %v13562_v49 = vld [vmem:[%s13879_s24 + $0x1ea4] sm:$0xf0] }
 0x2f1   : > { %v11579_v9 = vld [vmem:[%s13879_s24 + $0x1848] sm:$0xf]  ;;  %v12380_v13 = vor.u32 %v13562_v49, %v12379_v62  ;;  %7139 = vmatpush.bf16.msrb.mxu2 %v12124_v8  ;;  %v6863_v62 = vpop.f32.mrf.mxu2  ;;  %v8960_v8 = vor.u32 %v12702_v7, %v8957_v61  ;;  %v8605_v61 = vld [vmem:[%s13879_s24 + $0x128] sm:$0xf0] }
 0x2f2   : > { %v13362_v57 = vld [vmem:[%s13879_s24 + $0x1864] sm:$0xf0] }
 0x2f3   : > { %v11835_v11 = vld [vmem:[%s13879_s24 + $0x1a48] sm:$0xf]  ;;  %v11580_v4 = vor.u32 %v13362_v57, %v11579_v9  ;;  %7153 = vmatpush.bf16.msrb.mxu3 %v12380_v13  ;;  %v9216_v9 = vor.u32 %v12766_v55, %v9213_v56  ;;  %v12630_v57 = vld [vmem:[%s13879_s24 + $0x18c] sm:$0xf] }
 0x2f4   : > { %v13426_v14 = vld [vmem:[%s13879_s24 + $0x1a64] sm:$0xf0]  ;;  %v12694_v13 = vld [vmem:[%s13879_s24 + $0x38c] sm:$0xf] }
 0x2f5   : > { %v12091_v15 = vld [vmem:[%s13879_s24 + $0x1c48] sm:$0xf]  ;;  %v11836_v29 = vor.u32 %v13426_v14, %v11835_v11  ;;  %7112 = vmatpush.bf16.msrb.mxu0 %v11580_v4  ;;  %v8669_v11 = vld [vmem:[%s13879_s24 + $0x1a8] sm:$0xf0]  ;;  %v9472_v14 = vor.u32 %v12830_v63, %v9469_v0  ;;  %v6851_v4 = vpop.f32.mrf.mxu1 }
 0x2f6   : > { %v13490_v25 = vld [vmem:[%s13879_s24 + $0x1c64] sm:$0xf0]  ;;  %v12678_v55 = vld [vmem:[%s13879_s24 + $0x30c] sm:$0xf] }
 0x2f7   : > { %v12347_v19 = vld [vmem:[%s13879_s24 + $0x1e48] sm:$0xf]  ;;  %v12092_v24 = vor.u32 %v13490_v25, %v12091_v15  ;;  %7126 = vmatpush.bf16.msrb.mxu1 %v11836_v29  ;;  %v8925_v15 = vld [vmem:[%s13879_s24 + $0x3a8] sm:$0xf0] }
 0x2f8   : > { %v13554_v22 = vld [vmem:[%s13879_s24 + $0x1e64] sm:$0xf0]  ;;  %v12758_v25 = vld [vmem:[%s13879_s24 + $0x58c] sm:$0xf]  ;;  %v8928_v21 = vor.u32 %v12694_v13, %v8925_v15 }
 0x2f9   : > { %v11547_v48 = vld [vmem:[%s13879_s24 + $0x1808] sm:$0xf]  ;;  %v12348_v33 = vor.u32 %v13554_v22, %v12347_v19  ;;  %7140 = vmatpush.bf16.msrb.mxu2 %v12092_v24  ;;  %v6810_v19 = vadd.f32 %v6809_v23, %v6796_v5  ;;  %v6837_v22 = vpop.f32.mrf.mxu0  ;;  %v9184_v23 = vor.u32 %v12758_v25, %v9181_v54  ;;  %v12622_v29 = vld [vmem:[%s13879_s24 + $0x14c] sm:$0xf]  ;;  %v6865_v45 = vpop.f32.mrf.mxu2 }
 0x2fa   : > { %v13354_v52 = vld [vmem:[%s13879_s24 + $0x1824] sm:$0xf0]  ;;  %v8637_v24 = vld [vmem:[%s13879_s24 + $0x168] sm:$0xf0] }
 0x2fb   : > { %v11803_v26 = vld [vmem:[%s13879_s24 + $0x1a08] sm:$0xf]  ;;  %v11548_v53 = vor.u32 %v13354_v52, %v11547_v48  ;;  %7154 = vmatpush.bf16.msrb.mxu3 %v12348_v33  ;;  %v8672_v48 = vor.u32 %v12630_v57, %v8669_v11  ;;  %v6850_v52 = vadd.f32 %v6849_v12, %v6836_v6  ;;  %v12750_v33 = vld [vmem:[%s13879_s24 + $0x54c] sm:$0xf]  ;;  %v6824_v12 = vadd.f32 %v14923_v27, %v6810_v19 }
 0x2fc   : > { %v13418_v28 = vld [vmem:[%s13879_s24 + $0x1a24] sm:$0xf0]  ;;  %v8640_v18 = vor.u32 %v12622_v29, %v8637_v24  ;;  %v8861_v56 = vld [vmem:[%s13879_s24 + $0x328] sm:$0xf0]  ;;  %v8608_v6 = vor.u32 %v12614_v3, %v8605_v61 }
 0x2fd   : > { %v12059_v51 = vld [vmem:[%s13879_s24 + $0x1c08] sm:$0xf]  ;;  %v11804_v59 = vor.u32 %v13418_v28, %v11803_v26  ;;  %7113 = vmatpush.bf16.msrb.mxu0 %v11548_v53  ;;  %v12686_v26 = vld [vmem:[%s13879_s24 + $0x34c] sm:$0xf]  ;;  %v9440_v28 = vor.u32 %v12822_v37, %v9437_v16  ;;  %v6838_v7 = vadd.f32 %v6837_v22, %v6824_v12 }
 0x2fe   : > { %v13482_v30 = vld [vmem:[%s13879_s24 + $0x1c24] sm:$0xf0]  ;;  %v9117_v63 = vld [vmem:[%s13879_s24 + $0x528] sm:$0xf0] }
 0x2ff   : > { %v12315_v34 = vld [vmem:[%s13879_s24 + $0x1e08] sm:$0xf]  ;;  %v12060_v60 = vor.u32 %v13482_v30, %v12059_v51  ;;  %7127 = vmatpush.bf16.msrb.mxu1 %v11804_v59  ;;  %v8893_v51 = vld [vmem:[%s13879_s24 + $0x368] sm:$0xf0]  ;;  %v6852_v57 = vadd.f32 %v6851_v4, %v6838_v7 }
 0x300   : > { %v13546_v2 = vld [vmem:[%s13879_s24 + $0x1e24] sm:$0xf0]  ;;  %7114 = vmatmul.bf16.vlgmr.msrb.gmra.mxu0 %v14290_v32  ;;  %v9149_v30 = vld [vmem:[%s13879_s24 + $0x568] sm:$0xf0]  ;;  %v8896_v27 = vor.u32 %v12686_v26, %v8893_v51 }
 0x301   : > { %v12316_v49 = vor.u32 %v13546_v2, %v12315_v34  ;;  %7141 = vmatpush.bf16.msrb.mxu2 %v12060_v60  ;;  %7162 = vmatpush.bf16.msra.mxu0 %v8704_v50  ;;  %v6864_v34 = vadd.f32 %v6863_v62, %v6850_v52  ;;  %v12814_v2 = vld [vmem:[%s13879_s24 + $0x74c] sm:$0xf]  ;;  %v9152_v53 = vor.u32 %v12750_v33, %v9149_v30  ;;  %v6879_v62 = vpop.f32.mrf.mxu3  ;;  %v6919_v33 = vpop.f32.mrf.mxu2 }
 0x302   : > { %7128 = vmatmul.bf16.vlgmr.msrb.gmra.mxu1 %v14297_v41  ;;  %v9408_v59 = vor.u32 %v12814_v2, %v9405_v42  ;;  %v12742_v60 = vld [vmem:[%s13879_s24 + $0x50c] sm:$0xf]  ;;  %v6866_v37 = vadd.f32 %v6865_v45, %v6852_v57 }
 0x303   : > { %7155 = vmatpush.bf16.msrb.mxu3 %v12316_v49  ;;  %7176 = vmatpush.bf16.msra.mxu1 %v8960_v8  ;;  %v6878_v0 = vadd.f32 %v6877_v20, %v6864_v34  ;;  %v6891_v49 = vpop.f32.mrf.mxu0  ;;  %v12806_v50 = vld [vmem:[%s13879_s24 + $0x70c] sm:$0xf]  ;;  %v8864_v8 = vor.u32 %v12678_v55, %v8861_v56  ;;  %v9120_v20 = vor.u32 %v12742_v60, %v9117_v63 }
 0x304   : > { %7142 = vmatmul.bf16.vlgmr.msrb.gmra.mxu2 %v14295_v38  ;;  %v9373_v5 = vld [vmem:[%s13879_s24 + $0x728] sm:$0xf0]  ;;  %v6880_v34 = vadd.f32 %v6879_v62, %v6866_v37 }
 0x305   : > { %7190 = vmatpush.bf16.msra.mxu2 %v9216_v9  ;;  %7163 = vmatpush.bf16.msra.mxu0 %v8672_v48  ;;  %v6905_v9 = vpop.f32.mrf.mxu1  ;;  %v6892_v11 = vadd.f32 %v6891_v49, %v6878_v0  ;;  %v12606_v13 = vld [vmem:[%s13879_s24 + $0xcc] sm:$0xf]  ;;  %v9376_v25 = vor.u32 %v12806_v50, %v9373_v5 }
 0x306   : > { %7156 = vmatmul.bf16.vlgmr.msrb.gmra.mxu3 %v14301_v46  ;;  %v12670_v15 = vld [vmem:[%s13879_s24 + $0x2cc] sm:$0xf] }
 0x307   : > { %7204 = vmatpush.bf16.msra.mxu3 %v9472_v14  ;;  %7177 = vmatpush.bf16.msra.mxu1 %v8928_v21  ;;  %v8573_v14 = vld [vmem:[%s13879_s24 + $0xe8] sm:$0xf0]  ;;  %v6906_v21 = vadd.f32 %v6905_v9, %v6892_v11 }
 0x308   : > { %v8829_v54 = vld [vmem:[%s13879_s24 + $0x2e8] sm:$0xf0]  ;;  %v8576_v48 = vor.u32 %v12606_v13, %v8573_v14 }
 0x309   : > { %7191 = vmatpush.bf16.msra.mxu2 %v9184_v23  ;;  %7164 = vmatpush.bf16.msra.mxu0 %v8640_v18  ;;  %v12734_v19 = vld [vmem:[%s13879_s24 + $0x4cc] sm:$0xf]  ;;  %v8832_v23 = vor.u32 %v12670_v15, %v8829_v54  ;;  %v6920_v2 = vadd.f32 %v6919_v33, %v6906_v21  ;;  %v6933_v18 = vpop.f32.mrf.mxu3 }
 0x30a   : > { %v9085_v22 = vld [vmem:[%s13879_s24 + $0x4e8] sm:$0xf0] }
 0x30b   : > { %7205 = vmatpush.bf16.msra.mxu3 %v9440_v28  ;;  %7178 = vmatpush.bf16.msra.mxu1 %v8896_v27  ;;  %v12798_v16 = vld [vmem:[%s13879_s24 + $0x6cc] sm:$0xf]  ;;  %v9088_v29 = vor.u32 %v12734_v19, %v9085_v22  ;;  %v6893_v42 = vpop.f32.mrf.mxu0  ;;  %v6934_v55 = vadd.f32 %v6933_v18, %v6920_v2  ;;  %v6921_v19 = vpop.f32.mrf.mxu2 }
 0x30c   : > { %v9341_v4 = vld [vmem:[%s13879_s24 + $0x6e8] sm:$0xf0]  ;;  %v6894_v61 = vadd.f32 %v6893_v42, %v6880_v34 }
 0x30d   : > { %7192 = vmatpush.bf16.msra.mxu2 %v9152_v53  ;;  %7165 = vmatpush.bf16.msra.mxu0 %v8608_v6  ;;  %v12598_v52 = vld [vmem:[%s13879_s24 + $0x8c] sm:$0xf]  ;;  %v9344_v51 = vor.u32 %v12798_v16, %v9341_v4  ;;  %v6907_v0 = vpop.f32.mrf.mxu1  ;;  %8283 = vst [vmem:[%s14668_s9 + $0x8] sm:$0xff] %v6934_v55 }
 0x30e   : > { %v8541_v24 = vld [vmem:[%s13879_s24 + $0xa8] sm:$0xf0]  ;;  %v6908_v11 = vadd.f32 %v6907_v0, %v6894_v61 }
 0x30f   : > { %7206 = vmatpush.bf16.msra.mxu3 %v9408_v59  ;;  %7179 = vmatpush.bf16.msra.mxu1 %v8864_v8  ;;  %v12662_v26 = vld [vmem:[%s13879_s24 + $0x28c] sm:$0xf]  ;;  %v8544_v27 = vor.u32 %v12598_v52, %v8541_v24 }
 0x310   : > { %v8797_v28 = vld [vmem:[%s13879_s24 + $0x2a8] sm:$0xf0]  ;;  %v6922_v4 = vadd.f32 %v6921_v19, %v6908_v11 }
 0x311   : > { %7193 = vmatpush.bf16.msra.mxu2 %v9120_v20  ;;  %v12726_v30 = vld [vmem:[%s13879_s24 + $0x48c] sm:$0xf]  ;;  %7166 = vmatpush.bf16.msra.mxu0 %v8576_v48  ;;  %v8800_v53 = vor.u32 %v12662_v26, %v8797_v28  ;;  %v6935_v48 = vpop.f32.mrf.mxu3 }
 0x312   : > { %v9053_v12 = vld [vmem:[%s13879_s24 + $0x4a8] sm:$0xf0] }
 0x313   : > { %7207 = vmatpush.bf16.msra.mxu3 %v9376_v25  ;;  %v12790_v3 = vld [vmem:[%s13879_s24 + $0x68c] sm:$0xf]  ;;  %7180 = vmatpush.bf16.msra.mxu1 %v8832_v23  ;;  %v9056_v56 = vor.u32 %v12726_v30, %v9053_v12 }
 0x314   : > { %v9309_v7 = vld [vmem:[%s13879_s24 + $0x6a8] sm:$0xf0] }
 0x315   : > { %7194 = vmatpush.bf16.msra.mxu2 %v9088_v29  ;;  %v12590_v45 = vld [vmem:[%s13879_s24 + $0x4c] sm:$0xf]  ;;  %v9312_v63 = vor.u32 %v12790_v3, %v9309_v7  ;;  %7167 = vmatpush.bf16.msra.mxu0 %v8544_v27 }
 0x316   : > { %v8509_v59 = vld [vmem:[%s13879_s24 + $0x68] sm:$0xf0] }
 0x317   : > { %v12654_v60 = vld [vmem:[%s13879_s24 + $0x24c] sm:$0xf]  ;;  %7208 = vmatpush.bf16.msra.mxu3 %v9344_v51  ;;  %v8512_v8 = vor.u32 %v12590_v45, %v8509_v59  ;;  %7181 = vmatpush.bf16.msra.mxu1 %v8800_v53  ;;  %v6936_v51 = vadd.f32 %v6935_v48, %v6922_v4 }
 0x318   : > { %v8765_v62 = vld [vmem:[%s13879_s24 + $0x268] sm:$0xf0] }
 0x319   : > { %v12718_v49 = vld [vmem:[%s13879_s24 + $0x44c] sm:$0xf]  ;;  %7195 = vmatpush.bf16.msra.mxu2 %v9056_v56  ;;  %v8768_v20 = vor.u32 %v12654_v60, %v8765_v62  ;;  %7168 = vmatpush.bf16.msra.mxu0 %v8512_v8  ;;  %8291 = vst [vmem:[%s14668_s9 + $0x48] sm:$0xff] %v6936_v51 }
 0x31a   : > { %v9021_v50 = vld [vmem:[%s13879_s24 + $0x468] sm:$0xf0] }
 0x31b   : > { %v12782_v5 = vld [vmem:[%s13879_s24 + $0x64c] sm:$0xf]  ;;  %v9024_v13 = vor.u32 %v12718_v49, %v9021_v50  ;;  %7209 = vmatpush.bf16.msra.mxu3 %v9312_v63  ;;  %7182 = vmatpush.bf16.msra.mxu1 %v8768_v20 }
 0x31c   : > { %v9277_v6 = vld [vmem:[%s13879_s24 + $0x668] sm:$0xf0] }
 0x31d   : > { %v12582_v9 = vld [vmem:[%s13879_s24 + $0xc] sm:$0xf]  ;;  %v9280_v54 = vor.u32 %v12782_v5, %v9277_v6  ;;  %7196 = vmatpush.bf16.msra.mxu2 %v9024_v13 }
 0x31e   : > { %v8477_v57 = vld [vmem:[%s13879_s24 + $0x28] sm:$0xf0] }
 0x31f   : > { %v12646_v14 = vld [vmem:[%s13879_s24 + $0x20c] sm:$0xf]  ;;  %v8480_v29 = vor.u32 %v12582_v9, %v8477_v57  ;;  %7210 = vmatpush.bf16.msra.mxu3 %v9280_v54 }
 0x320   : > { %v8733_v15 = vld [vmem:[%s13879_s24 + $0x228] sm:$0xf0] }
 0x321   : > { %v12710_v25 = vld [vmem:[%s13879_s24 + $0x40c] sm:$0xf]  ;;  %v8736_v33 = vor.u32 %v12646_v14, %v8733_v15  ;;  %7169 = vmatpush.bf16.msra.mxu0 %v8480_v29 }
 0x322   : > { %v8989_v22 = vld [vmem:[%s13879_s24 + $0x428] sm:$0xf0] }
 0x323   : > { %v12774_v37 = vld [vmem:[%s13879_s24 + $0x60c] sm:$0xf]  ;;  %v8992_v30 = vor.u32 %v12710_v25, %v8989_v22  ;;  %7183 = vmatpush.bf16.msra.mxu1 %v8736_v33 }
 0x324   : > { %v9245_v16 = vld [vmem:[%s13879_s24 + $0x628] sm:$0xf0]  ;;  %7170 = vmatmul.bf16.vlgmr.msra.gmra.mxu0 %v13982_v58 }
 0x325   : > { %v12894_v52 = vld [vmem:[%s13879_s24 + $0x9cc] sm:$0xf]  ;;  %v9248_v2 = vor.u32 %v12774_v37, %v9245_v16  ;;  %7197 = vmatpush.bf16.msra.mxu2 %v8992_v30 }
 0x326   : > { %v9725_v21 = vld [vmem:[%s13879_s24 + $0x9e8] sm:$0xf0]  ;;  %7184 = vmatmul.bf16.vlgmr.msra.gmra.mxu1 %v14006_v10 }
 0x327   : > { %v12958_v23 = vld [vmem:[%s13879_s24 + $0xbcc] sm:$0xf]  ;;  %v9728_v42 = vor.u32 %v12894_v52, %v9725_v21  ;;  %7211 = vmatpush.bf16.msra.mxu3 %v9248_v2 }
 0x328   : > { %v9981_v24 = vld [vmem:[%s13879_s24 + $0xbe8] sm:$0xf0]  ;;  %7198 = vmatmul.bf16.vlgmr.msra.gmra.mxu2 %v13990_v1 }
 0x329   : > { %v13022_v26 = vld [vmem:[%s13879_s24 + $0xdcc] sm:$0xf]  ;;  %v9984_v3 = vor.u32 %v12958_v23, %v9981_v24  ;;  %7218 = vmatpush.bf16.msrb.mxu0 %v9728_v42 }
 0x32a   : > { %v10237_v28 = vld [vmem:[%s13879_s24 + $0xde8] sm:$0xf0]  ;;  %7212 = vmatmul.bf16.vlgmr.msra.gmra.mxu3 %v14014_v17 }
 0x32b   : > { %v13086_v12 = vld [vmem:[%s13879_s24 + $0xfcc] sm:$0xf]  ;;  %v10240_v7 = vor.u32 %v13022_v26, %v10237_v28  ;;  %7232 = vmatpush.bf16.msrb.mxu1 %v9984_v3 }
 0x32c   : > { %v10493_v34 = vld [vmem:[%s13879_s24 + $0xfe8] sm:$0xf0] }
 0x32d   : > { %v12886_v18 = vld [vmem:[%s13879_s24 + $0x98c] sm:$0xf]  ;;  %v10496_v61 = vor.u32 %v13086_v12, %v10493_v34  ;;  %7246 = vmatpush.bf16.msrb.mxu2 %v10240_v7 }
 0x32e   : > { %v9693_v27 = vld [vmem:[%s13879_s24 + $0x9a8] sm:$0xf0] }
 0x32f   : > { %v12950_v53 = vld [vmem:[%s13879_s24 + $0xb8c] sm:$0xf]  ;;  %v9696_v63 = vor.u32 %v12886_v18, %v9693_v27  ;;  %7260 = vmatpush.bf16.msrb.mxu3 %v10496_v61 }
 0x330   : > { %v9949_v55 = vld [vmem:[%s13879_s24 + $0xba8] sm:$0xf0] }
 0x331   : > { %v13014_v56 = vld [vmem:[%s13879_s24 + $0xd8c] sm:$0xf]  ;;  %v9952_v0 = vor.u32 %v12950_v53, %v9949_v55  ;;  %7219 = vmatpush.bf16.msrb.mxu0 %v9696_v63 }
 0x332   : > { %v10205_v45 = vld [vmem:[%s13879_s24 + $0xda8] sm:$0xf0] }
 0x333   : > { %v13078_v59 = vld [vmem:[%s13879_s24 + $0xf8c] sm:$0xf]  ;;  %v10208_v62 = vor.u32 %v13014_v56, %v10205_v45  ;;  %7233 = vmatpush.bf16.msrb.mxu1 %v9952_v0 }
 0x334   : > { %v10461_v60 = vld [vmem:[%s13879_s24 + $0xfa8] sm:$0xf0] }
 0x335   : > { %v12878_v49 = vld [vmem:[%s13879_s24 + $0x94c] sm:$0xf]  ;;  %v10464_v6 = vor.u32 %v13078_v59, %v10461_v60  ;;  %7247 = vmatpush.bf16.msrb.mxu2 %v10208_v62 }
 0x336   : > { %v9661_v50 = vld [vmem:[%s13879_s24 + $0x968] sm:$0xf0] }
 0x337   : > { %v12942_v5 = vld [vmem:[%s13879_s24 + $0xb4c] sm:$0xf]  ;;  %v9664_v13 = vor.u32 %v12878_v49, %v9661_v50  ;;  %7261 = vmatpush.bf16.msrb.mxu3 %v10464_v6 }
 0x338   : > { %v9917_v8 = vld [vmem:[%s13879_s24 + $0xb68] sm:$0xf0] }
 0x339   : > { %v13006_v9 = vld [vmem:[%s13879_s24 + $0xd4c] sm:$0xf]  ;;  %v9920_v14 = vor.u32 %v12942_v5, %v9917_v8  ;;  %7220 = vmatpush.bf16.msrb.mxu0 %v9664_v13 }
 0x33a   : > { %v10173_v57 = vld [vmem:[%s13879_s24 + $0xd68] sm:$0xf0] }
 0x33b   : > { %v13070_v11 = vld [vmem:[%s13879_s24 + $0xf4c] sm:$0xf]  ;;  %v10176_v15 = vor.u32 %v13006_v9, %v10173_v57  ;;  %7234 = vmatpush.bf16.msrb.mxu1 %v9920_v14 }
 0x33c   : > { %v10429_v20 = vld [vmem:[%s13879_s24 + $0xf68] sm:$0xf0] }
 0x33d   : > { %v12870_v25 = vld [vmem:[%s13879_s24 + $0x90c] sm:$0xf]  ;;  %v10432_v22 = vor.u32 %v13070_v11, %v10429_v20  ;;  %7248 = vmatpush.bf16.msrb.mxu2 %v10176_v15 }
 0x33e   : > { %v9629_v54 = vld [vmem:[%s13879_s24 + $0x928] sm:$0xf0] }
 0x33f   : > { %v12934_v19 = vld [vmem:[%s13879_s24 + $0xb0c] sm:$0xf]  ;;  %v9632_v21 = vor.u32 %v12870_v25, %v9629_v54  ;;  %7262 = vmatpush.bf16.msrb.mxu3 %v10432_v22 }
 0x340   : > { %v9885_v37 = vld [vmem:[%s13879_s24 + $0xb28] sm:$0xf0] }
 0x341   : > { %v12998_v16 = vld [vmem:[%s13879_s24 + $0xd0c] sm:$0xf]  ;;  %v9888_v23 = vor.u32 %v12934_v19, %v9885_v37  ;;  %7221 = vmatpush.bf16.msrb.mxu0 %v9632_v21 }
 0x342   : > { %v10141_v4 = vld [vmem:[%s13879_s24 + $0xd28] sm:$0xf0] }
 0x343   : > { %v13062_v48 = vld [vmem:[%s13879_s24 + $0xf0c] sm:$0xf]  ;;  %v10144_v29 = vor.u32 %v12998_v16, %v10141_v4  ;;  %7235 = vmatpush.bf16.msrb.mxu1 %v9888_v23 }
 0x344   : > { %v10397_v52 = vld [vmem:[%s13879_s24 + $0xf28] sm:$0xf0] }
 0x345   : > { %v12862_v24 = vld [vmem:[%s13879_s24 + $0x8cc] sm:$0xf]  ;;  %v10400_v51 = vor.u32 %v13062_v48, %v10397_v52  ;;  %7249 = vmatpush.bf16.msrb.mxu2 %v10144_v29 }
 0x346   : > { %v9597_v26 = vld [vmem:[%s13879_s24 + $0x8e8] sm:$0xf0] }
 0x347   : > { %v12926_v28 = vld [vmem:[%s13879_s24 + $0xacc] sm:$0xf]  ;;  %v9600_v42 = vor.u32 %v12862_v24, %v9597_v26  ;;  %7263 = vmatpush.bf16.msrb.mxu3 %v10400_v51 }
 0x348   : > { %v9853_v33 = vld [vmem:[%s13879_s24 + $0xae8] sm:$0xf0] }
 0x349   : > { %v12990_v30 = vld [vmem:[%s13879_s24 + $0xccc] sm:$0xf]  ;;  %v9856_v18 = vor.u32 %v12926_v28, %v9853_v33  ;;  %7222 = vmatpush.bf16.msrb.mxu0 %v9600_v42 }
 0x34a   : > { %v10109_v12 = vld [vmem:[%s13879_s24 + $0xce8] sm:$0xf0] }
 0x34b   : > { %v13054_v34 = vld [vmem:[%s13879_s24 + $0xecc] sm:$0xf]  ;;  %v10112_v3 = vor.u32 %v12990_v30, %v10109_v12  ;;  %7236 = vmatpush.bf16.msrb.mxu1 %v9856_v18 }
 0x34c   : > { %v10365_v2 = vld [vmem:[%s13879_s24 + $0xee8] sm:$0xf0] }
 0x34d   : > { %v12854_v7 = vld [vmem:[%s13879_s24 + $0x88c] sm:$0xf]  ;;  %v10368_v61 = vor.u32 %v13054_v34, %v10365_v2  ;;  %7250 = vmatpush.bf16.msrb.mxu2 %v10112_v3 }
 0x34e   : > { %v9565_v27 = vld [vmem:[%s13879_s24 + $0x8a8] sm:$0xf0] }
 0x34f   : > { %v12918_v53 = vld [vmem:[%s13879_s24 + $0xa8c] sm:$0xf]  ;;  %v9568_v63 = vor.u32 %v12854_v7, %v9565_v27  ;;  %7264 = vmatpush.bf16.msrb.mxu3 %v10368_v61 }
 0x350   : > { %v9821_v55 = vld [vmem:[%s13879_s24 + $0xaa8] sm:$0xf0] }
 0x351   : > { %v12982_v56 = vld [vmem:[%s13879_s24 + $0xc8c] sm:$0xf]  ;;  %v9824_v0 = vor.u32 %v12918_v53, %v9821_v55  ;;  %7223 = vmatpush.bf16.msrb.mxu0 %v9568_v63 }
 0x352   : > { %v10077_v45 = vld [vmem:[%s13879_s24 + $0xca8] sm:$0xf0] }
 0x353   : > { %v13046_v59 = vld [vmem:[%s13879_s24 + $0xe8c] sm:$0xf]  ;;  %v10080_v62 = vor.u32 %v12982_v56, %v10077_v45  ;;  %7237 = vmatpush.bf16.msrb.mxu1 %v9824_v0 }
 0x354   : > { %v10333_v60 = vld [vmem:[%s13879_s24 + $0xea8] sm:$0xf0] }
 0x355   : > { %v12846_v49 = vld [vmem:[%s13879_s24 + $0x84c] sm:$0xf]  ;;  %v10336_v6 = vor.u32 %v13046_v59, %v10333_v60  ;;  %7251 = vmatpush.bf16.msrb.mxu2 %v10080_v62 }
 0x356   : > { %v9533_v50 = vld [vmem:[%s13879_s24 + $0x868] sm:$0xf0] }
 0x357   : > { %v12910_v5 = vld [vmem:[%s13879_s24 + $0xa4c] sm:$0xf]  ;;  %v9536_v13 = vor.u32 %v12846_v49, %v9533_v50  ;;  %7265 = vmatpush.bf16.msrb.mxu3 %v10336_v6 }
 0x358   : > { %v9789_v8 = vld [vmem:[%s13879_s24 + $0xa68] sm:$0xf0] }
 0x359   : > { %v12974_v9 = vld [vmem:[%s13879_s24 + $0xc4c] sm:$0xf]  ;;  %v9792_v25 = vor.u32 %v12910_v5, %v9789_v8  ;;  %7224 = vmatpush.bf16.msrb.mxu0 %v9536_v13 }
 0x35a   : > { %v10045_v57 = vld [vmem:[%s13879_s24 + $0xc68] sm:$0xf0] }
 0x35b   : > { %v13038_v11 = vld [vmem:[%s13879_s24 + $0xe4c] sm:$0xf]  ;;  %v10048_v54 = vor.u32 %v12974_v9, %v10045_v57  ;;  %7238 = vmatpush.bf16.msrb.mxu1 %v9792_v25 }
 0x35c   : > { %v10301_v20 = vld [vmem:[%s13879_s24 + $0xe68] sm:$0xf0] }
 0x35d   : > { %v12838_v14 = vld [vmem:[%s13879_s24 + $0x80c] sm:$0xf]  ;;  %v10304_v16 = vor.u32 %v13038_v11, %v10301_v20  ;;  %7252 = vmatpush.bf16.msrb.mxu2 %v10048_v54 }
 0x35e   : > { %v9501_v15 = vld [vmem:[%s13879_s24 + $0x828] sm:$0xf0] }
 0x35f   : > { %v12902_v19 = vld [vmem:[%s13879_s24 + $0xa0c] sm:$0xf]  ;;  %v9504_v24 = vor.u32 %v12838_v14, %v9501_v15  ;;  %7266 = vmatpush.bf16.msrb.mxu3 %v10304_v16 }
 0x360   : > { %v9757_v22 = vld [vmem:[%s13879_s24 + $0xa28] sm:$0xf0] }
 0x361   : > { %v12966_v37 = vld [vmem:[%s13879_s24 + $0xc0c] sm:$0xf]  ;;  %v9760_v33 = vor.u32 %v12902_v19, %v9757_v22  ;;  %7225 = vmatpush.bf16.msrb.mxu0 %v9504_v24 }
 0x362   : > { %v10013_v4 = vld [vmem:[%s13879_s24 + $0xc28] sm:$0xf0] }
 0x363   : > { %v13030_v48 = vld [vmem:[%s13879_s24 + $0xe0c] sm:$0xf]  ;;  %v10016_v30 = vor.u32 %v12966_v37, %v10013_v4  ;;  %7239 = vmatpush.bf16.msrb.mxu1 %v9760_v33 }
 0x364   : > { %v10269_v52 = vld [vmem:[%s13879_s24 + $0xe28] sm:$0xf0]  ;;  %7226 = vmatmul.bf16.vlgmr.msrb.gmra.mxu0 %v14090_v39 }
 0x365   : > { %v13150_v21 = vld [vmem:[%s13879_s24 + $0x11cc] sm:$0xf]  ;;  %v10272_v2 = vor.u32 %v13030_v48, %v10269_v52  ;;  %7253 = vmatpush.bf16.msrb.mxu2 %v10016_v30 }
 0x366   : > { %v10749_v23 = vld [vmem:[%s13879_s24 + $0x11e8] sm:$0xf0]  ;;  %7240 = vmatmul.bf16.vlgmr.msrb.gmra.mxu1 %v14097_v44 }
 0x367   : > { %v13214_v29 = vld [vmem:[%s13879_s24 + $0x13cc] sm:$0xf]  ;;  %v10752_v42 = vor.u32 %v13150_v21, %v10749_v23  ;;  %7267 = vmatpush.bf16.msrb.mxu3 %v10272_v2 }
 0x368   : > { %v11005_v26 = vld [vmem:[%s13879_s24 + $0x13e8] sm:$0xf0]  ;;  %7254 = vmatmul.bf16.vlgmr.msrb.gmra.mxu2 %v14095_v43 }
 0x369   : > { %v13278_v28 = vld [vmem:[%s13879_s24 + $0x15cc] sm:$0xf]  ;;  %v11008_v18 = vor.u32 %v13214_v29, %v11005_v26  ;;  %7274 = vmatpush.bf16.msra.mxu0 %v10752_v42 }
 0x36a   : > { %v11261_v51 = vld [vmem:[%s13879_s24 + $0x15e8] sm:$0xf0]  ;;  %7268 = vmatmul.bf16.vlgmr.msrb.gmra.mxu3 %v14101_v47 }
 0x36b   : > { %v13342_v12 = vld [vmem:[%s13879_s24 + $0x17cc] sm:$0xf]  ;;  %v11264_v3 = vor.u32 %v13278_v28, %v11261_v51  ;;  %7288 = vmatpush.bf16.msra.mxu1 %v11008_v18  ;;  %v15123_v18 = vpop.f32.mrf.mxu1 }
 0x36c   : > { %v11517_v34 = vld [vmem:[%s13879_s24 + $0x17e8] sm:$0xf0] }
 0x36d   : > { %v13142_v7 = vld [vmem:[%s13879_s24 + $0x118c] sm:$0xf]  ;;  %v11520_v61 = vor.u32 %v13342_v12, %v11517_v34  ;;  %7302 = vmatpush.bf16.msra.mxu2 %v11264_v3  ;;  %v15119_v34 = vpop.f32.mrf.mxu0 }
 0x36e   : > { %v10717_v27 = vld [vmem:[%s13879_s24 + $0x11a8] sm:$0xf0] }
 0x36f   : > { %v13206_v53 = vld [vmem:[%s13879_s24 + $0x138c] sm:$0xf]  ;;  %v10720_v63 = vor.u32 %v13142_v7, %v10717_v27  ;;  %7316 = vmatpush.bf16.msra.mxu3 %v11520_v61 }
 0x370   : > { %v10973_v55 = vld [vmem:[%s13879_s24 + $0x13a8] sm:$0xf0] }
 0x371   : > { %v13270_v56 = vld [vmem:[%s13879_s24 + $0x158c] sm:$0xf]  ;;  %v10976_v0 = vor.u32 %v13206_v53, %v10973_v55  ;;  %7275 = vmatpush.bf16.msra.mxu0 %v10720_v63 }
 0x372   : > { %v11229_v45 = vld [vmem:[%s13879_s24 + $0x15a8] sm:$0xf0] }
 0x373   : > { %v13334_v59 = vld [vmem:[%s13879_s24 + $0x178c] sm:$0xf]  ;;  %v11232_v62 = vor.u32 %v13270_v56, %v11229_v45  ;;  %7289 = vmatpush.bf16.msra.mxu1 %v10976_v0 }
 0x374   : > { %v11485_v60 = vld [vmem:[%s13879_s24 + $0x17a8] sm:$0xf0] }
 0x375   : > { %v13134_v49 = vld [vmem:[%s13879_s24 + $0x114c] sm:$0xf]  ;;  %v11488_v6 = vor.u32 %v13334_v59, %v11485_v60  ;;  %7303 = vmatpush.bf16.msra.mxu2 %v11232_v62 }
 0x376   : > { %v10685_v50 = vld [vmem:[%s13879_s24 + $0x1168] sm:$0xf0] }
 0x377   : > { %v13198_v5 = vld [vmem:[%s13879_s24 + $0x134c] sm:$0xf]  ;;  %v10688_v13 = vor.u32 %v13134_v49, %v10685_v50  ;;  %7317 = vmatpush.bf16.msra.mxu3 %v11488_v6 }
 0x378   : > { %v10941_v8 = vld [vmem:[%s13879_s24 + $0x1368] sm:$0xf0] }
 0x379   : > { %v13262_v9 = vld [vmem:[%s13879_s24 + $0x154c] sm:$0xf]  ;;  %v10944_v14 = vor.u32 %v13198_v5, %v10941_v8  ;;  %7276 = vmatpush.bf16.msra.mxu0 %v10688_v13 }
 0x37a   : > { %v11197_v57 = vld [vmem:[%s13879_s24 + $0x1568] sm:$0xf0] }
 0x37b   : > { %v13326_v11 = vld [vmem:[%s13879_s24 + $0x174c] sm:$0xf]  ;;  %v11200_v15 = vor.u32 %v13262_v9, %v11197_v57  ;;  %7290 = vmatpush.bf16.msra.mxu1 %v10944_v14  ;;  %v15136_v9 = vpop.f32.mrf.mxu2  ;;  %v15141_v14 = vpop.f32.mrf.mxu3 }
 0x37c   : > { %v11453_v20 = vld [vmem:[%s13879_s24 + $0x1768] sm:$0xf0] }
 0x37d   : > { %v13126_v25 = vld [vmem:[%s13879_s24 + $0x110c] sm:$0xf]  ;;  %v11456_v22 = vor.u32 %v13326_v11, %v11453_v20  ;;  %7304 = vmatpush.bf16.msra.mxu2 %v11200_v15 }
 0x37e   : > { %v10653_v54 = vld [vmem:[%s13879_s24 + $0x1128] sm:$0xf0] }
 0x37f   : > { %v13190_v19 = vld [vmem:[%s13879_s24 + $0x130c] sm:$0xf]  ;;  %v10656_v21 = vor.u32 %v13126_v25, %v10653_v54  ;;  %7318 = vmatpush.bf16.msra.mxu3 %v11456_v22 }
 0x380   : > { %v10909_v37 = vld [vmem:[%s13879_s24 + $0x1328] sm:$0xf0] }
 0x381   : > { %v13254_v16 = vld [vmem:[%s13879_s24 + $0x150c] sm:$0xf]  ;;  %v10912_v23 = vor.u32 %v13190_v19, %v10909_v37  ;;  %7277 = vmatpush.bf16.msra.mxu0 %v10656_v21 }
 0x382   : > { %v11165_v4 = vld [vmem:[%s13879_s24 + $0x1528] sm:$0xf0] }
 0x383   : > { %v13318_v48 = vld [vmem:[%s13879_s24 + $0x170c] sm:$0xf]  ;;  %v11168_v29 = vor.u32 %v13254_v16, %v11165_v4  ;;  %7291 = vmatpush.bf16.msra.mxu1 %v10912_v23  ;;  %v15151_v4 = vpop.f32.mrf.mxu0 }
 0x384   : > { %v11421_v52 = vld [vmem:[%s13879_s24 + $0x1728] sm:$0xf0] }
 0x385   : > { %v13118_v24 = vld [vmem:[%s13879_s24 + $0x10cc] sm:$0xf]  ;;  %v11424_v51 = vor.u32 %v13318_v48, %v11421_v52  ;;  %7305 = vmatpush.bf16.msra.mxu2 %v11168_v29 }
 0x386   : > { %v10621_v26 = vld [vmem:[%s13879_s24 + $0x10e8] sm:$0xf0] }
 0x387   : > { %v13182_v28 = vld [vmem:[%s13879_s24 + $0x12cc] sm:$0xf]  ;;  %v10624_v3 = vor.u32 %v13118_v24, %v10621_v26  ;;  %7319 = vmatpush.bf16.msra.mxu3 %v11424_v51  ;;  %v15156_v24 = vpop.f32.mrf.mxu1 }
 0x388   : > { %v10877_v33 = vld [vmem:[%s13879_s24 + $0x12e8] sm:$0xf0] }
 0x389   : > { %v13246_v30 = vld [vmem:[%s13879_s24 + $0x14cc] sm:$0xf]  ;;  %v10880_v7 = vor.u32 %v13182_v28, %v10877_v33  ;;  %7278 = vmatpush.bf16.msra.mxu0 %v10624_v3 }
 0x38a   : > { %v11133_v12 = vld [vmem:[%s13879_s24 + $0x14e8] sm:$0xf0] }
 0x38b   : > { %v13310_v2 = vld [vmem:[%s13879_s24 + $0x16cc] sm:$0xf]  ;;  %v11136_v27 = vor.u32 %v13246_v30, %v11133_v12  ;;  %7292 = vmatpush.bf16.msra.mxu1 %v10880_v7 }
 0x38c   : > { %v11389_v42 = vld [vmem:[%s13879_s24 + $0x16e8] sm:$0xf0] }
 0x38d   : > { %v13110_v53 = vld [vmem:[%s13879_s24 + $0x108c] sm:$0xf]  ;;  %v11392_v56 = vor.u32 %v13310_v2, %v11389_v42  ;;  %7306 = vmatpush.bf16.msra.mxu2 %v11136_v27 }
 0x38e   : > { %v10589_v61 = vld [vmem:[%s13879_s24 + $0x10a8] sm:$0xf0] }
 0x38f   : > { %v13174_v55 = vld [vmem:[%s13879_s24 + $0x128c] sm:$0xf]  ;;  %v10592_v62 = vor.u32 %v13110_v53, %v10589_v61  ;;  %7320 = vmatpush.bf16.msra.mxu3 %v11392_v56 }
 0x390   : > { %v10845_v45 = vld [vmem:[%s13879_s24 + $0x12a8] sm:$0xf0] }
 0x391   : > { %v13238_v59 = vld [vmem:[%s13879_s24 + $0x148c] sm:$0xf]  ;;  %v10848_v49 = vor.u32 %v13174_v55, %v10845_v45  ;;  %7279 = vmatpush.bf16.msra.mxu0 %v10592_v62 }
 0x392   : > { %v11101_v60 = vld [vmem:[%s13879_s24 + $0x14a8] sm:$0xf0] }
 0x393   : > { %v13302_v63 = vld [vmem:[%s13879_s24 + $0x168c] sm:$0xf]  ;;  %v11104_v50 = vor.u32 %v13238_v59, %v11101_v60  ;;  %7293 = vmatpush.bf16.msra.mxu1 %v10848_v49 }
 0x394   : > { %v11357_v0 = vld [vmem:[%s13879_s24 + $0x16a8] sm:$0xf0] }
 0x395   : > { %v13102_v5 = vld [vmem:[%s13879_s24 + $0x104c] sm:$0xf]  ;;  %v11360_v57 = vor.u32 %v13302_v63, %v11357_v0  ;;  %7307 = vmatpush.bf16.msra.mxu2 %v11104_v50 }
 0x396   : > { %v10557_v6 = vld [vmem:[%s13879_s24 + $0x1068] sm:$0xf0] }
 0x397   : > { %v13166_v8 = vld [vmem:[%s13879_s24 + $0x124c] sm:$0xf]  ;;  %v10560_v22 = vor.u32 %v13102_v5, %v10557_v6  ;;  %7321 = vmatpush.bf16.msra.mxu3 %v11360_v57  ;;  %v15175_v5 = vpop.f32.mrf.mxu2 }
 0x398   : > { %v10813_v11 = vld [vmem:[%s13879_s24 + $0x1268] sm:$0xf0] }
 0x399   : > { %v13230_v20 = vld [vmem:[%s13879_s24 + $0x144c] sm:$0xf]  ;;  %v10816_v48 = vor.u32 %v13166_v8, %v10813_v11  ;;  %7280 = vmatpush.bf16.msra.mxu0 %v10560_v22  ;;  %v7003_v22 = vpop.f32.mrf.mxu0 }
 0x39a   : > { %v11069_v13 = vld [vmem:[%s13879_s24 + $0x1468] sm:$0xf0] }
 0x39b   : > { %v13294_v15 = vld [vmem:[%s13879_s24 + $0x164c] sm:$0xf]  ;;  %v11072_v52 = vor.u32 %v13230_v20, %v11069_v13  ;;  %7294 = vmatpush.bf16.msra.mxu1 %v10816_v48  ;;  %v15180_v20 = vpop.f32.mrf.mxu3 }
 0x39c   : > { %v11325_v25 = vld [vmem:[%s13879_s24 + $0x1668] sm:$0xf0] }
 0x39d   : > { %v15146_v54 = vld [vmem:[%s13885_s5] sm:$0xff]  ;;  %v11328_v26 = vor.u32 %v13294_v15, %v11325_v25  ;;  %7308 = vmatpush.bf16.msra.mxu2 %v11072_v52 }
 0x39e   : > { %v1276_v19 = vperm.slane %v15146_v54, 2  ;;  %v13094_v37 = vld [vmem:[%s13879_s24 + $0x100c] sm:$0xf] }
 0x39f   : > { %v10525_v16 = vld [vmem:[%s13879_s24 + $0x1028] sm:$0xf0]  ;;  %7322 = vmatpush.bf16.msra.mxu3 %v11328_v26 }
 0x3a0   : > { %v13158_v21 = vld [vmem:[%s13879_s24 + $0x120c] sm:$0xf]  ;;  %v10528_v42 = vor.u32 %v13094_v37, %v10525_v16  ;;  %v6948_v60 = vadd.f32 %v15119_v34, %v1276_v19 }
 0x3a1   : > { %v10781_v23 = vld [vmem:[%s13879_s24 + $0x1228] sm:$0xf0] }
 0x3a2   : > { %v13222_v29 = vld [vmem:[%s13879_s24 + $0x140c] sm:$0xf]  ;;  %v10784_v53 = vor.u32 %v13158_v21, %v10781_v23  ;;  %7281 = vmatpush.bf16.msra.mxu0 %v10528_v42  ;;  %v6962_v25 = vadd.f32 %v15123_v18, %v6948_v60  ;;  %v15188_v23 = vpop.f32.mrf.mxu1  ;;  %v15211_v60 = vpop.f32.mrf.mxu2 }
 0x3a3   : > { %v11037_v28 = vld [vmem:[%s13879_s24 + $0x1428] sm:$0xf0] }
 0x3a4   : > { %v13286_v51 = vld [vmem:[%s13879_s24 + $0x160c] sm:$0xf]  ;;  %v11040_v61 = vor.u32 %v13222_v29, %v11037_v28  ;;  %7295 = vmatpush.bf16.msra.mxu1 %v10784_v53 }
 0x3a5   : > { %v11293_v33 = vld [vmem:[%s13879_s24 + $0x1628] sm:$0xf0]  ;;  %7282 = vmatmul.bf16.vlgmr.msra.gmra.mxu0 %v14190_v31 }
 0x3a6   : > { %v13406_v30 = vld [vmem:[%s13879_s24 + $0x19cc] sm:$0xf]  ;;  %v11296_v45 = vor.u32 %v13286_v51, %v11293_v33  ;;  %7309 = vmatpush.bf16.msra.mxu2 %v11040_v61 }
 0x3a7   : > { %v11773_v12 = vld [vmem:[%s13879_s24 + $0x19e8] sm:$0xf0]  ;;  %7296 = vmatmul.bf16.vlgmr.msra.gmra.mxu1 %v14197_v36 }
 0x3a8   : > { %v13470_v2 = vld [vmem:[%s13879_s24 + $0x1bcc] sm:$0xf]  ;;  %v11776_v59 = vor.u32 %v13406_v30, %v11773_v12  ;;  %7323 = vmatpush.bf16.msra.mxu3 %v11296_v45  ;;  %v6976_v12 = vadd.f32 %v15136_v9, %v6962_v25  ;;  %v6950_v45 = vadd.f32 %v15151_v4, %v1276_v19 }
 0x3a9   : > { %v12029_v3 = vld [vmem:[%s13879_s24 + $0x1be8] sm:$0xf0]  ;;  %7310 = vmatmul.bf16.vlgmr.msra.gmra.mxu2 %v14195_v35 }
 0x3aa   : > { %v13534_v7 = vld [vmem:[%s13879_s24 + $0x1dcc] sm:$0xf]  ;;  %v12032_v63 = vor.u32 %v13470_v2, %v12029_v3  ;;  %7330 = vmatpush.bf16.msrb.mxu0 %v11776_v59  ;;  %v15225_v25 = vpop.f32.mrf.mxu1 }
 0x3ab   : > { %v12285_v27 = vld [vmem:[%s13879_s24 + $0x1de8] sm:$0xf0]  ;;  %7324 = vmatmul.bf16.vlgmr.msra.gmra.mxu3 %v14201_v40 }
 0x3ac   : > { %v13598_v55 = vld [vmem:[%s13879_s24 + $0x1fcc] sm:$0xf]  ;;  %v12288_v0 = vor.u32 %v13534_v7, %v12285_v27  ;;  %7344 = vmatpush.bf16.msrb.mxu1 %v12032_v63 }
 0x3ad   : > { %v12541_v56 = vld [vmem:[%s13879_s24 + $0x1fe8] sm:$0xf0] }
 0x3ae   : > { %v13398_v62 = vld [vmem:[%s13879_s24 + $0x198c] sm:$0xf]  ;;  %v12544_v6 = vor.u32 %v13598_v55, %v12541_v56  ;;  %7358 = vmatpush.bf16.msrb.mxu2 %v12288_v0  ;;  %v6990_v0 = vadd.f32 %v15141_v14, %v6976_v12  ;;  %v6964_v14 = vadd.f32 %v15156_v24, %v6950_v45 }
 0x3af   : > { %v11741_v49 = vld [vmem:[%s13879_s24 + $0x19a8] sm:$0xf0] }
 0x3b0   : > { %v13462_v50 = vld [vmem:[%s13879_s24 + $0x1b8c] sm:$0xf]  ;;  %v11744_v15 = vor.u32 %v13398_v62, %v11741_v49  ;;  %7372 = vmatpush.bf16.msrb.mxu3 %v12544_v6  ;;  %v15214_v62 = vpop.f32.mrf.mxu3 }
 0x3b1   : > { %v11997_v8 = vld [vmem:[%s13879_s24 + $0x1ba8] sm:$0xf0] }
 0x3b2   : > { %v13526_v57 = vld [vmem:[%s13879_s24 + $0x1d8c] sm:$0xf]  ;;  %v12000_v37 = vor.u32 %v13462_v50, %v11997_v8  ;;  %7331 = vmatpush.bf16.msrb.mxu0 %v11744_v15 }
 0x3b3   : > { %v12253_v11 = vld [vmem:[%s13879_s24 + $0x1da8] sm:$0xf0] }
 0x3b4   : > { %v13590_v34 = vld [vmem:[%s13879_s24 + $0x1f8c] sm:$0xf]  ;;  %v12256_v16 = vor.u32 %v13526_v57, %v12253_v11  ;;  %7345 = vmatpush.bf16.msrb.mxu1 %v12000_v37 }
 0x3b5   : > { %v12509_v13 = vld [vmem:[%s13879_s24 + $0x1fa8] sm:$0xf0] }
 0x3b6   : > { %v13390_v48 = vld [vmem:[%s13879_s24 + $0x194c] sm:$0xf]  ;;  %v12512_v29 = vor.u32 %v13590_v34, %v12509_v13  ;;  %7359 = vmatpush.bf16.msrb.mxu2 %v12256_v16  ;;  %v7005_v34 = vpop.f32.mrf.mxu0  ;;  %v7004_v16 = vadd.f32 %v7003_v22, %v6990_v0 }
 0x3b7   : > { %v11709_v52 = vld [vmem:[%s13879_s24 + $0x1968] sm:$0xf0] }
 0x3b8   : > { %v13454_v21 = vld [vmem:[%s13879_s24 + $0x1b4c] sm:$0xf]  ;;  %v11712_v30 = vor.u32 %v13390_v48, %v11709_v52  ;;  %7373 = vmatpush.bf16.msrb.mxu3 %v12512_v29 }
 0x3b9   : > { %v11965_v26 = vld [vmem:[%s13879_s24 + $0x1b68] sm:$0xf0] }
 0x3ba   : > { %v13518_v18 = vld [vmem:[%s13879_s24 + $0x1d4c] sm:$0xf]  ;;  %v11968_v2 = vor.u32 %v13454_v21, %v11965_v26  ;;  %7332 = vmatpush.bf16.msrb.mxu0 %v11712_v30 }
 0x3bb   : > { %v12221_v28 = vld [vmem:[%s13879_s24 + $0x1d68] sm:$0xf0] }
 0x3bc   : > { %v13582_v51 = vld [vmem:[%s13879_s24 + $0x1f4c] sm:$0xf]  ;;  %v12224_v42 = vor.u32 %v13518_v18, %v12221_v28  ;;  %7346 = vmatpush.bf16.msrb.mxu1 %v11968_v2  ;;  %v7018_v2 = vadd.f32 %v15188_v23, %v7004_v16 }
 0x3bd   : > { %v12477_v33 = vld [vmem:[%s13879_s24 + $0x1f68] sm:$0xf0] }
 0x3be   : > { %v13382_v3 = vld [vmem:[%s13879_s24 + $0x190c] sm:$0xf]  ;;  %v12480_v53 = vor.u32 %v13582_v51, %v12477_v33  ;;  %7360 = vmatpush.bf16.msrb.mxu2 %v12224_v42  ;;  %v6978_v33 = vadd.f32 %v15175_v5, %v6964_v14  ;;  %v7033_v5 = vpop.f32.mrf.mxu2 }
 0x3bf   : > { %v11677_v7 = vld [vmem:[%s13879_s24 + $0x1928] sm:$0xf0] }
 0x3c0   : > { %v13446_v27 = vld [vmem:[%s13879_s24 + $0x1b0c] sm:$0xf]  ;;  %v11680_v63 = vor.u32 %v13382_v3, %v11677_v7  ;;  %7374 = vmatpush.bf16.msrb.mxu3 %v12480_v53  ;;  %v6992_v23 = vadd.f32 %v15180_v20, %v6978_v33  ;;  %v9475_v33 = vld [vmem:[%s13879_s24 + $0x7d0] sm:$0xf] }
 0x3c1   : > { %v11933_v61 = vld [vmem:[%s13879_s24 + $0x1b28] sm:$0xf0] }
 0x3c2   : > { %v13510_v55 = vld [vmem:[%s13879_s24 + $0x1d0c] sm:$0xf]  ;;  %v11936_v54 = vor.u32 %v13446_v27, %v11933_v61  ;;  %7333 = vmatpush.bf16.msrb.mxu0 %v11680_v63  ;;  %v7006_v16 = vadd.f32 %v7005_v34, %v6992_v23  ;;  %v12835_v34 = vld [vmem:[%s13879_s24 + $0x7ec] sm:$0xf0] }
 0x3c3   : > { %v12189_v56 = vld [vmem:[%s13879_s24 + $0x1d28] sm:$0xf0]  ;;  %v12763_v23 = vld [vmem:[%s13879_s24 + $0x5ac] sm:$0xf0] }
 0x3c4   : > { %v13574_v9 = vld [vmem:[%s13879_s24 + $0x1f0c] sm:$0xf]  ;;  %v12192_v49 = vor.u32 %v13510_v55, %v12189_v56  ;;  %7347 = vmatpush.bf16.msrb.mxu1 %v11936_v54  ;;  %v7073_v54 = vpop.f32.mrf.mxu1 }
 0x3c5   : > { %v12445_v59 = vld [vmem:[%s13879_s24 + $0x1f28] sm:$0xf0] }
 0x3c6   : > { %v13374_v19 = vld [vmem:[%s13879_s24 + $0x18cc] sm:$0xf]  ;;  %v12448_v6 = vor.u32 %v13574_v9, %v12445_v59  ;;  %7361 = vmatpush.bf16.msrb.mxu2 %v12192_v49  ;;  %v15244_v9 = vpop.f32.mrf.mxu3  ;;  %v7059_v59 = vpop.f32.mrf.mxu0 }
 0x3c7   : > { %v11645_v4 = vld [vmem:[%s13879_s24 + $0x18e8] sm:$0xf0] }
 0x3c8   : > { %v13438_v50 = vld [vmem:[%s13879_s24 + $0x1acc] sm:$0xf]  ;;  %v11648_v37 = vor.u32 %v13374_v19, %v11645_v4  ;;  %7375 = vmatpush.bf16.msrb.mxu3 %v12448_v6 }
 0x3c9   : > { %v11901_v8 = vld [vmem:[%s13879_s24 + $0x1ae8] sm:$0xf0] }
 0x3ca   : > { %v13502_v57 = vld [vmem:[%s13879_s24 + $0x1ccc] sm:$0xf]  ;;  %v11904_v48 = vor.u32 %v13438_v50, %v11901_v8  ;;  %7334 = vmatpush.bf16.msrb.mxu0 %v11648_v37  ;;  %v7032_v50 = vadd.f32 %v15211_v60, %v7018_v2  ;;  %v8707_v60 = vld [vmem:[%s13879_s24 + $0x1d0] sm:$0xf]  ;;  %v7020_v2 = vadd.f32 %v15225_v25, %v7006_v16 }
 0x3cb   : > { %v12157_v11 = vld [vmem:[%s13879_s24 + $0x1ce8] sm:$0xf0]  ;;  %v9443_v25 = vld [vmem:[%s13879_s24 + $0x790] sm:$0xf] }
 0x3cc   : > { %v13566_v13 = vld [vmem:[%s13879_s24 + $0x1ecc] sm:$0xf]  ;;  %v12160_v52 = vor.u32 %v13502_v57, %v12157_v11  ;;  %7348 = vmatpush.bf16.msrb.mxu1 %v11904_v48  ;;  %v12643_v48 = vld [vmem:[%s13879_s24 + $0x1ec] sm:$0xf0] }
 0x3cd   : > { %v12413_v15 = vld [vmem:[%s13879_s24 + $0x1ee8] sm:$0xf0]  ;;  %v12819_v16 = vld [vmem:[%s13879_s24 + $0x76c] sm:$0xf0] }
 0x3ce   : > { %v13366_v21 = vld [vmem:[%s13879_s24 + $0x188c] sm:$0xf]  ;;  %v12416_v26 = vor.u32 %v13566_v13, %v12413_v15  ;;  %7362 = vmatpush.bf16.msrb.mxu2 %v12160_v52  ;;  %v8963_v52 = vld [vmem:[%s13879_s24 + $0x3d0] sm:$0xf] }
 0x3cf   : > { %v11613_v29 = vld [vmem:[%s13879_s24 + $0x18a8] sm:$0xf0] }
 0x3d0   : > { %v13430_v24 = vld [vmem:[%s13879_s24 + $0x1a8c] sm:$0xf]  ;;  %v11616_v12 = vor.u32 %v13366_v21, %v11613_v29  ;;  %7376 = vmatpush.bf16.msrb.mxu3 %v12416_v26  ;;  %v12707_v29 = vld [vmem:[%s13879_s24 + $0x3ec] sm:$0xf0] }
 0x3d1   : > { %v11869_v18 = vld [vmem:[%s13879_s24 + $0x1aa8] sm:$0xf0]  ;;  %v12771_v26 = vld [vmem:[%s13879_s24 + $0x5ec] sm:$0xf0] }
 0x3d2   : > { %v13494_v28 = vld [vmem:[%s13879_s24 + $0x1c8c] sm:$0xf]  ;;  %v11872_v42 = vor.u32 %v13430_v24, %v11869_v18  ;;  %7335 = vmatpush.bf16.msrb.mxu0 %v11616_v12  ;;  %v9219_v24 = vld [vmem:[%s13879_s24 + $0x5d0] sm:$0xf]  ;;  %v7046_v18 = vadd.f32 %v15214_v62, %v7032_v50  ;;  %v8708_v12 = vor.u32 %v12643_v48, %v8707_v60  ;;  %v7101_v62 = vpop.f32.mrf.mxu3 }
 0x3d3   : > { %v12125_v51 = vld [vmem:[%s13879_s24 + $0x1ca8] sm:$0xf0]  ;;  %v8611_v48 = vld [vmem:[%s13879_s24 + $0x110] sm:$0xf] }
 0x3d4   : > { %v13558_v30 = vld [vmem:[%s13879_s24 + $0x1e8c] sm:$0xf]  ;;  %v12128_v3 = vor.u32 %v13494_v28, %v12125_v51  ;;  %7349 = vmatpush.bf16.msrb.mxu1 %v11872_v42  ;;  %v7060_v42 = vadd.f32 %v7059_v59, %v7046_v18  ;;  %v12827_v59 = vld [vmem:[%s13879_s24 + $0x7ac] sm:$0xf0] }
 0x3d5   : > { %v12381_v22 = vld [vmem:[%s13879_s24 + $0x1ea8] sm:$0xf0] }
 0x3d6   : > { %v13358_v7 = vld [vmem:[%s13879_s24 + $0x184c] sm:$0xf]  ;;  %v12384_v61 = vor.u32 %v13558_v30, %v12381_v22  ;;  %7363 = vmatpush.bf16.msrb.mxu2 %v12128_v3  ;;  %v7087_v30 = vpop.f32.mrf.mxu2  ;;  %v8964_v3 = vor.u32 %v12707_v29, %v8963_v52  ;;  %v12619_v29 = vld [vmem:[%s13879_s24 + $0x12c] sm:$0xf0] }
 0x3d7   : > { %v11581_v27 = vld [vmem:[%s13879_s24 + $0x1868] sm:$0xf0] }
 0x3d8   : > { %v13422_v53 = vld [vmem:[%s13879_s24 + $0x1a4c] sm:$0xf]  ;;  %v11584_v49 = vor.u32 %v13358_v7, %v11581_v27  ;;  %7377 = vmatpush.bf16.msrb.mxu3 %v12384_v61  ;;  %v9220_v7 = vor.u32 %v12771_v26, %v9219_v24  ;;  %v8675_v27 = vld [vmem:[%s13879_s24 + $0x190] sm:$0xf] }
 0x3d9   : > { %v11837_v55 = vld [vmem:[%s13879_s24 + $0x1a68] sm:$0xf0]  ;;  %v8931_v61 = vld [vmem:[%s13879_s24 + $0x390] sm:$0xf] }
 0x3da   : > { %v13486_v56 = vld [vmem:[%s13879_s24 + $0x1c4c] sm:$0xf]  ;;  %v11840_v20 = vor.u32 %v13422_v53, %v11837_v55  ;;  %7336 = vmatpush.bf16.msrb.mxu0 %v11584_v49  ;;  %v12635_v53 = vld [vmem:[%s13879_s24 + $0x1ac] sm:$0xf0]  ;;  %v9476_v55 = vor.u32 %v12835_v34, %v9475_v33  ;;  %v7075_v49 = vpop.f32.mrf.mxu1 }
 0x3db   : > { %v12093_v45 = vld [vmem:[%s13879_s24 + $0x1c68] sm:$0xf0]  ;;  %v8867_v24 = vld [vmem:[%s13879_s24 + $0x310] sm:$0xf] }
 0x3dc   : > { %v13550_v63 = vld [vmem:[%s13879_s24 + $0x1e4c] sm:$0xf]  ;;  %v12096_v6 = vor.u32 %v13486_v56, %v12093_v45  ;;  %7350 = vmatpush.bf16.msrb.mxu1 %v11840_v20  ;;  %v12699_v56 = vld [vmem:[%s13879_s24 + $0x3ac] sm:$0xf0] }
 0x3dd   : > { %v12349_v0 = vld [vmem:[%s13879_s24 + $0x1e68] sm:$0xf0]  ;;  %v9187_v45 = vld [vmem:[%s13879_s24 + $0x590] sm:$0xf]  ;;  %v8932_v50 = vor.u32 %v12699_v56, %v8931_v61 }
 0x3de   : > { %v13350_v19 = vld [vmem:[%s13879_s24 + $0x180c] sm:$0xf]  ;;  %v12352_v14 = vor.u32 %v13550_v63, %v12349_v0  ;;  %7364 = vmatpush.bf16.msrb.mxu2 %v12096_v6  ;;  %v7034_v63 = vadd.f32 %v7033_v5, %v7020_v2  ;;  %v7061_v0 = vpop.f32.mrf.mxu0  ;;  %v9188_v5 = vor.u32 %v12763_v23, %v9187_v45  ;;  %v8643_v20 = vld [vmem:[%s13879_s24 + $0x150] sm:$0xf]  ;;  %v7089_v18 = vpop.f32.mrf.mxu2 }
 0x3df   : > { %v11549_v4 = vld [vmem:[%s13879_s24 + $0x1828] sm:$0xf0]  ;;  %v12627_v6 = vld [vmem:[%s13879_s24 + $0x16c] sm:$0xf0] }
 0x3e0   : > { %v13414_v8 = vld [vmem:[%s13879_s24 + $0x1a0c] sm:$0xf]  ;;  %v11552_v21 = vor.u32 %v13350_v19, %v11549_v4  ;;  %7378 = vmatpush.bf16.msrb.mxu3 %v12352_v14  ;;  %v8676_v19 = vor.u32 %v12635_v53, %v8675_v27  ;;  %v7074_v4 = vadd.f32 %v7073_v54, %v7060_v42  ;;  %v9155_v14 = vld [vmem:[%s13879_s24 + $0x550] sm:$0xf]  ;;  %v7048_v54 = vadd.f32 %v15244_v9, %v7034_v63 }
 0x3e1   : > { %v11805_v57 = vld [vmem:[%s13879_s24 + $0x1a28] sm:$0xf0]  ;;  %v8644_v60 = vor.u32 %v12627_v6, %v8643_v20  ;;  %v12683_v26 = vld [vmem:[%s13879_s24 + $0x32c] sm:$0xf0]  ;;  %v8612_v42 = vor.u32 %v12619_v29, %v8611_v48 }
 0x3e2   : > { %v13478_v11 = vld [vmem:[%s13879_s24 + $0x1c0c] sm:$0xf]  ;;  %v11808_v28 = vor.u32 %v13414_v8, %v11805_v57  ;;  %7337 = vmatpush.bf16.msrb.mxu0 %v11552_v21  ;;  %v8899_v8 = vld [vmem:[%s13879_s24 + $0x350] sm:$0xf]  ;;  %v9444_v57 = vor.u32 %v12827_v59, %v9443_v25  ;;  %v7062_v52 = vadd.f32 %v7061_v0, %v7048_v54 }
 0x3e3   : > { %v12061_v13 = vld [vmem:[%s13879_s24 + $0x1c28] sm:$0xf0]  ;;  %v12747_v33 = vld [vmem:[%s13879_s24 + $0x52c] sm:$0xf0] }
 0x3e4   : > { %v13542_v15 = vld [vmem:[%s13879_s24 + $0x1e0c] sm:$0xf]  ;;  %v12064_v51 = vor.u32 %v13478_v11, %v12061_v13  ;;  %7351 = vmatpush.bf16.msrb.mxu1 %v11808_v28  ;;  %v12691_v11 = vld [vmem:[%s13879_s24 + $0x36c] sm:$0xf0]  ;;  %v7076_v27 = vadd.f32 %v7075_v49, %v7062_v52 }
 0x3e5   : > { %v12317_v37 = vld [vmem:[%s13879_s24 + $0x1e28] sm:$0xf0]  ;;  %7338 = vmatmul.bf16.vlgmr.msrb.gmra.mxu0 %v14290_v32  ;;  %v12755_v13 = vld [vmem:[%s13879_s24 + $0x56c] sm:$0xf0]  ;;  %v8900_v9 = vor.u32 %v12691_v11, %v8899_v8 }
 0x3e6   : > { %v12320_v22 = vor.u32 %v13542_v15, %v12317_v37  ;;  %7365 = vmatpush.bf16.msrb.mxu2 %v12064_v51  ;;  %7386 = vmatpush.bf16.msra.mxu0 %v8708_v12  ;;  %v7088_v15 = vadd.f32 %v7087_v30, %v7074_v4  ;;  %v9411_v37 = vld [vmem:[%s13879_s24 + $0x750] sm:$0xf]  ;;  %v9156_v21 = vor.u32 %v12755_v13, %v9155_v14  ;;  %v7103_v30 = vpop.f32.mrf.mxu3  ;;  %v7143_v14 = vpop.f32.mrf.mxu2 }
 0x3e7   : > { %7352 = vmatmul.bf16.vlgmr.msrb.gmra.mxu1 %v14297_v41  ;;  %v9412_v28 = vor.u32 %v12819_v16, %v9411_v37  ;;  %v9123_v51 = vld [vmem:[%s13879_s24 + $0x510] sm:$0xf]  ;;  %v7090_v25 = vadd.f32 %v7089_v18, %v7076_v27 }
 0x3e8   : > { %7379 = vmatpush.bf16.msrb.mxu3 %v12320_v22  ;;  %7400 = vmatpush.bf16.msra.mxu1 %v8964_v3  ;;  %v7102_v34 = vadd.f32 %v7101_v62, %v7088_v15  ;;  %v7115_v22 = vpop.f32.mrf.mxu0  ;;  %v9379_v12 = vld [vmem:[%s13879_s24 + $0x710] sm:$0xf]  ;;  %v8868_v3 = vor.u32 %v12683_v26, %v8867_v24  ;;  %v9124_v62 = vor.u32 %v12747_v33, %v9123_v51 }
 0x3e9   : > { %7366 = vmatmul.bf16.vlgmr.msrb.gmra.mxu2 %v14295_v38  ;;  %v12811_v2 = vld [vmem:[%s13879_s24 + $0x72c] sm:$0xf0]  ;;  %v7104_v15 = vadd.f32 %v7103_v30, %v7090_v25 }
 0x3ea   : > { %7414 = vmatpush.bf16.msra.mxu2 %v9220_v7  ;;  %7387 = vmatpush.bf16.msra.mxu0 %v8676_v19  ;;  %v7129_v7 = vpop.f32.mrf.mxu1  ;;  %v7116_v53 = vadd.f32 %v7115_v22, %v7102_v34  ;;  %v8579_v61 = vld [vmem:[%s13879_s24 + $0xd0] sm:$0xf]  ;;  %v9380_v45 = vor.u32 %v12811_v2, %v9379_v12 }
 0x3eb   : > { %7380 = vmatmul.bf16.vlgmr.msrb.gmra.mxu3 %v14301_v46  ;;  %v8835_v56 = vld [vmem:[%s13879_s24 + $0x2d0] sm:$0xf] }
 0x3ec   : > { %7428 = vmatpush.bf16.msra.mxu3 %v9476_v55  ;;  %7401 = vmatpush.bf16.msra.mxu1 %v8932_v50  ;;  %v12611_v55 = vld [vmem:[%s13879_s24 + $0xec] sm:$0xf0]  ;;  %v7130_v50 = vadd.f32 %v7129_v7, %v7116_v53 }
 0x3ed   : > { %v12675_v23 = vld [vmem:[%s13879_s24 + $0x2ec] sm:$0xf0]  ;;  %v8580_v19 = vor.u32 %v12611_v55, %v8579_v61 }
 0x3ee   : > { %7415 = vmatpush.bf16.msra.mxu2 %v9188_v5  ;;  %7388 = vmatpush.bf16.msra.mxu0 %v8644_v60  ;;  %v9091_v63 = vld [vmem:[%s13879_s24 + $0x4d0] sm:$0xf]  ;;  %v8836_v5 = vor.u32 %v12675_v23, %v8835_v56  ;;  %v7144_v37 = vadd.f32 %v7143_v14, %v7130_v50  ;;  %v7157_v60 = vpop.f32.mrf.mxu3 }
 0x3ef   : > { %v12739_v0 = vld [vmem:[%s13879_s24 + $0x4ec] sm:$0xf0] }
 0x3f0   : > { %7429 = vmatpush.bf16.msra.mxu3 %v9444_v57  ;;  %7402 = vmatpush.bf16.msra.mxu1 %v8900_v9  ;;  %v9347_v59 = vld [vmem:[%s13879_s24 + $0x6d0] sm:$0xf]  ;;  %v9092_v20 = vor.u32 %v12739_v0, %v9091_v63  ;;  %v7117_v16 = vpop.f32.mrf.mxu0  ;;  %v7158_v24 = vadd.f32 %v7157_v60, %v7144_v37  ;;  %v7145_v63 = vpop.f32.mrf.mxu2 }
 0x3f1   : > { %v12803_v49 = vld [vmem:[%s13879_s24 + $0x6ec] sm:$0xf0]  ;;  %v7118_v29 = vadd.f32 %v7117_v16, %v7104_v15 }
 0x3f2   : > { %7416 = vmatpush.bf16.msra.mxu2 %v9156_v21  ;;  %7389 = vmatpush.bf16.msra.mxu0 %v8612_v42  ;;  %v8547_v4 = vld [vmem:[%s13879_s24 + $0x90] sm:$0xf]  ;;  %v9348_v11 = vor.u32 %v12803_v49, %v9347_v59  ;;  %v7131_v34 = vpop.f32.mrf.mxu1  ;;  %8284 = vst [vmem:[%s14668_s9 + $0x10] sm:$0xff] %v7158_v24 }
 0x3f3   : > { %v12603_v6 = vld [vmem:[%s13879_s24 + $0xac] sm:$0xf0]  ;;  %v7132_v53 = vadd.f32 %v7131_v34, %v7118_v29 }
 0x3f4   : > { %7430 = vmatpush.bf16.msra.mxu3 %v9412_v28  ;;  %7403 = vmatpush.bf16.msra.mxu1 %v8868_v3  ;;  %v8803_v8 = vld [vmem:[%s13879_s24 + $0x290] sm:$0xf]  ;;  %v8548_v9 = vor.u32 %v12603_v6, %v8547_v4 }
 0x3f5   : > { %v12667_v57 = vld [vmem:[%s13879_s24 + $0x2ac] sm:$0xf0]  ;;  %v7146_v49 = vadd.f32 %v7145_v63, %v7132_v53 }
 0x3f6   : > { %7417 = vmatpush.bf16.msra.mxu2 %v9124_v62  ;;  %v9059_v13 = vld [vmem:[%s13879_s24 + $0x490] sm:$0xf]  ;;  %7390 = vmatpush.bf16.msra.mxu0 %v8580_v19  ;;  %v8804_v21 = vor.u32 %v12667_v57, %v8803_v8  ;;  %v7159_v19 = vpop.f32.mrf.mxu3 }
 0x3f7   : > { %v12731_v54 = vld [vmem:[%s13879_s24 + $0x4ac] sm:$0xf0] }
 0x3f8   : > { %7431 = vmatpush.bf16.msra.mxu3 %v9380_v45  ;;  %v9315_v48 = vld [vmem:[%s13879_s24 + $0x690] sm:$0xf]  ;;  %7404 = vmatpush.bf16.msra.mxu1 %v8836_v5  ;;  %v9060_v26 = vor.u32 %v12731_v54, %v9059_v13 }
 0x3f9   : > { %v12795_v52 = vld [vmem:[%s13879_s24 + $0x6ac] sm:$0xf0] }
 0x3fa   : > { %7418 = vmatpush.bf16.msra.mxu2 %v9092_v20  ;;  %v8515_v18 = vld [vmem:[%s13879_s24 + $0x50] sm:$0xf]  ;;  %v9316_v33 = vor.u32 %v12795_v52, %v9315_v48  ;;  %7391 = vmatpush.bf16.msra.mxu0 %v8548_v9 }
 0x3fb   : > { %v12595_v28 = vld [vmem:[%s13879_s24 + $0x6c] sm:$0xf0] }
 0x3fc   : > { %v8771_v51 = vld [vmem:[%s13879_s24 + $0x250] sm:$0xf]  ;;  %7432 = vmatpush.bf16.msra.mxu3 %v9348_v11  ;;  %v8516_v3 = vor.u32 %v12595_v28, %v8515_v18  ;;  %7405 = vmatpush.bf16.msra.mxu1 %v8804_v21  ;;  %v7160_v11 = vadd.f32 %v7159_v19, %v7146_v49 }
 0x3fd   : > { %v12659_v30 = vld [vmem:[%s13879_s24 + $0x26c] sm:$0xf0] }
 0x3fe   : > { %v9027_v22 = vld [vmem:[%s13879_s24 + $0x450] sm:$0xf]  ;;  %7419 = vmatpush.bf16.msra.mxu2 %v9060_v26  ;;  %v8772_v62 = vor.u32 %v12659_v30, %v8771_v51  ;;  %7392 = vmatpush.bf16.msra.mxu0 %v8516_v3  ;;  %8292 = vst [vmem:[%s14668_s9 + $0x50] sm:$0xff] %v7160_v11 }
 0x3ff   : > { %v12723_v12 = vld [vmem:[%s13879_s24 + $0x46c] sm:$0xf0] }
 0x400   : > { %v9283_v2 = vld [vmem:[%s13879_s24 + $0x650] sm:$0xf]  ;;  %v9028_v61 = vor.u32 %v12723_v12, %v9027_v22  ;;  %7433 = vmatpush.bf16.msra.mxu3 %v9316_v33  ;;  %7406 = vmatpush.bf16.msra.mxu1 %v8772_v62 }
 0x401   : > { %v12787_v42 = vld [vmem:[%s13879_s24 + $0x66c] sm:$0xf0] }
 0x402   : > { %v8483_v7 = vld [vmem:[%s13879_s24 + $0x10] sm:$0xf]  ;;  %v9284_v23 = vor.u32 %v12787_v42, %v9283_v2  ;;  %7420 = vmatpush.bf16.msra.mxu2 %v9028_v61 }
 0x403   : > { %v12587_v27 = vld [vmem:[%s13879_s24 + $0x2c] sm:$0xf0] }
 0x404   : > { %v8739_v55 = vld [vmem:[%s13879_s24 + $0x210] sm:$0xf]  ;;  %v8484_v20 = vor.u32 %v12587_v27, %v8483_v7  ;;  %7434 = vmatpush.bf16.msra.mxu3 %v9284_v23 }
 0x405   : > { %v12651_v56 = vld [vmem:[%s13879_s24 + $0x22c] sm:$0xf0] }
 0x406   : > { %v8995_v45 = vld [vmem:[%s13879_s24 + $0x410] sm:$0xf]  ;;  %v8740_v14 = vor.u32 %v12651_v56, %v8739_v55  ;;  %7393 = vmatpush.bf16.msra.mxu0 %v8484_v20 }
 0x407   : > { %v12715_v0 = vld [vmem:[%s13879_s24 + $0x42c] sm:$0xf0] }
 0x408   : > { %v9251_v25 = vld [vmem:[%s13879_s24 + $0x610] sm:$0xf]  ;;  %v8996_v13 = vor.u32 %v12715_v0, %v8995_v45  ;;  %7407 = vmatpush.bf16.msra.mxu1 %v8740_v14 }
 0x409   : > { %v12779_v59 = vld [vmem:[%s13879_s24 + $0x62c] sm:$0xf0]  ;;  %7394 = vmatmul.bf16.vlgmr.msra.gmra.mxu0 %v13982_v58 }
 0x40a   : > { %v9731_v4 = vld [vmem:[%s13879_s24 + $0x9d0] sm:$0xf]  ;;  %v9252_v37 = vor.u32 %v12779_v59, %v9251_v25  ;;  %7421 = vmatpush.bf16.msra.mxu2 %v8996_v13 }
 0x40b   : > { %v12899_v50 = vld [vmem:[%s13879_s24 + $0x9ec] sm:$0xf0]  ;;  %7408 = vmatmul.bf16.vlgmr.msra.gmra.mxu1 %v14006_v10 }
 0x40c   : > { %v9987_v5 = vld [vmem:[%s13879_s24 + $0xbd0] sm:$0xf]  ;;  %v9732_v16 = vor.u32 %v12899_v50, %v9731_v4  ;;  %7435 = vmatpush.bf16.msra.mxu3 %v9252_v37 }
 0x40d   : > { %v12963_v6 = vld [vmem:[%s13879_s24 + $0xbec] sm:$0xf0]  ;;  %7422 = vmatmul.bf16.vlgmr.msra.gmra.mxu2 %v13990_v1 }
 0x40e   : > { %v10243_v8 = vld [vmem:[%s13879_s24 + $0xdd0] sm:$0xf]  ;;  %v9988_v48 = vor.u32 %v12963_v6, %v9987_v5  ;;  %7442 = vmatpush.bf16.msrb.mxu0 %v9732_v16 }
 0x40f   : > { %v13027_v57 = vld [vmem:[%s13879_s24 + $0xdec] sm:$0xf0]  ;;  %7436 = vmatmul.bf16.vlgmr.msra.gmra.mxu3 %v14014_v17 }
 0x410   : > { %v10499_v54 = vld [vmem:[%s13879_s24 + $0xfd0] sm:$0xf]  ;;  %v10244_v52 = vor.u32 %v13027_v57, %v10243_v8  ;;  %7456 = vmatpush.bf16.msrb.mxu1 %v9988_v48 }
 0x411   : > { %v13091_v15 = vld [vmem:[%s13879_s24 + $0xfec] sm:$0xf0] }
 0x412   : > { %v9699_v60 = vld [vmem:[%s13879_s24 + $0x990] sm:$0xf]  ;;  %v10500_v29 = vor.u32 %v13091_v15, %v10499_v54  ;;  %7470 = vmatpush.bf16.msrb.mxu2 %v10244_v52 }
 0x413   : > { %v12891_v9 = vld [vmem:[%s13879_s24 + $0x9ac] sm:$0xf0] }
 0x414   : > { %v9955_v21 = vld [vmem:[%s13879_s24 + $0xb90] sm:$0xf]  ;;  %v9700_v33 = vor.u32 %v12891_v9, %v9699_v60  ;;  %7484 = vmatpush.bf16.msrb.mxu3 %v10500_v29 }
 0x415   : > { %v12955_v24 = vld [vmem:[%s13879_s24 + $0xbac] sm:$0xf0] }
 0x416   : > { %v10211_v26 = vld [vmem:[%s13879_s24 + $0xd90] sm:$0xf]  ;;  %v9956_v34 = vor.u32 %v12955_v24, %v9955_v21  ;;  %7443 = vmatpush.bf16.msrb.mxu0 %v9700_v33 }
 0x417   : > { %v13019_v18 = vld [vmem:[%s13879_s24 + $0xdac] sm:$0xf0] }
 0x418   : > { %v10467_v28 = vld [vmem:[%s13879_s24 + $0xf90] sm:$0xf]  ;;  %v10212_v30 = vor.u32 %v13019_v18, %v10211_v26  ;;  %7457 = vmatpush.bf16.msrb.mxu1 %v9956_v34 }
 0x419   : > { %v13083_v51 = vld [vmem:[%s13879_s24 + $0xfac] sm:$0xf0] }
 0x41a   : > { %v9667_v22 = vld [vmem:[%s13879_s24 + $0x950] sm:$0xf]  ;;  %v10468_v42 = vor.u32 %v13083_v51, %v10467_v28  ;;  %7471 = vmatpush.bf16.msrb.mxu2 %v10212_v30 }
 0x41b   : > { %v12883_v12 = vld [vmem:[%s13879_s24 + $0x96c] sm:$0xf0] }
 0x41c   : > { %v9923_v2 = vld [vmem:[%s13879_s24 + $0xb50] sm:$0xf]  ;;  %v9668_v61 = vor.u32 %v12883_v12, %v9667_v22  ;;  %7485 = vmatpush.bf16.msrb.mxu3 %v10468_v42 }
 0x41d   : > { %v12947_v3 = vld [vmem:[%s13879_s24 + $0xb6c] sm:$0xf0] }
 0x41e   : > { %v10179_v7 = vld [vmem:[%s13879_s24 + $0xd50] sm:$0xf]  ;;  %v9924_v55 = vor.u32 %v12947_v3, %v9923_v2  ;;  %7444 = vmatpush.bf16.msrb.mxu0 %v9668_v61 }
 0x41f   : > { %v13011_v27 = vld [vmem:[%s13879_s24 + $0xd6c] sm:$0xf0] }
 0x420   : > { %v10435_v53 = vld [vmem:[%s13879_s24 + $0xf50] sm:$0xf]  ;;  %v10180_v56 = vor.u32 %v13011_v27, %v10179_v7  ;;  %7458 = vmatpush.bf16.msrb.mxu1 %v9924_v55 }
 0x421   : > { %v13075_v62 = vld [vmem:[%s13879_s24 + $0xf6c] sm:$0xf0] }
 0x422   : > { %v9635_v45 = vld [vmem:[%s13879_s24 + $0x910] sm:$0xf]  ;;  %v10436_v0 = vor.u32 %v13075_v62, %v10435_v53  ;;  %7472 = vmatpush.bf16.msrb.mxu2 %v10180_v56 }
 0x423   : > { %v12875_v23 = vld [vmem:[%s13879_s24 + $0x92c] sm:$0xf0] }
 0x424   : > { %v9891_v63 = vld [vmem:[%s13879_s24 + $0xb10] sm:$0xf]  ;;  %v9636_v50 = vor.u32 %v12875_v23, %v9635_v45  ;;  %7486 = vmatpush.bf16.msrb.mxu3 %v10436_v0 }
 0x425   : > { %v12939_v25 = vld [vmem:[%s13879_s24 + $0xb2c] sm:$0xf0] }
 0x426   : > { %v10147_v59 = vld [vmem:[%s13879_s24 + $0xd10] sm:$0xf]  ;;  %v9892_v5 = vor.u32 %v12939_v25, %v9891_v63  ;;  %7445 = vmatpush.bf16.msrb.mxu0 %v9636_v50 }
 0x427   : > { %v13003_v49 = vld [vmem:[%s13879_s24 + $0xd2c] sm:$0xf0] }
 0x428   : > { %v10403_v19 = vld [vmem:[%s13879_s24 + $0xf10] sm:$0xf]  ;;  %v10148_v20 = vor.u32 %v13003_v49, %v10147_v59  ;;  %7459 = vmatpush.bf16.msrb.mxu1 %v9892_v5 }
 0x429   : > { %v13067_v4 = vld [vmem:[%s13879_s24 + $0xf2c] sm:$0xf0] }
 0x42a   : > { %v9603_v6 = vld [vmem:[%s13879_s24 + $0x8d0] sm:$0xf]  ;;  %v10404_v11 = vor.u32 %v13067_v4, %v10403_v19  ;;  %7473 = vmatpush.bf16.msrb.mxu2 %v10148_v20 }
 0x42b   : > { %v12867_v8 = vld [vmem:[%s13879_s24 + $0x8ec] sm:$0xf0] }
 0x42c   : > { %v9859_v57 = vld [vmem:[%s13879_s24 + $0xad0] sm:$0xf]  ;;  %v9604_v16 = vor.u32 %v12867_v8, %v9603_v6  ;;  %7487 = vmatpush.bf16.msrb.mxu3 %v10404_v11 }
 0x42d   : > { %v12931_v14 = vld [vmem:[%s13879_s24 + $0xaec] sm:$0xf0] }
 0x42e   : > { %v10115_v13 = vld [vmem:[%s13879_s24 + $0xcd0] sm:$0xf]  ;;  %v9860_v60 = vor.u32 %v12931_v14, %v9859_v57  ;;  %7446 = vmatpush.bf16.msrb.mxu0 %v9604_v16 }
 0x42f   : > { %v12995_v54 = vld [vmem:[%s13879_s24 + $0xcec] sm:$0xf0] }
 0x430   : > { %v10371_v15 = vld [vmem:[%s13879_s24 + $0xed0] sm:$0xf]  ;;  %v10116_v48 = vor.u32 %v12995_v54, %v10115_v13  ;;  %7460 = vmatpush.bf16.msrb.mxu1 %v9860_v60 }
 0x431   : > { %v13059_v37 = vld [vmem:[%s13879_s24 + $0xeec] sm:$0xf0] }
 0x432   : > { %v9571_v52 = vld [vmem:[%s13879_s24 + $0x890] sm:$0xf]  ;;  %v10372_v29 = vor.u32 %v13059_v37, %v10371_v15  ;;  %7474 = vmatpush.bf16.msrb.mxu2 %v10116_v48 }
 0x433   : > { %v12859_v9 = vld [vmem:[%s13879_s24 + $0x8ac] sm:$0xf0] }
 0x434   : > { %v9827_v21 = vld [vmem:[%s13879_s24 + $0xa90] sm:$0xf]  ;;  %v9572_v33 = vor.u32 %v12859_v9, %v9571_v52  ;;  %7488 = vmatpush.bf16.msrb.mxu3 %v10372_v29 }
 0x435   : > { %v12923_v24 = vld [vmem:[%s13879_s24 + $0xaac] sm:$0xf0] }
 0x436   : > { %v10083_v26 = vld [vmem:[%s13879_s24 + $0xc90] sm:$0xf]  ;;  %v9828_v34 = vor.u32 %v12923_v24, %v9827_v21  ;;  %7447 = vmatpush.bf16.msrb.mxu0 %v9572_v33 }
 0x437   : > { %v12987_v18 = vld [vmem:[%s13879_s24 + $0xcac] sm:$0xf0] }
 0x438   : > { %v10339_v28 = vld [vmem:[%s13879_s24 + $0xe90] sm:$0xf]  ;;  %v10084_v30 = vor.u32 %v12987_v18, %v10083_v26  ;;  %7461 = vmatpush.bf16.msrb.mxu1 %v9828_v34 }
 0x439   : > { %v13051_v51 = vld [vmem:[%s13879_s24 + $0xeac] sm:$0xf0] }
 0x43a   : > { %v9539_v22 = vld [vmem:[%s13879_s24 + $0x850] sm:$0xf]  ;;  %v10340_v42 = vor.u32 %v13051_v51, %v10339_v28  ;;  %7475 = vmatpush.bf16.msrb.mxu2 %v10084_v30 }
 0x43b   : > { %v12851_v12 = vld [vmem:[%s13879_s24 + $0x86c] sm:$0xf0] }
 0x43c   : > { %v9795_v2 = vld [vmem:[%s13879_s24 + $0xa50] sm:$0xf]  ;;  %v9540_v61 = vor.u32 %v12851_v12, %v9539_v22  ;;  %7489 = vmatpush.bf16.msrb.mxu3 %v10340_v42 }
 0x43d   : > { %v12915_v3 = vld [vmem:[%s13879_s24 + $0xa6c] sm:$0xf0] }
 0x43e   : > { %v10051_v7 = vld [vmem:[%s13879_s24 + $0xc50] sm:$0xf]  ;;  %v9796_v45 = vor.u32 %v12915_v3, %v9795_v2  ;;  %7448 = vmatpush.bf16.msrb.mxu0 %v9540_v61 }
 0x43f   : > { %v12979_v27 = vld [vmem:[%s13879_s24 + $0xc6c] sm:$0xf0] }
 0x440   : > { %v10307_v53 = vld [vmem:[%s13879_s24 + $0xe50] sm:$0xf]  ;;  %v10052_v23 = vor.u32 %v12979_v27, %v10051_v7  ;;  %7462 = vmatpush.bf16.msrb.mxu1 %v9796_v45 }
 0x441   : > { %v13043_v62 = vld [vmem:[%s13879_s24 + $0xe6c] sm:$0xf0] }
 0x442   : > { %v9507_v55 = vld [vmem:[%s13879_s24 + $0x810] sm:$0xf]  ;;  %v10308_v59 = vor.u32 %v13043_v62, %v10307_v53  ;;  %7476 = vmatpush.bf16.msrb.mxu2 %v10052_v23 }
 0x443   : > { %v12843_v56 = vld [vmem:[%s13879_s24 + $0x82c] sm:$0xf0] }
 0x444   : > { %v9763_v63 = vld [vmem:[%s13879_s24 + $0xa10] sm:$0xf]  ;;  %v9508_v6 = vor.u32 %v12843_v56, %v9507_v55  ;;  %7490 = vmatpush.bf16.msrb.mxu3 %v10308_v59 }
 0x445   : > { %v12907_v0 = vld [vmem:[%s13879_s24 + $0xa2c] sm:$0xf0] }
 0x446   : > { %v10019_v25 = vld [vmem:[%s13879_s24 + $0xc10] sm:$0xf]  ;;  %v9764_v14 = vor.u32 %v12907_v0, %v9763_v63  ;;  %7449 = vmatpush.bf16.msrb.mxu0 %v9508_v6 }
 0x447   : > { %v12971_v49 = vld [vmem:[%s13879_s24 + $0xc2c] sm:$0xf0] }
 0x448   : > { %v10275_v19 = vld [vmem:[%s13879_s24 + $0xe10] sm:$0xf]  ;;  %v10020_v13 = vor.u32 %v12971_v49, %v10019_v25  ;;  %7463 = vmatpush.bf16.msrb.mxu1 %v9764_v14 }
 0x449   : > { %v13035_v4 = vld [vmem:[%s13879_s24 + $0xe2c] sm:$0xf0]  ;;  %7450 = vmatmul.bf16.vlgmr.msrb.gmra.mxu0 %v14090_v39 }
 0x44a   : > { %v10755_v50 = vld [vmem:[%s13879_s24 + $0x11d0] sm:$0xf]  ;;  %v10276_v37 = vor.u32 %v13035_v4, %v10275_v19  ;;  %7477 = vmatpush.bf16.msrb.mxu2 %v10020_v13 }
 0x44b   : > { %v13155_v5 = vld [vmem:[%s13879_s24 + $0x11ec] sm:$0xf0]  ;;  %7464 = vmatmul.bf16.vlgmr.msrb.gmra.mxu1 %v14097_v44 }
 0x44c   : > { %v11011_v20 = vld [vmem:[%s13879_s24 + $0x13d0] sm:$0xf]  ;;  %v10756_v16 = vor.u32 %v13155_v5, %v10755_v50  ;;  %7491 = vmatpush.bf16.msrb.mxu3 %v10276_v37 }
 0x44d   : > { %v13219_v8 = vld [vmem:[%s13879_s24 + $0x13ec] sm:$0xf0]  ;;  %7478 = vmatmul.bf16.vlgmr.msrb.gmra.mxu2 %v14095_v43 }
 0x44e   : > { %v11267_v57 = vld [vmem:[%s13879_s24 + $0x15d0] sm:$0xf]  ;;  %v11012_v60 = vor.u32 %v13219_v8, %v11011_v20  ;;  %7498 = vmatpush.bf16.msra.mxu0 %v10756_v16 }
 0x44f   : > { %v13283_v11 = vld [vmem:[%s13879_s24 + $0x15ec] sm:$0xf0]  ;;  %7492 = vmatmul.bf16.vlgmr.msrb.gmra.mxu3 %v14101_v47 }
 0x450   : > { %v11523_v54 = vld [vmem:[%s13879_s24 + $0x17d0] sm:$0xf]  ;;  %v11268_v48 = vor.u32 %v13283_v11, %v11267_v57  ;;  %7512 = vmatpush.bf16.msra.mxu1 %v11012_v60  ;;  %v15444_v60 = vpop.f32.mrf.mxu1 }
 0x451   : > { %v13347_v15 = vld [vmem:[%s13879_s24 + $0x17ec] sm:$0xf0] }
 0x452   : > { %v10723_v52 = vld [vmem:[%s13879_s24 + $0x1190] sm:$0xf]  ;;  %v11524_v29 = vor.u32 %v13347_v15, %v11523_v54  ;;  %7526 = vmatpush.bf16.msra.mxu2 %v11268_v48  ;;  %v15440_v15 = vpop.f32.mrf.mxu0 }
 0x453   : > { %v13147_v9 = vld [vmem:[%s13879_s24 + $0x11ac] sm:$0xf0] }
 0x454   : > { %v10979_v21 = vld [vmem:[%s13879_s24 + $0x1390] sm:$0xf]  ;;  %v10724_v33 = vor.u32 %v13147_v9, %v10723_v52  ;;  %7540 = vmatpush.bf16.msra.mxu3 %v11524_v29 }
 0x455   : > { %v13211_v24 = vld [vmem:[%s13879_s24 + $0x13ac] sm:$0xf0] }
 0x456   : > { %v11235_v26 = vld [vmem:[%s13879_s24 + $0x1590] sm:$0xf]  ;;  %v10980_v34 = vor.u32 %v13211_v24, %v10979_v21  ;;  %7499 = vmatpush.bf16.msra.mxu0 %v10724_v33 }
 0x457   : > { %v13275_v18 = vld [vmem:[%s13879_s24 + $0x15ac] sm:$0xf0] }
 0x458   : > { %v11491_v28 = vld [vmem:[%s13879_s24 + $0x1790] sm:$0xf]  ;;  %v11236_v30 = vor.u32 %v13275_v18, %v11235_v26  ;;  %7513 = vmatpush.bf16.msra.mxu1 %v10980_v34 }
 0x459   : > { %v13339_v51 = vld [vmem:[%s13879_s24 + $0x17ac] sm:$0xf0] }
 0x45a   : > { %v10691_v22 = vld [vmem:[%s13879_s24 + $0x1150] sm:$0xf]  ;;  %v11492_v42 = vor.u32 %v13339_v51, %v11491_v28  ;;  %7527 = vmatpush.bf16.msra.mxu2 %v11236_v30 }
 0x45b   : > { %v13139_v12 = vld [vmem:[%s13879_s24 + $0x116c] sm:$0xf0] }
 0x45c   : > { %v10947_v2 = vld [vmem:[%s13879_s24 + $0x1350] sm:$0xf]  ;;  %v10692_v61 = vor.u32 %v13139_v12, %v10691_v22  ;;  %7541 = vmatpush.bf16.msra.mxu3 %v11492_v42 }
 0x45d   : > { %v13203_v3 = vld [vmem:[%s13879_s24 + $0x136c] sm:$0xf0] }
 0x45e   : > { %v11203_v7 = vld [vmem:[%s13879_s24 + $0x1550] sm:$0xf]  ;;  %v10948_v55 = vor.u32 %v13203_v3, %v10947_v2  ;;  %7500 = vmatpush.bf16.msra.mxu0 %v10692_v61 }
 0x45f   : > { %v13267_v27 = vld [vmem:[%s13879_s24 + $0x156c] sm:$0xf0] }
 0x460   : > { %v11459_v53 = vld [vmem:[%s13879_s24 + $0x1750] sm:$0xf]  ;;  %v11204_v56 = vor.u32 %v13267_v27, %v11203_v7  ;;  %7514 = vmatpush.bf16.msra.mxu1 %v10948_v55  ;;  %v15457_v7 = vpop.f32.mrf.mxu2  ;;  %v15462_v55 = vpop.f32.mrf.mxu3 }
 0x461   : > { %v13331_v62 = vld [vmem:[%s13879_s24 + $0x176c] sm:$0xf0] }
 0x462   : > { %v10659_v45 = vld [vmem:[%s13879_s24 + $0x1110] sm:$0xf]  ;;  %v11460_v0 = vor.u32 %v13331_v62, %v11459_v53  ;;  %7528 = vmatpush.bf16.msra.mxu2 %v11204_v56 }
 0x463   : > { %v13131_v23 = vld [vmem:[%s13879_s24 + $0x112c] sm:$0xf0] }
 0x464   : > { %v10915_v63 = vld [vmem:[%s13879_s24 + $0x1310] sm:$0xf]  ;;  %v10660_v50 = vor.u32 %v13131_v23, %v10659_v45  ;;  %7542 = vmatpush.bf16.msra.mxu3 %v11460_v0  ;;  %v15467_v23 = vld [vmem:[%s13885_s5] sm:$0xff] }
 0x465   : > { %v13195_v25 = vld [vmem:[%s13879_s24 + $0x132c] sm:$0xf0] }
 0x466   : > { %v11171_v59 = vld [vmem:[%s13879_s24 + $0x1510] sm:$0xf]  ;;  %v10916_v5 = vor.u32 %v13195_v25, %v10915_v63  ;;  %7501 = vmatpush.bf16.msra.mxu0 %v10660_v50  ;;  %v1277_v63 = vperm.slane %v15467_v23, 3 }
 0x467   : > { %v13259_v49 = vld [vmem:[%s13879_s24 + $0x152c] sm:$0xf0] }
 0x468   : > { %v11427_v19 = vld [vmem:[%s13879_s24 + $0x1710] sm:$0xf]  ;;  %v11172_v20 = vor.u32 %v13259_v49, %v11171_v59  ;;  %7515 = vmatpush.bf16.msra.mxu1 %v10916_v5  ;;  %v15472_v49 = vpop.f32.mrf.mxu0 }
 0x469   : > { %v13323_v4 = vld [vmem:[%s13879_s24 + $0x172c] sm:$0xf0] }
 0x46a   : > { %v10627_v6 = vld [vmem:[%s13879_s24 + $0x10d0] sm:$0xf]  ;;  %v11428_v11 = vor.u32 %v13323_v4, %v11427_v19  ;;  %7529 = vmatpush.bf16.msra.mxu2 %v11172_v20 }
 0x46b   : > { %v13123_v8 = vld [vmem:[%s13879_s24 + $0x10ec] sm:$0xf0] }
 0x46c   : > { %v10883_v57 = vld [vmem:[%s13879_s24 + $0x12d0] sm:$0xf]  ;;  %v10628_v48 = vor.u32 %v13123_v8, %v10627_v6  ;;  %7543 = vmatpush.bf16.msra.mxu3 %v11428_v11  ;;  %v15477_v6 = vpop.f32.mrf.mxu1 }
 0x46d   : > { %v13187_v14 = vld [vmem:[%s13879_s24 + $0x12ec] sm:$0xf0] }
 0x46e   : > { %v11139_v13 = vld [vmem:[%s13879_s24 + $0x14d0] sm:$0xf]  ;;  %v10884_v52 = vor.u32 %v13187_v14, %v10883_v57  ;;  %7502 = vmatpush.bf16.msra.mxu0 %v10628_v48 }
 0x46f   : > { %v13251_v54 = vld [vmem:[%s13879_s24 + $0x14ec] sm:$0xf0] }
 0x470   : > { %v11395_v37 = vld [vmem:[%s13879_s24 + $0x16d0] sm:$0xf]  ;;  %v11140_v9 = vor.u32 %v13251_v54, %v11139_v13  ;;  %7516 = vmatpush.bf16.msra.mxu1 %v10884_v52 }
 0x471   : > { %v13315_v16 = vld [vmem:[%s13879_s24 + $0x16ec] sm:$0xf0] }
 0x472   : > { %v10595_v21 = vld [vmem:[%s13879_s24 + $0x1090] sm:$0xf]  ;;  %v11396_v26 = vor.u32 %v13315_v16, %v11395_v37  ;;  %7530 = vmatpush.bf16.msra.mxu2 %v11140_v9 }
 0x473   : > { %v13115_v29 = vld [vmem:[%s13879_s24 + $0x10ac] sm:$0xf0] }
 0x474   : > { %v10851_v24 = vld [vmem:[%s13879_s24 + $0x1290] sm:$0xf]  ;;  %v10596_v30 = vor.u32 %v13115_v29, %v10595_v21  ;;  %7544 = vmatpush.bf16.msra.mxu3 %v11396_v26 }
 0x475   : > { %v13179_v18 = vld [vmem:[%s13879_s24 + $0x12ac] sm:$0xf0] }
 0x476   : > { %v11107_v28 = vld [vmem:[%s13879_s24 + $0x1490] sm:$0xf]  ;;  %v10852_v22 = vor.u32 %v13179_v18, %v10851_v24  ;;  %7503 = vmatpush.bf16.msra.mxu0 %v10596_v30 }
 0x477   : > { %v13243_v51 = vld [vmem:[%s13879_s24 + $0x14ac] sm:$0xf0] }
 0x478   : > { %v11363_v33 = vld [vmem:[%s13879_s24 + $0x1690] sm:$0xf]  ;;  %v11108_v12 = vor.u32 %v13243_v51, %v11107_v28  ;;  %7517 = vmatpush.bf16.msra.mxu1 %v10852_v22  ;;  %v7172_v51 = vadd.f32 %v15440_v15, %v1277_v63 }
 0x479   : > { %v13307_v34 = vld [vmem:[%s13879_s24 + $0x16ac] sm:$0xf0] }
 0x47a   : > { %v10563_v2 = vld [vmem:[%s13879_s24 + $0x1050] sm:$0xf]  ;;  %v11364_v27 = vor.u32 %v13307_v34, %v11363_v33  ;;  %7531 = vmatpush.bf16.msra.mxu2 %v11108_v12 }
 0x47b   : > { %v13107_v42 = vld [vmem:[%s13879_s24 + $0x106c] sm:$0xf0] }
 0x47c   : > { %v10819_v3 = vld [vmem:[%s13879_s24 + $0x1250] sm:$0xf]  ;;  %v10564_v0 = vor.u32 %v13107_v42, %v10563_v2  ;;  %7545 = vmatpush.bf16.msra.mxu3 %v11364_v27  ;;  %v15496_v2 = vpop.f32.mrf.mxu2 }
 0x47d   : > { %v13171_v53 = vld [vmem:[%s13879_s24 + $0x126c] sm:$0xf0] }
 0x47e   : > { %v11075_v62 = vld [vmem:[%s13879_s24 + $0x1450] sm:$0xf]  ;;  %v10820_v19 = vor.u32 %v13171_v53, %v10819_v3  ;;  %7504 = vmatpush.bf16.msra.mxu0 %v10564_v0  ;;  %v7227_v0 = vpop.f32.mrf.mxu0 }
 0x47f   : > { %v13235_v61 = vld [vmem:[%s13879_s24 + $0x146c] sm:$0xf0] }
 0x480   : > { %v11331_v56 = vld [vmem:[%s13879_s24 + $0x1650] sm:$0xf]  ;;  %v11076_v4 = vor.u32 %v13235_v61, %v11075_v62  ;;  %7518 = vmatpush.bf16.msra.mxu1 %v10820_v19  ;;  %v15501_v62 = vpop.f32.mrf.mxu3 }
 0x481   : > { %v13299_v45 = vld [vmem:[%s13879_s24 + $0x166c] sm:$0xf0] }
 0x482   : > { %v10531_v25 = vld [vmem:[%s13879_s24 + $0x1010] sm:$0xf]  ;;  %v11332_v8 = vor.u32 %v13299_v45, %v11331_v56  ;;  %7532 = vmatpush.bf16.msra.mxu2 %v11076_v4  ;;  %v7186_v45 = vadd.f32 %v15444_v60, %v7172_v51 }
 0x483   : > { %v13099_v59 = vld [vmem:[%s13879_s24 + $0x102c] sm:$0xf0] }
 0x484   : > { %v10787_v50 = vld [vmem:[%s13879_s24 + $0x1210] sm:$0xf]  ;;  %v10532_v16 = vor.u32 %v13099_v59, %v10531_v25  ;;  %7546 = vmatpush.bf16.msra.mxu3 %v11332_v8  ;;  %v15532_v51 = vpop.f32.mrf.mxu2 }
 0x485   : > { %v13163_v5 = vld [vmem:[%s13879_s24 + $0x122c] sm:$0xf0] }
 0x486   : > { %v11043_v20 = vld [vmem:[%s13879_s24 + $0x1410] sm:$0xf]  ;;  %v10788_v21 = vor.u32 %v13163_v5, %v10787_v50  ;;  %7505 = vmatpush.bf16.msra.mxu0 %v10532_v16  ;;  %v15509_v5 = vpop.f32.mrf.mxu1 }
 0x487   : > { %v13227_v57 = vld [vmem:[%s13879_s24 + $0x142c] sm:$0xf0] }
 0x488   : > { %v11299_v11 = vld [vmem:[%s13879_s24 + $0x1610] sm:$0xf]  ;;  %v11044_v29 = vor.u32 %v13227_v57, %v11043_v20  ;;  %7519 = vmatpush.bf16.msra.mxu1 %v10788_v21 }
 0x489   : > { %v13291_v14 = vld [vmem:[%s13879_s24 + $0x162c] sm:$0xf0]  ;;  %7506 = vmatmul.bf16.vlgmr.msra.gmra.mxu0 %v14190_v31 }
 0x48a   : > { %v11779_v13 = vld [vmem:[%s13879_s24 + $0x19d0] sm:$0xf]  ;;  %v11300_v18 = vor.u32 %v13291_v14, %v11299_v11  ;;  %7533 = vmatpush.bf16.msra.mxu2 %v11044_v29 }
 0x48b   : > { %v13411_v54 = vld [vmem:[%s13879_s24 + $0x19ec] sm:$0xf0]  ;;  %7520 = vmatmul.bf16.vlgmr.msra.gmra.mxu1 %v14197_v36 }
 0x48c   : > { %v12035_v37 = vld [vmem:[%s13879_s24 + $0x1bd0] sm:$0xf]  ;;  %v11780_v28 = vor.u32 %v13411_v54, %v11779_v13  ;;  %7547 = vmatpush.bf16.msra.mxu3 %v11300_v18  ;;  %v7200_v54 = vadd.f32 %v15457_v7, %v7186_v45  ;;  %v7174_v18 = vadd.f32 %v15472_v49, %v1277_v63 }
 0x48d   : > { %v13475_v48 = vld [vmem:[%s13879_s24 + $0x1bec] sm:$0xf0]  ;;  %7534 = vmatmul.bf16.vlgmr.msra.gmra.mxu2 %v14195_v35 }
 0x48e   : > { %v12291_v52 = vld [vmem:[%s13879_s24 + $0x1dd0] sm:$0xf]  ;;  %v12036_v33 = vor.u32 %v13475_v48, %v12035_v37  ;;  %7554 = vmatpush.bf16.msrb.mxu0 %v11780_v28  ;;  %v15546_v45 = vpop.f32.mrf.mxu1 }
 0x48f   : > { %v13539_v9 = vld [vmem:[%s13879_s24 + $0x1dec] sm:$0xf0]  ;;  %7548 = vmatmul.bf16.vlgmr.msra.gmra.mxu3 %v14201_v40 }
 0x490   : > { %v12547_v24 = vld [vmem:[%s13879_s24 + $0x1fd0] sm:$0xf]  ;;  %v12292_v34 = vor.u32 %v13539_v9, %v12291_v52  ;;  %7568 = vmatpush.bf16.msrb.mxu1 %v12036_v33 }
 0x491   : > { %v13603_v26 = vld [vmem:[%s13879_s24 + $0x1fec] sm:$0xf0] }
 0x492   : > { %v11747_v30 = vld [vmem:[%s13879_s24 + $0x1990] sm:$0xf]  ;;  %v12548_v42 = vor.u32 %v13603_v26, %v12547_v24  ;;  %7582 = vmatpush.bf16.msrb.mxu2 %v12292_v34  ;;  %v7214_v34 = vadd.f32 %v15462_v55, %v7200_v54  ;;  %v7188_v55 = vadd.f32 %v15477_v6, %v7174_v18 }
 0x493   : > { %v13403_v22 = vld [vmem:[%s13879_s24 + $0x19ac] sm:$0xf0] }
 0x494   : > { %v12003_v12 = vld [vmem:[%s13879_s24 + $0x1b90] sm:$0xf]  ;;  %v11748_v56 = vor.u32 %v13403_v22, %v11747_v30  ;;  %7596 = vmatpush.bf16.msrb.mxu3 %v12548_v42  ;;  %v15535_v30 = vpop.f32.mrf.mxu3 }
 0x495   : > { %v13467_v3 = vld [vmem:[%s13879_s24 + $0x1bac] sm:$0xf0] }
 0x496   : > { %v12259_v27 = vld [vmem:[%s13879_s24 + $0x1d90] sm:$0xf]  ;;  %v12004_v25 = vor.u32 %v13467_v3, %v12003_v12  ;;  %7555 = vmatpush.bf16.msrb.mxu0 %v11748_v56 }
 0x497   : > { %v13531_v53 = vld [vmem:[%s13879_s24 + $0x1dac] sm:$0xf0] }
 0x498   : > { %v12515_v15 = vld [vmem:[%s13879_s24 + $0x1f90] sm:$0xf]  ;;  %v12260_v59 = vor.u32 %v13531_v53, %v12259_v27  ;;  %7569 = vmatpush.bf16.msrb.mxu1 %v12004_v25 }
 0x499   : > { %v13595_v61 = vld [vmem:[%s13879_s24 + $0x1fac] sm:$0xf0] }
 0x49a   : > { %v11715_v19 = vld [vmem:[%s13879_s24 + $0x1950] sm:$0xf]  ;;  %v12516_v20 = vor.u32 %v13595_v61, %v12515_v15  ;;  %7583 = vmatpush.bf16.msrb.mxu2 %v12260_v59  ;;  %v7229_v15 = vpop.f32.mrf.mxu0  ;;  %v7228_v59 = vadd.f32 %v7227_v0, %v7214_v34 }
 0x49b   : > { %v13395_v4 = vld [vmem:[%s13879_s24 + $0x196c] sm:$0xf0] }
 0x49c   : > { %v11971_v50 = vld [vmem:[%s13879_s24 + $0x1b50] sm:$0xf]  ;;  %v11716_v13 = vor.u32 %v13395_v4, %v11715_v19  ;;  %7597 = vmatpush.bf16.msrb.mxu3 %v12516_v20 }
 0x49d   : > { %v13459_v8 = vld [vmem:[%s13879_s24 + $0x1b6c] sm:$0xf0] }
 0x49e   : > { %v12227_v60 = vld [vmem:[%s13879_s24 + $0x1d50] sm:$0xf]  ;;  %v11972_v37 = vor.u32 %v13459_v8, %v11971_v50  ;;  %7556 = vmatpush.bf16.msrb.mxu0 %v11716_v13 }
 0x49f   : > { %v13523_v57 = vld [vmem:[%s13879_s24 + $0x1d6c] sm:$0xf0] }
 0x4a0   : > { %v12483_v11 = vld [vmem:[%s13879_s24 + $0x1f50] sm:$0xf]  ;;  %v12228_v16 = vor.u32 %v13523_v57, %v12227_v60  ;;  %7570 = vmatpush.bf16.msrb.mxu1 %v11972_v37  ;;  %v7242_v37 = vadd.f32 %v15509_v5, %v7228_v59 }
 0x4a1   : > { %v13587_v14 = vld [vmem:[%s13879_s24 + $0x1f6c] sm:$0xf0] }
 0x4a2   : > { %v11683_v48 = vld [vmem:[%s13879_s24 + $0x1910] sm:$0xf]  ;;  %v12484_v21 = vor.u32 %v13587_v14, %v12483_v11  ;;  %7584 = vmatpush.bf16.msrb.mxu2 %v12228_v16  ;;  %v7202_v14 = vadd.f32 %v15496_v2, %v7188_v55  ;;  %v7257_v2 = vpop.f32.mrf.mxu2 }
 0x4a3   : > { %v13387_v52 = vld [vmem:[%s13879_s24 + $0x192c] sm:$0xf0] }
 0x4a4   : > { %v11939_v9 = vld [vmem:[%s13879_s24 + $0x1b10] sm:$0xf]  ;;  %v11684_v33 = vor.u32 %v13387_v52, %v11683_v48  ;;  %7598 = vmatpush.bf16.msrb.mxu3 %v12484_v21  ;;  %v7216_v5 = vadd.f32 %v15501_v62, %v7202_v14  ;;  %v12831_v14 = vld [vmem:[%s13879_s24 + $0x7d4] sm:$0xf] }
 0x4a5   : > { %v13451_v29 = vld [vmem:[%s13879_s24 + $0x1b2c] sm:$0xf0] }
 0x4a6   : > { %v12195_v24 = vld [vmem:[%s13879_s24 + $0x1d10] sm:$0xf]  ;;  %v11940_v23 = vor.u32 %v13451_v29, %v11939_v9  ;;  %7557 = vmatpush.bf16.msrb.mxu0 %v11684_v33  ;;  %v7230_v59 = vadd.f32 %v7229_v15, %v7216_v5  ;;  %v9477_v15 = vld [vmem:[%s13879_s24 + $0x7f0] sm:$0xf0] }
 0x4a7   : > { %v13515_v26 = vld [vmem:[%s13879_s24 + $0x1d2c] sm:$0xf0]  ;;  %v9189_v5 = vld [vmem:[%s13879_s24 + $0x5b0] sm:$0xf0] }
 0x4a8   : > { %v12451_v7 = vld [vmem:[%s13879_s24 + $0x1f10] sm:$0xf]  ;;  %v12196_v22 = vor.u32 %v13515_v26, %v12195_v24  ;;  %7571 = vmatpush.bf16.msrb.mxu1 %v11940_v23  ;;  %v7297_v23 = vpop.f32.mrf.mxu1 }
 0x4a9   : > { %v13579_v28 = vld [vmem:[%s13879_s24 + $0x1f2c] sm:$0xf0] }
 0x4aa   : > { %v11651_v63 = vld [vmem:[%s13879_s24 + $0x18d0] sm:$0xf]  ;;  %v12452_v42 = vor.u32 %v13579_v28, %v12451_v7  ;;  %7585 = vmatpush.bf16.msrb.mxu2 %v12196_v22  ;;  %v15565_v7 = vpop.f32.mrf.mxu3  ;;  %v7283_v28 = vpop.f32.mrf.mxu0 }
 0x4ab   : > { %v13379_v49 = vld [vmem:[%s13879_s24 + $0x18ec] sm:$0xf0] }
 0x4ac   : > { %v11907_v12 = vld [vmem:[%s13879_s24 + $0x1ad0] sm:$0xf]  ;;  %v11652_v25 = vor.u32 %v13379_v49, %v11651_v63  ;;  %7599 = vmatpush.bf16.msrb.mxu3 %v12452_v42 }
 0x4ad   : > { %v13443_v3 = vld [vmem:[%s13879_s24 + $0x1aec] sm:$0xf0] }
 0x4ae   : > { %v12163_v27 = vld [vmem:[%s13879_s24 + $0x1cd0] sm:$0xf]  ;;  %v11908_v19 = vor.u32 %v13443_v3, %v11907_v12  ;;  %7558 = vmatpush.bf16.msrb.mxu0 %v11652_v25  ;;  %v7256_v12 = vadd.f32 %v15532_v51, %v7242_v37  ;;  %v12639_v51 = vld [vmem:[%s13879_s24 + $0x1d4] sm:$0xf]  ;;  %v7244_v37 = vadd.f32 %v15546_v45, %v7230_v59 }
 0x4af   : > { %v13507_v53 = vld [vmem:[%s13879_s24 + $0x1cec] sm:$0xf0]  ;;  %v12823_v45 = vld [vmem:[%s13879_s24 + $0x794] sm:$0xf] }
 0x4b0   : > { %v12419_v61 = vld [vmem:[%s13879_s24 + $0x1ed0] sm:$0xf]  ;;  %v12164_v4 = vor.u32 %v13507_v53, %v12163_v27  ;;  %7572 = vmatpush.bf16.msrb.mxu1 %v11908_v19  ;;  %v8709_v19 = vld [vmem:[%s13879_s24 + $0x1f0] sm:$0xf0] }
 0x4b1   : > { %v13571_v56 = vld [vmem:[%s13879_s24 + $0x1eec] sm:$0xf0]  ;;  %v9413_v59 = vld [vmem:[%s13879_s24 + $0x770] sm:$0xf0] }
 0x4b2   : > { %v11619_v50 = vld [vmem:[%s13879_s24 + $0x1890] sm:$0xf]  ;;  %v12420_v8 = vor.u32 %v13571_v56, %v12419_v61  ;;  %7586 = vmatpush.bf16.msrb.mxu2 %v12164_v4  ;;  %v12703_v4 = vld [vmem:[%s13879_s24 + $0x3d4] sm:$0xf] }
 0x4b3   : > { %v13371_v20 = vld [vmem:[%s13879_s24 + $0x18ac] sm:$0xf0] }
 0x4b4   : > { %v11875_v6 = vld [vmem:[%s13879_s24 + $0x1a90] sm:$0xf]  ;;  %v11620_v54 = vor.u32 %v13371_v20, %v11619_v50  ;;  %7600 = vmatpush.bf16.msrb.mxu3 %v12420_v8  ;;  %v8965_v20 = vld [vmem:[%s13879_s24 + $0x3f0] sm:$0xf0] }
 0x4b5   : > { %v13435_v60 = vld [vmem:[%s13879_s24 + $0x1aac] sm:$0xf0]  ;;  %v9221_v8 = vld [vmem:[%s13879_s24 + $0x5f0] sm:$0xf0] }
 0x4b6   : > { %v12131_v57 = vld [vmem:[%s13879_s24 + $0x1c90] sm:$0xf]  ;;  %v11876_v16 = vor.u32 %v13435_v60, %v11875_v6  ;;  %7559 = vmatpush.bf16.msrb.mxu0 %v11620_v54  ;;  %v12767_v6 = vld [vmem:[%s13879_s24 + $0x5d4] sm:$0xf]  ;;  %v7270_v60 = vadd.f32 %v15535_v30, %v7256_v12  ;;  %v8712_v54 = vor.u32 %v12639_v51, %v8709_v19  ;;  %v7325_v30 = vpop.f32.mrf.mxu3 }
 0x4b7   : > { %v13499_v11 = vld [vmem:[%s13879_s24 + $0x1cac] sm:$0xf0]  ;;  %v12615_v19 = vld [vmem:[%s13879_s24 + $0x114] sm:$0xf] }
 0x4b8   : > { %v12387_v13 = vld [vmem:[%s13879_s24 + $0x1e90] sm:$0xf]  ;;  %v12132_v48 = vor.u32 %v13499_v11, %v12131_v57  ;;  %7573 = vmatpush.bf16.msrb.mxu1 %v11876_v16  ;;  %v7284_v16 = vadd.f32 %v7283_v28, %v7270_v60  ;;  %v9445_v28 = vld [vmem:[%s13879_s24 + $0x7b0] sm:$0xf0] }
 0x4b9   : > { %v13563_v0 = vld [vmem:[%s13879_s24 + $0x1eac] sm:$0xf0] }
 0x4ba   : > { %v11587_v52 = vld [vmem:[%s13879_s24 + $0x1850] sm:$0xf]  ;;  %v12388_v29 = vor.u32 %v13563_v0, %v12387_v13  ;;  %7587 = vmatpush.bf16.msrb.mxu2 %v12132_v48  ;;  %v7311_v13 = vpop.f32.mrf.mxu2  ;;  %v8968_v48 = vor.u32 %v12703_v4, %v8965_v20  ;;  %v8613_v20 = vld [vmem:[%s13879_s24 + $0x130] sm:$0xf0] }
 0x4bb   : > { %v13363_v9 = vld [vmem:[%s13879_s24 + $0x186c] sm:$0xf0] }
 0x4bc   : > { %v11843_v21 = vld [vmem:[%s13879_s24 + $0x1a50] sm:$0xf]  ;;  %v11588_v22 = vor.u32 %v13363_v9, %v11587_v52  ;;  %7601 = vmatpush.bf16.msrb.mxu3 %v12388_v29  ;;  %v9224_v52 = vor.u32 %v12767_v6, %v9221_v8  ;;  %v12631_v9 = vld [vmem:[%s13879_s24 + $0x194] sm:$0xf] }
 0x4bd   : > { %v13427_v24 = vld [vmem:[%s13879_s24 + $0x1a6c] sm:$0xf0]  ;;  %v12695_v29 = vld [vmem:[%s13879_s24 + $0x394] sm:$0xf] }
 0x4be   : > { %v12099_v26 = vld [vmem:[%s13879_s24 + $0x1c50] sm:$0xf]  ;;  %v11844_v62 = vor.u32 %v13427_v24, %v11843_v21  ;;  %7560 = vmatpush.bf16.msrb.mxu0 %v11588_v22  ;;  %v8677_v21 = vld [vmem:[%s13879_s24 + $0x1b0] sm:$0xf0]  ;;  %v9480_v24 = vor.u32 %v12831_v14, %v9477_v15  ;;  %v7299_v22 = vpop.f32.mrf.mxu1 }
 0x4bf   : > { %v13491_v18 = vld [vmem:[%s13879_s24 + $0x1c6c] sm:$0xf0]  ;;  %v12679_v6 = vld [vmem:[%s13879_s24 + $0x314] sm:$0xf] }
 0x4c0   : > { %v12355_v33 = vld [vmem:[%s13879_s24 + $0x1e50] sm:$0xf]  ;;  %v12100_v42 = vor.u32 %v13491_v18, %v12099_v26  ;;  %7574 = vmatpush.bf16.msrb.mxu1 %v11844_v62  ;;  %v8933_v26 = vld [vmem:[%s13879_s24 + $0x3b0] sm:$0xf0] }
 0x4c1   : > { %v13555_v34 = vld [vmem:[%s13879_s24 + $0x1e6c] sm:$0xf0]  ;;  %v12759_v18 = vld [vmem:[%s13879_s24 + $0x594] sm:$0xf]  ;;  %v8936_v12 = vor.u32 %v12695_v29, %v8933_v26 }
 0x4c2   : > { %v11555_v63 = vld [vmem:[%s13879_s24 + $0x1810] sm:$0xf]  ;;  %v12356_v55 = vor.u32 %v13555_v34, %v12355_v33  ;;  %7588 = vmatpush.bf16.msrb.mxu2 %v12100_v42  ;;  %v7258_v33 = vadd.f32 %v7257_v2, %v7244_v37  ;;  %v7285_v34 = vpop.f32.mrf.mxu0  ;;  %v9192_v2 = vor.u32 %v12759_v18, %v9189_v5  ;;  %v12623_v62 = vld [vmem:[%s13879_s24 + $0x154] sm:$0xf]  ;;  %v7313_v60 = vpop.f32.mrf.mxu2 }
 0x4c3   : > { %v13355_v49 = vld [vmem:[%s13879_s24 + $0x182c] sm:$0xf0]  ;;  %v8645_v42 = vld [vmem:[%s13879_s24 + $0x170] sm:$0xf0] }
 0x4c4   : > { %v11811_v3 = vld [vmem:[%s13879_s24 + $0x1a10] sm:$0xf]  ;;  %v11556_v50 = vor.u32 %v13355_v49, %v11555_v63  ;;  %7602 = vmatpush.bf16.msrb.mxu3 %v12356_v55  ;;  %v8680_v63 = vor.u32 %v12631_v9, %v8677_v21  ;;  %v7298_v49 = vadd.f32 %v7297_v23, %v7284_v16  ;;  %v12751_v55 = vld [vmem:[%s13879_s24 + $0x554] sm:$0xf]  ;;  %v7272_v23 = vadd.f32 %v15565_v7, %v7258_v33 }
 0x4c5   : > { %v13419_v27 = vld [vmem:[%s13879_s24 + $0x1a2c] sm:$0xf0]  ;;  %v8648_v51 = vor.u32 %v12623_v62, %v8645_v42  ;;  %v8869_v8 = vld [vmem:[%s13879_s24 + $0x330] sm:$0xf0]  ;;  %v8616_v16 = vor.u32 %v12615_v19, %v8613_v20 }
 0x4c6   : > { %v12067_v53 = vld [vmem:[%s13879_s24 + $0x1c10] sm:$0xf]  ;;  %v11812_v57 = vor.u32 %v13419_v27, %v11811_v3  ;;  %7561 = vmatpush.bf16.msrb.mxu0 %v11556_v50  ;;  %v12687_v3 = vld [vmem:[%s13879_s24 + $0x354] sm:$0xf]  ;;  %v9448_v27 = vor.u32 %v12823_v45, %v9445_v28  ;;  %v7286_v4 = vadd.f32 %v7285_v34, %v7272_v23 }
 0x4c7   : > { %v13483_v61 = vld [vmem:[%s13879_s24 + $0x1c2c] sm:$0xf0]  ;;  %v9125_v14 = vld [vmem:[%s13879_s24 + $0x530] sm:$0xf0] }
 0x4c8   : > { %v12323_v56 = vld [vmem:[%s13879_s24 + $0x1e10] sm:$0xf]  ;;  %v12068_v11 = vor.u32 %v13483_v61, %v12067_v53  ;;  %7575 = vmatpush.bf16.msrb.mxu1 %v11812_v57  ;;  %v8901_v53 = vld [vmem:[%s13879_s24 + $0x370] sm:$0xf0]  ;;  %v7300_v9 = vadd.f32 %v7299_v22, %v7286_v4 }
 0x4c9   : > { %v13547_v25 = vld [vmem:[%s13879_s24 + $0x1e2c] sm:$0xf0]  ;;  %7562 = vmatmul.bf16.vlgmr.msrb.gmra.mxu0 %v14290_v32  ;;  %v9157_v61 = vld [vmem:[%s13879_s24 + $0x570] sm:$0xf0]  ;;  %v8904_v7 = vor.u32 %v12687_v3, %v8901_v53 }
 0x4ca   : > { %v12324_v0 = vor.u32 %v13547_v25, %v12323_v56  ;;  %7589 = vmatpush.bf16.msrb.mxu2 %v12068_v11  ;;  %7610 = vmatpush.bf16.msra.mxu0 %v8712_v54  ;;  %v7312_v56 = vadd.f32 %v7311_v13, %v7298_v49  ;;  %v12815_v25 = vld [vmem:[%s13879_s24 + $0x754] sm:$0xf]  ;;  %v9160_v50 = vor.u32 %v12751_v55, %v9157_v61  ;;  %v7327_v13 = vpop.f32.mrf.mxu3  ;;  %v7367_v55 = vpop.f32.mrf.mxu2 }
 0x4cb   : > { %7576 = vmatmul.bf16.vlgmr.msrb.gmra.mxu1 %v14297_v41  ;;  %v9416_v57 = vor.u32 %v12815_v25, %v9413_v59  ;;  %v12743_v11 = vld [vmem:[%s13879_s24 + $0x514] sm:$0xf]  ;;  %v7314_v45 = vadd.f32 %v7313_v60, %v7300_v9 }
 0x4cc   : > { %7603 = vmatpush.bf16.msrb.mxu3 %v12324_v0  ;;  %7624 = vmatpush.bf16.msra.mxu1 %v8968_v48  ;;  %v7326_v15 = vadd.f32 %v7325_v30, %v7312_v56  ;;  %v7339_v0 = vpop.f32.mrf.mxu0  ;;  %v12807_v54 = vld [vmem:[%s13879_s24 + $0x714] sm:$0xf]  ;;  %v8872_v48 = vor.u32 %v12679_v6, %v8869_v8  ;;  %v9128_v30 = vor.u32 %v12743_v11, %v9125_v14 }
 0x4cd   : > { %7590 = vmatmul.bf16.vlgmr.msrb.gmra.mxu2 %v14295_v38  ;;  %v9381_v37 = vld [vmem:[%s13879_s24 + $0x730] sm:$0xf0]  ;;  %v7328_v56 = vadd.f32 %v7327_v13, %v7314_v45 }
 0x4ce   : > { %7638 = vmatpush.bf16.msra.mxu2 %v9224_v52  ;;  %7611 = vmatpush.bf16.msra.mxu0 %v8680_v63  ;;  %v7353_v52 = vpop.f32.mrf.mxu1  ;;  %v7340_v21 = vadd.f32 %v7339_v0, %v7326_v15  ;;  %v12607_v29 = vld [vmem:[%s13879_s24 + $0xd4] sm:$0xf]  ;;  %v9384_v18 = vor.u32 %v12807_v54, %v9381_v37 }
 0x4cf   : > { %7604 = vmatmul.bf16.vlgmr.msrb.gmra.mxu3 %v14301_v46  ;;  %v12671_v26 = vld [vmem:[%s13879_s24 + $0x2d4] sm:$0xf] }
 0x4d0   : > { %7652 = vmatpush.bf16.msra.mxu3 %v9480_v24  ;;  %7625 = vmatpush.bf16.msra.mxu1 %v8936_v12  ;;  %v8581_v24 = vld [vmem:[%s13879_s24 + $0xf0] sm:$0xf0]  ;;  %v7354_v12 = vadd.f32 %v7353_v52, %v7340_v21 }
 0x4d1   : > { %v8837_v5 = vld [vmem:[%s13879_s24 + $0x2f0] sm:$0xf0]  ;;  %v8584_v63 = vor.u32 %v12607_v29, %v8581_v24 }
 0x4d2   : > { %7639 = vmatpush.bf16.msra.mxu2 %v9192_v2  ;;  %7612 = vmatpush.bf16.msra.mxu0 %v8648_v51  ;;  %v12735_v33 = vld [vmem:[%s13879_s24 + $0x4d4] sm:$0xf]  ;;  %v8840_v2 = vor.u32 %v12671_v26, %v8837_v5  ;;  %v7368_v25 = vadd.f32 %v7367_v55, %v7354_v12  ;;  %v7381_v51 = vpop.f32.mrf.mxu3 }
 0x4d3   : > { %v9093_v34 = vld [vmem:[%s13879_s24 + $0x4f0] sm:$0xf0] }
 0x4d4   : > { %7653 = vmatpush.bf16.msra.mxu3 %v9448_v27  ;;  %7626 = vmatpush.bf16.msra.mxu1 %v8904_v7  ;;  %v12799_v28 = vld [vmem:[%s13879_s24 + $0x6d4] sm:$0xf]  ;;  %v9096_v62 = vor.u32 %v12735_v33, %v9093_v34  ;;  %v7341_v59 = vpop.f32.mrf.mxu0  ;;  %v7382_v6 = vadd.f32 %v7381_v51, %v7368_v25  ;;  %v7369_v33 = vpop.f32.mrf.mxu2 }
 0x4d5   : > { %v9349_v22 = vld [vmem:[%s13879_s24 + $0x6f0] sm:$0xf0]  ;;  %v7342_v20 = vadd.f32 %v7341_v59, %v7328_v56 }
 0x4d6   : > { %7640 = vmatpush.bf16.msra.mxu2 %v9160_v50  ;;  %7613 = vmatpush.bf16.msra.mxu0 %v8616_v16  ;;  %v12599_v49 = vld [vmem:[%s13879_s24 + $0x94] sm:$0xf]  ;;  %v9352_v53 = vor.u32 %v12799_v28, %v9349_v22  ;;  %v7355_v15 = vpop.f32.mrf.mxu1  ;;  %8285 = vst [vmem:[%s14668_s9 + $0x18] sm:$0xff] %v7382_v6 }
 0x4d7   : > { %v8549_v42 = vld [vmem:[%s13879_s24 + $0xb0] sm:$0xf0]  ;;  %v7356_v21 = vadd.f32 %v7355_v15, %v7342_v20 }
 0x4d8   : > { %7654 = vmatpush.bf16.msra.mxu3 %v9416_v57  ;;  %7627 = vmatpush.bf16.msra.mxu1 %v8872_v48  ;;  %v12663_v3 = vld [vmem:[%s13879_s24 + $0x294] sm:$0xf]  ;;  %v8552_v7 = vor.u32 %v12599_v49, %v8549_v42 }
 0x4d9   : > { %v8805_v27 = vld [vmem:[%s13879_s24 + $0x2b0] sm:$0xf0]  ;;  %v7370_v22 = vadd.f32 %v7369_v33, %v7356_v21 }
 0x4da   : > { %7641 = vmatpush.bf16.msra.mxu2 %v9128_v30  ;;  %v12727_v61 = vld [vmem:[%s13879_s24 + $0x494] sm:$0xf]  ;;  %7614 = vmatpush.bf16.msra.mxu0 %v8584_v63  ;;  %v8808_v50 = vor.u32 %v12663_v3, %v8805_v27  ;;  %v7383_v63 = vpop.f32.mrf.mxu3 }
 0x4db   : > { %v9061_v23 = vld [vmem:[%s13879_s24 + $0x4b0] sm:$0xf0] }
 0x4dc   : > { %7655 = vmatpush.bf16.msra.mxu3 %v9384_v18  ;;  %v12791_v19 = vld [vmem:[%s13879_s24 + $0x694] sm:$0xf]  ;;  %7628 = vmatpush.bf16.msra.mxu1 %v8840_v2  ;;  %v9064_v8 = vor.u32 %v12727_v61, %v9061_v23 }
 0x4dd   : > { %v9317_v4 = vld [vmem:[%s13879_s24 + $0x6b0] sm:$0xf0] }
 0x4de   : > { %7642 = vmatpush.bf16.msra.mxu2 %v9096_v62  ;;  %v12591_v60 = vld [vmem:[%s13879_s24 + $0x54] sm:$0xf]  ;;  %v9320_v14 = vor.u32 %v12791_v19, %v9317_v4  ;;  %7615 = vmatpush.bf16.msra.mxu0 %v8552_v7 }
 0x4df   : > { %v8517_v57 = vld [vmem:[%s13879_s24 + $0x70] sm:$0xf0] }
 0x4e0   : > { %v12655_v11 = vld [vmem:[%s13879_s24 + $0x254] sm:$0xf]  ;;  %7656 = vmatpush.bf16.msra.mxu3 %v9352_v53  ;;  %v8520_v48 = vor.u32 %v12591_v60, %v8517_v57  ;;  %7629 = vmatpush.bf16.msra.mxu1 %v8808_v50  ;;  %v7384_v53 = vadd.f32 %v7383_v63, %v7370_v22 }
 0x4e1   : > { %v8773_v13 = vld [vmem:[%s13879_s24 + $0x270] sm:$0xf0] }
 0x4e2   : > { %v12719_v0 = vld [vmem:[%s13879_s24 + $0x454] sm:$0xf]  ;;  %7643 = vmatpush.bf16.msra.mxu2 %v9064_v8  ;;  %v8776_v30 = vor.u32 %v12655_v11, %v8773_v13  ;;  %7616 = vmatpush.bf16.msra.mxu0 %v8520_v48  ;;  %8293 = vst [vmem:[%s14668_s9 + $0x58] sm:$0xff] %v7384_v53 }
 0x4e3   : > { %v9029_v54 = vld [vmem:[%s13879_s24 + $0x470] sm:$0xf0] }
 0x4e4   : > { %v12783_v37 = vld [vmem:[%s13879_s24 + $0x654] sm:$0xf]  ;;  %v9032_v29 = vor.u32 %v12719_v0, %v9029_v54  ;;  %7657 = vmatpush.bf16.msra.mxu3 %v9320_v14  ;;  %7630 = vmatpush.bf16.msra.mxu1 %v8776_v30 }
 0x4e5   : > { %v9285_v16 = vld [vmem:[%s13879_s24 + $0x670] sm:$0xf0] }
 0x4e6   : > { %v12583_v52 = vld [vmem:[%s13879_s24 + $0x14] sm:$0xf]  ;;  %v9288_v5 = vor.u32 %v12783_v37, %v9285_v16  ;;  %7644 = vmatpush.bf16.msra.mxu2 %v9032_v29 }
 0x4e7   : > { %v8485_v9 = vld [vmem:[%s13879_s24 + $0x30] sm:$0xf0] }
 0x4e8   : > { %v12647_v24 = vld [vmem:[%s13879_s24 + $0x214] sm:$0xf]  ;;  %v8488_v62 = vor.u32 %v12583_v52, %v8485_v9  ;;  %7658 = vmatpush.bf16.msra.mxu3 %v9288_v5 }
 0x4e9   : > { %v8741_v26 = vld [vmem:[%s13879_s24 + $0x230] sm:$0xf0] }
 0x4ea   : > { %v12711_v18 = vld [vmem:[%s13879_s24 + $0x414] sm:$0xf]  ;;  %v8744_v55 = vor.u32 %v12647_v24, %v8741_v26  ;;  %7617 = vmatpush.bf16.msra.mxu0 %v8488_v62 }
 0x4eb   : > { %v8997_v34 = vld [vmem:[%s13879_s24 + $0x430] sm:$0xf0] }
 0x4ec   : > { %v12775_v45 = vld [vmem:[%s13879_s24 + $0x614] sm:$0xf]  ;;  %v9000_v61 = vor.u32 %v12711_v18, %v8997_v34  ;;  %7631 = vmatpush.bf16.msra.mxu1 %v8744_v55 }
 0x4ed   : > { %v9253_v28 = vld [vmem:[%s13879_s24 + $0x630] sm:$0xf0]  ;;  %7618 = vmatmul.bf16.vlgmr.msra.gmra.mxu0 %v13982_v58 }
 0x4ee   : > { %v12895_v49 = vld [vmem:[%s13879_s24 + $0x9d4] sm:$0xf]  ;;  %v9256_v25 = vor.u32 %v12775_v45, %v9253_v28  ;;  %7645 = vmatpush.bf16.msra.mxu2 %v9000_v61 }
 0x4ef   : > { %v9733_v12 = vld [vmem:[%s13879_s24 + $0x9f0] sm:$0xf0]  ;;  %7632 = vmatmul.bf16.vlgmr.msra.gmra.mxu1 %v14006_v10 }
 0x4f0   : > { %v12959_v2 = vld [vmem:[%s13879_s24 + $0xbd4] sm:$0xf]  ;;  %v9736_v59 = vor.u32 %v12895_v49, %v9733_v12  ;;  %7659 = vmatpush.bf16.msra.mxu3 %v9256_v25 }
 0x4f1   : > { %v9989_v42 = vld [vmem:[%s13879_s24 + $0xbf0] sm:$0xf0]  ;;  %7646 = vmatmul.bf16.vlgmr.msra.gmra.mxu2 %v13990_v1 }
 0x4f2   : > { %v13023_v3 = vld [vmem:[%s13879_s24 + $0xdd4] sm:$0xf]  ;;  %v9992_v19 = vor.u32 %v12959_v2, %v9989_v42  ;;  %7666 = vmatpush.bf16.msrb.mxu0 %v9736_v59 }
 0x4f3   : > { %v10245_v27 = vld [vmem:[%s13879_s24 + $0xdf0] sm:$0xf0]  ;;  %7660 = vmatmul.bf16.vlgmr.msra.gmra.mxu3 %v14014_v17 }
 0x4f4   : > { %v13087_v23 = vld [vmem:[%s13879_s24 + $0xfd4] sm:$0xf]  ;;  %v10248_v4 = vor.u32 %v13023_v3, %v10245_v27  ;;  %7680 = vmatpush.bf16.msrb.mxu1 %v9992_v19 }
 0x4f5   : > { %v10501_v56 = vld [vmem:[%s13879_s24 + $0xff0] sm:$0xf0] }
 0x4f6   : > { %v12887_v51 = vld [vmem:[%s13879_s24 + $0x994] sm:$0xf]  ;;  %v10504_v20 = vor.u32 %v13087_v23, %v10501_v56  ;;  %7694 = vmatpush.bf16.msrb.mxu2 %v10248_v4 }
 0x4f7   : > { %v9701_v7 = vld [vmem:[%s13879_s24 + $0x9b0] sm:$0xf0] }
 0x4f8   : > { %v12951_v50 = vld [vmem:[%s13879_s24 + $0xb94] sm:$0xf]  ;;  %v9704_v14 = vor.u32 %v12887_v51, %v9701_v7  ;;  %7708 = vmatpush.bf16.msrb.mxu3 %v10504_v20 }
 0x4f9   : > { %v9957_v6 = vld [vmem:[%s13879_s24 + $0xbb0] sm:$0xf0] }
 0x4fa   : > { %v13015_v8 = vld [vmem:[%s13879_s24 + $0xd94] sm:$0xf]  ;;  %v9960_v15 = vor.u32 %v12951_v50, %v9957_v6  ;;  %7667 = vmatpush.bf16.msrb.mxu0 %v9704_v14 }
 0x4fb   : > { %v10213_v60 = vld [vmem:[%s13879_s24 + $0xdb0] sm:$0xf0] }
 0x4fc   : > { %v13079_v57 = vld [vmem:[%s13879_s24 + $0xf94] sm:$0xf]  ;;  %v10216_v13 = vor.u32 %v13015_v8, %v10213_v60  ;;  %7681 = vmatpush.bf16.msrb.mxu1 %v9960_v15 }
 0x4fd   : > { %v10469_v11 = vld [vmem:[%s13879_s24 + $0xfb0] sm:$0xf0] }
 0x4fe   : > { %v12879_v0 = vld [vmem:[%s13879_s24 + $0x954] sm:$0xf]  ;;  %v10472_v16 = vor.u32 %v13079_v57, %v10469_v11  ;;  %7695 = vmatpush.bf16.msrb.mxu2 %v10216_v13 }
 0x4ff   : > { %v9669_v54 = vld [vmem:[%s13879_s24 + $0x970] sm:$0xf0] }
 0x500   : > { %v12943_v37 = vld [vmem:[%s13879_s24 + $0xb54] sm:$0xf]  ;;  %v9672_v29 = vor.u32 %v12879_v0, %v9669_v54  ;;  %7709 = vmatpush.bf16.msrb.mxu3 %v10472_v16 }
 0x501   : > { %v9925_v48 = vld [vmem:[%s13879_s24 + $0xb70] sm:$0xf0] }
 0x502   : > { %v13007_v52 = vld [vmem:[%s13879_s24 + $0xd54] sm:$0xf]  ;;  %v9928_v24 = vor.u32 %v12943_v37, %v9925_v48  ;;  %7668 = vmatpush.bf16.msrb.mxu0 %v9672_v29 }
 0x503   : > { %v10181_v9 = vld [vmem:[%s13879_s24 + $0xd70] sm:$0xf0] }
 0x504   : > { %v13071_v21 = vld [vmem:[%s13879_s24 + $0xf54] sm:$0xf]  ;;  %v10184_v26 = vor.u32 %v13007_v52, %v10181_v9  ;;  %7682 = vmatpush.bf16.msrb.mxu1 %v9928_v24 }
 0x505   : > { %v10437_v30 = vld [vmem:[%s13879_s24 + $0xf70] sm:$0xf0] }
 0x506   : > { %v12871_v18 = vld [vmem:[%s13879_s24 + $0x914] sm:$0xf]  ;;  %v10440_v34 = vor.u32 %v13071_v21, %v10437_v30  ;;  %7696 = vmatpush.bf16.msrb.mxu2 %v10184_v26 }
 0x507   : > { %v9637_v5 = vld [vmem:[%s13879_s24 + $0x930] sm:$0xf0] }
 0x508   : > { %v12935_v33 = vld [vmem:[%s13879_s24 + $0xb14] sm:$0xf]  ;;  %v9640_v12 = vor.u32 %v12871_v18, %v9637_v5  ;;  %7710 = vmatpush.bf16.msrb.mxu3 %v10440_v34 }
 0x509   : > { %v9893_v45 = vld [vmem:[%s13879_s24 + $0xb30] sm:$0xf0] }
 0x50a   : > { %v12999_v28 = vld [vmem:[%s13879_s24 + $0xd14] sm:$0xf]  ;;  %v9896_v2 = vor.u32 %v12935_v33, %v9893_v45  ;;  %7669 = vmatpush.bf16.msrb.mxu0 %v9640_v12 }
 0x50b   : > { %v10149_v22 = vld [vmem:[%s13879_s24 + $0xd30] sm:$0xf0] }
 0x50c   : > { %v13063_v63 = vld [vmem:[%s13879_s24 + $0xf14] sm:$0xf]  ;;  %v10152_v62 = vor.u32 %v12999_v28, %v10149_v22  ;;  %7683 = vmatpush.bf16.msrb.mxu1 %v9896_v2 }
 0x50d   : > { %v10405_v49 = vld [vmem:[%s13879_s24 + $0xf30] sm:$0xf0] }
 0x50e   : > { %v12863_v42 = vld [vmem:[%s13879_s24 + $0x8d4] sm:$0xf]  ;;  %v10408_v53 = vor.u32 %v13063_v63, %v10405_v49  ;;  %7697 = vmatpush.bf16.msrb.mxu2 %v10152_v62 }
 0x50f   : > { %v9605_v3 = vld [vmem:[%s13879_s24 + $0x8f0] sm:$0xf0] }
 0x510   : > { %v12927_v27 = vld [vmem:[%s13879_s24 + $0xad4] sm:$0xf]  ;;  %v9608_v59 = vor.u32 %v12863_v42, %v9605_v3  ;;  %7711 = vmatpush.bf16.msrb.mxu3 %v10408_v53 }
 0x511   : > { %v9861_v55 = vld [vmem:[%s13879_s24 + $0xaf0] sm:$0xf0] }
 0x512   : > { %v12991_v61 = vld [vmem:[%s13879_s24 + $0xcd4] sm:$0xf]  ;;  %v9864_v51 = vor.u32 %v12927_v27, %v9861_v55  ;;  %7670 = vmatpush.bf16.msrb.mxu0 %v9608_v59 }
 0x513   : > { %v10117_v23 = vld [vmem:[%s13879_s24 + $0xcf0] sm:$0xf0] }
 0x514   : > { %v13055_v56 = vld [vmem:[%s13879_s24 + $0xed4] sm:$0xf]  ;;  %v10120_v19 = vor.u32 %v12991_v61, %v10117_v23  ;;  %7684 = vmatpush.bf16.msrb.mxu1 %v9864_v51 }
 0x515   : > { %v10373_v25 = vld [vmem:[%s13879_s24 + $0xef0] sm:$0xf0] }
 0x516   : > { %v12855_v4 = vld [vmem:[%s13879_s24 + $0x894] sm:$0xf]  ;;  %v10376_v20 = vor.u32 %v13055_v56, %v10373_v25  ;;  %7698 = vmatpush.bf16.msrb.mxu2 %v10120_v19 }
 0x517   : > { %v9573_v7 = vld [vmem:[%s13879_s24 + $0x8b0] sm:$0xf0] }
 0x518   : > { %v12919_v50 = vld [vmem:[%s13879_s24 + $0xa94] sm:$0xf]  ;;  %v9576_v14 = vor.u32 %v12855_v4, %v9573_v7  ;;  %7712 = vmatpush.bf16.msrb.mxu3 %v10376_v20 }
 0x519   : > { %v9829_v6 = vld [vmem:[%s13879_s24 + $0xab0] sm:$0xf0] }
 0x51a   : > { %v12983_v8 = vld [vmem:[%s13879_s24 + $0xc94] sm:$0xf]  ;;  %v9832_v15 = vor.u32 %v12919_v50, %v9829_v6  ;;  %7671 = vmatpush.bf16.msrb.mxu0 %v9576_v14 }
 0x51b   : > { %v10085_v60 = vld [vmem:[%s13879_s24 + $0xcb0] sm:$0xf0] }
 0x51c   : > { %v13047_v57 = vld [vmem:[%s13879_s24 + $0xe94] sm:$0xf]  ;;  %v10088_v13 = vor.u32 %v12983_v8, %v10085_v60  ;;  %7685 = vmatpush.bf16.msrb.mxu1 %v9832_v15 }
 0x51d   : > { %v10341_v11 = vld [vmem:[%s13879_s24 + $0xeb0] sm:$0xf0] }
 0x51e   : > { %v12847_v0 = vld [vmem:[%s13879_s24 + $0x854] sm:$0xf]  ;;  %v10344_v16 = vor.u32 %v13047_v57, %v10341_v11  ;;  %7699 = vmatpush.bf16.msrb.mxu2 %v10088_v13 }
 0x51f   : > { %v9541_v54 = vld [vmem:[%s13879_s24 + $0x870] sm:$0xf0] }
 0x520   : > { %v12911_v37 = vld [vmem:[%s13879_s24 + $0xa54] sm:$0xf]  ;;  %v9544_v29 = vor.u32 %v12847_v0, %v9541_v54  ;;  %7713 = vmatpush.bf16.msrb.mxu3 %v10344_v16 }
 0x521   : > { %v9797_v48 = vld [vmem:[%s13879_s24 + $0xa70] sm:$0xf0] }
 0x522   : > { %v12975_v52 = vld [vmem:[%s13879_s24 + $0xc54] sm:$0xf]  ;;  %v9800_v18 = vor.u32 %v12911_v37, %v9797_v48  ;;  %7672 = vmatpush.bf16.msrb.mxu0 %v9544_v29 }
 0x523   : > { %v10053_v9 = vld [vmem:[%s13879_s24 + $0xc70] sm:$0xf0] }
 0x524   : > { %v13039_v21 = vld [vmem:[%s13879_s24 + $0xe54] sm:$0xf]  ;;  %v10056_v5 = vor.u32 %v12975_v52, %v10053_v9  ;;  %7686 = vmatpush.bf16.msrb.mxu1 %v9800_v18 }
 0x525   : > { %v10309_v30 = vld [vmem:[%s13879_s24 + $0xe70] sm:$0xf0] }
 0x526   : > { %v12839_v24 = vld [vmem:[%s13879_s24 + $0x814] sm:$0xf]  ;;  %v10312_v28 = vor.u32 %v13039_v21, %v10309_v30  ;;  %7700 = vmatpush.bf16.msrb.mxu2 %v10056_v5 }
 0x527   : > { %v9509_v26 = vld [vmem:[%s13879_s24 + $0x830] sm:$0xf0] }
 0x528   : > { %v12903_v33 = vld [vmem:[%s13879_s24 + $0xa14] sm:$0xf]  ;;  %v9512_v42 = vor.u32 %v12839_v24, %v9509_v26  ;;  %7714 = vmatpush.bf16.msrb.mxu3 %v10312_v28 }
 0x529   : > { %v9765_v34 = vld [vmem:[%s13879_s24 + $0xa30] sm:$0xf0] }
 0x52a   : > { %v12967_v45 = vld [vmem:[%s13879_s24 + $0xc14] sm:$0xf]  ;;  %v9768_v55 = vor.u32 %v12903_v33, %v9765_v34  ;;  %7673 = vmatpush.bf16.msrb.mxu0 %v9512_v42 }
 0x52b   : > { %v10021_v22 = vld [vmem:[%s13879_s24 + $0xc30] sm:$0xf0] }
 0x52c   : > { %v13031_v63 = vld [vmem:[%s13879_s24 + $0xe14] sm:$0xf]  ;;  %v10024_v61 = vor.u32 %v12967_v45, %v10021_v22  ;;  %7687 = vmatpush.bf16.msrb.mxu1 %v9768_v55 }
 0x52d   : > { %v10277_v49 = vld [vmem:[%s13879_s24 + $0xe30] sm:$0xf0]  ;;  %7674 = vmatmul.bf16.vlgmr.msrb.gmra.mxu0 %v14090_v39 }
 0x52e   : > { %v13151_v12 = vld [vmem:[%s13879_s24 + $0x11d4] sm:$0xf]  ;;  %v10280_v25 = vor.u32 %v13031_v63, %v10277_v49  ;;  %7701 = vmatpush.bf16.msrb.mxu2 %v10024_v61 }
 0x52f   : > { %v10757_v2 = vld [vmem:[%s13879_s24 + $0x11f0] sm:$0xf0]  ;;  %7688 = vmatmul.bf16.vlgmr.msrb.gmra.mxu1 %v14097_v44 }
 0x530   : > { %v13215_v62 = vld [vmem:[%s13879_s24 + $0x13d4] sm:$0xf]  ;;  %v10760_v59 = vor.u32 %v13151_v12, %v10757_v2  ;;  %7715 = vmatpush.bf16.msrb.mxu3 %v10280_v25 }
 0x531   : > { %v11013_v3 = vld [vmem:[%s13879_s24 + $0x13f0] sm:$0xf0]  ;;  %7702 = vmatmul.bf16.vlgmr.msrb.gmra.mxu2 %v14095_v43 }
 0x532   : > { %v13279_v27 = vld [vmem:[%s13879_s24 + $0x15d4] sm:$0xf]  ;;  %v11016_v51 = vor.u32 %v13215_v62, %v11013_v3  ;;  %7722 = vmatpush.bf16.msra.mxu0 %v10760_v59 }
 0x533   : > { %v11269_v53 = vld [vmem:[%s13879_s24 + $0x15f0] sm:$0xf0]  ;;  %7716 = vmatmul.bf16.vlgmr.msrb.gmra.mxu3 %v14101_v47 }
 0x534   : > { %v13343_v23 = vld [vmem:[%s13879_s24 + $0x17d4] sm:$0xf]  ;;  %v11272_v19 = vor.u32 %v13279_v27, %v11269_v53  ;;  %7736 = vmatpush.bf16.msra.mxu1 %v11016_v51  ;;  %v15765_v51 = vpop.f32.mrf.mxu1 }
 0x535   : > { %v11525_v56 = vld [vmem:[%s13879_s24 + $0x17f0] sm:$0xf0] }
 0x536   : > { %v13143_v4 = vld [vmem:[%s13879_s24 + $0x1194] sm:$0xf]  ;;  %v11528_v20 = vor.u32 %v13343_v23, %v11525_v56  ;;  %7750 = vmatpush.bf16.msra.mxu2 %v11272_v19  ;;  %v15761_v56 = vpop.f32.mrf.mxu0 }
 0x537   : > { %v10725_v7 = vld [vmem:[%s13879_s24 + $0x11b0] sm:$0xf0] }
 0x538   : > { %v13207_v50 = vld [vmem:[%s13879_s24 + $0x1394] sm:$0xf]  ;;  %v10728_v14 = vor.u32 %v13143_v4, %v10725_v7  ;;  %7764 = vmatpush.bf16.msra.mxu3 %v11528_v20 }
 0x539   : > { %v10981_v6 = vld [vmem:[%s13879_s24 + $0x13b0] sm:$0xf0] }
 0x53a   : > { %v13271_v8 = vld [vmem:[%s13879_s24 + $0x1594] sm:$0xf]  ;;  %v10984_v15 = vor.u32 %v13207_v50, %v10981_v6  ;;  %7723 = vmatpush.bf16.msra.mxu0 %v10728_v14 }
 0x53b   : > { %v11237_v60 = vld [vmem:[%s13879_s24 + $0x15b0] sm:$0xf0] }
 0x53c   : > { %v13335_v57 = vld [vmem:[%s13879_s24 + $0x1794] sm:$0xf]  ;;  %v11240_v13 = vor.u32 %v13271_v8, %v11237_v60  ;;  %7737 = vmatpush.bf16.msra.mxu1 %v10984_v15 }
 0x53d   : > { %v11493_v11 = vld [vmem:[%s13879_s24 + $0x17b0] sm:$0xf0] }
 0x53e   : > { %v13135_v0 = vld [vmem:[%s13879_s24 + $0x1154] sm:$0xf]  ;;  %v11496_v16 = vor.u32 %v13335_v57, %v11493_v11  ;;  %7751 = vmatpush.bf16.msra.mxu2 %v11240_v13 }
 0x53f   : > { %v10693_v54 = vld [vmem:[%s13879_s24 + $0x1170] sm:$0xf0] }
 0x540   : > { %v13199_v37 = vld [vmem:[%s13879_s24 + $0x1354] sm:$0xf]  ;;  %v10696_v29 = vor.u32 %v13135_v0, %v10693_v54  ;;  %7765 = vmatpush.bf16.msra.mxu3 %v11496_v16 }
 0x541   : > { %v10949_v48 = vld [vmem:[%s13879_s24 + $0x1370] sm:$0xf0] }
 0x542   : > { %v13263_v52 = vld [vmem:[%s13879_s24 + $0x1554] sm:$0xf]  ;;  %v10952_v24 = vor.u32 %v13199_v37, %v10949_v48  ;;  %7724 = vmatpush.bf16.msra.mxu0 %v10696_v29 }
 0x543   : > { %v11205_v9 = vld [vmem:[%s13879_s24 + $0x1570] sm:$0xf0] }
 0x544   : > { %v13327_v21 = vld [vmem:[%s13879_s24 + $0x1754] sm:$0xf]  ;;  %v11208_v26 = vor.u32 %v13263_v52, %v11205_v9  ;;  %7738 = vmatpush.bf16.msra.mxu1 %v10952_v24  ;;  %v15778_v52 = vpop.f32.mrf.mxu2  ;;  %v15783_v24 = vpop.f32.mrf.mxu3 }
 0x545   : > { %v11461_v30 = vld [vmem:[%s13879_s24 + $0x1770] sm:$0xf0] }
 0x546   : > { %v13127_v18 = vld [vmem:[%s13879_s24 + $0x1114] sm:$0xf]  ;;  %v11464_v34 = vor.u32 %v13327_v21, %v11461_v30  ;;  %7752 = vmatpush.bf16.msra.mxu2 %v11208_v26 }
 0x547   : > { %v10661_v5 = vld [vmem:[%s13879_s24 + $0x1130] sm:$0xf0] }
 0x548   : > { %v13191_v33 = vld [vmem:[%s13879_s24 + $0x1314] sm:$0xf]  ;;  %v10664_v12 = vor.u32 %v13127_v18, %v10661_v5  ;;  %7766 = vmatpush.bf16.msra.mxu3 %v11464_v34  ;;  %v15788_v5 = vld [vmem:[%s13885_s5] sm:$0xff] }
 0x549   : > { %v10917_v45 = vld [vmem:[%s13879_s24 + $0x1330] sm:$0xf0] }
 0x54a   : > { %v13255_v28 = vld [vmem:[%s13879_s24 + $0x1514] sm:$0xf]  ;;  %v10920_v2 = vor.u32 %v13191_v33, %v10917_v45  ;;  %7725 = vmatpush.bf16.msra.mxu0 %v10664_v12  ;;  %v1278_v33 = vperm.slane %v15788_v5, 4 }
 0x54b   : > { %v11173_v22 = vld [vmem:[%s13879_s24 + $0x1530] sm:$0xf0] }
 0x54c   : > { %v13319_v63 = vld [vmem:[%s13879_s24 + $0x1714] sm:$0xf]  ;;  %v11176_v62 = vor.u32 %v13255_v28, %v11173_v22  ;;  %7739 = vmatpush.bf16.msra.mxu1 %v10920_v2  ;;  %v15793_v22 = vpop.f32.mrf.mxu0 }
 0x54d   : > { %v11429_v49 = vld [vmem:[%s13879_s24 + $0x1730] sm:$0xf0] }
 0x54e   : > { %v13119_v42 = vld [vmem:[%s13879_s24 + $0x10d4] sm:$0xf]  ;;  %v11432_v53 = vor.u32 %v13319_v63, %v11429_v49  ;;  %7753 = vmatpush.bf16.msra.mxu2 %v11176_v62 }
 0x54f   : > { %v10629_v3 = vld [vmem:[%s13879_s24 + $0x10f0] sm:$0xf0] }
 0x550   : > { %v13183_v27 = vld [vmem:[%s13879_s24 + $0x12d4] sm:$0xf]  ;;  %v10632_v19 = vor.u32 %v13119_v42, %v10629_v3  ;;  %7767 = vmatpush.bf16.msra.mxu3 %v11432_v53  ;;  %v15798_v42 = vpop.f32.mrf.mxu1 }
 0x551   : > { %v10885_v55 = vld [vmem:[%s13879_s24 + $0x12f0] sm:$0xf0] }
 0x552   : > { %v13247_v61 = vld [vmem:[%s13879_s24 + $0x14d4] sm:$0xf]  ;;  %v10888_v4 = vor.u32 %v13183_v27, %v10885_v55  ;;  %7726 = vmatpush.bf16.msra.mxu0 %v10632_v19 }
 0x553   : > { %v11141_v23 = vld [vmem:[%s13879_s24 + $0x14f0] sm:$0xf0] }
 0x554   : > { %v13311_v25 = vld [vmem:[%s13879_s24 + $0x16d4] sm:$0xf]  ;;  %v11144_v7 = vor.u32 %v13247_v61, %v11141_v23  ;;  %7740 = vmatpush.bf16.msra.mxu1 %v10888_v4 }
 0x555   : > { %v11397_v59 = vld [vmem:[%s13879_s24 + $0x16f0] sm:$0xf0] }
 0x556   : > { %v13111_v50 = vld [vmem:[%s13879_s24 + $0x1094] sm:$0xf]  ;;  %v11400_v8 = vor.u32 %v13311_v25, %v11397_v59  ;;  %7754 = vmatpush.bf16.msra.mxu2 %v11144_v7 }
 0x557   : > { %v10597_v20 = vld [vmem:[%s13879_s24 + $0x10b0] sm:$0xf0] }
 0x558   : > { %v13175_v6 = vld [vmem:[%s13879_s24 + $0x1294] sm:$0xf]  ;;  %v10600_v13 = vor.u32 %v13111_v50, %v10597_v20  ;;  %7768 = vmatpush.bf16.msra.mxu3 %v11400_v8 }
 0x559   : > { %v10853_v60 = vld [vmem:[%s13879_s24 + $0x12b0] sm:$0xf0] }
 0x55a   : > { %v13239_v57 = vld [vmem:[%s13879_s24 + $0x1494] sm:$0xf]  ;;  %v10856_v0 = vor.u32 %v13175_v6, %v10853_v60  ;;  %7727 = vmatpush.bf16.msra.mxu0 %v10600_v13 }
 0x55b   : > { %v11109_v11 = vld [vmem:[%s13879_s24 + $0x14b0] sm:$0xf0] }
 0x55c   : > { %v13303_v14 = vld [vmem:[%s13879_s24 + $0x1694] sm:$0xf]  ;;  %v11112_v54 = vor.u32 %v13239_v57, %v11109_v11  ;;  %7741 = vmatpush.bf16.msra.mxu1 %v10856_v0  ;;  %v7396_v11 = vadd.f32 %v15761_v56, %v1278_v33 }
 0x55d   : > { %v11365_v15 = vld [vmem:[%s13879_s24 + $0x16b0] sm:$0xf0] }
 0x55e   : > { %v13103_v37 = vld [vmem:[%s13879_s24 + $0x1054] sm:$0xf]  ;;  %v11368_v9 = vor.u32 %v13303_v14, %v11365_v15  ;;  %7755 = vmatpush.bf16.msra.mxu2 %v11112_v54 }
 0x55f   : > { %v10565_v16 = vld [vmem:[%s13879_s24 + $0x1070] sm:$0xf0] }
 0x560   : > { %v13167_v48 = vld [vmem:[%s13879_s24 + $0x1254] sm:$0xf]  ;;  %v10568_v34 = vor.u32 %v13103_v37, %v10565_v16  ;;  %7769 = vmatpush.bf16.msra.mxu3 %v11368_v9  ;;  %v15817_v37 = vpop.f32.mrf.mxu2 }
 0x561   : > { %v10821_v21 = vld [vmem:[%s13879_s24 + $0x1270] sm:$0xf0] }
 0x562   : > { %v13231_v30 = vld [vmem:[%s13879_s24 + $0x1454] sm:$0xf]  ;;  %v10824_v63 = vor.u32 %v13167_v48, %v10821_v21  ;;  %7728 = vmatpush.bf16.msra.mxu0 %v10568_v34  ;;  %v7451_v34 = vpop.f32.mrf.mxu0 }
 0x563   : > { %v11077_v29 = vld [vmem:[%s13879_s24 + $0x1470] sm:$0xf0] }
 0x564   : > { %v13295_v26 = vld [vmem:[%s13879_s24 + $0x1654] sm:$0xf]  ;;  %v11080_v49 = vor.u32 %v13231_v30, %v11077_v29  ;;  %7742 = vmatpush.bf16.msra.mxu1 %v10824_v63  ;;  %v15822_v30 = vpop.f32.mrf.mxu3 }
 0x565   : > { %v11333_v18 = vld [vmem:[%s13879_s24 + $0x1670] sm:$0xf0] }
 0x566   : > { %v13095_v45 = vld [vmem:[%s13879_s24 + $0x1014] sm:$0xf]  ;;  %v11336_v3 = vor.u32 %v13295_v26, %v11333_v18  ;;  %7756 = vmatpush.bf16.msra.mxu2 %v11080_v49  ;;  %v7410_v18 = vadd.f32 %v15765_v51, %v7396_v11 }
 0x567   : > { %v10533_v28 = vld [vmem:[%s13879_s24 + $0x1030] sm:$0xf0] }
 0x568   : > { %v13159_v12 = vld [vmem:[%s13879_s24 + $0x1214] sm:$0xf]  ;;  %v10536_v59 = vor.u32 %v13095_v45, %v10533_v28  ;;  %7770 = vmatpush.bf16.msra.mxu3 %v11336_v3  ;;  %v15853_v11 = vpop.f32.mrf.mxu2 }
 0x569   : > { %v10789_v2 = vld [vmem:[%s13879_s24 + $0x1230] sm:$0xf0] }
 0x56a   : > { %v13223_v62 = vld [vmem:[%s13879_s24 + $0x1414] sm:$0xf]  ;;  %v10792_v50 = vor.u32 %v13159_v12, %v10789_v2  ;;  %7729 = vmatpush.bf16.msra.mxu0 %v10536_v59  ;;  %v15830_v2 = vpop.f32.mrf.mxu1 }
 0x56b   : > { %v11045_v27 = vld [vmem:[%s13879_s24 + $0x1430] sm:$0xf0] }
 0x56c   : > { %v13287_v53 = vld [vmem:[%s13879_s24 + $0x1614] sm:$0xf]  ;;  %v11048_v20 = vor.u32 %v13223_v62, %v11045_v27  ;;  %7743 = vmatpush.bf16.msra.mxu1 %v10792_v50 }
 0x56d   : > { %v11301_v55 = vld [vmem:[%s13879_s24 + $0x1630] sm:$0xf0]  ;;  %7730 = vmatmul.bf16.vlgmr.msra.gmra.mxu0 %v14190_v31 }
 0x56e   : > { %v13407_v61 = vld [vmem:[%s13879_s24 + $0x19d4] sm:$0xf]  ;;  %v11304_v60 = vor.u32 %v13287_v53, %v11301_v55  ;;  %7757 = vmatpush.bf16.msra.mxu2 %v11048_v20 }
 0x56f   : > { %v11781_v23 = vld [vmem:[%s13879_s24 + $0x19f0] sm:$0xf0]  ;;  %7744 = vmatmul.bf16.vlgmr.msra.gmra.mxu1 %v14197_v36 }
 0x570   : > { %v13471_v25 = vld [vmem:[%s13879_s24 + $0x1bd4] sm:$0xf]  ;;  %v11784_v57 = vor.u32 %v13407_v61, %v11781_v23  ;;  %7771 = vmatpush.bf16.msra.mxu3 %v11304_v60  ;;  %v7424_v23 = vadd.f32 %v15778_v52, %v7410_v18  ;;  %v7398_v60 = vadd.f32 %v15793_v22, %v1278_v33 }
 0x571   : > { %v12037_v19 = vld [vmem:[%s13879_s24 + $0x1bf0] sm:$0xf0]  ;;  %7758 = vmatmul.bf16.vlgmr.msra.gmra.mxu2 %v14195_v35 }
 0x572   : > { %v13535_v4 = vld [vmem:[%s13879_s24 + $0x1dd4] sm:$0xf]  ;;  %v12040_v14 = vor.u32 %v13471_v25, %v12037_v19  ;;  %7778 = vmatpush.bf16.msrb.mxu0 %v11784_v57  ;;  %v15867_v18 = vpop.f32.mrf.mxu1 }
 0x573   : > { %v12293_v7 = vld [vmem:[%s13879_s24 + $0x1df0] sm:$0xf0]  ;;  %7772 = vmatmul.bf16.vlgmr.msra.gmra.mxu3 %v14201_v40 }
 0x574   : > { %v13599_v6 = vld [vmem:[%s13879_s24 + $0x1fd4] sm:$0xf]  ;;  %v12296_v15 = vor.u32 %v13535_v4, %v12293_v7  ;;  %7792 = vmatpush.bf16.msrb.mxu1 %v12040_v14 }
 0x575   : > { %v12549_v8 = vld [vmem:[%s13879_s24 + $0x1ff0] sm:$0xf0] }
 0x576   : > { %v13399_v13 = vld [vmem:[%s13879_s24 + $0x1994] sm:$0xf]  ;;  %v12552_v16 = vor.u32 %v13599_v6, %v12549_v8  ;;  %7806 = vmatpush.bf16.msrb.mxu2 %v12296_v15  ;;  %v7438_v15 = vadd.f32 %v15783_v24, %v7424_v23  ;;  %v7412_v24 = vadd.f32 %v15798_v42, %v7398_v60 }
 0x577   : > { %v11749_v0 = vld [vmem:[%s13879_s24 + $0x19b0] sm:$0xf0] }
 0x578   : > { %v13463_v54 = vld [vmem:[%s13879_s24 + $0x1b94] sm:$0xf]  ;;  %v11752_v26 = vor.u32 %v13399_v13, %v11749_v0  ;;  %7820 = vmatpush.bf16.msrb.mxu3 %v12552_v16  ;;  %v15856_v13 = vpop.f32.mrf.mxu3 }
 0x579   : > { %v12005_v48 = vld [vmem:[%s13879_s24 + $0x1bb0] sm:$0xf0] }
 0x57a   : > { %v13527_v9 = vld [vmem:[%s13879_s24 + $0x1d94] sm:$0xf]  ;;  %v12008_v45 = vor.u32 %v13463_v54, %v12005_v48  ;;  %7779 = vmatpush.bf16.msrb.mxu0 %v11752_v26 }
 0x57b   : > { %v12261_v21 = vld [vmem:[%s13879_s24 + $0x1db0] sm:$0xf0] }
 0x57c   : > { %v13591_v56 = vld [vmem:[%s13879_s24 + $0x1f94] sm:$0xf]  ;;  %v12264_v28 = vor.u32 %v13527_v9, %v12261_v21  ;;  %7793 = vmatpush.bf16.msrb.mxu1 %v12008_v45 }
 0x57d   : > { %v12517_v29 = vld [vmem:[%s13879_s24 + $0x1fb0] sm:$0xf0] }
 0x57e   : > { %v13391_v63 = vld [vmem:[%s13879_s24 + $0x1954] sm:$0xf]  ;;  %v12520_v62 = vor.u32 %v13591_v56, %v12517_v29  ;;  %7807 = vmatpush.bf16.msrb.mxu2 %v12264_v28  ;;  %v7453_v56 = vpop.f32.mrf.mxu0  ;;  %v7452_v28 = vadd.f32 %v7451_v34, %v7438_v15 }
 0x57f   : > { %v11717_v49 = vld [vmem:[%s13879_s24 + $0x1970] sm:$0xf0] }
 0x580   : > { %v13455_v12 = vld [vmem:[%s13879_s24 + $0x1b54] sm:$0xf]  ;;  %v11720_v61 = vor.u32 %v13391_v63, %v11717_v49  ;;  %7821 = vmatpush.bf16.msrb.mxu3 %v12520_v62 }
 0x581   : > { %v11973_v3 = vld [vmem:[%s13879_s24 + $0x1b70] sm:$0xf0] }
 0x582   : > { %v13519_v51 = vld [vmem:[%s13879_s24 + $0x1d54] sm:$0xf]  ;;  %v11976_v25 = vor.u32 %v13455_v12, %v11973_v3  ;;  %7780 = vmatpush.bf16.msrb.mxu0 %v11720_v61 }
 0x583   : > { %v12229_v27 = vld [vmem:[%s13879_s24 + $0x1d70] sm:$0xf0] }
 0x584   : > { %v13583_v53 = vld [vmem:[%s13879_s24 + $0x1f54] sm:$0xf]  ;;  %v12232_v59 = vor.u32 %v13519_v51, %v12229_v27  ;;  %7794 = vmatpush.bf16.msrb.mxu1 %v11976_v25  ;;  %v7466_v25 = vadd.f32 %v15830_v2, %v7452_v28 }
 0x585   : > { %v12485_v55 = vld [vmem:[%s13879_s24 + $0x1f70] sm:$0xf0] }
 0x586   : > { %v13383_v19 = vld [vmem:[%s13879_s24 + $0x1914] sm:$0xf]  ;;  %v12488_v50 = vor.u32 %v13583_v53, %v12485_v55  ;;  %7808 = vmatpush.bf16.msrb.mxu2 %v12232_v59  ;;  %v7426_v55 = vadd.f32 %v15817_v37, %v7412_v24  ;;  %v7481_v37 = vpop.f32.mrf.mxu2 }
 0x587   : > { %v11685_v4 = vld [vmem:[%s13879_s24 + $0x1930] sm:$0xf0] }
 0x588   : > { %v13447_v7 = vld [vmem:[%s13879_s24 + $0x1b14] sm:$0xf]  ;;  %v11688_v14 = vor.u32 %v13383_v19, %v11685_v4  ;;  %7822 = vmatpush.bf16.msrb.mxu3 %v12488_v50  ;;  %v7440_v2 = vadd.f32 %v15822_v30, %v7426_v55  ;;  %v9483_v55 = vld [vmem:[%s13879_s24 + $0x7d8] sm:$0xf] }
 0x589   : > { %v11941_v20 = vld [vmem:[%s13879_s24 + $0x1b30] sm:$0xf0] }
 0x58a   : > { %v13511_v6 = vld [vmem:[%s13879_s24 + $0x1d14] sm:$0xf]  ;;  %v11944_v5 = vor.u32 %v13447_v7, %v11941_v20  ;;  %7781 = vmatpush.bf16.msrb.mxu0 %v11688_v14  ;;  %v7454_v28 = vadd.f32 %v7453_v56, %v7440_v2  ;;  %v12836_v56 = vld [vmem:[%s13879_s24 + $0x7f4] sm:$0xf0] }
 0x58b   : > { %v12197_v8 = vld [vmem:[%s13879_s24 + $0x1d30] sm:$0xf0]  ;;  %v12764_v2 = vld [vmem:[%s13879_s24 + $0x5b4] sm:$0xf0] }
 0x58c   : > { %v13575_v52 = vld [vmem:[%s13879_s24 + $0x1f14] sm:$0xf]  ;;  %v12200_v0 = vor.u32 %v13511_v6, %v12197_v8  ;;  %7795 = vmatpush.bf16.msrb.mxu1 %v11944_v5  ;;  %v7521_v5 = vpop.f32.mrf.mxu1 }
 0x58d   : > { %v12453_v57 = vld [vmem:[%s13879_s24 + $0x1f30] sm:$0xf0] }
 0x58e   : > { %v13375_v33 = vld [vmem:[%s13879_s24 + $0x18d4] sm:$0xf]  ;;  %v12456_v16 = vor.u32 %v13575_v52, %v12453_v57  ;;  %7809 = vmatpush.bf16.msrb.mxu2 %v12200_v0  ;;  %v15886_v52 = vpop.f32.mrf.mxu3  ;;  %v7507_v57 = vpop.f32.mrf.mxu0 }
 0x58f   : > { %v11653_v22 = vld [vmem:[%s13879_s24 + $0x18f0] sm:$0xf0] }
 0x590   : > { %v13439_v54 = vld [vmem:[%s13879_s24 + $0x1ad4] sm:$0xf]  ;;  %v11656_v45 = vor.u32 %v13375_v33, %v11653_v22  ;;  %7823 = vmatpush.bf16.msrb.mxu3 %v12456_v16 }
 0x591   : > { %v11909_v48 = vld [vmem:[%s13879_s24 + $0x1af0] sm:$0xf0] }
 0x592   : > { %v13503_v9 = vld [vmem:[%s13879_s24 + $0x1cd4] sm:$0xf]  ;;  %v11912_v63 = vor.u32 %v13439_v54, %v11909_v48  ;;  %7782 = vmatpush.bf16.msrb.mxu0 %v11656_v45  ;;  %v7480_v54 = vadd.f32 %v15853_v11, %v7466_v25  ;;  %v8715_v11 = vld [vmem:[%s13879_s24 + $0x1d8] sm:$0xf]  ;;  %v7468_v25 = vadd.f32 %v15867_v18, %v7454_v28 }
 0x593   : > { %v12165_v21 = vld [vmem:[%s13879_s24 + $0x1cf0] sm:$0xf0]  ;;  %v9451_v18 = vld [vmem:[%s13879_s24 + $0x798] sm:$0xf] }
 0x594   : > { %v13567_v29 = vld [vmem:[%s13879_s24 + $0x1ed4] sm:$0xf]  ;;  %v12168_v49 = vor.u32 %v13503_v9, %v12165_v21  ;;  %7796 = vmatpush.bf16.msrb.mxu1 %v11912_v63  ;;  %v12644_v63 = vld [vmem:[%s13879_s24 + $0x1f4] sm:$0xf0] }
 0x595   : > { %v12421_v26 = vld [vmem:[%s13879_s24 + $0x1ef0] sm:$0xf0]  ;;  %v12820_v28 = vld [vmem:[%s13879_s24 + $0x774] sm:$0xf0] }
 0x596   : > { %v13367_v12 = vld [vmem:[%s13879_s24 + $0x1894] sm:$0xf]  ;;  %v12424_v3 = vor.u32 %v13567_v29, %v12421_v26  ;;  %7810 = vmatpush.bf16.msrb.mxu2 %v12168_v49  ;;  %v8971_v49 = vld [vmem:[%s13879_s24 + $0x3d8] sm:$0xf] }
 0x597   : > { %v11621_v62 = vld [vmem:[%s13879_s24 + $0x18b0] sm:$0xf0] }
 0x598   : > { %v13431_v42 = vld [vmem:[%s13879_s24 + $0x1a94] sm:$0xf]  ;;  %v11624_v23 = vor.u32 %v13367_v12, %v11621_v62  ;;  %7824 = vmatpush.bf16.msrb.mxu3 %v12424_v3  ;;  %v12708_v62 = vld [vmem:[%s13879_s24 + $0x3f4] sm:$0xf0] }
 0x599   : > { %v11877_v51 = vld [vmem:[%s13879_s24 + $0x1ab0] sm:$0xf0]  ;;  %v12772_v3 = vld [vmem:[%s13879_s24 + $0x5f4] sm:$0xf0] }
 0x59a   : > { %v13495_v27 = vld [vmem:[%s13879_s24 + $0x1c94] sm:$0xf]  ;;  %v11880_v59 = vor.u32 %v13431_v42, %v11877_v51  ;;  %7783 = vmatpush.bf16.msrb.mxu0 %v11624_v23  ;;  %v9227_v42 = vld [vmem:[%s13879_s24 + $0x5d8] sm:$0xf]  ;;  %v7494_v51 = vadd.f32 %v15856_v13, %v7480_v54  ;;  %v8716_v23 = vor.u32 %v12644_v63, %v8715_v11  ;;  %v7549_v13 = vpop.f32.mrf.mxu3 }
 0x59b   : > { %v12133_v53 = vld [vmem:[%s13879_s24 + $0x1cb0] sm:$0xf0]  ;;  %v8619_v63 = vld [vmem:[%s13879_s24 + $0x118] sm:$0xf] }
 0x59c   : > { %v13559_v61 = vld [vmem:[%s13879_s24 + $0x1e94] sm:$0xf]  ;;  %v12136_v19 = vor.u32 %v13495_v27, %v12133_v53  ;;  %7797 = vmatpush.bf16.msrb.mxu1 %v11880_v59  ;;  %v7508_v59 = vadd.f32 %v7507_v57, %v7494_v51  ;;  %v12828_v57 = vld [vmem:[%s13879_s24 + $0x7b4] sm:$0xf0] }
 0x59d   : > { %v12389_v34 = vld [vmem:[%s13879_s24 + $0x1eb0] sm:$0xf0] }
 0x59e   : > { %v13359_v4 = vld [vmem:[%s13879_s24 + $0x1854] sm:$0xf]  ;;  %v12392_v20 = vor.u32 %v13559_v61, %v12389_v34  ;;  %7811 = vmatpush.bf16.msrb.mxu2 %v12136_v19  ;;  %v7535_v61 = vpop.f32.mrf.mxu2  ;;  %v8972_v19 = vor.u32 %v12708_v62, %v8971_v49  ;;  %v12620_v62 = vld [vmem:[%s13879_s24 + $0x134] sm:$0xf0] }
 0x59f   : > { %v11589_v7 = vld [vmem:[%s13879_s24 + $0x1870] sm:$0xf0] }
 0x5a0   : > { %v13423_v50 = vld [vmem:[%s13879_s24 + $0x1a54] sm:$0xf]  ;;  %v11592_v0 = vor.u32 %v13359_v4, %v11589_v7  ;;  %7825 = vmatpush.bf16.msrb.mxu3 %v12392_v20  ;;  %v9228_v4 = vor.u32 %v12772_v3, %v9227_v42  ;;  %v8683_v7 = vld [vmem:[%s13879_s24 + $0x198] sm:$0xf] }
 0x5a1   : > { %v11845_v6 = vld [vmem:[%s13879_s24 + $0x1a70] sm:$0xf0]  ;;  %v8939_v20 = vld [vmem:[%s13879_s24 + $0x398] sm:$0xf] }
 0x5a2   : > { %v13487_v8 = vld [vmem:[%s13879_s24 + $0x1c54] sm:$0xf]  ;;  %v11848_v30 = vor.u32 %v13423_v50, %v11845_v6  ;;  %7784 = vmatpush.bf16.msrb.mxu0 %v11592_v0  ;;  %v12636_v50 = vld [vmem:[%s13879_s24 + $0x1b4] sm:$0xf0]  ;;  %v9484_v6 = vor.u32 %v12836_v56, %v9483_v55  ;;  %v7523_v0 = vpop.f32.mrf.mxu1 }
 0x5a3   : > { %v12101_v60 = vld [vmem:[%s13879_s24 + $0x1c70] sm:$0xf0]  ;;  %v8875_v42 = vld [vmem:[%s13879_s24 + $0x318] sm:$0xf] }
 0x5a4   : > { %v13551_v14 = vld [vmem:[%s13879_s24 + $0x1e54] sm:$0xf]  ;;  %v12104_v16 = vor.u32 %v13487_v8, %v12101_v60  ;;  %7798 = vmatpush.bf16.msrb.mxu1 %v11848_v30  ;;  %v12700_v8 = vld [vmem:[%s13879_s24 + $0x3b4] sm:$0xf0] }
 0x5a5   : > { %v12357_v15 = vld [vmem:[%s13879_s24 + $0x1e70] sm:$0xf0]  ;;  %v9195_v60 = vld [vmem:[%s13879_s24 + $0x598] sm:$0xf]  ;;  %v8940_v54 = vor.u32 %v12700_v8, %v8939_v20 }
 0x5a6   : > { %v13351_v33 = vld [vmem:[%s13879_s24 + $0x1814] sm:$0xf]  ;;  %v12360_v24 = vor.u32 %v13551_v14, %v12357_v15  ;;  %7812 = vmatpush.bf16.msrb.mxu2 %v12104_v16  ;;  %v7482_v14 = vadd.f32 %v7481_v37, %v7468_v25  ;;  %v7509_v15 = vpop.f32.mrf.mxu0  ;;  %v9196_v37 = vor.u32 %v12764_v2, %v9195_v60  ;;  %v8651_v30 = vld [vmem:[%s13879_s24 + $0x158] sm:$0xf]  ;;  %v7537_v51 = vpop.f32.mrf.mxu2 }
 0x5a7   : > { %v11557_v22 = vld [vmem:[%s13879_s24 + $0x1830] sm:$0xf0]  ;;  %v12628_v16 = vld [vmem:[%s13879_s24 + $0x174] sm:$0xf0] }
 0x5a8   : > { %v13415_v48 = vld [vmem:[%s13879_s24 + $0x1a14] sm:$0xf]  ;;  %v11560_v12 = vor.u32 %v13351_v33, %v11557_v22  ;;  %7826 = vmatpush.bf16.msrb.mxu3 %v12360_v24  ;;  %v8684_v33 = vor.u32 %v12636_v50, %v8683_v7  ;;  %v7522_v22 = vadd.f32 %v7521_v5, %v7508_v59  ;;  %v9163_v24 = vld [vmem:[%s13879_s24 + $0x558] sm:$0xf]  ;;  %v7496_v5 = vadd.f32 %v15886_v52, %v7482_v14 }
 0x5a9   : > { %v11813_v9 = vld [vmem:[%s13879_s24 + $0x1a30] sm:$0xf0]  ;;  %v8652_v11 = vor.u32 %v12628_v16, %v8651_v30  ;;  %v12684_v3 = vld [vmem:[%s13879_s24 + $0x334] sm:$0xf0]  ;;  %v8620_v59 = vor.u32 %v12620_v62, %v8619_v63 }
 0x5aa   : > { %v13479_v21 = vld [vmem:[%s13879_s24 + $0x1c14] sm:$0xf]  ;;  %v11816_v27 = vor.u32 %v13415_v48, %v11813_v9  ;;  %7785 = vmatpush.bf16.msrb.mxu0 %v11560_v12  ;;  %v8907_v48 = vld [vmem:[%s13879_s24 + $0x358] sm:$0xf]  ;;  %v9452_v9 = vor.u32 %v12828_v57, %v9451_v18  ;;  %v7510_v49 = vadd.f32 %v7509_v15, %v7496_v5 }
 0x5ab   : > { %v12069_v29 = vld [vmem:[%s13879_s24 + $0x1c30] sm:$0xf0]  ;;  %v12748_v55 = vld [vmem:[%s13879_s24 + $0x534] sm:$0xf0] }
 0x5ac   : > { %v13543_v26 = vld [vmem:[%s13879_s24 + $0x1e14] sm:$0xf]  ;;  %v12072_v53 = vor.u32 %v13479_v21, %v12069_v29  ;;  %7799 = vmatpush.bf16.msrb.mxu1 %v11816_v27  ;;  %v12692_v21 = vld [vmem:[%s13879_s24 + $0x374] sm:$0xf0]  ;;  %v7524_v7 = vadd.f32 %v7523_v0, %v7510_v49 }
 0x5ad   : > { %v12325_v45 = vld [vmem:[%s13879_s24 + $0x1e30] sm:$0xf0]  ;;  %7786 = vmatmul.bf16.vlgmr.msrb.gmra.mxu0 %v14290_v32  ;;  %v12756_v29 = vld [vmem:[%s13879_s24 + $0x574] sm:$0xf0]  ;;  %v8908_v52 = vor.u32 %v12692_v21, %v8907_v48 }
 0x5ae   : > { %v12328_v34 = vor.u32 %v13543_v26, %v12325_v45  ;;  %7813 = vmatpush.bf16.msrb.mxu2 %v12072_v53  ;;  %7834 = vmatpush.bf16.msra.mxu0 %v8716_v23  ;;  %v7536_v26 = vadd.f32 %v7535_v61, %v7522_v22  ;;  %v9419_v45 = vld [vmem:[%s13879_s24 + $0x758] sm:$0xf]  ;;  %v9164_v12 = vor.u32 %v12756_v29, %v9163_v24  ;;  %v7551_v61 = vpop.f32.mrf.mxu3  ;;  %v7591_v24 = vpop.f32.mrf.mxu2 }
 0x5af   : > { %7800 = vmatmul.bf16.vlgmr.msrb.gmra.mxu1 %v14297_v41  ;;  %v9420_v27 = vor.u32 %v12820_v28, %v9419_v45  ;;  %v9131_v53 = vld [vmem:[%s13879_s24 + $0x518] sm:$0xf]  ;;  %v7538_v18 = vadd.f32 %v7537_v51, %v7524_v7 }
 0x5b0   : > { %7827 = vmatpush.bf16.msrb.mxu3 %v12328_v34  ;;  %7848 = vmatpush.bf16.msra.mxu1 %v8972_v19  ;;  %v7550_v56 = vadd.f32 %v7549_v13, %v7536_v26  ;;  %v7563_v34 = vpop.f32.mrf.mxu0  ;;  %v9387_v23 = vld [vmem:[%s13879_s24 + $0x718] sm:$0xf]  ;;  %v8876_v19 = vor.u32 %v12684_v3, %v8875_v42  ;;  %v9132_v13 = vor.u32 %v12748_v55, %v9131_v53 }
 0x5b1   : > { %7814 = vmatmul.bf16.vlgmr.msrb.gmra.mxu2 %v14295_v38  ;;  %v12812_v25 = vld [vmem:[%s13879_s24 + $0x734] sm:$0xf0]  ;;  %v7552_v26 = vadd.f32 %v7551_v61, %v7538_v18 }
 0x5b2   : > { %7862 = vmatpush.bf16.msra.mxu2 %v9228_v4  ;;  %7835 = vmatpush.bf16.msra.mxu0 %v8684_v33  ;;  %v7577_v4 = vpop.f32.mrf.mxu1  ;;  %v7564_v50 = vadd.f32 %v7563_v34, %v7550_v56  ;;  %v8587_v20 = vld [vmem:[%s13879_s24 + $0xd8] sm:$0xf]  ;;  %v9388_v60 = vor.u32 %v12812_v25, %v9387_v23 }
 0x5b3   : > { %7828 = vmatmul.bf16.vlgmr.msrb.gmra.mxu3 %v14301_v46  ;;  %v8843_v8 = vld [vmem:[%s13879_s24 + $0x2d8] sm:$0xf] }
 0x5b4   : > { %7876 = vmatpush.bf16.msra.mxu3 %v9484_v6  ;;  %7849 = vmatpush.bf16.msra.mxu1 %v8940_v54  ;;  %v12612_v6 = vld [vmem:[%s13879_s24 + $0xf4] sm:$0xf0]  ;;  %v7578_v54 = vadd.f32 %v7577_v4, %v7564_v50 }
 0x5b5   : > { %v12676_v2 = vld [vmem:[%s13879_s24 + $0x2f4] sm:$0xf0]  ;;  %v8588_v33 = vor.u32 %v12612_v6, %v8587_v20 }
 0x5b6   : > { %7863 = vmatpush.bf16.msra.mxu2 %v9196_v37  ;;  %7836 = vmatpush.bf16.msra.mxu0 %v8652_v11  ;;  %v9099_v14 = vld [vmem:[%s13879_s24 + $0x4d8] sm:$0xf]  ;;  %v8844_v37 = vor.u32 %v12676_v2, %v8843_v8  ;;  %v7592_v45 = vadd.f32 %v7591_v24, %v7578_v54  ;;  %v7605_v11 = vpop.f32.mrf.mxu3 }
 0x5b7   : > { %v12740_v15 = vld [vmem:[%s13879_s24 + $0x4f4] sm:$0xf0] }
 0x5b8   : > { %7877 = vmatpush.bf16.msra.mxu3 %v9452_v9  ;;  %7850 = vmatpush.bf16.msra.mxu1 %v8908_v52  ;;  %v9355_v57 = vld [vmem:[%s13879_s24 + $0x6d8] sm:$0xf]  ;;  %v9100_v30 = vor.u32 %v12740_v15, %v9099_v14  ;;  %v7565_v28 = vpop.f32.mrf.mxu0  ;;  %v7606_v42 = vadd.f32 %v7605_v11, %v7592_v45  ;;  %v7593_v14 = vpop.f32.mrf.mxu2 }
 0x5b9   : > { %v12804_v0 = vld [vmem:[%s13879_s24 + $0x6f4] sm:$0xf0]  ;;  %v7566_v62 = vadd.f32 %v7565_v28, %v7552_v26 }
 0x5ba   : > { %7864 = vmatpush.bf16.msra.mxu2 %v9164_v12  ;;  %7837 = vmatpush.bf16.msra.mxu0 %v8620_v59  ;;  %v8555_v22 = vld [vmem:[%s13879_s24 + $0x98] sm:$0xf]  ;;  %v9356_v21 = vor.u32 %v12804_v0, %v9355_v57  ;;  %v7579_v56 = vpop.f32.mrf.mxu1  ;;  %8286 = vst [vmem:[%s14668_s9 + $0x20] sm:$0xff] %v7606_v42 }
 0x5bb   : > { %v12604_v16 = vld [vmem:[%s13879_s24 + $0xb4] sm:$0xf0]  ;;  %v7580_v50 = vadd.f32 %v7579_v56, %v7566_v62 }
 0x5bc   : > { %7878 = vmatpush.bf16.msra.mxu3 %v9420_v27  ;;  %7851 = vmatpush.bf16.msra.mxu1 %v8876_v19  ;;  %v8811_v48 = vld [vmem:[%s13879_s24 + $0x298] sm:$0xf]  ;;  %v8556_v52 = vor.u32 %v12604_v16, %v8555_v22 }
 0x5bd   : > { %v12668_v9 = vld [vmem:[%s13879_s24 + $0x2b4] sm:$0xf0]  ;;  %v7594_v0 = vadd.f32 %v7593_v14, %v7580_v50 }
 0x5be   : > { %7865 = vmatpush.bf16.msra.mxu2 %v9132_v13  ;;  %v9067_v29 = vld [vmem:[%s13879_s24 + $0x498] sm:$0xf]  ;;  %7838 = vmatpush.bf16.msra.mxu0 %v8588_v33  ;;  %v8812_v12 = vor.u32 %v12668_v9, %v8811_v48  ;;  %v7607_v33 = vpop.f32.mrf.mxu3 }
 0x5bf   : > { %v12732_v5 = vld [vmem:[%s13879_s24 + $0x4b4] sm:$0xf0] }
 0x5c0   : > { %7879 = vmatpush.bf16.msra.mxu3 %v9388_v60  ;;  %v9323_v63 = vld [vmem:[%s13879_s24 + $0x698] sm:$0xf]  ;;  %7852 = vmatpush.bf16.msra.mxu1 %v8844_v37  ;;  %v9068_v3 = vor.u32 %v12732_v5, %v9067_v29 }
 0x5c1   : > { %v12796_v49 = vld [vmem:[%s13879_s24 + $0x6b4] sm:$0xf0] }
 0x5c2   : > { %7866 = vmatpush.bf16.msra.mxu2 %v9100_v30  ;;  %v8523_v51 = vld [vmem:[%s13879_s24 + $0x58] sm:$0xf]  ;;  %v9324_v55 = vor.u32 %v12796_v49, %v9323_v63  ;;  %7839 = vmatpush.bf16.msra.mxu0 %v8556_v52 }
 0x5c3   : > { %v12596_v27 = vld [vmem:[%s13879_s24 + $0x74] sm:$0xf0] }
 0x5c4   : > { %v8779_v53 = vld [vmem:[%s13879_s24 + $0x258] sm:$0xf]  ;;  %7880 = vmatpush.bf16.msra.mxu3 %v9356_v21  ;;  %v8524_v19 = vor.u32 %v12596_v27, %v8523_v51  ;;  %7853 = vmatpush.bf16.msra.mxu1 %v8812_v12  ;;  %v7608_v21 = vadd.f32 %v7607_v33, %v7594_v0 }
 0x5c5   : > { %v12660_v61 = vld [vmem:[%s13879_s24 + $0x274] sm:$0xf0] }
 0x5c6   : > { %v9035_v34 = vld [vmem:[%s13879_s24 + $0x458] sm:$0xf]  ;;  %7867 = vmatpush.bf16.msra.mxu2 %v9068_v3  ;;  %v8780_v13 = vor.u32 %v12660_v61, %v8779_v53  ;;  %7840 = vmatpush.bf16.msra.mxu0 %v8524_v19  ;;  %8294 = vst [vmem:[%s14668_s9 + $0x60] sm:$0xff] %v7608_v21 }
 0x5c7   : > { %v12724_v23 = vld [vmem:[%s13879_s24 + $0x474] sm:$0xf0] }
 0x5c8   : > { %v9291_v25 = vld [vmem:[%s13879_s24 + $0x658] sm:$0xf]  ;;  %v9036_v20 = vor.u32 %v12724_v23, %v9035_v34  ;;  %7881 = vmatpush.bf16.msra.mxu3 %v9324_v55  ;;  %7854 = vmatpush.bf16.msra.mxu1 %v8780_v13 }
 0x5c9   : > { %v12788_v59 = vld [vmem:[%s13879_s24 + $0x674] sm:$0xf0] }
 0x5ca   : > { %v8491_v4 = vld [vmem:[%s13879_s24 + $0x18] sm:$0xf]  ;;  %v9292_v2 = vor.u32 %v12788_v59, %v9291_v25  ;;  %7868 = vmatpush.bf16.msra.mxu2 %v9036_v20 }
 0x5cb   : > { %v12588_v7 = vld [vmem:[%s13879_s24 + $0x34] sm:$0xf0] }
 0x5cc   : > { %v8747_v6 = vld [vmem:[%s13879_s24 + $0x218] sm:$0xf]  ;;  %v8492_v30 = vor.u32 %v12588_v7, %v8491_v4  ;;  %7882 = vmatpush.bf16.msra.mxu3 %v9292_v2 }
 0x5cd   : > { %v12652_v8 = vld [vmem:[%s13879_s24 + $0x234] sm:$0xf0] }
 0x5ce   : > { %v9003_v60 = vld [vmem:[%s13879_s24 + $0x418] sm:$0xf]  ;;  %v8748_v24 = vor.u32 %v12652_v8, %v8747_v6  ;;  %7841 = vmatpush.bf16.msra.mxu0 %v8492_v30 }
 0x5cf   : > { %v12716_v15 = vld [vmem:[%s13879_s24 + $0x434] sm:$0xf0] }
 0x5d0   : > { %v9259_v18 = vld [vmem:[%s13879_s24 + $0x618] sm:$0xf]  ;;  %v9004_v29 = vor.u32 %v12716_v15, %v9003_v60  ;;  %7855 = vmatpush.bf16.msra.mxu1 %v8748_v24 }
 0x5d1   : > { %v12780_v57 = vld [vmem:[%s13879_s24 + $0x634] sm:$0xf0]  ;;  %7842 = vmatmul.bf16.vlgmr.msra.gmra.mxu0 %v13982_v58 }
 0x5d2   : > { %v9739_v22 = vld [vmem:[%s13879_s24 + $0x9d8] sm:$0xf]  ;;  %v9260_v45 = vor.u32 %v12780_v57, %v9259_v18  ;;  %7869 = vmatpush.bf16.msra.mxu2 %v9004_v29 }
 0x5d3   : > { %v12900_v54 = vld [vmem:[%s13879_s24 + $0x9f4] sm:$0xf0]  ;;  %7856 = vmatmul.bf16.vlgmr.msra.gmra.mxu1 %v14006_v10 }
 0x5d4   : > { %v9995_v37 = vld [vmem:[%s13879_s24 + $0xbd8] sm:$0xf]  ;;  %v9740_v28 = vor.u32 %v12900_v54, %v9739_v22  ;;  %7883 = vmatpush.bf16.msra.mxu3 %v9260_v45 }
 0x5d5   : > { %v12964_v16 = vld [vmem:[%s13879_s24 + $0xbf4] sm:$0xf0]  ;;  %7870 = vmatmul.bf16.vlgmr.msra.gmra.mxu2 %v13990_v1 }
 0x5d6   : > { %v10251_v48 = vld [vmem:[%s13879_s24 + $0xdd8] sm:$0xf]  ;;  %v9996_v63 = vor.u32 %v12964_v16, %v9995_v37  ;;  %7890 = vmatpush.bf16.msrb.mxu0 %v9740_v28 }
 0x5d7   : > { %v13028_v9 = vld [vmem:[%s13879_s24 + $0xdf4] sm:$0xf0]  ;;  %7884 = vmatmul.bf16.vlgmr.msra.gmra.mxu3 %v14014_v17 }
 0x5d8   : > { %v10507_v5 = vld [vmem:[%s13879_s24 + $0xfd8] sm:$0xf]  ;;  %v10252_v49 = vor.u32 %v13028_v9, %v10251_v48  ;;  %7904 = vmatpush.bf16.msrb.mxu1 %v9996_v63 }
 0x5d9   : > { %v13092_v26 = vld [vmem:[%s13879_s24 + $0xff4] sm:$0xf0] }
 0x5da   : > { %v9707_v11 = vld [vmem:[%s13879_s24 + $0x998] sm:$0xf]  ;;  %v10508_v62 = vor.u32 %v13092_v26, %v10507_v5  ;;  %7918 = vmatpush.bf16.msrb.mxu2 %v10252_v49 }
 0x5db   : > { %v12892_v52 = vld [vmem:[%s13879_s24 + $0x9b4] sm:$0xf0] }
 0x5dc   : > { %v9963_v12 = vld [vmem:[%s13879_s24 + $0xb98] sm:$0xf]  ;;  %v9708_v55 = vor.u32 %v12892_v52, %v9707_v11  ;;  %7932 = vmatpush.bf16.msrb.mxu3 %v10508_v62 }
 0x5dd   : > { %v12956_v42 = vld [vmem:[%s13879_s24 + $0xbb4] sm:$0xf0] }
 0x5de   : > { %v10219_v3 = vld [vmem:[%s13879_s24 + $0xd98] sm:$0xf]  ;;  %v9964_v56 = vor.u32 %v12956_v42, %v9963_v12  ;;  %7891 = vmatpush.bf16.msrb.mxu0 %v9708_v55 }
 0x5df   : > { %v13020_v51 = vld [vmem:[%s13879_s24 + $0xdb4] sm:$0xf0] }
 0x5e0   : > { %v10475_v27 = vld [vmem:[%s13879_s24 + $0xf98] sm:$0xf]  ;;  %v10220_v61 = vor.u32 %v13020_v51, %v10219_v3  ;;  %7905 = vmatpush.bf16.msrb.mxu1 %v9964_v56 }
 0x5e1   : > { %v13084_v53 = vld [vmem:[%s13879_s24 + $0xfb4] sm:$0xf0] }
 0x5e2   : > { %v9675_v34 = vld [vmem:[%s13879_s24 + $0x958] sm:$0xf]  ;;  %v10476_v59 = vor.u32 %v13084_v53, %v10475_v27  ;;  %7919 = vmatpush.bf16.msrb.mxu2 %v10220_v61 }
 0x5e3   : > { %v12884_v23 = vld [vmem:[%s13879_s24 + $0x974] sm:$0xf0] }
 0x5e4   : > { %v9931_v25 = vld [vmem:[%s13879_s24 + $0xb58] sm:$0xf]  ;;  %v9676_v20 = vor.u32 %v12884_v23, %v9675_v34  ;;  %7933 = vmatpush.bf16.msrb.mxu3 %v10476_v59 }
 0x5e5   : > { %v12948_v19 = vld [vmem:[%s13879_s24 + $0xb74] sm:$0xf0] }
 0x5e6   : > { %v10187_v4 = vld [vmem:[%s13879_s24 + $0xd58] sm:$0xf]  ;;  %v9932_v6 = vor.u32 %v12948_v19, %v9931_v25  ;;  %7892 = vmatpush.bf16.msrb.mxu0 %v9676_v20 }
 0x5e7   : > { %v13012_v7 = vld [vmem:[%s13879_s24 + $0xd74] sm:$0xf0] }
 0x5e8   : > { %v10443_v50 = vld [vmem:[%s13879_s24 + $0xf58] sm:$0xf]  ;;  %v10188_v8 = vor.u32 %v13012_v7, %v10187_v4  ;;  %7906 = vmatpush.bf16.msrb.mxu1 %v9932_v6 }
 0x5e9   : > { %v13076_v13 = vld [vmem:[%s13879_s24 + $0xf74] sm:$0xf0] }
 0x5ea   : > { %v9643_v60 = vld [vmem:[%s13879_s24 + $0x918] sm:$0xf]  ;;  %v10444_v15 = vor.u32 %v13076_v13, %v10443_v50  ;;  %7920 = vmatpush.bf16.msrb.mxu2 %v10188_v8 }
 0x5eb   : > { %v12876_v2 = vld [vmem:[%s13879_s24 + $0x934] sm:$0xf0] }
 0x5ec   : > { %v9899_v14 = vld [vmem:[%s13879_s24 + $0xb18] sm:$0xf]  ;;  %v9644_v54 = vor.u32 %v12876_v2, %v9643_v60  ;;  %7934 = vmatpush.bf16.msrb.mxu3 %v10444_v15 }
 0x5ed   : > { %v12940_v18 = vld [vmem:[%s13879_s24 + $0xb34] sm:$0xf0] }
 0x5ee   : > { %v10155_v57 = vld [vmem:[%s13879_s24 + $0xd18] sm:$0xf]  ;;  %v9900_v37 = vor.u32 %v12940_v18, %v9899_v14  ;;  %7893 = vmatpush.bf16.msrb.mxu0 %v9644_v54 }
 0x5ef   : > { %v13004_v0 = vld [vmem:[%s13879_s24 + $0xd34] sm:$0xf0] }
 0x5f0   : > { %v10411_v33 = vld [vmem:[%s13879_s24 + $0xf18] sm:$0xf]  ;;  %v10156_v30 = vor.u32 %v13004_v0, %v10155_v57  ;;  %7907 = vmatpush.bf16.msrb.mxu1 %v9900_v37 }
 0x5f1   : > { %v13068_v22 = vld [vmem:[%s13879_s24 + $0xf34] sm:$0xf0] }
 0x5f2   : > { %v9611_v16 = vld [vmem:[%s13879_s24 + $0x8d8] sm:$0xf]  ;;  %v10412_v21 = vor.u32 %v13068_v22, %v10411_v33  ;;  %7921 = vmatpush.bf16.msrb.mxu2 %v10156_v30 }
 0x5f3   : > { %v12868_v48 = vld [vmem:[%s13879_s24 + $0x8f4] sm:$0xf0] }
 0x5f4   : > { %v9867_v9 = vld [vmem:[%s13879_s24 + $0xad8] sm:$0xf]  ;;  %v9612_v28 = vor.u32 %v12868_v48, %v9611_v16  ;;  %7935 = vmatpush.bf16.msrb.mxu3 %v10412_v21 }
 0x5f5   : > { %v12932_v24 = vld [vmem:[%s13879_s24 + $0xaf4] sm:$0xf0] }
 0x5f6   : > { %v10123_v29 = vld [vmem:[%s13879_s24 + $0xcd8] sm:$0xf]  ;;  %v9868_v11 = vor.u32 %v12932_v24, %v9867_v9  ;;  %7894 = vmatpush.bf16.msrb.mxu0 %v9612_v28 }
 0x5f7   : > { %v12996_v5 = vld [vmem:[%s13879_s24 + $0xcf4] sm:$0xf0] }
 0x5f8   : > { %v10379_v26 = vld [vmem:[%s13879_s24 + $0xed8] sm:$0xf]  ;;  %v10124_v63 = vor.u32 %v12996_v5, %v10123_v29  ;;  %7908 = vmatpush.bf16.msrb.mxu1 %v9868_v11 }
 0x5f9   : > { %v13060_v45 = vld [vmem:[%s13879_s24 + $0xef4] sm:$0xf0] }
 0x5fa   : > { %v9579_v49 = vld [vmem:[%s13879_s24 + $0x898] sm:$0xf]  ;;  %v10380_v62 = vor.u32 %v13060_v45, %v10379_v26  ;;  %7922 = vmatpush.bf16.msrb.mxu2 %v10124_v63 }
 0x5fb   : > { %v12860_v52 = vld [vmem:[%s13879_s24 + $0x8b4] sm:$0xf0] }
 0x5fc   : > { %v9835_v12 = vld [vmem:[%s13879_s24 + $0xa98] sm:$0xf]  ;;  %v9580_v55 = vor.u32 %v12860_v52, %v9579_v49  ;;  %7936 = vmatpush.bf16.msrb.mxu3 %v10380_v62 }
 0x5fd   : > { %v12924_v42 = vld [vmem:[%s13879_s24 + $0xab4] sm:$0xf0] }
 0x5fe   : > { %v10091_v3 = vld [vmem:[%s13879_s24 + $0xc98] sm:$0xf]  ;;  %v9836_v56 = vor.u32 %v12924_v42, %v9835_v12  ;;  %7895 = vmatpush.bf16.msrb.mxu0 %v9580_v55 }
 0x5ff   : > { %v12988_v51 = vld [vmem:[%s13879_s24 + $0xcb4] sm:$0xf0] }
 0x600   : > { %v10347_v27 = vld [vmem:[%s13879_s24 + $0xe98] sm:$0xf]  ;;  %v10092_v61 = vor.u32 %v12988_v51, %v10091_v3  ;;  %7909 = vmatpush.bf16.msrb.mxu1 %v9836_v56 }
 0x601   : > { %v13052_v53 = vld [vmem:[%s13879_s24 + $0xeb4] sm:$0xf0] }
 0x602   : > { %v9547_v34 = vld [vmem:[%s13879_s24 + $0x858] sm:$0xf]  ;;  %v10348_v59 = vor.u32 %v13052_v53, %v10347_v27  ;;  %7923 = vmatpush.bf16.msrb.mxu2 %v10092_v61 }
 0x603   : > { %v12852_v23 = vld [vmem:[%s13879_s24 + $0x874] sm:$0xf0] }
 0x604   : > { %v9803_v25 = vld [vmem:[%s13879_s24 + $0xa58] sm:$0xf]  ;;  %v9548_v20 = vor.u32 %v12852_v23, %v9547_v34  ;;  %7937 = vmatpush.bf16.msrb.mxu3 %v10348_v59 }
 0x605   : > { %v12916_v19 = vld [vmem:[%s13879_s24 + $0xa74] sm:$0xf0] }
 0x606   : > { %v10059_v4 = vld [vmem:[%s13879_s24 + $0xc58] sm:$0xf]  ;;  %v9804_v60 = vor.u32 %v12916_v19, %v9803_v25  ;;  %7896 = vmatpush.bf16.msrb.mxu0 %v9548_v20 }
 0x607   : > { %v12980_v7 = vld [vmem:[%s13879_s24 + $0xc74] sm:$0xf0] }
 0x608   : > { %v10315_v50 = vld [vmem:[%s13879_s24 + $0xe58] sm:$0xf]  ;;  %v10060_v2 = vor.u32 %v12980_v7, %v10059_v4  ;;  %7910 = vmatpush.bf16.msrb.mxu1 %v9804_v60 }
 0x609   : > { %v13044_v13 = vld [vmem:[%s13879_s24 + $0xe74] sm:$0xf0] }
 0x60a   : > { %v9515_v6 = vld [vmem:[%s13879_s24 + $0x818] sm:$0xf]  ;;  %v10316_v57 = vor.u32 %v13044_v13, %v10315_v50  ;;  %7924 = vmatpush.bf16.msrb.mxu2 %v10060_v2 }
 0x60b   : > { %v12844_v8 = vld [vmem:[%s13879_s24 + $0x834] sm:$0xf0] }
 0x60c   : > { %v9771_v14 = vld [vmem:[%s13879_s24 + $0xa18] sm:$0xf]  ;;  %v9516_v16 = vor.u32 %v12844_v8, %v9515_v6  ;;  %7938 = vmatpush.bf16.msrb.mxu3 %v10316_v57 }
 0x60d   : > { %v12908_v15 = vld [vmem:[%s13879_s24 + $0xa34] sm:$0xf0] }
 0x60e   : > { %v10027_v18 = vld [vmem:[%s13879_s24 + $0xc18] sm:$0xf]  ;;  %v9772_v24 = vor.u32 %v12908_v15, %v9771_v14  ;;  %7897 = vmatpush.bf16.msrb.mxu0 %v9516_v16 }
 0x60f   : > { %v12972_v0 = vld [vmem:[%s13879_s24 + $0xc34] sm:$0xf0] }
 0x610   : > { %v10283_v33 = vld [vmem:[%s13879_s24 + $0xe18] sm:$0xf]  ;;  %v10028_v29 = vor.u32 %v12972_v0, %v10027_v18  ;;  %7911 = vmatpush.bf16.msrb.mxu1 %v9772_v24 }
 0x611   : > { %v13036_v22 = vld [vmem:[%s13879_s24 + $0xe34] sm:$0xf0]  ;;  %7898 = vmatmul.bf16.vlgmr.msrb.gmra.mxu0 %v14090_v39 }
 0x612   : > { %v10763_v54 = vld [vmem:[%s13879_s24 + $0x11d8] sm:$0xf]  ;;  %v10284_v45 = vor.u32 %v13036_v22, %v10283_v33  ;;  %7925 = vmatpush.bf16.msrb.mxu2 %v10028_v29 }
 0x613   : > { %v13156_v37 = vld [vmem:[%s13879_s24 + $0x11f4] sm:$0xf0]  ;;  %7912 = vmatmul.bf16.vlgmr.msrb.gmra.mxu1 %v14097_v44 }
 0x614   : > { %v11019_v30 = vld [vmem:[%s13879_s24 + $0x13d8] sm:$0xf]  ;;  %v10764_v28 = vor.u32 %v13156_v37, %v10763_v54  ;;  %7939 = vmatpush.bf16.msrb.mxu3 %v10284_v45 }
 0x615   : > { %v13220_v48 = vld [vmem:[%s13879_s24 + $0x13f4] sm:$0xf0]  ;;  %7926 = vmatmul.bf16.vlgmr.msrb.gmra.mxu2 %v14095_v43 }
 0x616   : > { %v11275_v9 = vld [vmem:[%s13879_s24 + $0x15d8] sm:$0xf]  ;;  %v11020_v11 = vor.u32 %v13220_v48, %v11019_v30  ;;  %7946 = vmatpush.bf16.msra.mxu0 %v10764_v28 }
 0x617   : > { %v13284_v21 = vld [vmem:[%s13879_s24 + $0x15f4] sm:$0xf0]  ;;  %7940 = vmatmul.bf16.vlgmr.msrb.gmra.mxu3 %v14101_v47 }
 0x618   : > { %v11531_v5 = vld [vmem:[%s13879_s24 + $0x17d8] sm:$0xf]  ;;  %v11276_v63 = vor.u32 %v13284_v21, %v11275_v9  ;;  %7960 = vmatpush.bf16.msra.mxu1 %v11020_v11  ;;  %v16086_v11 = vpop.f32.mrf.mxu1 }
 0x619   : > { %v13348_v26 = vld [vmem:[%s13879_s24 + $0x17f4] sm:$0xf0] }
 0x61a   : > { %v10731_v49 = vld [vmem:[%s13879_s24 + $0x1198] sm:$0xf]  ;;  %v11532_v62 = vor.u32 %v13348_v26, %v11531_v5  ;;  %7974 = vmatpush.bf16.msra.mxu2 %v11276_v63  ;;  %v16082_v26 = vpop.f32.mrf.mxu0 }
 0x61b   : > { %v13148_v52 = vld [vmem:[%s13879_s24 + $0x11b4] sm:$0xf0] }
 0x61c   : > { %v10987_v12 = vld [vmem:[%s13879_s24 + $0x1398] sm:$0xf]  ;;  %v10732_v55 = vor.u32 %v13148_v52, %v10731_v49  ;;  %7988 = vmatpush.bf16.msra.mxu3 %v11532_v62 }
 0x61d   : > { %v13212_v42 = vld [vmem:[%s13879_s24 + $0x13b4] sm:$0xf0] }
 0x61e   : > { %v11243_v3 = vld [vmem:[%s13879_s24 + $0x1598] sm:$0xf]  ;;  %v10988_v56 = vor.u32 %v13212_v42, %v10987_v12  ;;  %7947 = vmatpush.bf16.msra.mxu0 %v10732_v55 }
 0x61f   : > { %v13276_v51 = vld [vmem:[%s13879_s24 + $0x15b4] sm:$0xf0] }
 0x620   : > { %v11499_v27 = vld [vmem:[%s13879_s24 + $0x1798] sm:$0xf]  ;;  %v11244_v61 = vor.u32 %v13276_v51, %v11243_v3  ;;  %7961 = vmatpush.bf16.msra.mxu1 %v10988_v56 }
 0x621   : > { %v13340_v53 = vld [vmem:[%s13879_s24 + $0x17b4] sm:$0xf0] }
 0x622   : > { %v10699_v34 = vld [vmem:[%s13879_s24 + $0x1158] sm:$0xf]  ;;  %v11500_v59 = vor.u32 %v13340_v53, %v11499_v27  ;;  %7975 = vmatpush.bf16.msra.mxu2 %v11244_v61 }
 0x623   : > { %v13140_v23 = vld [vmem:[%s13879_s24 + $0x1174] sm:$0xf0] }
 0x624   : > { %v10955_v25 = vld [vmem:[%s13879_s24 + $0x1358] sm:$0xf]  ;;  %v10700_v20 = vor.u32 %v13140_v23, %v10699_v34  ;;  %7989 = vmatpush.bf16.msra.mxu3 %v11500_v59 }
 0x625   : > { %v13204_v19 = vld [vmem:[%s13879_s24 + $0x1374] sm:$0xf0] }
 0x626   : > { %v11211_v4 = vld [vmem:[%s13879_s24 + $0x1558] sm:$0xf]  ;;  %v10956_v6 = vor.u32 %v13204_v19, %v10955_v25  ;;  %7948 = vmatpush.bf16.msra.mxu0 %v10700_v20 }
 0x627   : > { %v13268_v7 = vld [vmem:[%s13879_s24 + $0x1574] sm:$0xf0] }
 0x628   : > { %v11467_v50 = vld [vmem:[%s13879_s24 + $0x1758] sm:$0xf]  ;;  %v11212_v8 = vor.u32 %v13268_v7, %v11211_v4  ;;  %7962 = vmatpush.bf16.msra.mxu1 %v10956_v6  ;;  %v16099_v4 = vpop.f32.mrf.mxu2  ;;  %v16104_v6 = vpop.f32.mrf.mxu3 }
 0x629   : > { %v13332_v13 = vld [vmem:[%s13879_s24 + $0x1774] sm:$0xf0] }
 0x62a   : > { %v10667_v60 = vld [vmem:[%s13879_s24 + $0x1118] sm:$0xf]  ;;  %v11468_v15 = vor.u32 %v13332_v13, %v11467_v50  ;;  %7976 = vmatpush.bf16.msra.mxu2 %v11212_v8 }
 0x62b   : > { %v13132_v2 = vld [vmem:[%s13879_s24 + $0x1134] sm:$0xf0] }
 0x62c   : > { %v10923_v14 = vld [vmem:[%s13879_s24 + $0x1318] sm:$0xf]  ;;  %v10668_v54 = vor.u32 %v13132_v2, %v10667_v60  ;;  %7990 = vmatpush.bf16.msra.mxu3 %v11468_v15  ;;  %v16109_v2 = vld [vmem:[%s13885_s5] sm:$0xff] }
 0x62d   : > { %v13196_v18 = vld [vmem:[%s13879_s24 + $0x1334] sm:$0xf0] }
 0x62e   : > { %v11179_v57 = vld [vmem:[%s13879_s24 + $0x1518] sm:$0xf]  ;;  %v10924_v37 = vor.u32 %v13196_v18, %v10923_v14  ;;  %7949 = vmatpush.bf16.msra.mxu0 %v10668_v54  ;;  %v1279_v14 = vperm.slane %v16109_v2, 5 }
 0x62f   : > { %v13260_v0 = vld [vmem:[%s13879_s24 + $0x1534] sm:$0xf0] }
 0x630   : > { %v11435_v33 = vld [vmem:[%s13879_s24 + $0x1718] sm:$0xf]  ;;  %v11180_v30 = vor.u32 %v13260_v0, %v11179_v57  ;;  %7963 = vmatpush.bf16.msra.mxu1 %v10924_v37  ;;  %v16114_v0 = vpop.f32.mrf.mxu0 }
 0x631   : > { %v13324_v22 = vld [vmem:[%s13879_s24 + $0x1734] sm:$0xf0] }
 0x632   : > { %v10635_v16 = vld [vmem:[%s13879_s24 + $0x10d8] sm:$0xf]  ;;  %v11436_v21 = vor.u32 %v13324_v22, %v11435_v33  ;;  %7977 = vmatpush.bf16.msra.mxu2 %v11180_v30 }
 0x633   : > { %v13124_v48 = vld [vmem:[%s13879_s24 + $0x10f4] sm:$0xf0] }
 0x634   : > { %v10891_v9 = vld [vmem:[%s13879_s24 + $0x12d8] sm:$0xf]  ;;  %v10636_v63 = vor.u32 %v13124_v48, %v10635_v16  ;;  %7991 = vmatpush.bf16.msra.mxu3 %v11436_v21  ;;  %v16119_v16 = vpop.f32.mrf.mxu1 }
 0x635   : > { %v13188_v24 = vld [vmem:[%s13879_s24 + $0x12f4] sm:$0xf0] }
 0x636   : > { %v11147_v29 = vld [vmem:[%s13879_s24 + $0x14d8] sm:$0xf]  ;;  %v10892_v49 = vor.u32 %v13188_v24, %v10891_v9  ;;  %7950 = vmatpush.bf16.msra.mxu0 %v10636_v63 }
 0x637   : > { %v13252_v5 = vld [vmem:[%s13879_s24 + $0x14f4] sm:$0xf0] }
 0x638   : > { %v11403_v45 = vld [vmem:[%s13879_s24 + $0x16d8] sm:$0xf]  ;;  %v11148_v52 = vor.u32 %v13252_v5, %v11147_v29  ;;  %7964 = vmatpush.bf16.msra.mxu1 %v10892_v49 }
 0x639   : > { %v13316_v28 = vld [vmem:[%s13879_s24 + $0x16f4] sm:$0xf0] }
 0x63a   : > { %v10603_v12 = vld [vmem:[%s13879_s24 + $0x1098] sm:$0xf]  ;;  %v11404_v3 = vor.u32 %v13316_v28, %v11403_v45  ;;  %7978 = vmatpush.bf16.msra.mxu2 %v11148_v52 }
 0x63b   : > { %v13116_v62 = vld [vmem:[%s13879_s24 + $0x10b4] sm:$0xf0] }
 0x63c   : > { %v10859_v42 = vld [vmem:[%s13879_s24 + $0x1298] sm:$0xf]  ;;  %v10604_v61 = vor.u32 %v13116_v62, %v10603_v12  ;;  %7992 = vmatpush.bf16.msra.mxu3 %v11404_v3 }
 0x63d   : > { %v13180_v51 = vld [vmem:[%s13879_s24 + $0x12b4] sm:$0xf0] }
 0x63e   : > { %v11115_v27 = vld [vmem:[%s13879_s24 + $0x1498] sm:$0xf]  ;;  %v10860_v34 = vor.u32 %v13180_v51, %v10859_v42  ;;  %7951 = vmatpush.bf16.msra.mxu0 %v10604_v61 }
 0x63f   : > { %v13244_v53 = vld [vmem:[%s13879_s24 + $0x14b4] sm:$0xf0] }
 0x640   : > { %v11371_v55 = vld [vmem:[%s13879_s24 + $0x1698] sm:$0xf]  ;;  %v11116_v23 = vor.u32 %v13244_v53, %v11115_v27  ;;  %7965 = vmatpush.bf16.msra.mxu1 %v10860_v34  ;;  %v7620_v53 = vadd.f32 %v16082_v26, %v1279_v14 }
 0x641   : > { %v13308_v56 = vld [vmem:[%s13879_s24 + $0x16b4] sm:$0xf0] }
 0x642   : > { %v10571_v25 = vld [vmem:[%s13879_s24 + $0x1058] sm:$0xf]  ;;  %v11372_v7 = vor.u32 %v13308_v56, %v11371_v55  ;;  %7979 = vmatpush.bf16.msra.mxu2 %v11116_v23 }
 0x643   : > { %v13108_v59 = vld [vmem:[%s13879_s24 + $0x1074] sm:$0xf0] }
 0x644   : > { %v10827_v19 = vld [vmem:[%s13879_s24 + $0x1258] sm:$0xf]  ;;  %v10572_v15 = vor.u32 %v13108_v59, %v10571_v25  ;;  %7993 = vmatpush.bf16.msra.mxu3 %v11372_v7  ;;  %v16138_v25 = vpop.f32.mrf.mxu2 }
 0x645   : > { %v13172_v50 = vld [vmem:[%s13879_s24 + $0x1274] sm:$0xf0] }
 0x646   : > { %v11083_v13 = vld [vmem:[%s13879_s24 + $0x1458] sm:$0xf]  ;;  %v10828_v33 = vor.u32 %v13172_v50, %v10827_v19  ;;  %7952 = vmatpush.bf16.msra.mxu0 %v10572_v15  ;;  %v7675_v15 = vpop.f32.mrf.mxu0 }
 0x647   : > { %v13236_v20 = vld [vmem:[%s13879_s24 + $0x1474] sm:$0xf0] }
 0x648   : > { %v11339_v8 = vld [vmem:[%s13879_s24 + $0x1658] sm:$0xf]  ;;  %v11084_v22 = vor.u32 %v13236_v20, %v11083_v13  ;;  %7966 = vmatpush.bf16.msra.mxu1 %v10828_v33  ;;  %v16143_v13 = vpop.f32.mrf.mxu3 }
 0x649   : > { %v13300_v60 = vld [vmem:[%s13879_s24 + $0x1674] sm:$0xf0] }
 0x64a   : > { %v10539_v18 = vld [vmem:[%s13879_s24 + $0x1018] sm:$0xf]  ;;  %v11340_v48 = vor.u32 %v13300_v60, %v11339_v8  ;;  %7980 = vmatpush.bf16.msra.mxu2 %v11084_v22  ;;  %v7634_v60 = vadd.f32 %v16086_v11, %v7620_v53 }
 0x64b   : > { %v13100_v57 = vld [vmem:[%s13879_s24 + $0x1034] sm:$0xf0] }
 0x64c   : > { %v10795_v54 = vld [vmem:[%s13879_s24 + $0x1218] sm:$0xf]  ;;  %v10540_v28 = vor.u32 %v13100_v57, %v10539_v18  ;;  %7994 = vmatpush.bf16.msra.mxu3 %v11340_v48  ;;  %v16174_v53 = vpop.f32.mrf.mxu2 }
 0x64d   : > { %v13164_v37 = vld [vmem:[%s13879_s24 + $0x1234] sm:$0xf0] }
 0x64e   : > { %v11051_v30 = vld [vmem:[%s13879_s24 + $0x1418] sm:$0xf]  ;;  %v10796_v12 = vor.u32 %v13164_v37, %v10795_v54  ;;  %7953 = vmatpush.bf16.msra.mxu0 %v10540_v28  ;;  %v16151_v37 = vpop.f32.mrf.mxu1 }
 0x64f   : > { %v13228_v9 = vld [vmem:[%s13879_s24 + $0x1434] sm:$0xf0] }
 0x650   : > { %v11307_v21 = vld [vmem:[%s13879_s24 + $0x1618] sm:$0xf]  ;;  %v11052_v62 = vor.u32 %v13228_v9, %v11051_v30  ;;  %7967 = vmatpush.bf16.msra.mxu1 %v10796_v12 }
 0x651   : > { %v13292_v24 = vld [vmem:[%s13879_s24 + $0x1634] sm:$0xf0]  ;;  %7954 = vmatmul.bf16.vlgmr.msra.gmra.mxu0 %v14190_v31 }
 0x652   : > { %v11787_v29 = vld [vmem:[%s13879_s24 + $0x19d8] sm:$0xf]  ;;  %v11308_v51 = vor.u32 %v13292_v24, %v11307_v21  ;;  %7981 = vmatpush.bf16.msra.mxu2 %v11052_v62 }
 0x653   : > { %v13412_v5 = vld [vmem:[%s13879_s24 + $0x19f4] sm:$0xf0]  ;;  %7968 = vmatmul.bf16.vlgmr.msra.gmra.mxu1 %v14197_v36 }
 0x654   : > { %v12043_v45 = vld [vmem:[%s13879_s24 + $0x1bd8] sm:$0xf]  ;;  %v11788_v27 = vor.u32 %v13412_v5, %v11787_v29  ;;  %7995 = vmatpush.bf16.msra.mxu3 %v11308_v51  ;;  %v7648_v5 = vadd.f32 %v16099_v4, %v7634_v60  ;;  %v7622_v51 = vadd.f32 %v16114_v0, %v1279_v14 }
 0x655   : > { %v13476_v63 = vld [vmem:[%s13879_s24 + $0x1bf4] sm:$0xf0]  ;;  %7982 = vmatmul.bf16.vlgmr.msra.gmra.mxu2 %v14195_v35 }
 0x656   : > { %v12299_v49 = vld [vmem:[%s13879_s24 + $0x1dd8] sm:$0xf]  ;;  %v12044_v55 = vor.u32 %v13476_v63, %v12043_v45  ;;  %8002 = vmatpush.bf16.msrb.mxu0 %v11788_v27  ;;  %v16188_v60 = vpop.f32.mrf.mxu1 }
 0x657   : > { %v13540_v52 = vld [vmem:[%s13879_s24 + $0x1df4] sm:$0xf0]  ;;  %7996 = vmatmul.bf16.vlgmr.msra.gmra.mxu3 %v14201_v40 }
 0x658   : > { %v12555_v42 = vld [vmem:[%s13879_s24 + $0x1fd8] sm:$0xf]  ;;  %v12300_v56 = vor.u32 %v13540_v52, %v12299_v49  ;;  %8016 = vmatpush.bf16.msrb.mxu1 %v12044_v55 }
 0x659   : > { %v13604_v3 = vld [vmem:[%s13879_s24 + $0x1ff4] sm:$0xf0] }
 0x65a   : > { %v11755_v61 = vld [vmem:[%s13879_s24 + $0x1998] sm:$0xf]  ;;  %v12556_v59 = vor.u32 %v13604_v3, %v12555_v42  ;;  %8030 = vmatpush.bf16.msrb.mxu2 %v12300_v56  ;;  %v7662_v56 = vadd.f32 %v16104_v6, %v7648_v5  ;;  %v7636_v6 = vadd.f32 %v16119_v16, %v7622_v51 }
 0x65b   : > { %v13404_v34 = vld [vmem:[%s13879_s24 + $0x19b4] sm:$0xf0] }
 0x65c   : > { %v12011_v23 = vld [vmem:[%s13879_s24 + $0x1b98] sm:$0xf]  ;;  %v11756_v8 = vor.u32 %v13404_v34, %v11755_v61  ;;  %8044 = vmatpush.bf16.msrb.mxu3 %v12556_v59  ;;  %v16177_v61 = vpop.f32.mrf.mxu3 }
 0x65d   : > { %v13468_v19 = vld [vmem:[%s13879_s24 + $0x1bb4] sm:$0xf0] }
 0x65e   : > { %v12267_v7 = vld [vmem:[%s13879_s24 + $0x1d98] sm:$0xf]  ;;  %v12012_v18 = vor.u32 %v13468_v19, %v12011_v23  ;;  %8003 = vmatpush.bf16.msrb.mxu0 %v11756_v8 }
 0x65f   : > { %v13532_v50 = vld [vmem:[%s13879_s24 + $0x1db4] sm:$0xf0] }
 0x660   : > { %v12523_v26 = vld [vmem:[%s13879_s24 + $0x1f98] sm:$0xf]  ;;  %v12268_v57 = vor.u32 %v13532_v50, %v12267_v7  ;;  %8017 = vmatpush.bf16.msrb.mxu1 %v12012_v18 }
 0x661   : > { %v13596_v20 = vld [vmem:[%s13879_s24 + $0x1fb4] sm:$0xf0] }
 0x662   : > { %v11723_v33 = vld [vmem:[%s13879_s24 + $0x1958] sm:$0xf]  ;;  %v12524_v30 = vor.u32 %v13596_v20, %v12523_v26  ;;  %8031 = vmatpush.bf16.msrb.mxu2 %v12268_v57  ;;  %v7677_v26 = vpop.f32.mrf.mxu0  ;;  %v7676_v57 = vadd.f32 %v7675_v15, %v7662_v56 }
 0x663   : > { %v13396_v22 = vld [vmem:[%s13879_s24 + $0x1974] sm:$0xf0] }
 0x664   : > { %v11979_v54 = vld [vmem:[%s13879_s24 + $0x1b58] sm:$0xf]  ;;  %v11724_v29 = vor.u32 %v13396_v22, %v11723_v33  ;;  %8045 = vmatpush.bf16.msrb.mxu3 %v12524_v30 }
 0x665   : > { %v13460_v48 = vld [vmem:[%s13879_s24 + $0x1b74] sm:$0xf0] }
 0x666   : > { %v12235_v11 = vld [vmem:[%s13879_s24 + $0x1d58] sm:$0xf]  ;;  %v11980_v45 = vor.u32 %v13460_v48, %v11979_v54  ;;  %8004 = vmatpush.bf16.msrb.mxu0 %v11724_v29 }
 0x667   : > { %v13524_v9 = vld [vmem:[%s13879_s24 + $0x1d74] sm:$0xf0] }
 0x668   : > { %v12491_v21 = vld [vmem:[%s13879_s24 + $0x1f58] sm:$0xf]  ;;  %v12236_v28 = vor.u32 %v13524_v9, %v12235_v11  ;;  %8018 = vmatpush.bf16.msrb.mxu1 %v11980_v45  ;;  %v7690_v45 = vadd.f32 %v16151_v37, %v7676_v57 }
 0x669   : > { %v13588_v24 = vld [vmem:[%s13879_s24 + $0x1f74] sm:$0xf0] }
 0x66a   : > { %v11691_v63 = vld [vmem:[%s13879_s24 + $0x1918] sm:$0xf]  ;;  %v12492_v12 = vor.u32 %v13588_v24, %v12491_v21  ;;  %8032 = vmatpush.bf16.msrb.mxu2 %v12236_v28  ;;  %v7650_v24 = vadd.f32 %v16138_v25, %v7636_v6  ;;  %v7705_v25 = vpop.f32.mrf.mxu2 }
 0x66b   : > { %v13388_v49 = vld [vmem:[%s13879_s24 + $0x1934] sm:$0xf0] }
 0x66c   : > { %v11947_v52 = vld [vmem:[%s13879_s24 + $0x1b18] sm:$0xf]  ;;  %v11692_v55 = vor.u32 %v13388_v49, %v11691_v63  ;;  %8046 = vmatpush.bf16.msrb.mxu3 %v12492_v12  ;;  %v7664_v37 = vadd.f32 %v16143_v13, %v7650_v24  ;;  %v12832_v24 = vld [vmem:[%s13879_s24 + $0x7dc] sm:$0xf] }
 0x66d   : > { %v13452_v62 = vld [vmem:[%s13879_s24 + $0x1b34] sm:$0xf0] }
 0x66e   : > { %v12203_v42 = vld [vmem:[%s13879_s24 + $0x1d18] sm:$0xf]  ;;  %v11948_v2 = vor.u32 %v13452_v62, %v11947_v52  ;;  %8005 = vmatpush.bf16.msrb.mxu0 %v11692_v55  ;;  %v7678_v57 = vadd.f32 %v7677_v26, %v7664_v37  ;;  %v9485_v26 = vld [vmem:[%s13879_s24 + $0x7f8] sm:$0xf0] }
 0x66f   : > { %v13516_v3 = vld [vmem:[%s13879_s24 + $0x1d34] sm:$0xf0]  ;;  %v9197_v37 = vld [vmem:[%s13879_s24 + $0x5b8] sm:$0xf0] }
 0x670   : > { %v12459_v4 = vld [vmem:[%s13879_s24 + $0x1f18] sm:$0xf]  ;;  %v12204_v34 = vor.u32 %v13516_v3, %v12203_v42  ;;  %8019 = vmatpush.bf16.msrb.mxu1 %v11948_v2  ;;  %v7745_v2 = vpop.f32.mrf.mxu1 }
 0x671   : > { %v13580_v27 = vld [vmem:[%s13879_s24 + $0x1f34] sm:$0xf0] }
 0x672   : > { %v11659_v14 = vld [vmem:[%s13879_s24 + $0x18d8] sm:$0xf]  ;;  %v12460_v59 = vor.u32 %v13580_v27, %v12459_v4  ;;  %8033 = vmatpush.bf16.msrb.mxu2 %v12204_v34  ;;  %v16207_v4 = vpop.f32.mrf.mxu3  ;;  %v7731_v27 = vpop.f32.mrf.mxu0 }
 0x673   : > { %v13380_v0 = vld [vmem:[%s13879_s24 + $0x18f4] sm:$0xf0] }
 0x674   : > { %v11915_v23 = vld [vmem:[%s13879_s24 + $0x1ad8] sm:$0xf]  ;;  %v11660_v18 = vor.u32 %v13380_v0, %v11659_v14  ;;  %8047 = vmatpush.bf16.msrb.mxu3 %v12460_v59 }
 0x675   : > { %v13444_v19 = vld [vmem:[%s13879_s24 + $0x1af4] sm:$0xf0] }
 0x676   : > { %v12171_v7 = vld [vmem:[%s13879_s24 + $0x1cd8] sm:$0xf]  ;;  %v11916_v33 = vor.u32 %v13444_v19, %v11915_v23  ;;  %8006 = vmatpush.bf16.msrb.mxu0 %v11660_v18  ;;  %v7704_v23 = vadd.f32 %v16174_v53, %v7690_v45  ;;  %v12640_v53 = vld [vmem:[%s13879_s24 + $0x1dc] sm:$0xf]  ;;  %v7692_v45 = vadd.f32 %v16188_v60, %v7678_v57 }
 0x677   : > { %v13508_v50 = vld [vmem:[%s13879_s24 + $0x1cf4] sm:$0xf0]  ;;  %v12824_v60 = vld [vmem:[%s13879_s24 + $0x79c] sm:$0xf] }
 0x678   : > { %v12427_v20 = vld [vmem:[%s13879_s24 + $0x1ed8] sm:$0xf]  ;;  %v12172_v22 = vor.u32 %v13508_v50, %v12171_v7  ;;  %8020 = vmatpush.bf16.msrb.mxu1 %v11916_v33  ;;  %v8717_v33 = vld [vmem:[%s13879_s24 + $0x1f8] sm:$0xf0] }
 0x679   : > { %v13572_v8 = vld [vmem:[%s13879_s24 + $0x1ef4] sm:$0xf0]  ;;  %v9421_v57 = vld [vmem:[%s13879_s24 + $0x778] sm:$0xf0] }
 0x67a   : > { %v11627_v54 = vld [vmem:[%s13879_s24 + $0x1898] sm:$0xf]  ;;  %v12428_v48 = vor.u32 %v13572_v8, %v12427_v20  ;;  %8034 = vmatpush.bf16.msrb.mxu2 %v12172_v22  ;;  %v12704_v22 = vld [vmem:[%s13879_s24 + $0x3dc] sm:$0xf] }
 0x67b   : > { %v13372_v30 = vld [vmem:[%s13879_s24 + $0x18b4] sm:$0xf0] }
 0x67c   : > { %v11883_v16 = vld [vmem:[%s13879_s24 + $0x1a98] sm:$0xf]  ;;  %v11628_v5 = vor.u32 %v13372_v30, %v11627_v54  ;;  %8048 = vmatpush.bf16.msrb.mxu3 %v12428_v48  ;;  %v8973_v30 = vld [vmem:[%s13879_s24 + $0x3f8] sm:$0xf0] }
 0x67d   : > { %v13436_v11 = vld [vmem:[%s13879_s24 + $0x1ab4] sm:$0xf0]  ;;  %v9229_v48 = vld [vmem:[%s13879_s24 + $0x5f8] sm:$0xf0] }
 0x67e   : > { %v12139_v9 = vld [vmem:[%s13879_s24 + $0x1c98] sm:$0xf]  ;;  %v11884_v28 = vor.u32 %v13436_v11, %v11883_v16  ;;  %8007 = vmatpush.bf16.msrb.mxu0 %v11628_v5  ;;  %v12768_v16 = vld [vmem:[%s13879_s24 + $0x5dc] sm:$0xf]  ;;  %v7718_v11 = vadd.f32 %v16177_v61, %v7704_v23  ;;  %v8720_v5 = vor.u32 %v12640_v53, %v8717_v33  ;;  %v7773_v61 = vpop.f32.mrf.mxu3 }
 0x67f   : > { %v13500_v21 = vld [vmem:[%s13879_s24 + $0x1cb4] sm:$0xf0]  ;;  %v12616_v33 = vld [vmem:[%s13879_s24 + $0x11c] sm:$0xf] }
 0x680   : > { %v12395_v29 = vld [vmem:[%s13879_s24 + $0x1e98] sm:$0xf]  ;;  %v12140_v63 = vor.u32 %v13500_v21, %v12139_v9  ;;  %8021 = vmatpush.bf16.msrb.mxu1 %v11884_v28  ;;  %v7732_v28 = vadd.f32 %v7731_v27, %v7718_v11  ;;  %v9453_v27 = vld [vmem:[%s13879_s24 + $0x7b8] sm:$0xf0] }
 0x681   : > { %v13564_v15 = vld [vmem:[%s13879_s24 + $0x1eb4] sm:$0xf0] }
 0x682   : > { %v11595_v49 = vld [vmem:[%s13879_s24 + $0x1858] sm:$0xf]  ;;  %v12396_v62 = vor.u32 %v13564_v15, %v12395_v29  ;;  %8035 = vmatpush.bf16.msrb.mxu2 %v12140_v63  ;;  %v7759_v29 = vpop.f32.mrf.mxu2  ;;  %v8976_v63 = vor.u32 %v12704_v22, %v8973_v30  ;;  %v8621_v30 = vld [vmem:[%s13879_s24 + $0x138] sm:$0xf0] }
 0x683   : > { %v13364_v52 = vld [vmem:[%s13879_s24 + $0x1874] sm:$0xf0] }
 0x684   : > { %v11851_v12 = vld [vmem:[%s13879_s24 + $0x1a58] sm:$0xf]  ;;  %v11596_v34 = vor.u32 %v13364_v52, %v11595_v49  ;;  %8049 = vmatpush.bf16.msrb.mxu3 %v12396_v62  ;;  %v9232_v49 = vor.u32 %v12768_v16, %v9229_v48  ;;  %v12632_v52 = vld [vmem:[%s13879_s24 + $0x19c] sm:$0xf] }
 0x685   : > { %v13428_v42 = vld [vmem:[%s13879_s24 + $0x1a74] sm:$0xf0]  ;;  %v12696_v62 = vld [vmem:[%s13879_s24 + $0x39c] sm:$0xf] }
 0x686   : > { %v12107_v3 = vld [vmem:[%s13879_s24 + $0x1c58] sm:$0xf]  ;;  %v11852_v13 = vor.u32 %v13428_v42, %v11851_v12  ;;  %8008 = vmatpush.bf16.msrb.mxu0 %v11596_v34  ;;  %v8685_v12 = vld [vmem:[%s13879_s24 + $0x1b8] sm:$0xf0]  ;;  %v9488_v42 = vor.u32 %v12832_v24, %v9485_v26  ;;  %v7747_v34 = vpop.f32.mrf.mxu1 }
 0x687   : > { %v13492_v51 = vld [vmem:[%s13879_s24 + $0x1c74] sm:$0xf0]  ;;  %v12680_v16 = vld [vmem:[%s13879_s24 + $0x31c] sm:$0xf] }
 0x688   : > { %v12363_v55 = vld [vmem:[%s13879_s24 + $0x1e58] sm:$0xf]  ;;  %v12108_v59 = vor.u32 %v13492_v51, %v12107_v3  ;;  %8022 = vmatpush.bf16.msrb.mxu1 %v11852_v13  ;;  %v8941_v3 = vld [vmem:[%s13879_s24 + $0x3b8] sm:$0xf0] }
 0x689   : > { %v13556_v56 = vld [vmem:[%s13879_s24 + $0x1e74] sm:$0xf0]  ;;  %v12760_v51 = vld [vmem:[%s13879_s24 + $0x59c] sm:$0xf]  ;;  %v8944_v23 = vor.u32 %v12696_v62, %v8941_v3 }
 0x68a   : > { %v11563_v14 = vld [vmem:[%s13879_s24 + $0x1818] sm:$0xf]  ;;  %v12364_v6 = vor.u32 %v13556_v56, %v12363_v55  ;;  %8036 = vmatpush.bf16.msrb.mxu2 %v12108_v59  ;;  %v7706_v55 = vadd.f32 %v7705_v25, %v7692_v45  ;;  %v7733_v56 = vpop.f32.mrf.mxu0  ;;  %v9200_v25 = vor.u32 %v12760_v51, %v9197_v37  ;;  %v12624_v13 = vld [vmem:[%s13879_s24 + $0x15c] sm:$0xf]  ;;  %v7761_v11 = vpop.f32.mrf.mxu2 }
 0x68b   : > { %v13356_v0 = vld [vmem:[%s13879_s24 + $0x1834] sm:$0xf0]  ;;  %v8653_v59 = vld [vmem:[%s13879_s24 + $0x178] sm:$0xf0] }
 0x68c   : > { %v11819_v19 = vld [vmem:[%s13879_s24 + $0x1a18] sm:$0xf]  ;;  %v11564_v54 = vor.u32 %v13356_v0, %v11563_v14  ;;  %8050 = vmatpush.bf16.msrb.mxu3 %v12364_v6  ;;  %v8688_v14 = vor.u32 %v12632_v52, %v8685_v12  ;;  %v7746_v0 = vadd.f32 %v7745_v2, %v7732_v28  ;;  %v12752_v6 = vld [vmem:[%s13879_s24 + $0x55c] sm:$0xf]  ;;  %v7720_v2 = vadd.f32 %v16207_v4, %v7706_v55 }
 0x68d   : > { %v13420_v7 = vld [vmem:[%s13879_s24 + $0x1a34] sm:$0xf0]  ;;  %v8656_v53 = vor.u32 %v12624_v13, %v8653_v59  ;;  %v8877_v48 = vld [vmem:[%s13879_s24 + $0x338] sm:$0xf0]  ;;  %v8624_v28 = vor.u32 %v12616_v33, %v8621_v30 }
 0x68e   : > { %v12075_v50 = vld [vmem:[%s13879_s24 + $0x1c18] sm:$0xf]  ;;  %v11820_v9 = vor.u32 %v13420_v7, %v11819_v19  ;;  %8009 = vmatpush.bf16.msrb.mxu0 %v11564_v54  ;;  %v12688_v19 = vld [vmem:[%s13879_s24 + $0x35c] sm:$0xf]  ;;  %v9456_v7 = vor.u32 %v12824_v60, %v9453_v27  ;;  %v7734_v22 = vadd.f32 %v7733_v56, %v7720_v2 }
 0x68f   : > { %v13484_v20 = vld [vmem:[%s13879_s24 + $0x1c34] sm:$0xf0]  ;;  %v9133_v24 = vld [vmem:[%s13879_s24 + $0x538] sm:$0xf0] }
 0x690   : > { %v12331_v8 = vld [vmem:[%s13879_s24 + $0x1e18] sm:$0xf]  ;;  %v12076_v21 = vor.u32 %v13484_v20, %v12075_v50  ;;  %8023 = vmatpush.bf16.msrb.mxu1 %v11820_v9  ;;  %v8909_v50 = vld [vmem:[%s13879_s24 + $0x378] sm:$0xf0]  ;;  %v7748_v52 = vadd.f32 %v7747_v34, %v7734_v22 }
 0x691   : > { %v13548_v18 = vld [vmem:[%s13879_s24 + $0x1e34] sm:$0xf0]  ;;  %8010 = vmatmul.bf16.vlgmr.msrb.gmra.mxu0 %v14290_v32  ;;  %v9165_v20 = vld [vmem:[%s13879_s24 + $0x578] sm:$0xf0]  ;;  %v8912_v4 = vor.u32 %v12688_v19, %v8909_v50 }
 0x692   : > { %v12332_v15 = vor.u32 %v13548_v18, %v12331_v8  ;;  %8037 = vmatpush.bf16.msrb.mxu2 %v12076_v21  ;;  %8058 = vmatpush.bf16.msra.mxu0 %v8720_v5  ;;  %v7760_v8 = vadd.f32 %v7759_v29, %v7746_v0  ;;  %v12816_v18 = vld [vmem:[%s13879_s24 + $0x75c] sm:$0xf]  ;;  %v9168_v54 = vor.u32 %v12752_v6, %v9165_v20  ;;  %v7775_v29 = vpop.f32.mrf.mxu3  ;;  %v7815_v6 = vpop.f32.mrf.mxu2 }
 0x693   : > { %8024 = vmatmul.bf16.vlgmr.msrb.gmra.mxu1 %v14297_v41  ;;  %v9424_v9 = vor.u32 %v12816_v18, %v9421_v57  ;;  %v12744_v21 = vld [vmem:[%s13879_s24 + $0x51c] sm:$0xf]  ;;  %v7762_v60 = vadd.f32 %v7761_v11, %v7748_v52 }
 0x694   : > { %8051 = vmatpush.bf16.msrb.mxu3 %v12332_v15  ;;  %8072 = vmatpush.bf16.msra.mxu1 %v8976_v63  ;;  %v7774_v26 = vadd.f32 %v7773_v61, %v7760_v8  ;;  %v7787_v15 = vpop.f32.mrf.mxu0  ;;  %v12808_v5 = vld [vmem:[%s13879_s24 + $0x71c] sm:$0xf]  ;;  %v8880_v63 = vor.u32 %v12680_v16, %v8877_v48  ;;  %v9136_v61 = vor.u32 %v12744_v21, %v9133_v24 }
 0x695   : > { %8038 = vmatmul.bf16.vlgmr.msrb.gmra.mxu2 %v14295_v38  ;;  %v9389_v45 = vld [vmem:[%s13879_s24 + $0x738] sm:$0xf0]  ;;  %v7776_v8 = vadd.f32 %v7775_v29, %v7762_v60 }
 0x696   : > { %8086 = vmatpush.bf16.msra.mxu2 %v9232_v49  ;;  %8059 = vmatpush.bf16.msra.mxu0 %v8688_v14  ;;  %v7801_v49 = vpop.f32.mrf.mxu1  ;;  %v7788_v12 = vadd.f32 %v7787_v15, %v7774_v26  ;;  %v12608_v62 = vld [vmem:[%s13879_s24 + $0xdc] sm:$0xf]  ;;  %v9392_v51 = vor.u32 %v12808_v5, %v9389_v45 }
 0x697   : > { %8052 = vmatmul.bf16.vlgmr.msrb.gmra.mxu3 %v14301_v46  ;;  %v12672_v3 = vld [vmem:[%s13879_s24 + $0x2dc] sm:$0xf] }
 0x698   : > { %8100 = vmatpush.bf16.msra.mxu3 %v9488_v42  ;;  %8073 = vmatpush.bf16.msra.mxu1 %v8944_v23  ;;  %v8589_v42 = vld [vmem:[%s13879_s24 + $0xf8] sm:$0xf0]  ;;  %v7802_v23 = vadd.f32 %v7801_v49, %v7788_v12 }
 0x699   : > { %v8845_v37 = vld [vmem:[%s13879_s24 + $0x2f8] sm:$0xf0]  ;;  %v8592_v14 = vor.u32 %v12608_v62, %v8589_v42 }
 0x69a   : > { %8087 = vmatpush.bf16.msra.mxu2 %v9200_v25  ;;  %8060 = vmatpush.bf16.msra.mxu0 %v8656_v53  ;;  %v12736_v55 = vld [vmem:[%s13879_s24 + $0x4dc] sm:$0xf]  ;;  %v8848_v25 = vor.u32 %v12672_v3, %v8845_v37  ;;  %v7816_v18 = vadd.f32 %v7815_v6, %v7802_v23  ;;  %v7829_v53 = vpop.f32.mrf.mxu3 }
 0x69b   : > { %v9101_v56 = vld [vmem:[%s13879_s24 + $0x4f8] sm:$0xf0] }
 0x69c   : > { %8101 = vmatpush.bf16.msra.mxu3 %v9456_v7  ;;  %8074 = vmatpush.bf16.msra.mxu1 %v8912_v4  ;;  %v12800_v27 = vld [vmem:[%s13879_s24 + $0x6dc] sm:$0xf]  ;;  %v9104_v13 = vor.u32 %v12736_v55, %v9101_v56  ;;  %v7789_v57 = vpop.f32.mrf.mxu0  ;;  %v7830_v16 = vadd.f32 %v7829_v53, %v7816_v18  ;;  %v7817_v55 = vpop.f32.mrf.mxu2 }
 0x69d   : > { %v9357_v34 = vld [vmem:[%s13879_s24 + $0x6f8] sm:$0xf0]  ;;  %v7790_v30 = vadd.f32 %v7789_v57, %v7776_v8 }
 0x69e   : > { %8088 = vmatpush.bf16.msra.mxu2 %v9168_v54  ;;  %8061 = vmatpush.bf16.msra.mxu0 %v8624_v28  ;;  %v12600_v0 = vld [vmem:[%s13879_s24 + $0x9c] sm:$0xf]  ;;  %v9360_v50 = vor.u32 %v12800_v27, %v9357_v34  ;;  %v7803_v26 = vpop.f32.mrf.mxu1  ;;  %8287 = vst [vmem:[%s14668_s9 + $0x28] sm:$0xff] %v7830_v16 }
 0x69f   : > { %v8557_v59 = vld [vmem:[%s13879_s24 + $0xb8] sm:$0xf0]  ;;  %v7804_v12 = vadd.f32 %v7803_v26, %v7790_v30 }
 0x6a0   : > { %8102 = vmatpush.bf16.msra.mxu3 %v9424_v9  ;;  %8075 = vmatpush.bf16.msra.mxu1 %v8880_v63  ;;  %v12664_v19 = vld [vmem:[%s13879_s24 + $0x29c] sm:$0xf]  ;;  %v8560_v4 = vor.u32 %v12600_v0, %v8557_v59 }
 0x6a1   : > { %v8813_v7 = vld [vmem:[%s13879_s24 + $0x2b8] sm:$0xf0]  ;;  %v7818_v34 = vadd.f32 %v7817_v55, %v7804_v12 }
 0x6a2   : > { %8089 = vmatpush.bf16.msra.mxu2 %v9136_v61  ;;  %v12728_v20 = vld [vmem:[%s13879_s24 + $0x49c] sm:$0xf]  ;;  %8062 = vmatpush.bf16.msra.mxu0 %v8592_v14  ;;  %v8816_v54 = vor.u32 %v12664_v19, %v8813_v7  ;;  %v7831_v14 = vpop.f32.mrf.mxu3 }
 0x6a3   : > { %v9069_v2 = vld [vmem:[%s13879_s24 + $0x4b8] sm:$0xf0] }
 0x6a4   : > { %8103 = vmatpush.bf16.msra.mxu3 %v9392_v51  ;;  %v12792_v33 = vld [vmem:[%s13879_s24 + $0x69c] sm:$0xf]  ;;  %8076 = vmatpush.bf16.msra.mxu1 %v8848_v25  ;;  %v9072_v48 = vor.u32 %v12728_v20, %v9069_v2 }
 0x6a5   : > { %v9325_v22 = vld [vmem:[%s13879_s24 + $0x6b8] sm:$0xf0] }
 0x6a6   : > { %8090 = vmatpush.bf16.msra.mxu2 %v9104_v13  ;;  %v12592_v11 = vld [vmem:[%s13879_s24 + $0x5c] sm:$0xf]  ;;  %v9328_v24 = vor.u32 %v12792_v33, %v9325_v22  ;;  %8063 = vmatpush.bf16.msra.mxu0 %v8560_v4 }
 0x6a7   : > { %v8525_v9 = vld [vmem:[%s13879_s24 + $0x78] sm:$0xf0] }
 0x6a8   : > { %v12656_v21 = vld [vmem:[%s13879_s24 + $0x25c] sm:$0xf]  ;;  %8104 = vmatpush.bf16.msra.mxu3 %v9360_v50  ;;  %v8528_v63 = vor.u32 %v12592_v11, %v8525_v9  ;;  %8077 = vmatpush.bf16.msra.mxu1 %v8816_v54  ;;  %v7832_v50 = vadd.f32 %v7831_v14, %v7818_v34 }
 0x6a9   : > { %v8781_v29 = vld [vmem:[%s13879_s24 + $0x278] sm:$0xf0] }
 0x6aa   : > { %v12720_v15 = vld [vmem:[%s13879_s24 + $0x45c] sm:$0xf]  ;;  %8091 = vmatpush.bf16.msra.mxu2 %v9072_v48  ;;  %v8784_v61 = vor.u32 %v12656_v21, %v8781_v29  ;;  %8064 = vmatpush.bf16.msra.mxu0 %v8528_v63  ;;  %8295 = vst [vmem:[%s14668_s9 + $0x68] sm:$0xff] %v7832_v50 }
 0x6ab   : > { %v9037_v5 = vld [vmem:[%s13879_s24 + $0x478] sm:$0xf0] }
 0x6ac   : > { %v12784_v45 = vld [vmem:[%s13879_s24 + $0x65c] sm:$0xf]  ;;  %v9040_v62 = vor.u32 %v12720_v15, %v9037_v5  ;;  %8105 = vmatpush.bf16.msra.mxu3 %v9328_v24  ;;  %8078 = vmatpush.bf16.msra.mxu1 %v8784_v61 }
 0x6ad   : > { %v9293_v28 = vld [vmem:[%s13879_s24 + $0x678] sm:$0xf0] }
 0x6ae   : > { %v12584_v49 = vld [vmem:[%s13879_s24 + $0x1c] sm:$0xf]  ;;  %v9296_v37 = vor.u32 %v12784_v45, %v9293_v28  ;;  %8092 = vmatpush.bf16.msra.mxu2 %v9040_v62 }
 0x6af   : > { %v8493_v52 = vld [vmem:[%s13879_s24 + $0x38] sm:$0xf0] }
 0x6b0   : > { %v12648_v42 = vld [vmem:[%s13879_s24 + $0x21c] sm:$0xf]  ;;  %v8496_v13 = vor.u32 %v12584_v49, %v8493_v52  ;;  %8106 = vmatpush.bf16.msra.mxu3 %v9296_v37 }
 0x6b1   : > { %v8749_v3 = vld [vmem:[%s13879_s24 + $0x238] sm:$0xf0] }
 0x6b2   : > { %v12712_v51 = vld [vmem:[%s13879_s24 + $0x41c] sm:$0xf]  ;;  %v8752_v6 = vor.u32 %v12648_v42, %v8749_v3  ;;  %8065 = vmatpush.bf16.msra.mxu0 %v8496_v13 }
 0x6b3   : > { %v9005_v56 = vld [vmem:[%s13879_s24 + $0x438] sm:$0xf0] }
 0x6b4   : > { %v12776_v60 = vld [vmem:[%s13879_s24 + $0x61c] sm:$0xf]  ;;  %v9008_v20 = vor.u32 %v12712_v51, %v9005_v56  ;;  %8079 = vmatpush.bf16.msra.mxu1 %v8752_v6 }
 0x6b5   : > { %v9261_v27 = vld [vmem:[%s13879_s24 + $0x638] sm:$0xf0]  ;;  %8066 = vmatmul.bf16.vlgmr.msra.gmra.mxu0 %v13982_v58 }
 0x6b6   : > { %v12896_v0 = vld [vmem:[%s13879_s24 + $0x9dc] sm:$0xf]  ;;  %v9264_v18 = vor.u32 %v12776_v60, %v9261_v27  ;;  %8093 = vmatpush.bf16.msra.mxu2 %v9008_v20 }
 0x6b7   : > { %v9741_v23 = vld [vmem:[%s13879_s24 + $0x9f8] sm:$0xf0]  ;;  %8080 = vmatmul.bf16.vlgmr.msra.gmra.mxu1 %v14006_v10 }
 0x6b8   : > { %v12960_v25 = vld [vmem:[%s13879_s24 + $0xbdc] sm:$0xf]  ;;  %v9744_v57 = vor.u32 %v12896_v0, %v9741_v23  ;;  %8107 = vmatpush.bf16.msra.mxu3 %v9264_v18 }
 0x6b9   : > { %v9997_v59 = vld [vmem:[%s13879_s24 + $0xbf8] sm:$0xf0]  ;;  %8094 = vmatmul.bf16.vlgmr.msra.gmra.mxu2 %v13990_v1 }
 0x6ba   : > { %v13024_v19 = vld [vmem:[%s13879_s24 + $0xddc] sm:$0xf]  ;;  %v10000_v33 = vor.u32 %v12960_v25, %v9997_v59  ;;  %8114 = vmatpush.bf16.msrb.mxu0 %v9744_v57 }
 0x6bb   : > { %v10253_v7 = vld [vmem:[%s13879_s24 + $0xdf8] sm:$0xf0]  ;;  %8108 = vmatmul.bf16.vlgmr.msra.gmra.mxu3 %v14014_v17 }
 0x6bc   : > { %v13088_v2 = vld [vmem:[%s13879_s24 + $0xfdc] sm:$0xf]  ;;  %v10256_v22 = vor.u32 %v13024_v19, %v10253_v7  ;;  %8128 = vmatpush.bf16.msrb.mxu1 %v10000_v33 }
 0x6bd   : > { %v10509_v8 = vld [vmem:[%s13879_s24 + $0xff8] sm:$0xf0] }
 0x6be   : > { %v12888_v53 = vld [vmem:[%s13879_s24 + $0x99c] sm:$0xf]  ;;  %v10512_v30 = vor.u32 %v13088_v2, %v10509_v8  ;;  %8142 = vmatpush.bf16.msrb.mxu2 %v10256_v22 }
 0x6bf   : > { %v9709_v4 = vld [vmem:[%s13879_s24 + $0x9b8] sm:$0xf0] }
 0x6c0   : > { %v12952_v54 = vld [vmem:[%s13879_s24 + $0xb9c] sm:$0xf]  ;;  %v9712_v24 = vor.u32 %v12888_v53, %v9709_v4  ;;  %8156 = vmatpush.bf16.msrb.mxu3 %v10512_v30 }
 0x6c1   : > { %v9965_v16 = vld [vmem:[%s13879_s24 + $0xbb8] sm:$0xf0] }
 0x6c2   : > { %v13016_v48 = vld [vmem:[%s13879_s24 + $0xd9c] sm:$0xf]  ;;  %v9968_v26 = vor.u32 %v12952_v54, %v9965_v16  ;;  %8115 = vmatpush.bf16.msrb.mxu0 %v9712_v24 }
 0x6c3   : > { %v10221_v11 = vld [vmem:[%s13879_s24 + $0xdb8] sm:$0xf0] }
 0x6c4   : > { %v13080_v9 = vld [vmem:[%s13879_s24 + $0xf9c] sm:$0xf]  ;;  %v10224_v29 = vor.u32 %v13016_v48, %v10221_v11  ;;  %8129 = vmatpush.bf16.msrb.mxu1 %v9968_v26 }
 0x6c5   : > { %v10477_v21 = vld [vmem:[%s13879_s24 + $0xfb8] sm:$0xf0] }
 0x6c6   : > { %v12880_v15 = vld [vmem:[%s13879_s24 + $0x95c] sm:$0xf]  ;;  %v10480_v28 = vor.u32 %v13080_v9, %v10477_v21  ;;  %8143 = vmatpush.bf16.msrb.mxu2 %v10224_v29 }
 0x6c7   : > { %v9677_v5 = vld [vmem:[%s13879_s24 + $0x978] sm:$0xf0] }
 0x6c8   : > { %v12944_v45 = vld [vmem:[%s13879_s24 + $0xb5c] sm:$0xf]  ;;  %v9680_v62 = vor.u32 %v12880_v15, %v9677_v5  ;;  %8157 = vmatpush.bf16.msrb.mxu3 %v10480_v28 }
 0x6c9   : > { %v9933_v63 = vld [vmem:[%s13879_s24 + $0xb78] sm:$0xf0] }
 0x6ca   : > { %v13008_v49 = vld [vmem:[%s13879_s24 + $0xd5c] sm:$0xf]  ;;  %v9936_v42 = vor.u32 %v12944_v45, %v9933_v63  ;;  %8116 = vmatpush.bf16.msrb.mxu0 %v9680_v62 }
 0x6cb   : > { %v10189_v52 = vld [vmem:[%s13879_s24 + $0xd78] sm:$0xf0] }
 0x6cc   : > { %v13072_v12 = vld [vmem:[%s13879_s24 + $0xf5c] sm:$0xf]  ;;  %v10192_v3 = vor.u32 %v13008_v49, %v10189_v52  ;;  %8130 = vmatpush.bf16.msrb.mxu1 %v9936_v42 }
 0x6cd   : > { %v10445_v61 = vld [vmem:[%s13879_s24 + $0xf78] sm:$0xf0] }
 0x6ce   : > { %v12872_v58 = vld [vmem:[%s13879_s24 + $0x91c] sm:$0xf]  ;;  %v10448_v1 = vor.u32 %v13072_v12, %v10445_v61  ;;  %8144 = vmatpush.bf16.msrb.mxu2 %v10192_v3 }
 0x6cf   : > { %v9645_v51 = vld [vmem:[%s13879_s24 + $0x938] sm:$0xf0] }
 0x6d0   : > { %v12936_v37 = vld [vmem:[%s13879_s24 + $0xb1c] sm:$0xf]  ;;  %v9648_v27 = vor.u32 %v12872_v58, %v9645_v51  ;;  %8158 = vmatpush.bf16.msrb.mxu3 %v10448_v1 }
 0x6d1   : > { %v9901_v55 = vld [vmem:[%s13879_s24 + $0xb38] sm:$0xf0] }
 0x6d2   : > { %v13000_v10 = vld [vmem:[%s13879_s24 + $0xd1c] sm:$0xf]  ;;  %v9904_v34 = vor.u32 %v12936_v37, %v9901_v55  ;;  %8117 = vmatpush.bf16.msrb.mxu0 %v9648_v27 }
 0x6d3   : > { %v10157_v56 = vld [vmem:[%s13879_s24 + $0xd38] sm:$0xf0] }
 0x6d4   : > { %v13064_v60 = vld [vmem:[%s13879_s24 + $0xf1c] sm:$0xf]  ;;  %v10160_v14 = vor.u32 %v13000_v10, %v10157_v56  ;;  %8131 = vmatpush.bf16.msrb.mxu1 %v9904_v34 }
 0x6d5   : > { %v10413_v17 = vld [vmem:[%s13879_s24 + $0xf38] sm:$0xf0] }
 0x6d6   : > { %v12864_v0 = vld [vmem:[%s13879_s24 + $0x8dc] sm:$0xf]  ;;  %v10416_v13 = vor.u32 %v13064_v60, %v10413_v17  ;;  %8145 = vmatpush.bf16.msrb.mxu2 %v10160_v14 }
 0x6d7   : > { %v9613_v23 = vld [vmem:[%s13879_s24 + $0x8f8] sm:$0xf0] }
 0x6d8   : > { %v12928_v25 = vld [vmem:[%s13879_s24 + $0xadc] sm:$0xf]  ;;  %v9616_v20 = vor.u32 %v12864_v0, %v9613_v23  ;;  %8159 = vmatpush.bf16.msrb.mxu3 %v10416_v13 }
 0x6d9   : > { %v9869_v59 = vld [vmem:[%s13879_s24 + $0xaf8] sm:$0xf0] }
 0x6da   : > { %v12992_v19 = vld [vmem:[%s13879_s24 + $0xcdc] sm:$0xf]  ;;  %v9872_v2 = vor.u32 %v12928_v25, %v9869_v59  ;;  %8118 = vmatpush.bf16.msrb.mxu0 %v9616_v20 }
 0x6db   : > { %v10125_v7 = vld [vmem:[%s13879_s24 + $0xcf8] sm:$0xf0] }
 0x6dc   : > { %v13056_v50 = vld [vmem:[%s13879_s24 + $0xedc] sm:$0xf]  ;;  %v10128_v8 = vor.u32 %v12992_v19, %v10125_v7  ;;  %8132 = vmatpush.bf16.msrb.mxu1 %v9872_v2 }
 0x6dd   : > { %v10381_v6 = vld [vmem:[%s13879_s24 + $0xef8] sm:$0xf0] }
 0x6de   : > { %v12856_v18 = vld [vmem:[%s13879_s24 + $0x89c] sm:$0xf]  ;;  %v10384_v33 = vor.u32 %v13056_v50, %v10381_v6  ;;  %8146 = vmatpush.bf16.msrb.mxu2 %v10128_v8 }
 0x6df   : > { %v9581_v57 = vld [vmem:[%s13879_s24 + $0x8b8] sm:$0xf0] }
 0x6e0   : > { %v12920_v53 = vld [vmem:[%s13879_s24 + $0xa9c] sm:$0xf]  ;;  %v9584_v48 = vor.u32 %v12856_v18, %v9581_v57  ;;  %8160 = vmatpush.bf16.msrb.mxu3 %v10384_v33 }
 0x6e1   : > { %v9837_v22 = vld [vmem:[%s13879_s24 + $0xab8] sm:$0xf0] }
 0x6e2   : > { %v12984_v4 = vld [vmem:[%s13879_s24 + $0xc9c] sm:$0xf]  ;;  %v9840_v11 = vor.u32 %v12920_v53, %v9837_v22  ;;  %8119 = vmatpush.bf16.msrb.mxu0 %v9584_v48 }
 0x6e3   : > { %v10093_v54 = vld [vmem:[%s13879_s24 + $0xcb8] sm:$0xf0] }
 0x6e4   : > { %v13048_v30 = vld [vmem:[%s13879_s24 + $0xe9c] sm:$0xf]  ;;  %v10096_v9 = vor.u32 %v12984_v4, %v10093_v54  ;;  %8133 = vmatpush.bf16.msrb.mxu1 %v9840_v11 }
 0x6e5   : > { %v10349_v16 = vld [vmem:[%s13879_s24 + $0xeb8] sm:$0xf0] }
 0x6e6   : > { %v12848_v21 = vld [vmem:[%s13879_s24 + $0x85c] sm:$0xf]  ;;  %v10352_v29 = vor.u32 %v13048_v30, %v10349_v16  ;;  %8147 = vmatpush.bf16.msrb.mxu2 %v10096_v9 }
 0x6e7   : > { %v9549_v24 = vld [vmem:[%s13879_s24 + $0x878] sm:$0xf0] }
 0x6e8   : > { %v12912_v26 = vld [vmem:[%s13879_s24 + $0xa5c] sm:$0xf]  ;;  %v9552_v49 = vor.u32 %v12848_v21, %v9549_v24  ;;  %8161 = vmatpush.bf16.msrb.mxu3 %v10352_v29 }
 0x6e9   : > { %v9805_v15 = vld [vmem:[%s13879_s24 + $0xa78] sm:$0xf0] }
 0x6ea   : > { %v12976_v5 = vld [vmem:[%s13879_s24 + $0xc5c] sm:$0xf]  ;;  %v9808_v61 = vor.u32 %v12912_v26, %v9805_v15  ;;  %8120 = vmatpush.bf16.msrb.mxu0 %v9552_v49 }
 0x6eb   : > { %v10061_v45 = vld [vmem:[%s13879_s24 + $0xc78] sm:$0xf0] }
 0x6ec   : > { %v13040_v28 = vld [vmem:[%s13879_s24 + $0xe5c] sm:$0xf]  ;;  %v10064_v62 = vor.u32 %v12976_v5, %v10061_v45  ;;  %8134 = vmatpush.bf16.msrb.mxu1 %v9808_v61 }
 0x6ed   : > { %v10317_v63 = vld [vmem:[%s13879_s24 + $0xe78] sm:$0xf0] }
 0x6ee   : > { %v12840_v52 = vld [vmem:[%s13879_s24 + $0x81c] sm:$0xf]  ;;  %v10320_v51 = vor.u32 %v13040_v28, %v10317_v63  ;;  %8148 = vmatpush.bf16.msrb.mxu2 %v10064_v62 }
 0x6ef   : > { %v9517_v12 = vld [vmem:[%s13879_s24 + $0x838] sm:$0xf0] }
 0x6f0   : > { %v12904_v42 = vld [vmem:[%s13879_s24 + $0xa1c] sm:$0xf]  ;;  %v9520_v17 = vor.u32 %v12840_v52, %v9517_v12  ;;  %8162 = vmatpush.bf16.msrb.mxu3 %v10320_v51 }
 0x6f1   : > { %v9773_v3 = vld [vmem:[%s13879_s24 + $0xa38] sm:$0xf0] }
 0x6f2   : > { %v12968_v58 = vld [vmem:[%s13879_s24 + $0xc1c] sm:$0xf]  ;;  %v9776_v0 = vor.u32 %v12904_v42, %v9773_v3  ;;  %8121 = vmatpush.bf16.msrb.mxu0 %v9520_v17 }
 0x6f3   : > { %v10029_v37 = vld [vmem:[%s13879_s24 + $0xc38] sm:$0xf0] }
 0x6f4   : > { %v13032_v1 = vld [vmem:[%s13879_s24 + $0xe1c] sm:$0xf]  ;;  %v10032_v23 = vor.u32 %v12968_v58, %v10029_v37  ;;  %8135 = vmatpush.bf16.msrb.mxu1 %v9776_v0 }
 0x6f5   : > { %v10285_v55 = vld [vmem:[%s13879_s24 + $0xe38] sm:$0xf0]  ;;  %8122 = vmatmul.bf16.vlgmr.msrb.gmra.mxu0 %v14090_v39 }
 0x6f6   : > { %v13152_v10 = vld [vmem:[%s13879_s24 + $0x11dc] sm:$0xf]  ;;  %v10288_v59 = vor.u32 %v13032_v1, %v10285_v55  ;;  %8149 = vmatpush.bf16.msrb.mxu2 %v10032_v23 }
 0x6f7   : > { %v10765_v56 = vld [vmem:[%s13879_s24 + $0x11f8] sm:$0xf0]  ;;  %8136 = vmatmul.bf16.vlgmr.msrb.gmra.mxu1 %v14097_v44 }
 0x6f8   : > { %v13216_v60 = vld [vmem:[%s13879_s24 + $0x13dc] sm:$0xf]  ;;  %v10768_v19 = vor.u32 %v13152_v10, %v10765_v56  ;;  %8163 = vmatpush.bf16.msrb.mxu3 %v10288_v59 }
 0x6f9   : > { %v11021_v27 = vld [vmem:[%s13879_s24 + $0x13f8] sm:$0xf0]  ;;  %8150 = vmatmul.bf16.vlgmr.msrb.gmra.mxu2 %v14095_v43 }
 0x6fa   : > { %v13280_v34 = vld [vmem:[%s13879_s24 + $0x15dc] sm:$0xf]  ;;  %v11024_v7 = vor.u32 %v13216_v60, %v11021_v27  ;;  %8170 = vmatpush.bf16.msra.mxu0 %v10768_v19  ;;  %v16403_v60 = vpop.f32.mrf.mxu0 }
 0x6fb   : > { %v11277_v14 = vld [vmem:[%s13879_s24 + $0x15f8] sm:$0xf0]  ;;  %8164 = vmatmul.bf16.vlgmr.msrb.gmra.mxu3 %v14101_v47 }
 0x6fc   : > { %v13344_v25 = vld [vmem:[%s13879_s24 + $0x17dc] sm:$0xf]  ;;  %v11280_v50 = vor.u32 %v13280_v34, %v11277_v14  ;;  %8184 = vmatpush.bf16.msra.mxu1 %v11024_v7  ;;  %v16407_v34 = vpop.f32.mrf.mxu1 }
 0x6fd   : > { %v11533_v13 = vld [vmem:[%s13879_s24 + $0x17f8] sm:$0xf0] }
 0x6fe   : > { %v13144_v6 = vld [vmem:[%s13879_s24 + $0x119c] sm:$0xf]  ;;  %v11536_v8 = vor.u32 %v13344_v25, %v11533_v13  ;;  %8198 = vmatpush.bf16.msra.mxu2 %v11280_v50 }
 0x6ff   : > { %v10733_v20 = vld [vmem:[%s13879_s24 + $0x11b8] sm:$0xf0] }
 0x700   : > { %v13208_v2 = vld [vmem:[%s13879_s24 + $0x139c] sm:$0xf]  ;;  %v10736_v4 = vor.u32 %v13144_v6, %v10733_v20  ;;  %8212 = vmatpush.bf16.msra.mxu3 %v11536_v8 }
 0x701   : > { %v10989_v18 = vld [vmem:[%s13879_s24 + $0x13b8] sm:$0xf0] }
 0x702   : > { %v13272_v57 = vld [vmem:[%s13879_s24 + $0x159c] sm:$0xf]  ;;  %v10992_v54 = vor.u32 %v13208_v2, %v10989_v18  ;;  %8171 = vmatpush.bf16.msra.mxu0 %v10736_v4  ;;  %v16420_v4 = vpop.f32.mrf.mxu2 }
 0x703   : > { %v11245_v53 = vld [vmem:[%s13879_s24 + $0x15b8] sm:$0xf0] }
 0x704   : > { %v13336_v33 = vld [vmem:[%s13879_s24 + $0x179c] sm:$0xf]  ;;  %v11248_v30 = vor.u32 %v13272_v57, %v11245_v53  ;;  %8185 = vmatpush.bf16.msra.mxu1 %v10992_v54 }
 0x705   : > { %v11501_v22 = vld [vmem:[%s13879_s24 + $0x17b8] sm:$0xf0] }
 0x706   : > { %v13136_v16 = vld [vmem:[%s13879_s24 + $0x115c] sm:$0xf]  ;;  %v11504_v9 = vor.u32 %v13336_v33, %v11501_v22  ;;  %8199 = vmatpush.bf16.msra.mxu2 %v11248_v30 }
 0x707   : > { %v10701_v48 = vld [vmem:[%s13879_s24 + $0x1178] sm:$0xf0] }
 0x708   : > { %v13200_v11 = vld [vmem:[%s13879_s24 + $0x135c] sm:$0xf]  ;;  %v10704_v39 = vor.u32 %v13136_v16, %v10701_v48  ;;  %8213 = vmatpush.bf16.msra.mxu3 %v11504_v9 }
 0x709   : > { %v10957_v21 = vld [vmem:[%s13879_s24 + $0x1378] sm:$0xf0] }
 0x70a   : > { %v13264_v24 = vld [vmem:[%s13879_s24 + $0x155c] sm:$0xf]  ;;  %v10960_v5 = vor.u32 %v13200_v11, %v10957_v21  ;;  %8172 = vmatpush.bf16.msra.mxu0 %v10704_v39  ;;  %v16425_v11 = vpop.f32.mrf.mxu3 }
 0x70b   : > { %v11213_v26 = vld [vmem:[%s13879_s24 + $0x1578] sm:$0xf0] }
 0x70c   : > { %v13328_v29 = vld [vmem:[%s13879_s24 + $0x175c] sm:$0xf]  ;;  %v11216_v45 = vor.u32 %v13264_v24, %v11213_v26  ;;  %8186 = vmatpush.bf16.msra.mxu1 %v10960_v5  ;;  %v16430_v24 = vld [vmem:[%s13885_s5] sm:$0xff]  ;;  %v16435_v5 = vpop.f32.mrf.mxu0 }
 0x70d   : > { %v11469_v15 = vld [vmem:[%s13879_s24 + $0x1778] sm:$0xf0]  ;;  %v1280_v26 = vperm.slane %v16430_v24, 6 }
 0x70e   : > { %v13128_v28 = vld [vmem:[%s13879_s24 + $0x111c] sm:$0xf]  ;;  %v11472_v44 = vor.u32 %v13328_v29, %v11469_v15  ;;  %8200 = vmatpush.bf16.msra.mxu2 %v11216_v45 }
 0x70f   : > { %v10669_v43 = vld [vmem:[%s13879_s24 + $0x1138] sm:$0xf0] }
 0x710   : > { %v13192_v63 = vld [vmem:[%s13879_s24 + $0x131c] sm:$0xf]  ;;  %v10672_v62 = vor.u32 %v13128_v28, %v10669_v43  ;;  %8214 = vmatpush.bf16.msra.mxu3 %v11472_v44 }
 0x711   : > { %v10925_v49 = vld [vmem:[%s13879_s24 + $0x1338] sm:$0xf0] }
 0x712   : > { %v13256_v52 = vld [vmem:[%s13879_s24 + $0x151c] sm:$0xf]  ;;  %v10928_v42 = vor.u32 %v13192_v63, %v10925_v49  ;;  %8173 = vmatpush.bf16.msra.mxu0 %v10672_v62  ;;  %v16440_v49 = vpop.f32.mrf.mxu1 }
 0x713   : > { %v11181_v47 = vld [vmem:[%s13879_s24 + $0x1538] sm:$0xf0] }
 0x714   : > { %v13320_v12 = vld [vmem:[%s13879_s24 + $0x171c] sm:$0xf]  ;;  %v11184_v3 = vor.u32 %v13256_v52, %v11181_v47  ;;  %8187 = vmatpush.bf16.msra.mxu1 %v10928_v42 }
 0x715   : > { %v11437_v61 = vld [vmem:[%s13879_s24 + $0x1738] sm:$0xf0] }
 0x716   : > { %v13120_v58 = vld [vmem:[%s13879_s24 + $0x10dc] sm:$0xf]  ;;  %v11440_v1 = vor.u32 %v13320_v12, %v11437_v61  ;;  %8201 = vmatpush.bf16.msra.mxu2 %v11184_v3 }
 0x717   : > { %v10637_v51 = vld [vmem:[%s13879_s24 + $0x10f8] sm:$0xf0] }
 0x718   : > { %v13184_v37 = vld [vmem:[%s13879_s24 + $0x12dc] sm:$0xf]  ;;  %v10640_v14 = vor.u32 %v13120_v58, %v10637_v51  ;;  %8215 = vmatpush.bf16.msra.mxu3 %v11440_v1 }
 0x719   : > { %v10893_v55 = vld [vmem:[%s13879_s24 + $0x12f8] sm:$0xf0] }
 0x71a   : > { %v13248_v10 = vld [vmem:[%s13879_s24 + $0x14dc] sm:$0xf]  ;;  %v10896_v0 = vor.u32 %v13184_v37, %v10893_v55  ;;  %8174 = vmatpush.bf16.msra.mxu0 %v10640_v14 }
 0x71b   : > { %v11149_v56 = vld [vmem:[%s13879_s24 + $0x14f8] sm:$0xf0] }
 0x71c   : > { %v13312_v17 = vld [vmem:[%s13879_s24 + $0x16dc] sm:$0xf]  ;;  %v11152_v23 = vor.u32 %v13248_v10, %v11149_v56  ;;  %8188 = vmatpush.bf16.msra.mxu1 %v10896_v0  ;;  %v7844_v0 = vadd.f32 %v16403_v60, %v1280_v26 }
 0x71d   : > { %v11405_v27 = vld [vmem:[%s13879_s24 + $0x16f8] sm:$0xf0] }
 0x71e   : > { %v13112_v25 = vld [vmem:[%s13879_s24 + $0x109c] sm:$0xf]  ;;  %v11408_v19 = vor.u32 %v13312_v17, %v11405_v27  ;;  %8202 = vmatpush.bf16.msra.mxu2 %v11152_v23 }
 0x71f   : > { %v10605_v13 = vld [vmem:[%s13879_s24 + $0x10b8] sm:$0xf0] }
 0x720   : > { %v13176_v59 = vld [vmem:[%s13879_s24 + $0x129c] sm:$0xf]  ;;  %v10608_v8 = vor.u32 %v13112_v25, %v10605_v13  ;;  %8216 = vmatpush.bf16.msra.mxu3 %v11408_v19 }
 0x721   : > { %v10861_v7 = vld [vmem:[%s13879_s24 + $0x12b8] sm:$0xf0] }
 0x722   : > { %v13240_v50 = vld [vmem:[%s13879_s24 + $0x149c] sm:$0xf]  ;;  %v10864_v18 = vor.u32 %v13176_v59, %v10861_v7  ;;  %8175 = vmatpush.bf16.msra.mxu0 %v10608_v8  ;;  %v16459_v7 = vpop.f32.mrf.mxu2  ;;  %v16464_v8 = vpop.f32.mrf.mxu3 }
 0x723   : > { %v11117_v6 = vld [vmem:[%s13879_s24 + $0x14b8] sm:$0xf0] }
 0x724   : > { %v13304_v20 = vld [vmem:[%s13879_s24 + $0x169c] sm:$0xf]  ;;  %v11120_v57 = vor.u32 %v13240_v50, %v11117_v6  ;;  %8189 = vmatpush.bf16.msra.mxu1 %v10864_v18 }
 0x725   : > { %v11373_v2 = vld [vmem:[%s13879_s24 + $0x16b8] sm:$0xf0] }
 0x726   : > { %v13104_v53 = vld [vmem:[%s13879_s24 + $0x105c] sm:$0xf]  ;;  %v11376_v54 = vor.u32 %v13304_v20, %v11373_v2  ;;  %8203 = vmatpush.bf16.msra.mxu2 %v11120_v57 }
 0x727   : > { %v10573_v33 = vld [vmem:[%s13879_s24 + $0x1078] sm:$0xf0] }
 0x728   : > { %v13168_v22 = vld [vmem:[%s13879_s24 + $0x125c] sm:$0xf]  ;;  %v10576_v29 = vor.u32 %v13104_v53, %v10573_v33  ;;  %8217 = vmatpush.bf16.msra.mxu3 %v11376_v54  ;;  %v7858_v53 = vadd.f32 %v16407_v34, %v7844_v0  ;;  %v7899_v33 = vpop.f32.mrf.mxu0 }
 0x729   : > { %v10829_v30 = vld [vmem:[%s13879_s24 + $0x1278] sm:$0xf0] }
 0x72a   : > { %v13232_v16 = vld [vmem:[%s13879_s24 + $0x145c] sm:$0xf]  ;;  %v10832_v45 = vor.u32 %v13168_v22, %v10829_v30  ;;  %8176 = vmatpush.bf16.msra.mxu0 %v10576_v29 }
 0x72b   : > { %v11085_v48 = vld [vmem:[%s13879_s24 + $0x1478] sm:$0xf0] }
 0x72c   : > { %v13296_v9 = vld [vmem:[%s13879_s24 + $0x165c] sm:$0xf]  ;;  %v11088_v28 = vor.u32 %v13232_v16, %v11085_v48  ;;  %8190 = vmatpush.bf16.msra.mxu1 %v10832_v45 }
 0x72d   : > { %v11341_v21 = vld [vmem:[%s13879_s24 + $0x1678] sm:$0xf0] }
 0x72e   : > { %v13096_v15 = vld [vmem:[%s13879_s24 + $0x101c] sm:$0xf]  ;;  %v11344_v52 = vor.u32 %v13296_v9, %v11341_v21  ;;  %8204 = vmatpush.bf16.msra.mxu2 %v11088_v28  ;;  %v16472_v9 = vpop.f32.mrf.mxu1  ;;  %v7872_v28 = vadd.f32 %v16420_v4, %v7858_v53 }
 0x72f   : > { %v10541_v39 = vld [vmem:[%s13879_s24 + $0x1038] sm:$0xf0] }
 0x730   : > { %v13160_v43 = vld [vmem:[%s13879_s24 + $0x121c] sm:$0xf]  ;;  %v10544_v58 = vor.u32 %v13096_v15, %v10541_v39  ;;  %8218 = vmatpush.bf16.msra.mxu3 %v11344_v52 }
 0x731   : > { %v10797_v63 = vld [vmem:[%s13879_s24 + $0x1238] sm:$0xf0] }
 0x732   : > { %v13224_v44 = vld [vmem:[%s13879_s24 + $0x141c] sm:$0xf]  ;;  %v10800_v55 = vor.u32 %v13160_v43, %v10797_v63  ;;  %8177 = vmatpush.bf16.msra.mxu0 %v10544_v58  ;;  %v7886_v58 = vadd.f32 %v16425_v11, %v7872_v28 }
 0x733   : > { %v11053_v47 = vld [vmem:[%s13879_s24 + $0x1438] sm:$0xf0] }
 0x734   : > { %v13288_v12 = vld [vmem:[%s13879_s24 + $0x161c] sm:$0xf]  ;;  %v11056_v10 = vor.u32 %v13224_v44, %v11053_v47  ;;  %8191 = vmatpush.bf16.msra.mxu1 %v10800_v55 }
 0x735   : > { %v11309_v61 = vld [vmem:[%s13879_s24 + $0x1638] sm:$0xf0]  ;;  %8178 = vmatmul.bf16.vlgmr.msra.gmra.mxu0 %v14190_v31 }
 0x736   : > { %v13408_v62 = vld [vmem:[%s13879_s24 + $0x19dc] sm:$0xf]  ;;  %v11312_v27 = vor.u32 %v13288_v12, %v11309_v61  ;;  %8205 = vmatpush.bf16.msra.mxu2 %v11056_v10  ;;  %v7846_v61 = vadd.f32 %v16435_v5, %v1280_v26 }
 0x737   : > { %v11789_v42 = vld [vmem:[%s13879_s24 + $0x19f8] sm:$0xf0]  ;;  %8192 = vmatmul.bf16.vlgmr.msra.gmra.mxu1 %v14197_v36 }
 0x738   : > { %v13472_v3 = vld [vmem:[%s13879_s24 + $0x1bdc] sm:$0xf]  ;;  %v11792_v14 = vor.u32 %v13408_v62, %v11789_v42  ;;  %8219 = vmatpush.bf16.msra.mxu3 %v11312_v27  ;;  %v16495_v42 = vpop.f32.mrf.mxu2  ;;  %v7860_v11 = vadd.f32 %v16440_v49, %v7846_v61 }
 0x739   : > { %v12045_v51 = vld [vmem:[%s13879_s24 + $0x1bf8] sm:$0xf0]  ;;  %8206 = vmatmul.bf16.vlgmr.msra.gmra.mxu2 %v14195_v35 }
 0x73a   : > { %v13536_v37 = vld [vmem:[%s13879_s24 + $0x1ddc] sm:$0xf]  ;;  %v12048_v23 = vor.u32 %v13472_v3, %v12045_v51  ;;  %8226 = vmatpush.bf16.msrb.mxu0 %v11792_v14  ;;  %v16498_v51 = vpop.f32.mrf.mxu3  ;;  %v7901_v14 = vpop.f32.mrf.mxu0  ;;  %v7874_v53 = vadd.f32 %v16459_v7, %v7860_v11 }
 0x73b   : > { %v12301_v1 = vld [vmem:[%s13879_s24 + $0x1df8] sm:$0xf0]  ;;  %8220 = vmatmul.bf16.vlgmr.msra.gmra.mxu3 %v14201_v40 }
 0x73c   : > { %v13600_v56 = vld [vmem:[%s13879_s24 + $0x1fdc] sm:$0xf]  ;;  %v12304_v25 = vor.u32 %v13536_v37, %v12301_v1  ;;  %8240 = vmatpush.bf16.msrb.mxu1 %v12048_v23 }
 0x73d   : > { %v12557_v17 = vld [vmem:[%s13879_s24 + $0x1ff8] sm:$0xf0] }
 0x73e   : > { %v13400_v13 = vld [vmem:[%s13879_s24 + $0x199c] sm:$0xf]  ;;  %v12560_v50 = vor.u32 %v13600_v56, %v12557_v17  ;;  %8254 = vmatpush.bf16.msrb.mxu2 %v12304_v25  ;;  %v16509_v25 = vpop.f32.mrf.mxu1 }
 0x73f   : > { %v11757_v59 = vld [vmem:[%s13879_s24 + $0x19b8] sm:$0xf0] }
 0x740   : > { %v13464_v19 = vld [vmem:[%s13879_s24 + $0x1b9c] sm:$0xf]  ;;  %v11760_v57 = vor.u32 %v13400_v13, %v11757_v59  ;;  %8268 = vmatpush.bf16.msrb.mxu3 %v12560_v50  ;;  %v7900_v59 = vadd.f32 %v7899_v33, %v7886_v58 }
 0x741   : > { %v12013_v6 = vld [vmem:[%s13879_s24 + $0x1bb8] sm:$0xf0] }
 0x742   : > { %v13528_v20 = vld [vmem:[%s13879_s24 + $0x1d9c] sm:$0xf]  ;;  %v12016_v22 = vor.u32 %v13464_v19, %v12013_v6  ;;  %8227 = vmatpush.bf16.msrb.mxu0 %v11760_v57  ;;  %v7943_v28 = vpop.f32.mrf.mxu3 }
 0x743   : > { %v12269_v2 = vld [vmem:[%s13879_s24 + $0x1db8] sm:$0xf0] }
 0x744   : > { %v13592_v60 = vld [vmem:[%s13879_s24 + $0x1f9c] sm:$0xf]  ;;  %v12272_v54 = vor.u32 %v13528_v20, %v12269_v2  ;;  %8241 = vmatpush.bf16.msrb.mxu1 %v12016_v22 }
 0x745   : > { %v12525_v18 = vld [vmem:[%s13879_s24 + $0x1fb8] sm:$0xf0] }
 0x746   : > { %v13392_v30 = vld [vmem:[%s13879_s24 + $0x195c] sm:$0xf]  ;;  %v12528_v21 = vor.u32 %v13592_v60, %v12525_v18  ;;  %8255 = vmatpush.bf16.msrb.mxu2 %v12272_v54 }
 0x747   : > { %v11725_v16 = vld [vmem:[%s13879_s24 + $0x1978] sm:$0xf0] }
 0x748   : > { %v13456_v48 = vld [vmem:[%s13879_s24 + $0x1b5c] sm:$0xf]  ;;  %v11728_v31 = vor.u32 %v13392_v30, %v11725_v16  ;;  %8269 = vmatpush.bf16.msrb.mxu3 %v12528_v21  ;;  %v7914_v30 = vadd.f32 %v16472_v9, %v7900_v59  ;;  %v7888_v9 = vadd.f32 %v16464_v8, %v7874_v53 }
 0x749   : > { %v11981_v29 = vld [vmem:[%s13879_s24 + $0x1b78] sm:$0xf0] }
 0x74a   : > { %v13520_v34 = vld [vmem:[%s13879_s24 + $0x1d5c] sm:$0xf]  ;;  %v11984_v43 = vor.u32 %v13456_v48, %v11981_v29  ;;  %8228 = vmatpush.bf16.msrb.mxu0 %v11728_v31 }
 0x74b   : > { %v12237_v15 = vld [vmem:[%s13879_s24 + $0x1d78] sm:$0xf0] }
 0x74c   : > { %v13584_v39 = vld [vmem:[%s13879_s24 + $0x1f5c] sm:$0xf]  ;;  %v12240_v63 = vor.u32 %v13520_v34, %v12237_v15  ;;  %8242 = vmatpush.bf16.msrb.mxu1 %v11984_v43  ;;  %v7929_v15 = vpop.f32.mrf.mxu2  ;;  %v7955_v43 = vpop.f32.mrf.mxu0 }
 0x74d   : > { %v12493_v45 = vld [vmem:[%s13879_s24 + $0x1f78] sm:$0xf0] }
 0x74e   : > { %v13384_v35 = vld [vmem:[%s13879_s24 + $0x191c] sm:$0xf]  ;;  %v12496_v52 = vor.u32 %v13584_v39, %v12493_v45  ;;  %8256 = vmatpush.bf16.msrb.mxu2 %v12240_v63 }
 0x74f   : > { %v11693_v44 = vld [vmem:[%s13879_s24 + $0x1938] sm:$0xf0] }
 0x750   : > { %v13448_v36 = vld [vmem:[%s13879_s24 + $0x1b1c] sm:$0xf]  ;;  %v11696_v3 = vor.u32 %v13384_v35, %v11693_v44  ;;  %8270 = vmatpush.bf16.msrb.mxu3 %v12496_v52  ;;  %v7969_v44 = vpop.f32.mrf.mxu1  ;;  %v7928_v52 = vadd.f32 %v16495_v42, %v7914_v30 }
 0x751   : > { %v11949_v47 = vld [vmem:[%s13879_s24 + $0x1b38] sm:$0xf0] }
 0x752   : > { %v13512_v12 = vld [vmem:[%s13879_s24 + $0x1d1c] sm:$0xf]  ;;  %v11952_v37 = vor.u32 %v13448_v36, %v11949_v47  ;;  %8229 = vmatpush.bf16.msrb.mxu0 %v11696_v3 }
 0x753   : > { %v12205_v40 = vld [vmem:[%s13879_s24 + $0x1d38] sm:$0xf0] }
 0x754   : > { %v13576_v4 = vld [vmem:[%s13879_s24 + $0x1f1c] sm:$0xf]  ;;  %v12208_v1 = vor.u32 %v13512_v12, %v12205_v40  ;;  %8243 = vmatpush.bf16.msrb.mxu1 %v11952_v37  ;;  %v7902_v37 = vadd.f32 %v7901_v14, %v7888_v9  ;;  %v7957_v14 = vpop.f32.mrf.mxu0  ;;  %v1281_v9 = vperm.slane %v16430_v24, 7 }
 0x755   : > { %v12461_v62 = vld [vmem:[%s13879_s24 + $0x1f38] sm:$0xf0] }
 0x756   : > { %v13376_v26 = vld [vmem:[%s13879_s24 + $0x18dc] sm:$0xf]  ;;  %v12464_v10 = vor.u32 %v13576_v4, %v12461_v62  ;;  %8257 = vmatpush.bf16.msrb.mxu2 %v12208_v1 }
 0x757   : > { %v11661_v5 = vld [vmem:[%s13879_s24 + $0x18f8] sm:$0xf0] }
 0x758   : > { %v13440_v55 = vld [vmem:[%s13879_s24 + $0x1adc] sm:$0xf]  ;;  %v11664_v13 = vor.u32 %v13376_v26, %v11661_v5  ;;  %8271 = vmatpush.bf16.msrb.mxu3 %v12464_v10 }
 0x759   : > { %v11917_v56 = vld [vmem:[%s13879_s24 + $0x1af8] sm:$0xf0] }
 0x75a   : > { %v13504_v17 = vld [vmem:[%s13879_s24 + $0x1cdc] sm:$0xf]  ;;  %v11920_v19 = vor.u32 %v13440_v55, %v11917_v56  ;;  %8230 = vmatpush.bf16.msrb.mxu0 %v11664_v13  ;;  %v7942_v55 = vadd.f32 %v16498_v51, %v7928_v52  ;;  %v7983_v56 = vpop.f32.mrf.mxu2  ;;  %v7971_v13 = vpop.f32.mrf.mxu1 }
 0x75b   : > { %v12173_v27 = vld [vmem:[%s13879_s24 + $0x1cf8] sm:$0xf0] }
 0x75c   : > { %v13568_v0 = vld [vmem:[%s13879_s24 + $0x1edc] sm:$0xf]  ;;  %v12176_v50 = vor.u32 %v13504_v17, %v12173_v27  ;;  %8244 = vmatpush.bf16.msrb.mxu1 %v11920_v19  ;;  %v7916_v27 = vadd.f32 %v16509_v25, %v7902_v37  ;;  %v7956_v11 = vadd.f32 %v7955_v43, %v7942_v55 }
 0x75d   : > { %v12429_v23 = vld [vmem:[%s13879_s24 + $0x1ef8] sm:$0xf0] }
 0x75e   : > { %v13368_v6 = vld [vmem:[%s13879_s24 + $0x189c] sm:$0xf]  ;;  %v12432_v2 = vor.u32 %v13568_v0, %v12429_v23  ;;  %8258 = vmatpush.bf16.msrb.mxu2 %v12176_v50  ;;  %v7997_v0 = vpop.f32.mrf.mxu3  ;;  %v7930_v23 = vadd.f32 %v7929_v15, %v7916_v27  ;;  %v7970_v59 = vadd.f32 %v7969_v44, %v7956_v11 }
 0x75f   : > { %v11629_v20 = vld [vmem:[%s13879_s24 + $0x18b8] sm:$0xf0] }
 0x760   : > { %v13432_v49 = vld [vmem:[%s13879_s24 + $0x1a9c] sm:$0xf]  ;;  %v11632_v54 = vor.u32 %v13368_v6, %v11629_v20  ;;  %8272 = vmatpush.bf16.msrb.mxu3 %v12432_v2  ;;  %v7944_v51 = vadd.f32 %v7943_v28, %v7930_v23  ;;  %v7984_v19 = vadd.f32 %v7983_v56, %v7970_v59 }
 0x761   : > { %v11885_v60 = vld [vmem:[%s13879_s24 + $0x1ab8] sm:$0xf0] }
 0x762   : > { %v13496_v18 = vld [vmem:[%s13879_s24 + $0x1c9c] sm:$0xf]  ;;  %v11888_v16 = vor.u32 %v13432_v49, %v11885_v60  ;;  %8231 = vmatpush.bf16.msrb.mxu0 %v11632_v54  ;;  %v7958_v25 = vadd.f32 %v7957_v14, %v7944_v51  ;;  %v7985_v50 = vpop.f32.mrf.mxu2  ;;  %v7998_v6 = vadd.f32 %v7997_v0, %v7984_v19  ;;  %v8011_v49 = vpop.f32.mrf.mxu0 }
 0x763   : > { %v12141_v57 = vld [vmem:[%s13879_s24 + $0x1cb8] sm:$0xf0]  ;;  %v8025_v2 = vpop.f32.mrf.mxu1 }
 0x764   : > { %v13560_v22 = vld [vmem:[%s13879_s24 + $0x1e9c] sm:$0xf]  ;;  %v12144_v48 = vor.u32 %v13496_v18, %v12141_v57  ;;  %8245 = vmatpush.bf16.msrb.mxu1 %v11888_v16  ;;  %v7972_v60 = vadd.f32 %v7971_v13, %v7958_v25  ;;  %v8012_v18 = vadd.f32 %v8011_v49, %v7998_v6 }
 0x765   : > { %v12397_v33 = vld [vmem:[%s13879_s24 + $0x1eb8] sm:$0xf0] }
 0x766   : > { %v13360_v21 = vld [vmem:[%s13879_s24 + $0x185c] sm:$0xf]  ;;  %v12400_v7 = vor.u32 %v13560_v22, %v12397_v33  ;;  %8259 = vmatpush.bf16.msrb.mxu2 %v12144_v48  ;;  %v7999_v20 = vpop.f32.mrf.mxu3  ;;  %v7986_v57 = vadd.f32 %v7985_v50, %v7972_v60 }
 0x767   : > { %v11597_v29 = vld [vmem:[%s13879_s24 + $0x1878] sm:$0xf0] }
 0x768   : > { %v13424_v34 = vld [vmem:[%s13879_s24 + $0x1a5c] sm:$0xf]  ;;  %v11600_v36 = vor.u32 %v13360_v21, %v11597_v29  ;;  %8273 = vmatpush.bf16.msrb.mxu3 %v12400_v7 }
 0x769   : > { %v11853_v39 = vld [vmem:[%s13879_s24 + $0x1a78] sm:$0xf0] }
 0x76a   : > { %v13488_v45 = vld [vmem:[%s13879_s24 + $0x1c5c] sm:$0xf]  ;;  %v11856_v47 = vor.u32 %v13424_v34, %v11853_v39  ;;  %8232 = vmatpush.bf16.msrb.mxu0 %v11600_v36  ;;  %v8039_v53 = vpop.f32.mrf.mxu2 }
 0x76b   : > { %v12109_v31 = vld [vmem:[%s13879_s24 + $0x1c78] sm:$0xf0] }
 0x76c   : > { %v13552_v63 = vld [vmem:[%s13879_s24 + $0x1e5c] sm:$0xf]  ;;  %v12112_v12 = vor.u32 %v13488_v45, %v12109_v31  ;;  %8246 = vmatpush.bf16.msrb.mxu1 %v11856_v47 }
 0x76d   : > { %v12365_v35 = vld [vmem:[%s13879_s24 + $0x1e78] sm:$0xf0] }
 0x76e   : > { %v13352_v40 = vld [vmem:[%s13879_s24 + $0x181c] sm:$0xf]  ;;  %v12368_v4 = vor.u32 %v13552_v63, %v12365_v35  ;;  %8260 = vmatpush.bf16.msrb.mxu2 %v12112_v12  ;;  %v8053_v33 = vpop.f32.mrf.mxu3 }
 0x76f   : > { %v11565_v8 = vld [vmem:[%s13879_s24 + $0x1838] sm:$0xf0] }
 0x770   : > { %v13416_v61 = vld [vmem:[%s13879_s24 + $0x1a1c] sm:$0xf]  ;;  %v11568_v5 = vor.u32 %v13352_v40, %v11565_v8  ;;  %8274 = vmatpush.bf16.msrb.mxu3 %v12368_v4 }
 0x771   : > { %v11821_v62 = vld [vmem:[%s13879_s24 + $0x1a38] sm:$0xf0] }
 0x772   : > { %v13480_v3 = vld [vmem:[%s13879_s24 + $0x1c1c] sm:$0xf]  ;;  %v11824_v42 = vor.u32 %v13416_v61, %v11821_v62  ;;  %8233 = vmatpush.bf16.msrb.mxu0 %v11568_v5  ;;  %v8041_v48 = vpop.f32.mrf.mxu2 }
 0x773   : > { %v12077_v58 = vld [vmem:[%s13879_s24 + $0x1c38] sm:$0xf0] }
 0x774   : > { %v13544_v1 = vld [vmem:[%s13879_s24 + $0x1e1c] sm:$0xf]  ;;  %v12080_v10 = vor.u32 %v13480_v3, %v12077_v58  ;;  %8247 = vmatpush.bf16.msrb.mxu1 %v11824_v42 }
 0x775   : > { %v12333_v26 = vld [vmem:[%s13879_s24 + $0x1e38] sm:$0xf0]  ;;  %8234 = vmatmul.bf16.vlgmr.msrb.gmra.mxu0 %v14290_v32  ;;  %v8026_v32 = vadd.f32 %v8025_v2, %v8012_v18 }
 0x776   : > { %v12336_v17 = vor.u32 %v13544_v1, %v12333_v26  ;;  %8261 = vmatpush.bf16.msrb.mxu2 %v12080_v10  ;;  %v8055_v29 = vpop.f32.mrf.mxu3 }
 0x777   : > { %8248 = vmatmul.bf16.vlgmr.msrb.gmra.mxu1 %v14297_v41  ;;  %v8000_v41 = vadd.f32 %v7999_v20, %v7986_v57  ;;  %v8040_v22 = vadd.f32 %v8039_v53, %v8026_v32 }
 0x778   : > { %8275 = vmatpush.bf16.msrb.mxu3 %v12336_v17 }
 0x779   : > { %8262 = vmatmul.bf16.vlgmr.msrb.gmra.mxu2 %v14295_v38  ;;  %v8013_v38 = vpop.f32.mrf.mxu0  ;;  %v8054_v30 = vadd.f32 %v8053_v33, %v8040_v22 }
 0x77a   : > { %v8014_v54 = vadd.f32 %v8013_v38, %v8000_v41  ;;  %v8095_v39 = vpop.f32.mrf.mxu2 }
 0x77b   : > { %8276 = vmatmul.bf16.vlgmr.msrb.gmra.mxu3 %v14301_v46  ;;  %v8027_v46 = vpop.f32.mrf.mxu1  ;;  %8288 = vst [vmem:[%s14668_s9 + $0x30] sm:$0xff] %v8054_v30 }
 0x77c   : > { %v8028_v16 = vadd.f32 %v8027_v46, %v8014_v54 }
 0x77e   : > { %v8042_v21 = vadd.f32 %v8041_v48, %v8028_v16  ;;  %v8109_v45 = vpop.f32.mrf.mxu3 }
 0x780   : > { %v8056_v34 = vadd.f32 %v8055_v29, %v8042_v21 }
 0x781   : > { %v8067_v15 = vpop.f32.mrf.mxu0 }
 0x782   : > { %8296 = vst [vmem:[%s14668_s9 + $0x70] sm:$0xff] %v8056_v34  ;;  %v8068_v43 = vadd.f32 %v8067_v15, %v1281_v9  ;;  %v8097_v63 = vpop.f32.mrf.mxu2 }
 0x783   : > { %v8081_v7 = vpop.f32.mrf.mxu1 }
 0x784   : > { %v8082_v44 = vadd.f32 %v8081_v7, %v8068_v43 }
 0x786   : > { %v8111_v35 = vpop.f32.mrf.mxu3  ;;  %v8096_v47 = vadd.f32 %v8095_v39, %v8082_v44 }
 0x788   : > { %v8110_v8 = vadd.f32 %v8109_v45, %v8096_v47 }
 0x789   : > { %v8069_v31 = vpop.f32.mrf.mxu0 }
 0x78a   : > { %v8070_v12 = vadd.f32 %v8069_v31, %v1281_v9  ;;  %v8151_v40 = vpop.f32.mrf.mxu2 }
 0x78b   : > { %v8083_v28 = vpop.f32.mrf.mxu1 }
 0x78c   : > { %v8084_v4 = vadd.f32 %v8083_v28, %v8070_v12 }
 0x78e   : > { %v8165_v61 = vpop.f32.mrf.mxu3  ;;  %v8098_v37 = vadd.f32 %v8097_v63, %v8084_v4 }
 0x790   : > { %v8112_v24 = vadd.f32 %v8111_v35, %v8098_v37 }
 0x791   : > { %v8123_v36 = vpop.f32.mrf.mxu0 }
 0x792   : > { %v8124_v3 = vadd.f32 %v8123_v36, %v8110_v8  ;;  %v8153_v26 = vpop.f32.mrf.mxu2 }
 0x793   : > { %v8137_v52 = vpop.f32.mrf.mxu1 }
 0x794   : > { %v8138_v1 = vadd.f32 %v8137_v52, %v8124_v3 }
 0x796   : > { %v8167_v5 = vpop.f32.mrf.mxu3  ;;  %v8152_v42 = vadd.f32 %v8151_v40, %v8138_v1 }
 0x798   : > { %v8166_v17 = vadd.f32 %v8165_v61, %v8152_v42 }
 0x799   : > { %v8125_v62 = vpop.f32.mrf.mxu0 }
 0x79a   : > { %v8126_v56 = vadd.f32 %v8125_v62, %v8112_v24 }
 0x79b   : > { %v8139_v58 = vpop.f32.mrf.mxu1 }
 0x79c   : > { %v8140_v11 = vadd.f32 %v8139_v58, %v8126_v56 }
 0x79e   : > { %v8154_v14 = vadd.f32 %v8153_v26, %v8140_v11 }
 0x7a0   : > { %v8168_v19 = vadd.f32 %v8167_v5, %v8154_v14 }
 0x7b2   : > { %v8179_v55 = vpop.f32.mrf.mxu0 }
 0x7b3   : > { %v8180_v0 = vadd.f32 %v8179_v55, %v8166_v17 }
 0x7b4   : > { %v8193_v10 = vpop.f32.mrf.mxu1 }
 0x7b5   : > { %v8194_v59 = vadd.f32 %v8193_v10, %v8180_v0 }
 0x7ba   : > { %v8181_v13 = vpop.f32.mrf.mxu0 }
 0x7bb   : > { %v8182_v50 = vadd.f32 %v8181_v13, %v8168_v19 }
 0x7bc   : > { %v8207_v27 = vpop.f32.mrf.mxu2  ;;  %v8195_v51 = vpop.f32.mrf.mxu1 }
 0x7bd   : > { %v8208_v25 = vadd.f32 %v8207_v27, %v8194_v59  ;;  %v8196_v60 = vadd.f32 %v8195_v51, %v8182_v50 }
 0x7be   : > { %v8221_v23 = vpop.f32.mrf.mxu3 }
 0x7bf   : > { %v8222_v20 = vadd.f32 %v8221_v23, %v8208_v25 }
 0x7c4   : > { %v8209_v6 = vpop.f32.mrf.mxu2 }
 0x7c5   : > { %v8210_v32 = vadd.f32 %v8209_v6, %v8196_v60 }
 0x7c6   : > { %v8223_v49 = vpop.f32.mrf.mxu3 }
 0x7c7   : > { %v8224_v22 = vadd.f32 %v8223_v49, %v8210_v32 }
 0x7f2   : > { %v8235_v2 = vpop.f32.mrf.mxu0 }
 0x7f3   : > { %v8236_v18 = vadd.f32 %v8235_v2, %v8222_v20 }
 0x7f4   : > { %v8249_v57 = vpop.f32.mrf.mxu1 }
 0x7f5   : > { %v8250_v53 = vadd.f32 %v8249_v57, %v8236_v18 }
 0x7fa   : > { %v8237_v54 = vpop.f32.mrf.mxu0 }
 0x7fb   : > { %v8238_v46 = vadd.f32 %v8237_v54, %v8224_v22 }
 0x7fc   : > { %v8263_v41 = vpop.f32.mrf.mxu2  ;;  %v8251_v16 = vpop.f32.mrf.mxu1 }
 0x7fd   : > { %v8264_v38 = vadd.f32 %v8263_v41, %v8250_v53  ;;  %v8252_v48 = vadd.f32 %v8251_v16, %v8238_v46 }
 0x7fe   : > { %v8277_v33 = vpop.f32.mrf.mxu3 }
 0x7ff   : > { %v8278_v30 = vadd.f32 %v8277_v33, %v8264_v38 }
 0x801   : > { %8289 = vst [vmem:[%s14668_s9 + $0x38] sm:$0xff] %v8278_v30 }
 0x804   : > { %v8265_v21 = vpop.f32.mrf.mxu2 }
 0x805   : > { %v8266_v29 = vadd.f32 %v8265_v21, %v8252_v48 }
 0x806   : > { %v8279_v34 = vpop.f32.mrf.mxu3 }
 0x807   : > { %v8280_v15 = vadd.f32 %v8279_v34, %v8266_v29 }
 0x809   : > { %8297 = vst [vmem:[%s14668_s9 + $0x78] sm:$0xff] %v8280_v15 }
 0x80a PF: > { %p16_p8 = scmp.ge.s32.totalorder %s13801_s17, 4   ;;  %s16571_s12 = smov %s13747_s13 }
 0x80b   : > { %s16572_s13 = smov %s13751_s14  ;;  %s16573_s14 = smov %s13811_s20 }
 0x80c   : > { %s16574_s15 = smov %s13801_s17  ;;  %18 = sbr.rel (!%p16_p8) target bundleno = 5 (0x5), region = 85 }
 0x811   :  { %8319 = vsyncpa [#allocation3], 1 }
 0x812   :  { %8321 = vsyncpa [#allocation3 + $0x1], 1 }
 0x813   :  { %8322 = vsyncpa [#allocation5], 1 }
 0x814   :  { %8324 = vsyncpa [#allocation5 + $0x1], 1 }

</bundles_post_ra>
